<compile_context>
chip_gen: v6e
topology: v6e:2x2x1
jax: 0.10.0
libtpu: 0.0.40
codegen_flags: <defaults>
</compile_context>

<pallas_src>
import functools

import jax
import jax.numpy as jnp
from jax import lax
from jax.experimental import pallas as pl
from jax.experimental.pallas import tpu as pltpu


# --------------------------------------------------------------------------- #
# Fused Inception kernel (one batch element per grid step)
# --------------------------------------------------------------------------- #
def _inception_kernel(x_ref, wa_ref, ba_ref, wp_ref, bp_ref, w3_ref, b3_ref,
                      w5_ref, b5_ref, out_ref,
                      pool_pad, pad3, patches3, pad5, patches5,
                      *, H, W, ch1, c3r, c3, c5r, c5, cp):
    """Whole Inception block for one image.

    x_ref   : (1, H, W, Cin)              bf16 input tile
    wa_ref  : (Cin, ch1+c3r+c5r)          bf16 fused 1x1 weights [b1 | 3x3red | 5x5red]
    ba_ref  : (1,  ch1+c3r+c5r)           f32  fused 1x1 bias
    wp_ref  : (Cin, cp) / bp_ref (1, cp)  pool-projection 1x1
    w3_ref  : (9*c3r,  c3) / b3_ref       3x3 conv, im2col (tap-major) layout
    w5_ref  : (25*c5r, c5) / b5_ref       5x5 conv, im2col (tap-major) layout
    out_ref : (1, H, W, ch1+c3+c5+cp)     f32  fused (pre-concatenated) output
    scratch : pool_pad / pad3 / patches3 / pad5 / patches5   (VMEM, f32)
    """
    f32 = jnp.float32
    bf16 = jnp.bfloat16
    x_img = x_ref[0]                                  # (H, W, Cin), bf16
    cin = x_img.shape[-1]

    # ---- fused 1x1 over x: output columns = [branch1 | 3x3-reduce | 5x5-reduce]
    ya = jnp.dot(x_img.reshape(H * W, cin), wa_ref[...],
                 preferred_element_type=f32)
    ya = jnp.maximum(ya + ba_ref[...], 0.0)           # (H*W, ch1+c3r+c5r), f32

    # branch 1 -> output channels [0, ch1)
    out_ref[:, :, :, 0:ch1] = ya[:, 0:ch1].reshape(1, H, W, ch1)

    # ---- branch 2: 3x3 conv (pad=1) on reduced features, single big-K dot ----
    # TODO(synk): at production sizes tile H*W (M) so the accumulator stays in
    # the 64-vreg budget, and pad channel counts to multiples of 128 lanes.
    pad3[...] = jnp.zeros(pad3.shape, pad3.dtype)
    pad3[1:1 + H, 1:1 + W, :] = ya[:, ch1:ch1 + c3r].reshape(H, W, c3r)
    for kh in range(3):
        for kw in range(3):
            t = kh * 3 + kw
            patches3[:, :, t * c3r:(t + 1) * c3r] = pad3[kh:kh + H, kw:kw + W, :]
    p3 = patches3[...].reshape(H * W, 9 * c3r).astype(bf16)
    y2 = jnp.dot(p3, w3_ref[...], preferred_element_type=f32) + b3_ref[...]
    out_ref[:, :, :, ch1:ch1 + c3] = jnp.maximum(y2, 0.0).reshape(1, H, W, c3)

    # ---- branch 3: 5x5 conv (pad=2) on reduced features, single big-K dot ----
    pad5[...] = jnp.zeros(pad5.shape, pad5.dtype)
    pad5[2:2 + H, 2:2 + W, :] = \
        ya[:, ch1 + c3r:ch1 + c3r + c5r].reshape(H, W, c5r)
    for kh in range(5):
        for kw in range(5):
            t = kh * 5 + kw
            patches5[:, :, t * c5r:(t + 1) * c5r] = pad5[kh:kh + H, kw:kw + W, :]
    p5 = patches5[...].reshape(H * W, 25 * c5r).astype(bf16)
    y3 = jnp.dot(p5, w5_ref[...], preferred_element_type=f32) + b5_ref[...]
    out_ref[:, :, :, ch1 + c3:ch1 + c3 + c5] = \
        jnp.maximum(y3, 0.0).reshape(1, H, W, c5)

    # ---- branch 4: 3x3/s1/p1 max-pool (in-kernel halo) + 1x1 projection ------
    pool_pad[...] = jnp.full(pool_pad.shape, jnp.finfo(f32).min, f32)
    pool_pad[1:1 + H, 1:1 + W, :] = x_img.astype(f32)
    m = pool_pad[1:1 + H, 1:1 + W, :]                 # center tap
    for kh in range(3):
        for kw in range(3):
            if (kh, kw) == (1, 1):
                continue
            m = jnp.maximum(m, pool_pad[kh:kh + H, kw:kw + W, :])
    y4 = jnp.dot(m.reshape(H * W, cin).astype(bf16), wp_ref[...],
                 preferred_element_type=f32) + bp_ref[...]
    out_ref[:, :, :, ch1 + c3 + c5:ch1 + c3 + c5 + cp] = \
        jnp.maximum(y4, 0.0).reshape(1, H, W, cp)


# --------------------------------------------------------------------------- #
# Wrapper
# --------------------------------------------------------------------------- #
def _prep_weights(params):
    """PyTorch OIHW params -> MXU-friendly 2-D (K, Cout) bf16 weights, f32 bias."""
    bf16, f32 = jnp.bfloat16, jnp.float32

    def w_1x1(p):                        # (Cout, Cin, 1, 1) -> (Cin, Cout)
        return jnp.transpose(p["w"][:, :, 0, 0], (1, 0))

    def w_kxk(p):                        # (Cout, Cin, K, K) -> (K*K*Cin, Cout) tap-major
        cout, cin, kh, kw = p["w"].shape
        return jnp.transpose(p["w"], (2, 3, 1, 0)).reshape(kh * kw * cin, cout)

    wa = jnp.concatenate([w_1x1(params["b1"]), w_1x1(params["b2_reduce"]),
                          w_1x1(params["b3_reduce"])], axis=1).astype(bf16)
    ba = jnp.concatenate([params["b1"]["b"], params["b2_reduce"]["b"],
                          params["b3_reduce"]["b"]])[None, :].astype(f32)
    wp = w_1x1(params["b4"]).astype(bf16)
    bp = params["b4"]["b"][None, :].astype(f32)
    w3 = w_kxk(params["b2"]).astype(bf16)
    b3 = params["b2"]["b"][None, :].astype(f32)
    w5 = w_kxk(params["b3"]).astype(bf16)
    b5 = params["b3"]["b"][None, :].astype(f32)
    return wa, ba, wp, bp, w3, b3, w5, b5


@jax.jit
def inception_forward(params, x_nchw):
    """PyTorch-semantics Inception forward: NCHW f32 in, NCHW f32 out."""
    N, Cin, H, W = x_nchw.shape
    ch1 = params["b1"]["w"].shape[0]
    c3r = params["b2_reduce"]["w"].shape[0]
    c3 = params["b2"]["w"].shape[0]
    c5r = params["b3_reduce"]["w"].shape[0]
    c5 = params["b3"]["w"].shape[0]
    cp = params["b4"]["w"].shape[0]
    ctot = ch1 + c3 + c5 + cp

    x = jnp.transpose(x_nchw, (0, 2, 3, 1)).astype(jnp.bfloat16)   # NHWC, bf16
    wa, ba, wp, bp, w3, b3, w5, b5 = _prep_weights(params)

    kernel = functools.partial(_inception_kernel, H=H, W=W, ch1=ch1, c3r=c3r,
                               c3=c3, c5r=c5r, c5=c5, cp=cp)

    # TODO(synk): for production-size layers on v7x (64 MiB VMEM, 2 TCs) add an
    # H-tile grid axis with explicit halo fetch so per-step blocks stay bounded
    # and both TensorCores are busy even at N=1.
    const2 = lambda n: (0, 0)
    out_nhwc = pl.pallas_call(
        kernel,
        out_shape=jax.ShapeDtypeStruct((N, H, W, ctot), jnp.float32),
        grid=(N,),
        in_specs=[
            pl.BlockSpec((1, H, W, Cin), lambda n: (n, 0, 0, 0)),
            pl.BlockSpec(wa.shape, const2),
            pl.BlockSpec(ba.shape, const2),
            pl.BlockSpec(wp.shape, const2),
            pl.BlockSpec(bp.shape, const2),
            pl.BlockSpec(w3.shape, const2),
            pl.BlockSpec(b3.shape, const2),
            pl.BlockSpec(w5.shape, const2),
            pl.BlockSpec(b5.shape, const2),
        ],
        out_specs=pl.BlockSpec((1, H, W, ctot), lambda n: (n, 0, 0, 0)),
        scratch_shapes=[
            pltpu.VMEM((H + 2, W + 2, Cin), jnp.float32),    # max-pool halo
            pltpu.VMEM((H + 2, W + 2, c3r), jnp.float32),    # 3x3 conv halo
            pltpu.VMEM((H, W, 9 * c3r), jnp.float32),        # 3x3 im2col patches
            pltpu.VMEM((H + 4, W + 4, c5r), jnp.float32),    # 5x5 conv halo
            pltpu.VMEM((H, W, 25 * c5r), jnp.float32),       # 5x5 im2col patches
        ],
        compiler_params=pltpu.CompilerParams(
            dimension_semantics=("parallel",),
            vmem_limit_bytes=48 * 1024 * 1024),
    )(x, wa, ba, wp, bp, w3, b3, w5, b5)

    return jnp.transpose(out_nhwc, (0, 3, 1, 2))               # -> NCHW


# --------------------------------------------------------------------------- #
# Parameter init (PyTorch OIHW layout, PyTorch-style uniform init)
# --------------------------------------------------------------------------- #
def init_inception_params(key, in_channels, ch1x1, ch3x3reduce, ch3x3,
                          ch5x5reduce, ch5x5, pool_proj):
    def conv_p(k, cout, cin, kh, kw):
        kw_, kb_ = jax.random.split(k)
        fan_in = cin * kh * kw
        bound = 1.0 / jnp.sqrt(fan_in)
        w = jax.random.uniform(kw_, (cout, cin, kh, kw), jnp.float32, -bound, bound)
        b = jax.random.uniform(kb_, (cout,), jnp.float32, -bound, bound)
        return {"w": w, "b": b}

    keys = jax.random.split(key, 6)
    return {
        "b1": conv_p(keys[0], ch1x1, in_channels, 1, 1),
        "b2_reduce": conv_p(keys[1], ch3x3reduce, in_channels, 1, 1),
        "b2": conv_p(keys[2], ch3x3, ch3x3reduce, 3, 3),
        "b3_reduce": conv_p(keys[3], ch5x5reduce, in_channels, 1, 1),
        "b3": conv_p(keys[4], ch5x5, ch5x5reduce, 5, 5),
        "b4": conv_p(keys[5], pool_proj, in_channels, 1, 1),
    }


# --------------------------------------------------------------------------- #
# Pure-JAX reference with matching numerics (bf16 matmul inputs, f32 accum)
# --------------------------------------------------------------------------- #
def _ref_conv_relu(x_nhwc, w_oihw, b, padding):
    xq = x_nhwc.astype(jnp.bfloat16)
    wq = jnp.transpose(w_oihw, (2, 3, 1, 0)).astype(jnp.bfloat16)
    y = lax.conv_general_dilated(
        xq, wq, window_strides=(1, 1),
        padding=[(padding, padding), (padding, padding)],
        dimension_numbers=("NHWC", "HWIO", "NHWC"),
        preferred_element_type=jnp.float32)
    return jnp.maximum(y + b.reshape(1, 1, 1, -1), 0.0)


def _ref_forward(params, x_nchw):
    x = jnp.transpose(x_nchw, (0, 2, 3, 1)).astype(jnp.float32)
    xq = x.astype(jnp.bfloat16).astype(jnp.float32)
    br1 = _ref_conv_relu(xq, params["b1"]["w"], params["b1"]["b"], 0)
    br2 = _ref_conv_relu(_ref_conv_relu(xq, params["b2_reduce"]["w"],
                                        params["b2_reduce"]["b"], 0),
                         params["b2"]["w"], params["b2"]["b"], 1)
    br3 = _ref_conv_relu(_ref_conv_relu(xq, params["b3_reduce"]["w"],
                                        params["b3_reduce"]["b"], 0),
                         params["b3"]["w"], params["b3"]["b"], 2)
    pooled = lax.reduce_window(xq, -jnp.inf, lax.max, (1, 3, 3, 1), (1, 1, 1, 1),
                               [(0, 0), (1, 1), (1, 1), (0, 0)])
    br4 = _ref_conv_relu(pooled, params["b4"]["w"], params["b4"]["b"], 0)
    out = jnp.concatenate([br1, br2, br3, br4], axis=-1)
    return jnp.transpose(out, (0, 3, 1, 2))


# --------------------------------------------------------------------------- #
if __name__ == "__main__":
    key = jax.random.PRNGKey(0)
    k_x, k_p = jax.random.split(key)

    # Small shapes: N=2, Cin=4, H=W=16; Inception(4, 8, 4, 8, 4, 8, 8) -> 32 out ch
    N, Cin, H, W = 2, 4, 16, 16
    x = jax.random.normal(k_x, (N, Cin, H, W), jnp.float32)
    params = init_inception_params(k_p, Cin, ch1x1=8, ch3x3reduce=4, ch3x3=8,
                                   ch5x5reduce=4, ch5x5=8, pool_proj=8)

    out = jax.block_until_ready(inception_forward(params, x))
    assert out.shape == (N, 8 + 8 + 8 + 8, H, W), out.shape

    ref = jax.block_until_ready(_ref_forward(params, x))
    max_err = float(jnp.max(jnp.abs(out - ref)))
    assert jnp.allclose(out, ref, rtol=1e-2, atol=1e-2), max_err

    print("KERNEL_OK")
</pallas_src>

<mosaic_0001>
module attributes {stable_mosaic.version = 11 : i64} {
  func.func @_inception_kernel(%arg0: i32, %arg1: memref<1x16x16x4xbf16, #tpu.memory_space<vmem>>, %arg2: memref<4x16xbf16, #tpu.memory_space<vmem>>, %arg3: memref<1x16xf32, #tpu.memory_space<vmem>>, %arg4: memref<4x8xbf16, #tpu.memory_space<vmem>>, %arg5: memref<1x8xf32, #tpu.memory_space<vmem>>, %arg6: memref<36x8xbf16, #tpu.memory_space<vmem>>, %arg7: memref<1x8xf32, #tpu.memory_space<vmem>>, %arg8: memref<100x8xbf16, #tpu.memory_space<vmem>>, %arg9: memref<1x8xf32, #tpu.memory_space<vmem>>, %arg10: memref<1x16x16x32xf32, #tpu.memory_space<vmem>>, %arg11: memref<18x18x4xf32, #tpu.memory_space<vmem>>, %arg12: memref<18x18x4xf32, #tpu.memory_space<vmem>>, %arg13: memref<16x16x36xf32, #tpu.memory_space<vmem>>, %arg14: memref<20x20x4xf32, #tpu.memory_space<vmem>>, %arg15: memref<16x16x100xf32, #tpu.memory_space<vmem>>) attributes {dimension_semantics = [#tpu.dimension_semantics<parallel>], iteration_bounds = array<i64: 2>, scalar_prefetch = 0 : i64, scratch_operands = 5 : i64, tpu.core_type = #tpu.core_type<tc>, window_params = [{transform_indices = @transform_0, window_bounds = array<i64: 1, 16, 16, 4>}, {pipeline_mode = #tpu.pipeline_mode<synchronous>, transform_indices = @transform_1, window_bounds = array<i64: 4, 16>}, {pipeline_mode = #tpu.pipeline_mode<synchronous>, transform_indices = @transform_2, window_bounds = array<i64: 1, 16>}, {pipeline_mode = #tpu.pipeline_mode<synchronous>, transform_indices = @transform_3, window_bounds = array<i64: 4, 8>}, {pipeline_mode = #tpu.pipeline_mode<synchronous>, transform_indices = @transform_4, window_bounds = array<i64: 1, 8>}, {pipeline_mode = #tpu.pipeline_mode<synchronous>, transform_indices = @transform_5, window_bounds = array<i64: 36, 8>}, {pipeline_mode = #tpu.pipeline_mode<synchronous>, transform_indices = @transform_6, window_bounds = array<i64: 1, 8>}, {pipeline_mode = #tpu.pipeline_mode<synchronous>, transform_indices = @transform_7, window_bounds = array<i64: 100, 8>}, {pipeline_mode = #tpu.pipeline_mode<synchronous>, transform_indices = @transform_8, window_bounds = array<i64: 1, 8>}, {transform_indices = @transform_9, window_bounds = array<i64: 1, 16, 16, 32>}]} {
    %c0 = arith.constant 0 : index
    %c0_0 = arith.constant 0 : index
    %c0_1 = arith.constant 0 : index
    %c0_2 = arith.constant 0 : index
    %0 = vector.load %arg1[%c0, %c0_0, %c0_1, %c0_2] : memref<1x16x16x4xbf16, #tpu.memory_space<vmem>>, vector<1x16x16x4xbf16>
    %1 = vector.shape_cast %0 : vector<1x16x16x4xbf16> to vector<16x16x4xbf16>
    %2 = vector.shape_cast %1 : vector<16x16x4xbf16> to vector<256x4xbf16>
    %c0_3 = arith.constant 0 : index
    %c0_4 = arith.constant 0 : index
    %3 = vector.load %arg2[%c0_3, %c0_4] : memref<4x16xbf16, #tpu.memory_space<vmem>>, vector<4x16xbf16>
    %cst = arith.constant dense<0.000000e+00> : vector<256x16xf32>
    %4 = tpu.matmul %2, %3, %cst {dimension_numbers = #tpu.dot_dimension_numbers<[1], [0], [0], [1], [0, 0, 1, 1], [], []>} : vector<256x4xbf16>, vector<4x16xbf16>, vector<256x16xf32> -> vector<256x16xf32>
    %c0_5 = arith.constant 0 : index
    %c0_6 = arith.constant 0 : index
    %5 = vector.load %arg3[%c0_5, %c0_6] : memref<1x16xf32, #tpu.memory_space<vmem>>, vector<1x16xf32>
    %6 = vector.broadcast %5 : vector<1x16xf32> to vector<256x16xf32>
    %7 = arith.addf %4, %6 : vector<256x16xf32>
    %cst_7 = arith.constant 0.000000e+00 : f32
    %8 = vector.broadcast %cst_7 : f32 to vector<256x16xf32>
    %9 = arith.maximumf %7, %8 : vector<256x16xf32>
    %10 = vector.extract_strided_slice %9 {offsets = [0, 0], sizes = [256, 8], strides = [1, 1]} : vector<256x16xf32> to vector<256x8xf32>
    %11 = vector.shape_cast %10 : vector<256x8xf32> to vector<1x16x16x8xf32>
    %c0_8 = arith.constant 0 : index
    %c0_9 = arith.constant 0 : index
    %c0_10 = arith.constant 0 : index
    %c0_11 = arith.constant 0 : index
    %12 = vector.load %arg10[%c0_8, %c0_9, %c0_10, %c0_11] : memref<1x16x16x32xf32, #tpu.memory_space<vmem>>, vector<1x16x16x8xf32>
    tpu.vector_store %arg10[%c0_8, %c0_9, %c0_10, %c0_11], %11 {strides = array<i32>} : memref<1x16x16x32xf32, #tpu.memory_space<vmem>>, vector<1x16x16x8xf32>,
    %cst_12 = arith.constant 0.000000e+00 : f32
    %13 = vector.broadcast %cst_12 : f32 to vector<18x18x4xf32>
    %c0_13 = arith.constant 0 : index
    %c0_14 = arith.constant 0 : index
    %c0_15 = arith.constant 0 : index
    %14 = vector.load %arg12[%c0_13, %c0_14, %c0_15] : memref<18x18x4xf32, #tpu.memory_space<vmem>>, vector<18x18x4xf32>
    tpu.vector_store %arg12[%c0_13, %c0_14, %c0_15], %13 {strides = array<i32>} : memref<18x18x4xf32, #tpu.memory_space<vmem>>, vector<18x18x4xf32>,
    %15 = vector.extract_strided_slice %9 {offsets = [0, 8], sizes = [256, 4], strides = [1, 1]} : vector<256x16xf32> to vector<256x4xf32>
    %16 = vector.shape_cast %15 : vector<256x4xf32> to vector<16x16x4xf32>
    %c1 = arith.constant 1 : index
    %c1_16 = arith.constant 1 : index
    %c0_17 = arith.constant 0 : index
    %17 = vector.load %arg12[%c1, %c1_16, %c0_17] : memref<18x18x4xf32, #tpu.memory_space<vmem>>, vector<16x16x4xf32>
    tpu.vector_store %arg12[%c1, %c1_16, %c0_17], %16 {strides = array<i32>} : memref<18x18x4xf32, #tpu.memory_space<vmem>>, vector<16x16x4xf32>,
    %c0_18 = arith.constant 0 : index
    %c0_19 = arith.constant 0 : index
    %c0_20 = arith.constant 0 : index
    %18 = vector.load %arg12[%c0_18, %c0_19, %c0_20] : memref<18x18x4xf32, #tpu.memory_space<vmem>>, vector<16x16x4xf32>
    %c0_21 = arith.constant 0 : index
    %c0_22 = arith.constant 0 : index
    %c0_23 = arith.constant 0 : index
    %19 = vector.load %arg13[%c0_21, %c0_22, %c0_23] : memref<16x16x36xf32, #tpu.memory_space<vmem>>, vector<16x16x4xf32>
    tpu.vector_store %arg13[%c0_21, %c0_22, %c0_23], %18 {strides = array<i32>} : memref<16x16x36xf32, #tpu.memory_space<vmem>>, vector<16x16x4xf32>,
    %c0_24 = arith.constant 0 : index
    %c1_25 = arith.constant 1 : index
    %c0_26 = arith.constant 0 : index
    %20 = vector.load %arg12[%c0_24, %c1_25, %c0_26] : memref<18x18x4xf32, #tpu.memory_space<vmem>>, vector<16x16x4xf32>
    %c0_27 = arith.constant 0 : index
    %c0_28 = arith.constant 0 : index
    %c4 = arith.constant 4 : index
    %21 = vector.load %arg13[%c0_27, %c0_28, %c4] : memref<16x16x36xf32, #tpu.memory_space<vmem>>, vector<16x16x4xf32>
    tpu.vector_store %arg13[%c0_27, %c0_28, %c4], %20 {strides = array<i32>} : memref<16x16x36xf32, #tpu.memory_space<vmem>>, vector<16x16x4xf32>,
    %c0_29 = arith.constant 0 : index
    %c2 = arith.constant 2 : index
    %c0_30 = arith.constant 0 : index
    %22 = vector.load %arg12[%c0_29, %c2, %c0_30] : memref<18x18x4xf32, #tpu.memory_space<vmem>>, vector<16x16x4xf32>
    %c0_31 = arith.constant 0 : index
    %c0_32 = arith.constant 0 : index
    %c8 = arith.constant 8 : index
    %23 = vector.load %arg13[%c0_31, %c0_32, %c8] : memref<16x16x36xf32, #tpu.memory_space<vmem>>, vector<16x16x4xf32>
    tpu.vector_store %arg13[%c0_31, %c0_32, %c8], %22 {strides = array<i32>} : memref<16x16x36xf32, #tpu.memory_space<vmem>>, vector<16x16x4xf32>,
    %c1_33 = arith.constant 1 : index
    %c0_34 = arith.constant 0 : index
    %c0_35 = arith.constant 0 : index
    %24 = vector.load %arg12[%c1_33, %c0_34, %c0_35] : memref<18x18x4xf32, #tpu.memory_space<vmem>>, vector<16x16x4xf32>
    %c0_36 = arith.constant 0 : index
    %c0_37 = arith.constant 0 : index
    %c12 = arith.constant 12 : index
    %25 = vector.load %arg13[%c0_36, %c0_37, %c12] : memref<16x16x36xf32, #tpu.memory_space<vmem>>, vector<16x16x4xf32>
    tpu.vector_store %arg13[%c0_36, %c0_37, %c12], %24 {strides = array<i32>} : memref<16x16x36xf32, #tpu.memory_space<vmem>>, vector<16x16x4xf32>,
    %c1_38 = arith.constant 1 : index
    %c1_39 = arith.constant 1 : index
    %c0_40 = arith.constant 0 : index
    %26 = vector.load %arg12[%c1_38, %c1_39, %c0_40] : memref<18x18x4xf32, #tpu.memory_space<vmem>>, vector<16x16x4xf32>
    %c0_41 = arith.constant 0 : index
    %c0_42 = arith.constant 0 : index
    %c16 = arith.constant 16 : index
    %27 = vector.load %arg13[%c0_41, %c0_42, %c16] : memref<16x16x36xf32, #tpu.memory_space<vmem>>, vector<16x16x4xf32>
    tpu.vector_store %arg13[%c0_41, %c0_42, %c16], %26 {strides = array<i32>} : memref<16x16x36xf32, #tpu.memory_space<vmem>>, vector<16x16x4xf32>,
    %c1_43 = arith.constant 1 : index
    %c2_44 = arith.constant 2 : index
    %c0_45 = arith.constant 0 : index
    %28 = vector.load %arg12[%c1_43, %c2_44, %c0_45] : memref<18x18x4xf32, #tpu.memory_space<vmem>>, vector<16x16x4xf32>
    %c0_46 = arith.constant 0 : index
    %c0_47 = arith.constant 0 : index
    %c20 = arith.constant 20 : index
    %29 = vector.load %arg13[%c0_46, %c0_47, %c20] : memref<16x16x36xf32, #tpu.memory_space<vmem>>, vector<16x16x4xf32>
    tpu.vector_store %arg13[%c0_46, %c0_47, %c20], %28 {strides = array<i32>} : memref<16x16x36xf32, #tpu.memory_space<vmem>>, vector<16x16x4xf32>,
    %c2_48 = arith.constant 2 : index
    %c0_49 = arith.constant 0 : index
    %c0_50 = arith.constant 0 : index
    %30 = vector.load %arg12[%c2_48, %c0_49, %c0_50] : memref<18x18x4xf32, #tpu.memory_space<vmem>>, vector<16x16x4xf32>
    %c0_51 = arith.constant 0 : index
    %c0_52 = arith.constant 0 : index
    %c24 = arith.constant 24 : index
    %31 = vector.load %arg13[%c0_51, %c0_52, %c24] : memref<16x16x36xf32, #tpu.memory_space<vmem>>, vector<16x16x4xf32>
    tpu.vector_store %arg13[%c0_51, %c0_52, %c24], %30 {strides = array<i32>} : memref<16x16x36xf32, #tpu.memory_space<vmem>>, vector<16x16x4xf32>,
    %c2_53 = arith.constant 2 : index
    %c1_54 = arith.constant 1 : index
    %c0_55 = arith.constant 0 : index
    %32 = vector.load %arg12[%c2_53, %c1_54, %c0_55] : memref<18x18x4xf32, #tpu.memory_space<vmem>>, vector<16x16x4xf32>
    %c0_56 = arith.constant 0 : index
    %c0_57 = arith.constant 0 : index
    %c28 = arith.constant 28 : index
    %33 = vector.load %arg13[%c0_56, %c0_57, %c28] : memref<16x16x36xf32, #tpu.memory_space<vmem>>, vector<16x16x4xf32>
    tpu.vector_store %arg13[%c0_56, %c0_57, %c28], %32 {strides = array<i32>} : memref<16x16x36xf32, #tpu.memory_space<vmem>>, vector<16x16x4xf32>,
    %c2_58 = arith.constant 2 : index
    %c2_59 = arith.constant 2 : index
    %c0_60 = arith.constant 0 : index
    %34 = vector.load %arg12[%c2_58, %c2_59, %c0_60] : memref<18x18x4xf32, #tpu.memory_space<vmem>>, vector<16x16x4xf32>
    %c0_61 = arith.constant 0 : index
    %c0_62 = arith.constant 0 : index
    %c32 = arith.constant 32 : index
    %35 = vector.load %arg13[%c0_61, %c0_62, %c32] : memref<16x16x36xf32, #tpu.memory_space<vmem>>, vector<16x16x4xf32>
    tpu.vector_store %arg13[%c0_61, %c0_62, %c32], %34 {strides = array<i32>} : memref<16x16x36xf32, #tpu.memory_space<vmem>>, vector<16x16x4xf32>,
    %c0_63 = arith.constant 0 : index
    %c0_64 = arith.constant 0 : index
    %c0_65 = arith.constant 0 : index
    %36 = vector.load %arg13[%c0_63, %c0_64, %c0_65] : memref<16x16x36xf32, #tpu.memory_space<vmem>>, vector<16x16x36xf32>
    %37 = vector.shape_cast %36 : vector<16x16x36xf32> to vector<256x36xf32>
    %38 = arith.truncf %37 : vector<256x36xf32> to vector<256x36xbf16>
    %c0_66 = arith.constant 0 : index
    %c0_67 = arith.constant 0 : index
    %39 = vector.load %arg6[%c0_66, %c0_67] : memref<36x8xbf16, #tpu.memory_space<vmem>>, vector<36x8xbf16>
    %cst_68 = arith.constant dense<0.000000e+00> : vector<256x8xf32>
    %40 = tpu.matmul %38, %39, %cst_68 {dimension_numbers = #tpu.dot_dimension_numbers<[1], [0], [0], [1], [0, 0, 1, 1], [], []>} : vector<256x36xbf16>, vector<36x8xbf16>, vector<256x8xf32> -> vector<256x8xf32>
    %c0_69 = arith.constant 0 : index
    %c0_70 = arith.constant 0 : index
    %41 = vector.load %arg7[%c0_69, %c0_70] : memref<1x8xf32, #tpu.memory_space<vmem>>, vector<1x8xf32>
    %42 = vector.broadcast %41 : vector<1x8xf32> to vector<256x8xf32>
    %43 = arith.addf %40, %42 : vector<256x8xf32>
    %cst_71 = arith.constant 0.000000e+00 : f32
    %44 = vector.broadcast %cst_71 : f32 to vector<256x8xf32>
    %45 = arith.maximumf %43, %44 : vector<256x8xf32>
    %46 = vector.shape_cast %45 : vector<256x8xf32> to vector<1x16x16x8xf32>
    %c0_72 = arith.constant 0 : index
    %c0_73 = arith.constant 0 : index
    %c0_74 = arith.constant 0 : index
    %c8_75 = arith.constant 8 : index
    %47 = vector.load %arg10[%c0_72, %c0_73, %c0_74, %c8_75] : memref<1x16x16x32xf32, #tpu.memory_space<vmem>>, vector<1x16x16x8xf32>
    tpu.vector_store %arg10[%c0_72, %c0_73, %c0_74, %c8_75], %46 {strides = array<i32>} : memref<1x16x16x32xf32, #tpu.memory_space<vmem>>, vector<1x16x16x8xf32>,
    %cst_76 = arith.constant 0.000000e+00 : f32
    %48 = vector.broadcast %cst_76 : f32 to vector<20x20x4xf32>
    %c0_77 = arith.constant 0 : index
    %c0_78 = arith.constant 0 : index
    %c0_79 = arith.constant 0 : index
    %49 = vector.load %arg14[%c0_77, %c0_78, %c0_79] : memref<20x20x4xf32, #tpu.memory_space<vmem>>, vector<20x20x4xf32>
    tpu.vector_store %arg14[%c0_77, %c0_78, %c0_79], %48 {strides = array<i32>} : memref<20x20x4xf32, #tpu.memory_space<vmem>>, vector<20x20x4xf32>,
    %50 = vector.extract_strided_slice %9 {offsets = [0, 12], sizes = [256, 4], strides = [1, 1]} : vector<256x16xf32> to vector<256x4xf32>
    %51 = vector.shape_cast %50 : vector<256x4xf32> to vector<16x16x4xf32>
    %c2_80 = arith.constant 2 : index
    %c2_81 = arith.constant 2 : index
    %c0_82 = arith.constant 0 : index
    %52 = vector.load %arg14[%c2_80, %c2_81, %c0_82] : memref<20x20x4xf32, #tpu.memory_space<vmem>>, vector<16x16x4xf32>
    tpu.vector_store %arg14[%c2_80, %c2_81, %c0_82], %51 {strides = array<i32>} : memref<20x20x4xf32, #tpu.memory_space<vmem>>, vector<16x16x4xf32>,
    %c0_83 = arith.constant 0 : index
    %c0_84 = arith.constant 0 : index
    %c0_85 = arith.constant 0 : index
    %53 = vector.load %arg14[%c0_83, %c0_84, %c0_85] : memref<20x20x4xf32, #tpu.memory_space<vmem>>, vector<16x16x4xf32>
    %c0_86 = arith.constant 0 : index
    %c0_87 = arith.constant 0 : index
    %c0_88 = arith.constant 0 : index
    %54 = vector.load %arg15[%c0_86, %c0_87, %c0_88] : memref<16x16x100xf32, #tpu.memory_space<vmem>>, vector<16x16x4xf32>
    tpu.vector_store %arg15[%c0_86, %c0_87, %c0_88], %53 {strides = array<i32>} : memref<16x16x100xf32, #tpu.memory_space<vmem>>, vector<16x16x4xf32>,
    %c0_89 = arith.constant 0 : index
    %c1_90 = arith.constant 1 : index
    %c0_91 = arith.constant 0 : index
    %55 = vector.load %arg14[%c0_89, %c1_90, %c0_91] : memref<20x20x4xf32, #tpu.memory_space<vmem>>, vector<16x16x4xf32>
    %c0_92 = arith.constant 0 : index
    %c0_93 = arith.constant 0 : index
    %c4_94 = arith.constant 4 : index
    %56 = vector.load %arg15[%c0_92, %c0_93, %c4_94] : memref<16x16x100xf32, #tpu.memory_space<vmem>>, vector<16x16x4xf32>
    tpu.vector_store %arg15[%c0_92, %c0_93, %c4_94], %55 {strides = array<i32>} : memref<16x16x100xf32, #tpu.memory_space<vmem>>, vector<16x16x4xf32>,
    %c0_95 = arith.constant 0 : index
    %c2_96 = arith.constant 2 : index
    %c0_97 = arith.constant 0 : index
    %57 = vector.load %arg14[%c0_95, %c2_96, %c0_97] : memref<20x20x4xf32, #tpu.memory_space<vmem>>, vector<16x16x4xf32>
    %c0_98 = arith.constant 0 : index
    %c0_99 = arith.constant 0 : index
    %c8_100 = arith.constant 8 : index
    %58 = vector.load %arg15[%c0_98, %c0_99, %c8_100] : memref<16x16x100xf32, #tpu.memory_space<vmem>>, vector<16x16x4xf32>
    tpu.vector_store %arg15[%c0_98, %c0_99, %c8_100], %57 {strides = array<i32>} : memref<16x16x100xf32, #tpu.memory_space<vmem>>, vector<16x16x4xf32>,
    %c0_101 = arith.constant 0 : index
    %c3 = arith.constant 3 : index
    %c0_102 = arith.constant 0 : index
    %59 = vector.load %arg14[%c0_101, %c3, %c0_102] : memref<20x20x4xf32, #tpu.memory_space<vmem>>, vector<16x16x4xf32>
    %c0_103 = arith.constant 0 : index
    %c0_104 = arith.constant 0 : index
    %c12_105 = arith.constant 12 : index
    %60 = vector.load %arg15[%c0_103, %c0_104, %c12_105] : memref<16x16x100xf32, #tpu.memory_space<vmem>>, vector<16x16x4xf32>
    tpu.vector_store %arg15[%c0_103, %c0_104, %c12_105], %59 {strides = array<i32>} : memref<16x16x100xf32, #tpu.memory_space<vmem>>, vector<16x16x4xf32>,
    %c0_106 = arith.constant 0 : index
    %c4_107 = arith.constant 4 : index
    %c0_108 = arith.constant 0 : index
    %61 = vector.load %arg14[%c0_106, %c4_107, %c0_108] : memref<20x20x4xf32, #tpu.memory_space<vmem>>, vector<16x16x4xf32>
    %c0_109 = arith.constant 0 : index
    %c0_110 = arith.constant 0 : index
    %c16_111 = arith.constant 16 : index
    %62 = vector.load %arg15[%c0_109, %c0_110, %c16_111] : memref<16x16x100xf32, #tpu.memory_space<vmem>>, vector<16x16x4xf32>
    tpu.vector_store %arg15[%c0_109, %c0_110, %c16_111], %61 {strides = array<i32>} : memref<16x16x100xf32, #tpu.memory_space<vmem>>, vector<16x16x4xf32>,
    %c1_112 = arith.constant 1 : index
    %c0_113 = arith.constant 0 : index
    %c0_114 = arith.constant 0 : index
    %63 = vector.load %arg14[%c1_112, %c0_113, %c0_114] : memref<20x20x4xf32, #tpu.memory_space<vmem>>, vector<16x16x4xf32>
    %c0_115 = arith.constant 0 : index
    %c0_116 = arith.constant 0 : index
    %c20_117 = arith.constant 20 : index
    %64 = vector.load %arg15[%c0_115, %c0_116, %c20_117] : memref<16x16x100xf32, #tpu.memory_space<vmem>>, vector<16x16x4xf32>
    tpu.vector_store %arg15[%c0_115, %c0_116, %c20_117], %63 {strides = array<i32>} : memref<16x16x100xf32, #tpu.memory_space<vmem>>, vector<16x16x4xf32>,
    %c1_118 = arith.constant 1 : index
    %c1_119 = arith.constant 1 : index
    %c0_120 = arith.constant 0 : index
    %65 = vector.load %arg14[%c1_118, %c1_119, %c0_120] : memref<20x20x4xf32, #tpu.memory_space<vmem>>, vector<16x16x4xf32>
    %c0_121 = arith.constant 0 : index
    %c0_122 = arith.constant 0 : index
    %c24_123 = arith.constant 24 : index
    %66 = vector.load %arg15[%c0_121, %c0_122, %c24_123] : memref<16x16x100xf32, #tpu.memory_space<vmem>>, vector<16x16x4xf32>
    tpu.vector_store %arg15[%c0_121, %c0_122, %c24_123], %65 {strides = array<i32>} : memref<16x16x100xf32, #tpu.memory_space<vmem>>, vector<16x16x4xf32>,
    %c1_124 = arith.constant 1 : index
    %c2_125 = arith.constant 2 : index
    %c0_126 = arith.constant 0 : index
    %67 = vector.load %arg14[%c1_124, %c2_125, %c0_126] : memref<20x20x4xf32, #tpu.memory_space<vmem>>, vector<16x16x4xf32>
    %c0_127 = arith.constant 0 : index
    %c0_128 = arith.constant 0 : index
    %c28_129 = arith.constant 28 : index
    %68 = vector.load %arg15[%c0_127, %c0_128, %c28_129] : memref<16x16x100xf32, #tpu.memory_space<vmem>>, vector<16x16x4xf32>
    tpu.vector_store %arg15[%c0_127, %c0_128, %c28_129], %67 {strides = array<i32>} : memref<16x16x100xf32, #tpu.memory_space<vmem>>, vector<16x16x4xf32>,
    %c1_130 = arith.constant 1 : index
    %c3_131 = arith.constant 3 : index
    %c0_132 = arith.constant 0 : index
    %69 = vector.load %arg14[%c1_130, %c3_131, %c0_132] : memref<20x20x4xf32, #tpu.memory_space<vmem>>, vector<16x16x4xf32>
    %c0_133 = arith.constant 0 : index
    %c0_134 = arith.constant 0 : index
    %c32_135 = arith.constant 32 : index
    %70 = vector.load %arg15[%c0_133, %c0_134, %c32_135] : memref<16x16x100xf32, #tpu.memory_space<vmem>>, vector<16x16x4xf32>
    tpu.vector_store %arg15[%c0_133, %c0_134, %c32_135], %69 {strides = array<i32>} : memref<16x16x100xf32, #tpu.memory_space<vmem>>, vector<16x16x4xf32>,
    %c1_136 = arith.constant 1 : index
    %c4_137 = arith.constant 4 : index
    %c0_138 = arith.constant 0 : index
    %71 = vector.load %arg14[%c1_136, %c4_137, %c0_138] : memref<20x20x4xf32, #tpu.memory_space<vmem>>, vector<16x16x4xf32>
    %c0_139 = arith.constant 0 : index
    %c0_140 = arith.constant 0 : index
    %c36 = arith.constant 36 : index
    %72 = vector.load %arg15[%c0_139, %c0_140, %c36] : memref<16x16x100xf32, #tpu.memory_space<vmem>>, vector<16x16x4xf32>
    tpu.vector_store %arg15[%c0_139, %c0_140, %c36], %71 {strides = array<i32>} : memref<16x16x100xf32, #tpu.memory_space<vmem>>, vector<16x16x4xf32>,
    %c2_141 = arith.constant 2 : index
    %c0_142 = arith.constant 0 : index
    %c0_143 = arith.constant 0 : index
    %73 = vector.load %arg14[%c2_141, %c0_142, %c0_143] : memref<20x20x4xf32, #tpu.memory_space<vmem>>, vector<16x16x4xf32>
    %c0_144 = arith.constant 0 : index
    %c0_145 = arith.constant 0 : index
    %c40 = arith.constant 40 : index
    %74 = vector.load %arg15[%c0_144, %c0_145, %c40] : memref<16x16x100xf32, #tpu.memory_space<vmem>>, vector<16x16x4xf32>
    tpu.vector_store %arg15[%c0_144, %c0_145, %c40], %73 {strides = array<i32>} : memref<16x16x100xf32, #tpu.memory_space<vmem>>, vector<16x16x4xf32>,
    %c2_146 = arith.constant 2 : index
    %c1_147 = arith.constant 1 : index
    %c0_148 = arith.constant 0 : index
    %75 = vector.load %arg14[%c2_146, %c1_147, %c0_148] : memref<20x20x4xf32, #tpu.memory_space<vmem>>, vector<16x16x4xf32>
    %c0_149 = arith.constant 0 : index
    %c0_150 = arith.constant 0 : index
    %c44 = arith.constant 44 : index
    %76 = vector.load %arg15[%c0_149, %c0_150, %c44] : memref<16x16x100xf32, #tpu.memory_space<vmem>>, vector<16x16x4xf32>
    tpu.vector_store %arg15[%c0_149, %c0_150, %c44], %75 {strides = array<i32>} : memref<16x16x100xf32, #tpu.memory_space<vmem>>, vector<16x16x4xf32>,
    %c2_151 = arith.constant 2 : index
    %c2_152 = arith.constant 2 : index
    %c0_153 = arith.constant 0 : index
    %77 = vector.load %arg14[%c2_151, %c2_152, %c0_153] : memref<20x20x4xf32, #tpu.memory_space<vmem>>, vector<16x16x4xf32>
    %c0_154 = arith.constant 0 : index
    %c0_155 = arith.constant 0 : index
    %c48 = arith.constant 48 : index
    %78 = vector.load %arg15[%c0_154, %c0_155, %c48] : memref<16x16x100xf32, #tpu.memory_space<vmem>>, vector<16x16x4xf32>
    tpu.vector_store %arg15[%c0_154, %c0_155, %c48], %77 {strides = array<i32>} : memref<16x16x100xf32, #tpu.memory_space<vmem>>, vector<16x16x4xf32>,
    %c2_156 = arith.constant 2 : index
    %c3_157 = arith.constant 3 : index
    %c0_158 = arith.constant 0 : index
    %79 = vector.load %arg14[%c2_156, %c3_157, %c0_158] : memref<20x20x4xf32, #tpu.memory_space<vmem>>, vector<16x16x4xf32>
    %c0_159 = arith.constant 0 : index
    %c0_160 = arith.constant 0 : index
    %c52 = arith.constant 52 : index
    %80 = vector.load %arg15[%c0_159, %c0_160, %c52] : memref<16x16x100xf32, #tpu.memory_space<vmem>>, vector<16x16x4xf32>
    tpu.vector_store %arg15[%c0_159, %c0_160, %c52], %79 {strides = array<i32>} : memref<16x16x100xf32, #tpu.memory_space<vmem>>, vector<16x16x4xf32>,
    %c2_161 = arith.constant 2 : index
    %c4_162 = arith.constant 4 : index
    %c0_163 = arith.constant 0 : index
    %81 = vector.load %arg14[%c2_161, %c4_162, %c0_163] : memref<20x20x4xf32, #tpu.memory_space<vmem>>, vector<16x16x4xf32>
    %c0_164 = arith.constant 0 : index
    %c0_165 = arith.constant 0 : index
    %c56 = arith.constant 56 : index
    %82 = vector.load %arg15[%c0_164, %c0_165, %c56] : memref<16x16x100xf32, #tpu.memory_space<vmem>>, vector<16x16x4xf32>
    tpu.vector_store %arg15[%c0_164, %c0_165, %c56], %81 {strides = array<i32>} : memref<16x16x100xf32, #tpu.memory_space<vmem>>, vector<16x16x4xf32>,
    %c3_166 = arith.constant 3 : index
    %c0_167 = arith.constant 0 : index
    %c0_168 = arith.constant 0 : index
    %83 = vector.load %arg14[%c3_166, %c0_167, %c0_168] : memref<20x20x4xf32, #tpu.memory_space<vmem>>, vector<16x16x4xf32>
    %c0_169 = arith.constant 0 : index
    %c0_170 = arith.constant 0 : index
    %c60 = arith.constant 60 : index
    %84 = vector.load %arg15[%c0_169, %c0_170, %c60] : memref<16x16x100xf32, #tpu.memory_space<vmem>>, vector<16x16x4xf32>
    tpu.vector_store %arg15[%c0_169, %c0_170, %c60], %83 {strides = array<i32>} : memref<16x16x100xf32, #tpu.memory_space<vmem>>, vector<16x16x4xf32>,
    %c3_171 = arith.constant 3 : index
    %c1_172 = arith.constant 1 : index
    %c0_173 = arith.constant 0 : index
    %85 = vector.load %arg14[%c3_171, %c1_172, %c0_173] : memref<20x20x4xf32, #tpu.memory_space<vmem>>, vector<16x16x4xf32>
    %c0_174 = arith.constant 0 : index
    %c0_175 = arith.constant 0 : index
    %c64 = arith.constant 64 : index
    %86 = vector.load %arg15[%c0_174, %c0_175, %c64] : memref<16x16x100xf32, #tpu.memory_space<vmem>>, vector<16x16x4xf32>
    tpu.vector_store %arg15[%c0_174, %c0_175, %c64], %85 {strides = array<i32>} : memref<16x16x100xf32, #tpu.memory_space<vmem>>, vector<16x16x4xf32>,
    %c3_176 = arith.constant 3 : index
    %c2_177 = arith.constant 2 : index
    %c0_178 = arith.constant 0 : index
    %87 = vector.load %arg14[%c3_176, %c2_177, %c0_178] : memref<20x20x4xf32, #tpu.memory_space<vmem>>, vector<16x16x4xf32>
    %c0_179 = arith.constant 0 : index
    %c0_180 = arith.constant 0 : index
    %c68 = arith.constant 68 : index
    %88 = vector.load %arg15[%c0_179, %c0_180, %c68] : memref<16x16x100xf32, #tpu.memory_space<vmem>>, vector<16x16x4xf32>
    tpu.vector_store %arg15[%c0_179, %c0_180, %c68], %87 {strides = array<i32>} : memref<16x16x100xf32, #tpu.memory_space<vmem>>, vector<16x16x4xf32>,
    %c3_181 = arith.constant 3 : index
    %c3_182 = arith.constant 3 : index
    %c0_183 = arith.constant 0 : index
    %89 = vector.load %arg14[%c3_181, %c3_182, %c0_183] : memref<20x20x4xf32, #tpu.memory_space<vmem>>, vector<16x16x4xf32>
    %c0_184 = arith.constant 0 : index
    %c0_185 = arith.constant 0 : index
    %c72 = arith.constant 72 : index
    %90 = vector.load %arg15[%c0_184, %c0_185, %c72] : memref<16x16x100xf32, #tpu.memory_space<vmem>>, vector<16x16x4xf32>
    tpu.vector_store %arg15[%c0_184, %c0_185, %c72], %89 {strides = array<i32>} : memref<16x16x100xf32, #tpu.memory_space<vmem>>, vector<16x16x4xf32>,
    %c3_186 = arith.constant 3 : index
    %c4_187 = arith.constant 4 : index
    %c0_188 = arith.constant 0 : index
    %91 = vector.load %arg14[%c3_186, %c4_187, %c0_188] : memref<20x20x4xf32, #tpu.memory_space<vmem>>, vector<16x16x4xf32>
    %c0_189 = arith.constant 0 : index
    %c0_190 = arith.constant 0 : index
    %c76 = arith.constant 76 : index
    %92 = vector.load %arg15[%c0_189, %c0_190, %c76] : memref<16x16x100xf32, #tpu.memory_space<vmem>>, vector<16x16x4xf32>
    tpu.vector_store %arg15[%c0_189, %c0_190, %c76], %91 {strides = array<i32>} : memref<16x16x100xf32, #tpu.memory_space<vmem>>, vector<16x16x4xf32>,
    %c4_191 = arith.constant 4 : index
    %c0_192 = arith.constant 0 : index
    %c0_193 = arith.constant 0 : index
    %93 = vector.load %arg14[%c4_191, %c0_192, %c0_193] : memref<20x20x4xf32, #tpu.memory_space<vmem>>, vector<16x16x4xf32>
    %c0_194 = arith.constant 0 : index
    %c0_195 = arith.constant 0 : index
    %c80 = arith.constant 80 : index
    %94 = vector.load %arg15[%c0_194, %c0_195, %c80] : memref<16x16x100xf32, #tpu.memory_space<vmem>>, vector<16x16x4xf32>
    tpu.vector_store %arg15[%c0_194, %c0_195, %c80], %93 {strides = array<i32>} : memref<16x16x100xf32, #tpu.memory_space<vmem>>, vector<16x16x4xf32>,
    %c4_196 = arith.constant 4 : index
    %c1_197 = arith.constant 1 : index
    %c0_198 = arith.constant 0 : index
    %95 = vector.load %arg14[%c4_196, %c1_197, %c0_198] : memref<20x20x4xf32, #tpu.memory_space<vmem>>, vector<16x16x4xf32>
    %c0_199 = arith.constant 0 : index
    %c0_200 = arith.constant 0 : index
    %c84 = arith.constant 84 : index
    %96 = vector.load %arg15[%c0_199, %c0_200, %c84] : memref<16x16x100xf32, #tpu.memory_space<vmem>>, vector<16x16x4xf32>
    tpu.vector_store %arg15[%c0_199, %c0_200, %c84], %95 {strides = array<i32>} : memref<16x16x100xf32, #tpu.memory_space<vmem>>, vector<16x16x4xf32>,
    %c4_201 = arith.constant 4 : index
    %c2_202 = arith.constant 2 : index
    %c0_203 = arith.constant 0 : index
    %97 = vector.load %arg14[%c4_201, %c2_202, %c0_203] : memref<20x20x4xf32, #tpu.memory_space<vmem>>, vector<16x16x4xf32>
    %c0_204 = arith.constant 0 : index
    %c0_205 = arith.constant 0 : index
    %c88 = arith.constant 88 : index
    %98 = vector.load %arg15[%c0_204, %c0_205, %c88] : memref<16x16x100xf32, #tpu.memory_space<vmem>>, vector<16x16x4xf32>
    tpu.vector_store %arg15[%c0_204, %c0_205, %c88], %97 {strides = array<i32>} : memref<16x16x100xf32, #tpu.memory_space<vmem>>, vector<16x16x4xf32>,
    %c4_206 = arith.constant 4 : index
    %c3_207 = arith.constant 3 : index
    %c0_208 = arith.constant 0 : index
    %99 = vector.load %arg14[%c4_206, %c3_207, %c0_208] : memref<20x20x4xf32, #tpu.memory_space<vmem>>, vector<16x16x4xf32>
    %c0_209 = arith.constant 0 : index
    %c0_210 = arith.constant 0 : index
    %c92 = arith.constant 92 : index
    %100 = vector.load %arg15[%c0_209, %c0_210, %c92] : memref<16x16x100xf32, #tpu.memory_space<vmem>>, vector<16x16x4xf32>
    tpu.vector_store %arg15[%c0_209, %c0_210, %c92], %99 {strides = array<i32>} : memref<16x16x100xf32, #tpu.memory_space<vmem>>, vector<16x16x4xf32>,
    %c4_211 = arith.constant 4 : index
    %c4_212 = arith.constant 4 : index
    %c0_213 = arith.constant 0 : index
    %101 = vector.load %arg14[%c4_211, %c4_212, %c0_213] : memref<20x20x4xf32, #tpu.memory_space<vmem>>, vector<16x16x4xf32>
    %c0_214 = arith.constant 0 : index
    %c0_215 = arith.constant 0 : index
    %c96 = arith.constant 96 : index
    %102 = vector.load %arg15[%c0_214, %c0_215, %c96] : memref<16x16x100xf32, #tpu.memory_space<vmem>>, vector<16x16x4xf32>
    tpu.vector_store %arg15[%c0_214, %c0_215, %c96], %101 {strides = array<i32>} : memref<16x16x100xf32, #tpu.memory_space<vmem>>, vector<16x16x4xf32>,
    %c0_216 = arith.constant 0 : index
    %c0_217 = arith.constant 0 : index
    %c0_218 = arith.constant 0 : index
    %103 = vector.load %arg15[%c0_216, %c0_217, %c0_218] : memref<16x16x100xf32, #tpu.memory_space<vmem>>, vector<16x16x100xf32>
    %104 = vector.shape_cast %103 : vector<16x16x100xf32> to vector<256x100xf32>
    %105 = arith.truncf %104 : vector<256x100xf32> to vector<256x100xbf16>
    %c0_219 = arith.constant 0 : index
    %c0_220 = arith.constant 0 : index
    %106 = vector.load %arg8[%c0_219, %c0_220] : memref<100x8xbf16, #tpu.memory_space<vmem>>, vector<100x8xbf16>
    %cst_221 = arith.constant dense<0.000000e+00> : vector<256x8xf32>
    %107 = tpu.matmul %105, %106, %cst_221 {dimension_numbers = #tpu.dot_dimension_numbers<[1], [0], [0], [1], [0, 0, 1, 1], [], []>} : vector<256x100xbf16>, vector<100x8xbf16>, vector<256x8xf32> -> vector<256x8xf32>
    %c0_222 = arith.constant 0 : index
    %c0_223 = arith.constant 0 : index
    %108 = vector.load %arg9[%c0_222, %c0_223] : memref<1x8xf32, #tpu.memory_space<vmem>>, vector<1x8xf32>
    %109 = vector.broadcast %108 : vector<1x8xf32> to vector<256x8xf32>
    %110 = arith.addf %107, %109 : vector<256x8xf32>
    %cst_224 = arith.constant 0.000000e+00 : f32
    %111 = vector.broadcast %cst_224 : f32 to vector<256x8xf32>
    %112 = arith.maximumf %110, %111 : vector<256x8xf32>
    %113 = vector.shape_cast %112 : vector<256x8xf32> to vector<1x16x16x8xf32>
    %c0_225 = arith.constant 0 : index
    %c0_226 = arith.constant 0 : index
    %c0_227 = arith.constant 0 : index
    %c16_228 = arith.constant 16 : index
    %114 = vector.load %arg10[%c0_225, %c0_226, %c0_227, %c16_228] : memref<1x16x16x32xf32, #tpu.memory_space<vmem>>, vector<1x16x16x8xf32>
    tpu.vector_store %arg10[%c0_225, %c0_226, %c0_227, %c16_228], %113 {strides = array<i32>} : memref<1x16x16x32xf32, #tpu.memory_space<vmem>>, vector<1x16x16x8xf32>,
    %cst_229 = arith.constant -3.40282347E+38 : f32
    %115 = vector.broadcast %cst_229 : f32 to vector<18x18x4xf32>
    %c0_230 = arith.constant 0 : index
    %c0_231 = arith.constant 0 : index
    %c0_232 = arith.constant 0 : index
    %116 = vector.load %arg11[%c0_230, %c0_231, %c0_232] : memref<18x18x4xf32, #tpu.memory_space<vmem>>, vector<18x18x4xf32>
    tpu.vector_store %arg11[%c0_230, %c0_231, %c0_232], %115 {strides = array<i32>} : memref<18x18x4xf32, #tpu.memory_space<vmem>>, vector<18x18x4xf32>,
    %117 = arith.extf %1 : vector<16x16x4xbf16> to vector<16x16x4xf32>
    %c1_233 = arith.constant 1 : index
    %c1_234 = arith.constant 1 : index
    %c0_235 = arith.constant 0 : index
    %118 = vector.load %arg11[%c1_233, %c1_234, %c0_235] : memref<18x18x4xf32, #tpu.memory_space<vmem>>, vector<16x16x4xf32>
    tpu.vector_store %arg11[%c1_233, %c1_234, %c0_235], %117 {strides = array<i32>} : memref<18x18x4xf32, #tpu.memory_space<vmem>>, vector<16x16x4xf32>,
    %c1_236 = arith.constant 1 : index
    %c1_237 = arith.constant 1 : index
    %c0_238 = arith.constant 0 : index
    %119 = vector.load %arg11[%c1_236, %c1_237, %c0_238] : memref<18x18x4xf32, #tpu.memory_space<vmem>>, vector<16x16x4xf32>
    %c0_239 = arith.constant 0 : index
    %c0_240 = arith.constant 0 : index
    %c0_241 = arith.constant 0 : index
    %120 = vector.load %arg11[%c0_239, %c0_240, %c0_241] : memref<18x18x4xf32, #tpu.memory_space<vmem>>, vector<16x16x4xf32>
    %121 = arith.maximumf %119, %120 : vector<16x16x4xf32>
    %c0_242 = arith.constant 0 : index
    %c1_243 = arith.constant 1 : index
    %c0_244 = arith.constant 0 : index
    %122 = vector.load %arg11[%c0_242, %c1_243, %c0_244] : memref<18x18x4xf32, #tpu.memory_space<vmem>>, vector<16x16x4xf32>
    %123 = arith.maximumf %121, %122 : vector<16x16x4xf32>
    %c0_245 = arith.constant 0 : index
    %c2_246 = arith.constant 2 : index
    %c0_247 = arith.constant 0 : index
    %124 = vector.load %arg11[%c0_245, %c2_246, %c0_247] : memref<18x18x4xf32, #tpu.memory_space<vmem>>, vector<16x16x4xf32>
    %125 = arith.maximumf %123, %124 : vector<16x16x4xf32>
    %c1_248 = arith.constant 1 : index
    %c0_249 = arith.constant 0 : index
    %c0_250 = arith.constant 0 : index
    %126 = vector.load %arg11[%c1_248, %c0_249, %c0_250] : memref<18x18x4xf32, #tpu.memory_space<vmem>>, vector<16x16x4xf32>
    %127 = arith.maximumf %125, %126 : vector<16x16x4xf32>
    %c1_251 = arith.constant 1 : index
    %c2_252 = arith.constant 2 : index
    %c0_253 = arith.constant 0 : index
    %128 = vector.load %arg11[%c1_251, %c2_252, %c0_253] : memref<18x18x4xf32, #tpu.memory_space<vmem>>, vector<16x16x4xf32>
    %129 = arith.maximumf %127, %128 : vector<16x16x4xf32>
    %c2_254 = arith.constant 2 : index
    %c0_255 = arith.constant 0 : index
    %c0_256 = arith.constant 0 : index
    %130 = vector.load %arg11[%c2_254, %c0_255, %c0_256] : memref<18x18x4xf32, #tpu.memory_space<vmem>>, vector<16x16x4xf32>
    %131 = arith.maximumf %129, %130 : vector<16x16x4xf32>
    %c2_257 = arith.constant 2 : index
    %c1_258 = arith.constant 1 : index
    %c0_259 = arith.constant 0 : index
    %132 = vector.load %arg11[%c2_257, %c1_258, %c0_259] : memref<18x18x4xf32, #tpu.memory_space<vmem>>, vector<16x16x4xf32>
    %133 = arith.maximumf %131, %132 : vector<16x16x4xf32>
    %c2_260 = arith.constant 2 : index
    %c2_261 = arith.constant 2 : index
    %c0_262 = arith.constant 0 : index
    %134 = vector.load %arg11[%c2_260, %c2_261, %c0_262] : memref<18x18x4xf32, #tpu.memory_space<vmem>>, vector<16x16x4xf32>
    %135 = arith.maximumf %133, %134 : vector<16x16x4xf32>
    %136 = vector.shape_cast %135 : vector<16x16x4xf32> to vector<256x4xf32>
    %137 = arith.truncf %136 : vector<256x4xf32> to vector<256x4xbf16>
    %c0_263 = arith.constant 0 : index
    %c0_264 = arith.constant 0 : index
    %138 = vector.load %arg4[%c0_263, %c0_264] : memref<4x8xbf16, #tpu.memory_space<vmem>>, vector<4x8xbf16>
    %cst_265 = arith.constant dense<0.000000e+00> : vector<256x8xf32>
    %139 = tpu.matmul %137, %138, %cst_265 {dimension_numbers = #tpu.dot_dimension_numbers<[1], [0], [0], [1], [0, 0, 1, 1], [], []>} : vector<256x4xbf16>, vector<4x8xbf16>, vector<256x8xf32> -> vector<256x8xf32>
    %c0_266 = arith.constant 0 : index
    %c0_267 = arith.constant 0 : index
    %140 = vector.load %arg5[%c0_266, %c0_267] : memref<1x8xf32, #tpu.memory_space<vmem>>, vector<1x8xf32>
    %141 = vector.broadcast %140 : vector<1x8xf32> to vector<256x8xf32>
    %142 = arith.addf %139, %141 : vector<256x8xf32>
    %cst_268 = arith.constant 0.000000e+00 : f32
    %143 = vector.broadcast %cst_268 : f32 to vector<256x8xf32>
    %144 = arith.maximumf %142, %143 : vector<256x8xf32>
    %145 = vector.shape_cast %144 : vector<256x8xf32> to vector<1x16x16x8xf32>
    %c0_269 = arith.constant 0 : index
    %c0_270 = arith.constant 0 : index
    %c0_271 = arith.constant 0 : index
    %c24_272 = arith.constant 24 : index
    %146 = vector.load %arg10[%c0_269, %c0_270, %c0_271, %c24_272] : memref<1x16x16x32xf32, #tpu.memory_space<vmem>>, vector<1x16x16x8xf32>
    tpu.vector_store %arg10[%c0_269, %c0_270, %c0_271, %c24_272], %145 {strides = array<i32>} : memref<1x16x16x32xf32, #tpu.memory_space<vmem>>, vector<1x16x16x8xf32>,
    return
  }
  func.func @transform_0(%arg0: i32) -> (i32, i32, i32, i32) {
    %c0_i32 = arith.constant 0 : i32
    %c0_i32_0 = arith.constant 0 : i32
    %c0_i32_1 = arith.constant 0 : i32
    %c0_i32_2 = arith.constant 0 : i32
    return %arg0, %c0_i32, %c0_i32_0, %c0_i32_1 : i32, i32, i32, i32
  }
  func.func @transform_1(%arg0: i32) -> (i32, i32) {
    %c0_i32 = arith.constant 0 : i32
    %c0_i32_0 = arith.constant 0 : i32
    %c0_i32_1 = arith.constant 0 : i32
    return %c0_i32, %c0_i32_0 : i32, i32
  }
  func.func @transform_2(%arg0: i32) -> (i32, i32) {
    %c0_i32 = arith.constant 0 : i32
    %c0_i32_0 = arith.constant 0 : i32
    %c0_i32_1 = arith.constant 0 : i32
    return %c0_i32, %c0_i32_0 : i32, i32
  }
  func.func @transform_3(%arg0: i32) -> (i32, i32) {
    %c0_i32 = arith.constant 0 : i32
    %c0_i32_0 = arith.constant 0 : i32
    %c0_i32_1 = arith.constant 0 : i32
    return %c0_i32, %c0_i32_0 : i32, i32
  }
  func.func @transform_4(%arg0: i32) -> (i32, i32) {
    %c0_i32 = arith.constant 0 : i32
    %c0_i32_0 = arith.constant 0 : i32
    %c0_i32_1 = arith.constant 0 : i32
    return %c0_i32, %c0_i32_0 : i32, i32
  }
  func.func @transform_5(%arg0: i32) -> (i32, i32) {
    %c0_i32 = arith.constant 0 : i32
    %c0_i32_0 = arith.constant 0 : i32
    %c0_i32_1 = arith.constant 0 : i32
    return %c0_i32, %c0_i32_0 : i32, i32
  }
  func.func @transform_6(%arg0: i32) -> (i32, i32) {
    %c0_i32 = arith.constant 0 : i32
    %c0_i32_0 = arith.constant 0 : i32
    %c0_i32_1 = arith.constant 0 : i32
    return %c0_i32, %c0_i32_0 : i32, i32
  }
  func.func @transform_7(%arg0: i32) -> (i32, i32) {
    %c0_i32 = arith.constant 0 : i32
    %c0_i32_0 = arith.constant 0 : i32
    %c0_i32_1 = arith.constant 0 : i32
    return %c0_i32, %c0_i32_0 : i32, i32
  }
  func.func @transform_8(%arg0: i32) -> (i32, i32) {
    %c0_i32 = arith.constant 0 : i32
    %c0_i32_0 = arith.constant 0 : i32
    %c0_i32_1 = arith.constant 0 : i32
    return %c0_i32, %c0_i32_0 : i32, i32
  }
  func.func @transform_9(%arg0: i32) -> (i32, i32, i32, i32) {
    %c0_i32 = arith.constant 0 : i32
    %c0_i32_0 = arith.constant 0 : i32
    %c0_i32_1 = arith.constant 0 : i32
    %c0_i32_2 = arith.constant 0 : i32
    return %arg0, %c0_i32, %c0_i32_0, %c0_i32_1 : i32, i32, i32, i32
  }
}

</mosaic_0001>

<bundles_post_ra>
// kernel: inception_forward.1
= control target key start
LH: loop header
LB: loop body
LE: loop exit
PB: predicated region body
PF: predicated region fallthrough
CT: control target
= control target key end

     0   :  { %14 = vsyncpa [#allocation8], 0  ;;  %s14316_s0 = inlined_call_operand.vmem [shape: bf16[2,16,16,4], index: 0, kind: input, shape index: {}]   ;;  %s14317_s1 = inlined_call_operand.vmem [shape: bf16[4,16], index: 1, kind: input, shape index: {}]   ;;  %s14318_s2 = inlined_call_operand.vmem [shape: f32[1,16], index: 2, kind: input, shape index: {}]   ;;  %s14319_s3 = inlined_call_operand.vmem [shape: bf16[4,8], index: 3, kind: input, shape index: {}]   ;;  %s14320_s4 = inlined_call_operand.vmem [shape: f32[1,8], index: 4, kind: input, shape index: {}]   ;;  %s14321_s5 = inlined_call_operand.vmem [shape: bf16[36,8], index: 5, kind: input, shape index: {}]   ;;  %s14322_s6 = inlined_call_operand.vmem [shape: f32[1,8], index: 6, kind: input, shape index: {}]   ;;  %s14323_s7 = inlined_call_operand.vmem [shape: bf16[100,8], index: 7, kind: input, shape index: {}]   ;;  %s14324_s8 = inlined_call_operand.vmem [shape: f32[1,8], index: 8, kind: input, shape index: {}]   ;;  %s14325_s9 = inlined_call_operand.hbm [shape: f32[2,16,16,32], index: 9, kind: output, shape index: {}]  }
   0x1   :  { %16 = vsyncpa [#allocation8 + $0x1], 0  ;;  %s10192_s30 = smov 0   ;;  %s10194_s10 = smov 0  }
   0x2   :  { %s10196_s11 = smov 0   ;;  %s10198_s12 = smov 0  }
   0x3 LB: > { %s10213_s13 = sadd.s32 4294967295, %s10110_s12   ;;  %s9600_s14 = sadd.s32 4294967294, %s10110_s12   ;;  %s10110_s12 = sphi %s10198_s12, %s14411_s12   ;;  %s10106_s11 = sphi %s10196_s11, %s14410_s11   ;;  %s10102_s10 = sphi %s10194_s10, %s14409_s10   ;;  %s10098_s30 = sphi %s10192_s30, %s14408_s30  }
   0x4   : > { %s10217_s15 = sadd.s32 1, %s10110_s12   ;;  %s223_s16 = sadd.s32 1, %s10106_s11 }
   0x5   : > { %s220_s17 = ssub.s32 %s10110_s12, %s10217_s15  ;;  %p233_p0 = scmp.ne.s32.totalorder %s10106_s11, %s10102_s10 }
   0x6   : > { %p221_p1 = scmp.eq.s32.totalorder %s220_s17, 0  ;;  %p234_p2 = scmp.eq.s32.totalorder %s10213_s13, 1 }
   0x7   : > { %p239_p3 = scmp.ne.s32.totalorder %s10102_s10, %s10098_s30  ;;  %p240_p4 = scmp.eq.s32.totalorder %s9600_s14, 1 }
   0x8   : > { %s10228_s18 = scalar_select %p221_p1, %s10106_s11, %s223_s16  }
   0x9   : > { %p10230_p5 = por %p234_p2, %p233_p0  ;;  %p10234_p6 = por %p240_p4, %p239_p3 }
   0xa   : > { %p9603_p7 = scmp.ge.s32.totalorder %s10110_s12, 1  ;;  %p290_p8 = scmp.lt.s32.totalorder %s10110_s12, 3 }
   0xc   : > { %p291_p9 = pnand %p9603_p7, %p290_p8 }
   0xe   : > { %294 = sbr.rel (%p291_p9) target bundleno = 3218 (0xc92), region = 56 }
  0x13   : > { %v364_v0 = vld [vmem:[%s14317_s1] sm:$0x3]  ;;  %vm501_vm0 = vcmask 1041408   ;;  %p326_p10 = scmp.lt.s32.totalorder %s10213_s13, 1  ;;  %vm733_vm1 = vcmask 25600   ;;  %vm452_vm2 = vcmask 31744  }
  0x14   : > { %9936 = vmatprep.subr.msk.bf16.mxu0 %vm501_vm0, %v364_v0  ;;  %v503_v1 = vsel %vm501_vm0, %v364_v0, 0  ;;  %v10112_v2 = vmov -3.4028235e+38   ;;  %v14326_v3 = vmov 0.0   ;;  %s10114_s28 = smov 4   ;;  %s10115_s29 = smov 8  }
  0x15   : > { %9785 = vmatpush3.bf16.msra.mxu0 %v503_v1  ;;  %s10247_s23 = scalar_select %p326_p10, %s10213_s13, 1  ;;  %8434 = vst.msk [vmem:[#allocation2 + $0x18] sm:$0xff] %vm452_vm2, %v10112_v2  ;;  %8435 = vst.msk [vmem:[#allocation2 + $0x20] sm:$0xff] %vm452_vm2, %v10112_v2  ;;  %vm1171_vm3 = vcmask 64544   ;;  %vm1364_vm4 = vcmask 97344   ;;  %vm698_vm5 = vcmask 64512  }
  0x16   : > { %8436 = vst.msk [vmem:[#allocation2 + $0x28] sm:$0x3] %vm733_vm1, %v10112_v2  ;;  %8433 = vst.msk [vmem:[#allocation2 + $0x10] sm:$0x3] %vm733_vm1, %v10112_v2  ;;  %s14352_s14 = sand.u32 1, %s10102_s10   ;;  %s10118_s25 = smov 16  }
  0x17   : > { %8431 = vst.msk [vmem:[#allocation2] sm:$0xff] %vm452_vm2, %v10112_v2  ;;  %8432 = vst.msk [vmem:[#allocation2 + $0x8] sm:$0xff] %vm452_vm2, %v10112_v2  ;;  %s9706_s24 = sshll.u32 %s10247_s23, 7  ;;  %v10605_v62 = vld [vmem:[%s14318_s2] ss:$0 sm:$0xff]  ;;  %s9604_s21 = sshll.u32 %s14352_s14, 8 }
  0x18   : > { %8437 = vst.msk [vmem:[#allocation2 + $0x30] sm:$0xff] %vm452_vm2, %v10112_v2  ;;  %8438 = vst.msk [vmem:[#allocation2 + $0x38] sm:$0xff] %vm452_vm2, %v10112_v2  ;;  %s10495_s27 = scalar_lea.vmem %s14316_s0, %s9706_s24  ;;  %s10613_s22 = scalar_lea.vmem [#allocation7], %s9604_s21  ;;  %vm1557_vm6 = vcmask 130144   ;;  %vm1750_vm7 = vcmask 162944   ;;  %vm1943_vm8 = vcmask 195744  }
  0x19   : > { %8439 = vst.msk [vmem:[#allocation2 + $0x40] sm:$0x3] %vm733_vm1, %v10112_v2  ;;  %8442 = vst.msk [vmem:[#allocation2 + $0x58] sm:$0x3] %vm733_vm1, %v10112_v2  ;;  %v332_v4 = vld [vmem:[%s10495_s27] sm:$0xff]   ;;  %v334_v5 = vld [vmem:[%s10495_s27 + $0x8] sm:$0xff]  }
  0x1a   : > { %8440 = vst.msk [vmem:[#allocation2 + $0x48] sm:$0xff] %vm452_vm2, %v10112_v2  ;;  %8441 = vst.msk [vmem:[#allocation2 + $0x50] sm:$0xff] %vm452_vm2, %v10112_v2  ;;  %v336_v6 = vld [vmem:[%s10495_s27 + $0x10] sm:$0xff]   ;;  %v8485_v7 = vunpack.c.l.bf16 %v332_v4  ;;  %v8486_v8 = vunpack.c.h.bf16 %v332_v4  ;;  %v8487_v9 = vunpack.c.l.bf16 %v334_v5  ;;  %v8488_v10 = vunpack.c.h.bf16 %v334_v5  ;;  %v10501_v12 = vld [vmem:[%s10495_s27 + $0x18] sm:$0xff]   ;;  %9786 = vmatprep.mubr.msk.bf16.mxu0 %vm452_vm2, %v332_v4  ;;  %s10116_s23 = smov 120   ;;  %s10117_s24 = smov 12  }
  0x1b   : > { %8443 = vst.msk [vmem:[#allocation2 + $0x60] sm:$0xff] %vm452_vm2, %v10112_v2  ;;  %8444 = vst.msk [vmem:[#allocation2 + $0x68] sm:$0xff] %vm452_vm2, %v10112_v2  ;;  %v8489_v11 = vunpack.c.l.bf16 %v336_v6  ;;  %v8490_v13 = vunpack.c.h.bf16 %v336_v6  ;;  %v8491_v14 = vunpack.c.l.bf16 %v10501_v12  ;;  %v8492_v15 = vunpack.c.h.bf16 %v10501_v12  ;;  %v10509_v16 = vld [vmem:[%s10495_s27 + $0x20] sm:$0xff]   ;;  %v10512_v17 = vld [vmem:[%s10495_s27 + $0x28] sm:$0xff]   ;;  %9787 = vmatmul.mubr.msk.bf16.vlgmr.msra.gmra.mxu0 %vm452_vm2, %v334_v5  ;;  %s14353_s26 = smov 24   ;;  %s10121_s16 = smov 28  }
  0x1c   : > { %8445 = vst.msk [vmem:[#allocation2 + $0x70] sm:$0x3] %vm733_vm1, %v10112_v2  ;;  %8448 = vst.msk [vmem:[#allocation2 + $0x88] sm:$0x3] %vm733_vm1, %v10112_v2  ;;  %v8493_v18 = vunpack.c.l.bf16 %v10509_v16  ;;  %v8494_v19 = vunpack.c.h.bf16 %v10509_v16  ;;  %v10521_v20 = vld [vmem:[%s10495_s27 + $0x30] sm:$0xff]   ;;  %v10524_v21 = vld [vmem:[%s10495_s27 + $0x38] sm:$0xff]   ;;  %9790 = vmatprep.mubr.msk.bf16.mxu0 %vm452_vm2, %v336_v6  ;;  %v8495_v23 = vunpack.c.l.bf16 %v10512_v17  ;;  %v8496_v24 = vunpack.c.h.bf16 %v10512_v17 }
  0x1d   : > { %8446 = vst.msk [vmem:[#allocation2 + $0x78] sm:$0xff] %vm452_vm2, %v10112_v2  ;;  %8447 = vst.msk [vmem:[#allocation2 + $0x80] sm:$0xff] %vm452_vm2, %v10112_v2  ;;  %v10527_v22 = vld [vmem:[%s10495_s27 + $0x40] sm:$0xff]   ;;  %v8497_v25 = vunpack.c.l.bf16 %v10521_v20  ;;  %v350_v26 = vld [vmem:[%s10495_s27 + $0x48] sm:$0xff]   ;;  %v8498_v30 = vunpack.c.h.bf16 %v10521_v20  ;;  %v8499_v31 = vunpack.c.l.bf16 %v10524_v21  ;;  %v8500_v32 = vunpack.c.h.bf16 %v10524_v21  ;;  %s10122_s21 = smov 32   ;;  %s10123_s14 = smov 116  }
  0x1e   : > { %8449 = vst.msk [vmem:[#allocation2 + $0x90] sm:$0xff] %vm452_vm2, %v10112_v2  ;;  %8450 = vst.msk [vmem:[#allocation2 + $0x98] sm:$0xff] %vm452_vm2, %v10112_v2  ;;  %v352_v27 = vld [vmem:[%s10495_s27 + $0x50] sm:$0xff]   ;;  %v354_v33 = vld [vmem:[%s10495_s27 + $0x58] sm:$0xff]   ;;  %v8501_v34 = vunpack.c.l.bf16 %v10527_v22  ;;  %v8502_v35 = vunpack.c.h.bf16 %v10527_v22  ;;  %v8503_v36 = vunpack.c.l.bf16 %v350_v26  ;;  %v8504_v37 = vunpack.c.h.bf16 %v350_v26  ;;  %s10127_s17 = smov 48  }
  0x1f   : > { %8451 = vst.msk [vmem:[#allocation2 + $0xa0] sm:$0x3] %vm733_vm1, %v10112_v2  ;;  %8454 = vst.msk [vmem:[#allocation2 + $0xb8] sm:$0x3] %vm733_vm1, %v10112_v2  ;;  %v8505_v38 = vunpack.c.l.bf16 %v352_v27  ;;  %v8506_v39 = vunpack.c.h.bf16 %v352_v27  ;;  %v8507_v40 = vunpack.c.l.bf16 %v354_v33  ;;  %v8508_v41 = vunpack.c.h.bf16 %v354_v33  ;;  %v356_v42 = vld [vmem:[%s10495_s27 + $0x60] sm:$0xff]   ;;  %v358_v45 = vld [vmem:[%s10495_s27 + $0x68] sm:$0xff]  }
  0x20   : > { %8452 = vst.msk [vmem:[#allocation2 + $0xa8] sm:$0xff] %vm452_vm2, %v10112_v2  ;;  %8453 = vst.msk [vmem:[#allocation2 + $0xb0] sm:$0xff] %vm452_vm2, %v10112_v2  ;;  %v8509_v43 = vunpack.c.l.bf16 %v356_v42  ;;  %v8510_v44 = vunpack.c.h.bf16 %v356_v42  ;;  %v360_v46 = vld [vmem:[%s10495_s27 + $0x70] sm:$0xff]   ;;  %v8511_v47 = vunpack.c.l.bf16 %v358_v45  ;;  %v8512_v48 = vunpack.c.h.bf16 %v358_v45  ;;  %v362_v50 = vld [vmem:[%s10495_s27 + $0x78] sm:$0xff]   ;;  %s10120_s27 = smov 20  }
  0x21   : > { %8455 = vst.msk [vmem:[#allocation2 + $0xc0] sm:$0xff] %vm452_vm2, %v10112_v2  ;;  %8456 = vst.msk [vmem:[#allocation2 + $0xc8] sm:$0xff] %vm452_vm2, %v10112_v2  ;;  %v8513_v49 = vunpack.c.l.bf16 %v360_v46  ;;  %v8514_v51 = vunpack.c.h.bf16 %v360_v46  ;;  %v8515_v52 = vunpack.c.l.bf16 %v362_v50  ;;  %v8516_v53 = vunpack.c.h.bf16 %v362_v50 }
  0x22   : > { %8457 = vst.msk [vmem:[#allocation2 + $0xd0] sm:$0x3] %vm733_vm1, %v10112_v2  ;;  %8460 = vst.msk [vmem:[#allocation2 + $0xe8] sm:$0x3] %vm733_vm1, %v10112_v2  ;;  %vm2137_vm9 = vcmask 228544   ;;  %vm2330_vm10 = vcmask 261344  }
  0x23   : > { %8458 = vst.msk [vmem:[#allocation2 + $0xd8] sm:$0xff] %vm452_vm2, %v10112_v2  ;;  %8459 = vst.msk [vmem:[#allocation2 + $0xe0] sm:$0xff] %vm452_vm2, %v10112_v2  ;;  %9791 = vmatmul.mubr.msk.bf16.gmra.mxu0 %vm452_vm2, %v10501_v12  ;;  %vm3039_vm11 = vcmask 27648   ;;  %vm2523_vm12 = vcmask 294144   ;;  %vm2631_vm13 = vcmask 293888   ;;  %vm3004_vm14 = vcmask 130112  }
  0x24   : > { %8461 = vst.msk [vmem:[#allocation2 + $0xf0] sm:$0xff] %vm452_vm2, %v10112_v2  ;;  %8462 = vst.msk [vmem:[#allocation2 + $0xf8] sm:$0xff] %vm452_vm2, %v10112_v2  ;;  %9794 = vmatprep.mubr.msk.bf16.mxu0 %vm452_vm2, %v10509_v16  ;;  %vm4988_vm15 = vcmask 326944  }
  0x25   : > { %8463 = vst.msk [vmem:[#allocation2 + $0x100] sm:$0x3] %vm733_vm1, %v10112_v2  ;;  %8466 = vst.msk [vmem:[#allocation2 + $0x118] sm:$0x3] %vm733_vm1, %v10112_v2 }
  0x26   : > { %8464 = vst.msk [vmem:[#allocation2 + $0x108] sm:$0xff] %vm452_vm2, %v10112_v2  ;;  %8465 = vst.msk [vmem:[#allocation2 + $0x110] sm:$0xff] %vm452_vm2, %v10112_v2 }
  0x27   : > { %8467 = vst.msk [vmem:[#allocation2 + $0x120] sm:$0xff] %vm452_vm2, %v10112_v2  ;;  %8468 = vst.msk [vmem:[#allocation2 + $0x128] sm:$0xff] %vm452_vm2, %v10112_v2 }
  0x28   : > { %8469 = vst.msk [vmem:[#allocation2 + $0x130] sm:$0x3] %vm733_vm1, %v10112_v2  ;;  %8472 = vst.msk [vmem:[#allocation2 + $0x148] sm:$0x3] %vm733_vm1, %v10112_v2 }
  0x29   : > { %8470 = vst.msk [vmem:[#allocation2 + $0x138] sm:$0xff] %vm452_vm2, %v10112_v2  ;;  %8471 = vst.msk [vmem:[#allocation2 + $0x140] sm:$0xff] %vm452_vm2, %v10112_v2 }
  0x2a   : > { %8473 = vst.msk [vmem:[#allocation2 + $0x150] sm:$0xff] %vm452_vm2, %v10112_v2  ;;  %8474 = vst.msk [vmem:[#allocation2 + $0x158] sm:$0xff] %vm452_vm2, %v10112_v2 }
  0x2b   : > { %8475 = vst.msk [vmem:[#allocation2 + $0x160] sm:$0x3] %vm733_vm1, %v10112_v2  ;;  %8478 = vst.msk [vmem:[#allocation2 + $0x178] sm:$0x3] %vm733_vm1, %v10112_v2  ;;  %9795 = vmatmul.mubr.msk.bf16.gmra.mxu0 %vm452_vm2, %v10512_v17 }
  0x2c   : > { %8476 = vst.msk [vmem:[#allocation2 + $0x168] sm:$0xff] %vm452_vm2, %v10112_v2  ;;  %8477 = vst.msk [vmem:[#allocation2 + $0x170] sm:$0xff] %vm452_vm2, %v10112_v2  ;;  %9798 = vmatprep.mubr.msk.bf16.mxu0 %vm452_vm2, %v10521_v20 }
  0x2d   : > { %8479 = vst.msk [vmem:[#allocation2 + $0x180] sm:$0xff] %vm452_vm2, %v10112_v2  ;;  %8480 = vst.msk [vmem:[#allocation2 + $0x188] sm:$0xff] %vm452_vm2, %v10112_v2 }
  0x2e   : > { %8481 = vst.msk [vmem:[#allocation2 + $0x190] sm:$0x3] %vm733_vm1, %v10112_v2  ;;  %8484 = vst.msk [vmem:[#allocation2 + $0x1a8] sm:$0x3] %vm733_vm1, %v10112_v2 }
  0x2f   : > { %8482 = vst.msk [vmem:[#allocation2 + $0x198] sm:$0xff] %vm452_vm2, %v10112_v2  ;;  %8483 = vst.msk [vmem:[#allocation2 + $0x1a0] sm:$0xff] %vm452_vm2, %v10112_v2 }
  0x30   : > { %732 = vst.msk [vmem:[#allocation3 + $0x8] sm:$0xff] %vm452_vm2, %v14326_v3  ;;  %731 = vst.msk [vmem:[#allocation3] sm:$0xff] %vm452_vm2, %v14326_v3 }
  0x31   : > { %734 = vst.msk [vmem:[#allocation3 + $0x10] sm:$0x3] %vm733_vm1, %v14326_v3  ;;  %737 = vst.msk [vmem:[#allocation3 + $0x28] sm:$0x3] %vm733_vm1, %v14326_v3 }
  0x32   : > { %735 = vst.msk [vmem:[#allocation3 + $0x18] sm:$0xff] %vm452_vm2, %v14326_v3  ;;  %736 = vst.msk [vmem:[#allocation3 + $0x20] sm:$0xff] %vm452_vm2, %v14326_v3 }
  0x33   : > { %738 = vst.msk [vmem:[#allocation3 + $0x30] sm:$0xff] %vm452_vm2, %v14326_v3  ;;  %739 = vst.msk [vmem:[#allocation3 + $0x38] sm:$0xff] %vm452_vm2, %v14326_v3  ;;  %9799 = vmatmul.mubr.msk.bf16.gmra.mxu0 %vm452_vm2, %v10524_v21 }
  0x34   : > { %740 = vst.msk [vmem:[#allocation3 + $0x40] sm:$0x3] %vm733_vm1, %v14326_v3  ;;  %743 = vst.msk [vmem:[#allocation3 + $0x58] sm:$0x3] %vm733_vm1, %v14326_v3  ;;  %9802 = vmatprep.mubr.msk.bf16.mxu0 %vm452_vm2, %v10527_v22 }
  0x35   : > { %741 = vst.msk [vmem:[#allocation3 + $0x48] sm:$0xff] %vm452_vm2, %v14326_v3  ;;  %742 = vst.msk [vmem:[#allocation3 + $0x50] sm:$0xff] %vm452_vm2, %v14326_v3 }
  0x36   : > { %744 = vst.msk [vmem:[#allocation3 + $0x60] sm:$0xff] %vm452_vm2, %v14326_v3  ;;  %745 = vst.msk [vmem:[#allocation3 + $0x68] sm:$0xff] %vm452_vm2, %v14326_v3 }
  0x37   : > { %746 = vst.msk [vmem:[#allocation3 + $0x70] sm:$0x3] %vm733_vm1, %v14326_v3  ;;  %749 = vst.msk [vmem:[#allocation3 + $0x88] sm:$0x3] %vm733_vm1, %v14326_v3  ;;  %v1011_v29 = vld [vmem:[#allocation3 + $0x1] sm:$0xff] }
  0x38   : > { %747 = vst.msk [vmem:[#allocation3 + $0x78] sm:$0xff] %vm452_vm2, %v14326_v3  ;;  %748 = vst.msk [vmem:[#allocation3 + $0x80] sm:$0xff] %vm452_vm2, %v14326_v3  ;;  %v1012_v28 = vld [vmem:[#allocation3 + $0x9] sm:$0xff]  ;;  %1075 = vrot.lane.b32.xlu0 %v1011_v29, %s10114_s28  ;;  %v947_v58 = vld [vmem:[#allocation3] sm:$0xff] }
  0x39   : > { %750 = vst.msk [vmem:[#allocation3 + $0x90] sm:$0xff] %vm452_vm2, %v14326_v3  ;;  %751 = vst.msk [vmem:[#allocation3 + $0x98] sm:$0xff] %vm452_vm2, %v14326_v3  ;;  %1077 = vrot.lane.b32.xlu1 %v1012_v28, %s10114_s28  ;;  %v1205_v54 = vld [vmem:[#allocation3 + $0xa] sm:$0xff]  ;;  %v1204_v55 = vld [vmem:[#allocation3 + $0x2] sm:$0xff] }
  0x3a   : > { %752 = vst.msk [vmem:[#allocation3 + $0xa0] sm:$0x3] %vm733_vm1, %v14326_v3  ;;  %755 = vst.msk [vmem:[#allocation3 + $0xb8] sm:$0x3] %vm733_vm1, %v14326_v3  ;;  %v948_v57 = vld [vmem:[#allocation3 + $0x8] sm:$0xff] }
  0x3b   : > { %753 = vst.msk [vmem:[#allocation3 + $0xa8] sm:$0xff] %vm452_vm2, %v14326_v3  ;;  %754 = vst.msk [vmem:[#allocation3 + $0xb0] sm:$0xff] %vm452_vm2, %v14326_v3  ;;  %9803 = vmatmul.mubr.msk.bf16.gmra.mxu0 %vm452_vm2, %v350_v26 }
  0x3c   : > { %756 = vst.msk [vmem:[#allocation3 + $0xc0] sm:$0xff] %vm452_vm2, %v14326_v3  ;;  %757 = vst.msk [vmem:[#allocation3 + $0xc8] sm:$0xff] %vm452_vm2, %v14326_v3  ;;  %9806 = vmatprep.mubr.msk.bf16.mxu0 %vm452_vm2, %v352_v27  ;;  %1268 = vrot.lane.b32.xlu0 %v1204_v55, %s10115_s29 }
  0x3d   : > { %758 = vst.msk [vmem:[#allocation3 + $0xd0] sm:$0x3] %vm733_vm1, %v14326_v3  ;;  %761 = vst.msk [vmem:[#allocation3 + $0xe8] sm:$0x3] %vm733_vm1, %v14326_v3  ;;  %1270 = vrot.lane.b32.xlu1 %v1205_v54, %s10115_s29 }
  0x3e   : > { %759 = vst.msk [vmem:[#allocation3 + $0xd8] sm:$0xff] %vm452_vm2, %v14326_v3  ;;  %760 = vst.msk [vmem:[#allocation3 + $0xe0] sm:$0xff] %vm452_vm2, %v14326_v3 }
  0x3f   : > { %762 = vst.msk [vmem:[#allocation3 + $0xf0] sm:$0xff] %vm452_vm2, %v14326_v3  ;;  %763 = vst.msk [vmem:[#allocation3 + $0xf8] sm:$0xff] %vm452_vm2, %v14326_v3 }
  0x40   : > { %764 = vst.msk [vmem:[#allocation3 + $0x100] sm:$0x3] %vm733_vm1, %v14326_v3  ;;  %767 = vst.msk [vmem:[#allocation3 + $0x118] sm:$0x3] %vm733_vm1, %v14326_v3 }
  0x41   : > { %765 = vst.msk [vmem:[#allocation3 + $0x108] sm:$0xff] %vm452_vm2, %v14326_v3  ;;  %766 = vst.msk [vmem:[#allocation3 + $0x110] sm:$0xff] %vm452_vm2, %v14326_v3 }
  0x42   : > { %768 = vst.msk [vmem:[#allocation3 + $0x120] sm:$0xff] %vm452_vm2, %v14326_v3  ;;  %769 = vst.msk [vmem:[#allocation3 + $0x128] sm:$0xff] %vm452_vm2, %v14326_v3 }
  0x43   : > { %770 = vst.msk [vmem:[#allocation3 + $0x130] sm:$0x3] %vm733_vm1, %v14326_v3  ;;  %773 = vst.msk [vmem:[#allocation3 + $0x148] sm:$0x3] %vm733_vm1, %v14326_v3  ;;  %9807 = vmatmul.mubr.msk.bf16.gmra.mxu0 %vm452_vm2, %v354_v33 }
  0x44   : > { %771 = vst.msk [vmem:[#allocation3 + $0x138] sm:$0xff] %vm452_vm2, %v14326_v3  ;;  %772 = vst.msk [vmem:[#allocation3 + $0x140] sm:$0xff] %vm452_vm2, %v14326_v3  ;;  %9810 = vmatprep.mubr.msk.bf16.mxu0 %vm452_vm2, %v356_v42 }
  0x45   : > { %774 = vst.msk [vmem:[#allocation3 + $0x150] sm:$0xff] %vm452_vm2, %v14326_v3  ;;  %775 = vst.msk [vmem:[#allocation3 + $0x158] sm:$0xff] %vm452_vm2, %v14326_v3 }
  0x46   : > { %776 = vst.msk [vmem:[#allocation3 + $0x160] sm:$0x3] %vm733_vm1, %v14326_v3  ;;  %779 = vst.msk [vmem:[#allocation3 + $0x178] sm:$0x3] %vm733_vm1, %v14326_v3 }
  0x47   : > { %777 = vst.msk [vmem:[#allocation3 + $0x168] sm:$0xff] %vm452_vm2, %v14326_v3  ;;  %778 = vst.msk [vmem:[#allocation3 + $0x170] sm:$0xff] %vm452_vm2, %v14326_v3 }
  0x48   : > { %780 = vst.msk [vmem:[#allocation3 + $0x180] sm:$0xff] %vm452_vm2, %v14326_v3  ;;  %781 = vst.msk [vmem:[#allocation3 + $0x188] sm:$0xff] %vm452_vm2, %v14326_v3 }
  0x49   : > { %782 = vst.msk [vmem:[#allocation3 + $0x190] sm:$0x3] %vm733_vm1, %v14326_v3  ;;  %785 = vst.msk [vmem:[#allocation3 + $0x1a8] sm:$0x3] %vm733_vm1, %v14326_v3  ;;  %vm5181_vm1 = vcmask 359744  }
  0x4a   : > { %783 = vst.msk [vmem:[#allocation3 + $0x198] sm:$0xff] %vm452_vm2, %v14326_v3  ;;  %784 = vst.msk [vmem:[#allocation3 + $0x1a0] sm:$0xff] %vm452_vm2, %v14326_v3 }
  0x4b   : > { %3037 = vst.msk [vmem:[#allocation5] sm:$0xff] %vm452_vm2, %v14326_v3  ;;  %3038 = vst.msk [vmem:[#allocation5 + $0x8] sm:$0xff] %vm452_vm2, %v14326_v3  ;;  %9811 = vmatmul.mubr.msk.bf16.gmra.mxu0 %vm452_vm2, %v358_v45 }
  0x4c   : > { %3041 = vst.msk [vmem:[#allocation5 + $0x18] sm:$0xff] %vm452_vm2, %v14326_v3  ;;  %3042 = vst.msk [vmem:[#allocation5 + $0x20] sm:$0xff] %vm452_vm2, %v14326_v3  ;;  %9814 = vmatprep.mubr.msk.bf16.mxu0 %vm452_vm2, %v360_v46 }
  0x4d   : > { %3044 = vst.msk [vmem:[#allocation5 + $0x30] sm:$0xff] %vm452_vm2, %v14326_v3  ;;  %3045 = vst.msk [vmem:[#allocation5 + $0x38] sm:$0xff] %vm452_vm2, %v14326_v3 }
  0x4e   : > { %3047 = vst.msk [vmem:[#allocation5 + $0x48] sm:$0xff] %vm452_vm2, %v14326_v3  ;;  %3048 = vst.msk [vmem:[#allocation5 + $0x50] sm:$0xff] %vm452_vm2, %v14326_v3 }
  0x4f   : > { %3050 = vst.msk [vmem:[#allocation5 + $0x60] sm:$0xff] %vm452_vm2, %v14326_v3  ;;  %3051 = vst.msk [vmem:[#allocation5 + $0x68] sm:$0xff] %vm452_vm2, %v14326_v3 }
  0x50   : > { %3053 = vst.msk [vmem:[#allocation5 + $0x78] sm:$0xff] %vm452_vm2, %v14326_v3  ;;  %3054 = vst.msk [vmem:[#allocation5 + $0x80] sm:$0xff] %vm452_vm2, %v14326_v3 }
  0x51   : > { %3056 = vst.msk [vmem:[#allocation5 + $0x90] sm:$0xff] %vm452_vm2, %v14326_v3  ;;  %3057 = vst.msk [vmem:[#allocation5 + $0x98] sm:$0xff] %vm452_vm2, %v14326_v3 }
  0x52   : > { %3059 = vst.msk [vmem:[#allocation5 + $0xa8] sm:$0xff] %vm452_vm2, %v14326_v3  ;;  %3060 = vst.msk [vmem:[#allocation5 + $0xb0] sm:$0xff] %vm452_vm2, %v14326_v3 }
  0x53   : > { %3062 = vst.msk [vmem:[#allocation5 + $0xc0] sm:$0xff] %vm452_vm2, %v14326_v3  ;;  %3063 = vst.msk [vmem:[#allocation5 + $0xc8] sm:$0xff] %vm452_vm2, %v14326_v3  ;;  %9815 = vmatmul.mubr.msk.bf16.gmra.mxu0 %vm452_vm2, %v362_v50 }
  0x54   : > { %3065 = vst.msk [vmem:[#allocation5 + $0xd8] sm:$0xff] %vm452_vm2, %v14326_v3  ;;  %3066 = vst.msk [vmem:[#allocation5 + $0xe0] sm:$0xff] %vm452_vm2, %v14326_v3 }
  0x55   : > { %3068 = vst.msk [vmem:[#allocation5 + $0xf0] sm:$0xff] %vm452_vm2, %v14326_v3  ;;  %3069 = vst.msk [vmem:[#allocation5 + $0xf8] sm:$0xff] %vm452_vm2, %v14326_v3 }
  0x56   : > { %3071 = vst.msk [vmem:[#allocation5 + $0x108] sm:$0xff] %vm452_vm2, %v14326_v3  ;;  %3072 = vst.msk [vmem:[#allocation5 + $0x110] sm:$0xff] %vm452_vm2, %v14326_v3 }
  0x57   : > { %3074 = vst.msk [vmem:[#allocation5 + $0x120] sm:$0xff] %vm452_vm2, %v14326_v3  ;;  %3075 = vst.msk [vmem:[#allocation5 + $0x128] sm:$0xff] %vm452_vm2, %v14326_v3 }
  0x58   : > { %3077 = vst.msk [vmem:[#allocation5 + $0x138] sm:$0xff] %vm452_vm2, %v14326_v3  ;;  %3078 = vst.msk [vmem:[#allocation5 + $0x140] sm:$0xff] %vm452_vm2, %v14326_v3 }
  0x59   : > { %3080 = vst.msk [vmem:[#allocation5 + $0x150] sm:$0xff] %vm452_vm2, %v14326_v3  ;;  %3081 = vst.msk [vmem:[#allocation5 + $0x158] sm:$0xff] %vm452_vm2, %v14326_v3 }
  0x5a   : > { %3083 = vst.msk [vmem:[#allocation5 + $0x168] sm:$0xff] %vm452_vm2, %v14326_v3  ;;  %3084 = vst.msk [vmem:[#allocation5 + $0x170] sm:$0xff] %vm452_vm2, %v14326_v3 }
  0x5b   : > { %3086 = vst.msk [vmem:[#allocation5 + $0x180] sm:$0xff] %vm452_vm2, %v14326_v3  ;;  %3087 = vst.msk [vmem:[#allocation5 + $0x188] sm:$0xff] %vm452_vm2, %v14326_v3 }
  0x5c   : > { %3089 = vst.msk [vmem:[#allocation5 + $0x198] sm:$0xff] %vm452_vm2, %v14326_v3  ;;  %3090 = vst.msk [vmem:[#allocation5 + $0x1a0] sm:$0xff] %vm452_vm2, %v14326_v3 }
  0x5d   : > { %3092 = vst.msk [vmem:[#allocation5 + $0x1b0] sm:$0xff] %vm452_vm2, %v14326_v3  ;;  %3093 = vst.msk [vmem:[#allocation5 + $0x1b8] sm:$0xff] %vm452_vm2, %v14326_v3 }
  0x5e   : > { %3095 = vst.msk [vmem:[#allocation5 + $0x1c8] sm:$0xff] %vm452_vm2, %v14326_v3  ;;  %3096 = vst.msk [vmem:[#allocation5 + $0x1d0] sm:$0xff] %vm452_vm2, %v14326_v3 }
  0x5f   : > { %8518 = vst.msk [vmem:[#allocation2 + $0x19] sm:$0xff] %vm452_vm2, %v8485_v7  ;;  %8519 = vst.msk [vmem:[#allocation2 + $0x21] sm:$0xff] %vm452_vm2, %v8486_v8 }
  0x60   : > { %8520 = vst.msk [vmem:[#allocation2 + $0x31] sm:$0xff] %vm452_vm2, %v8487_v9  ;;  %8521 = vst.msk [vmem:[#allocation2 + $0x39] sm:$0xff] %vm452_vm2, %v8488_v10 }
  0x61   : > { %8522 = vst.msk [vmem:[#allocation2 + $0x49] sm:$0xff] %vm452_vm2, %v8489_v11  ;;  %8523 = vst.msk [vmem:[#allocation2 + $0x51] sm:$0xff] %vm452_vm2, %v8490_v13 }
  0x62   : > { %8524 = vst.msk [vmem:[#allocation2 + $0x61] sm:$0xff] %vm452_vm2, %v8491_v14  ;;  %8525 = vst.msk [vmem:[#allocation2 + $0x69] sm:$0xff] %vm452_vm2, %v8492_v15 }
  0x63   : > { %8526 = vst.msk [vmem:[#allocation2 + $0x79] sm:$0xff] %vm452_vm2, %v8493_v18  ;;  %8527 = vst.msk [vmem:[#allocation2 + $0x81] sm:$0xff] %vm452_vm2, %v8494_v19 }
  0x64   : > { %8528 = vst.msk [vmem:[#allocation2 + $0x91] sm:$0xff] %vm452_vm2, %v8495_v23  ;;  %8529 = vst.msk [vmem:[#allocation2 + $0x99] sm:$0xff] %vm452_vm2, %v8496_v24 }
  0x65   : > { %8530 = vst.msk [vmem:[#allocation2 + $0xa9] sm:$0xff] %vm452_vm2, %v8497_v25  ;;  %8531 = vst.msk [vmem:[#allocation2 + $0xb1] sm:$0xff] %vm452_vm2, %v8498_v30 }
  0x66   : > { %8532 = vst.msk [vmem:[#allocation2 + $0xc1] sm:$0xff] %vm452_vm2, %v8499_v31  ;;  %8533 = vst.msk [vmem:[#allocation2 + $0xc9] sm:$0xff] %vm452_vm2, %v8500_v32 }
  0x67   : > { %8534 = vst.msk [vmem:[#allocation2 + $0xd9] sm:$0xff] %vm452_vm2, %v8501_v34  ;;  %8535 = vst.msk [vmem:[#allocation2 + $0xe1] sm:$0xff] %vm452_vm2, %v8502_v35 }
  0x68   : > { %8536 = vst.msk [vmem:[#allocation2 + $0xf1] sm:$0xff] %vm452_vm2, %v8503_v36  ;;  %8537 = vst.msk [vmem:[#allocation2 + $0xf9] sm:$0xff] %vm452_vm2, %v8504_v37 }
  0x69   : > { %8538 = vst.msk [vmem:[#allocation2 + $0x109] sm:$0xff] %vm452_vm2, %v8505_v38  ;;  %8539 = vst.msk [vmem:[#allocation2 + $0x111] sm:$0xff] %vm452_vm2, %v8506_v39 }
  0x6a   : > { %8540 = vst.msk [vmem:[#allocation2 + $0x121] sm:$0xff] %vm452_vm2, %v8507_v40  ;;  %8541 = vst.msk [vmem:[#allocation2 + $0x129] sm:$0xff] %vm452_vm2, %v8508_v41 }
  0x6b   : > { %8542 = vst.msk [vmem:[#allocation2 + $0x139] sm:$0xff] %vm452_vm2, %v8509_v43  ;;  %8543 = vst.msk [vmem:[#allocation2 + $0x141] sm:$0xff] %vm452_vm2, %v8510_v44 }
  0x6c   : > { %8544 = vst.msk [vmem:[#allocation2 + $0x151] sm:$0xff] %vm452_vm2, %v8511_v47  ;;  %8545 = vst.msk [vmem:[#allocation2 + $0x159] sm:$0xff] %vm452_vm2, %v8512_v48 }
  0x6d   : > { %8546 = vst.msk [vmem:[#allocation2 + $0x169] sm:$0xff] %vm452_vm2, %v8513_v49  ;;  %8547 = vst.msk [vmem:[#allocation2 + $0x171] sm:$0xff] %vm452_vm2, %v8514_v51 }
  0x6e   : > { %8548 = vst.msk [vmem:[#allocation2 + $0x181] sm:$0xff] %vm452_vm2, %v8515_v52  ;;  %8549 = vst.msk [vmem:[#allocation2 + $0x189] sm:$0xff] %vm452_vm2, %v8516_v53 }
  0x6f   : > { %980 = vst.msk [vmem:[#allocation4 + $0x8] sm:$0xff] %vm452_vm2, %v948_v57  ;;  %979 = vst.msk [vmem:[#allocation4] sm:$0xff] %vm452_vm2, %v947_v58 }
  0xaa   : > { %v1076_v59 = vpop.permute.xlu0 %1075 }
  0xab   : > { %v1078_v56 = vpop.permute.xlu1 %1077  ;;  %1172 = vst.msk [vmem:[#allocation4] sm:$0xff] %vm1171_vm3, %v1076_v59 }
  0xac   : > { %1173 = vst.msk [vmem:[#allocation4 + $0x8] sm:$0xff] %vm1171_vm3, %v1078_v56 }
  0xae   : > { %v1269_v61 = vpop.permute.xlu0 %1268 }
  0xaf   : > { %v1271_v60 = vpop.permute.xlu1 %1270  ;;  %1365 = vst.msk [vmem:[#allocation4] sm:$0xff] %vm1364_vm4, %v1269_v61 }
  0xb0   : > { %1366 = vst.msk [vmem:[#allocation4 + $0x8] sm:$0xff] %vm1364_vm4, %v1271_v60 }
  0xdb   : > { %v9788_v63 = vpop.f32.mrf.mxu0 }
  0xdc   : > { %v548_v0 = vadd.f32 %v9788_v63, %v10605_v62 }
  0xdd   : > { %v539_v1 = vpop.f32.mrf.mxu0 }
  0xde   : > { %v10610_v2 = vmax.f32 %v548_v0, 0.0  ;;  %v540_v4 = vadd.f32 %v10605_v62, %v539_v1 }
  0xdf   : > { %v9789_v5 = vpop.f32.mrf.mxu0 }
  0xe0   : > { %701 = vst.msk [vmem:[%s10613_s22 + $0x10] sm:$0xff] %vm698_vm5, %v10610_v2  ;;  %v10618_v6 = vmax.f32 %v540_v4, 0.0  ;;  %v551_v7 = vadd.f32 %v9789_v5, %v10605_v62  ;;  %822 = vrot.lane.b32.xlu1 %v10610_v2, %s10116_s23 }
  0xe1   : > { %v542_v8 = vpop.f32.mrf.mxu0 }
  0xe2   : > { %699 = vst.msk [vmem:[%s10613_s22] sm:$0xff] %vm698_vm5, %v10618_v6  ;;  %v10626_v9 = vmax.f32 %v551_v7, 0.0  ;;  %v543_v10 = vadd.f32 %v10605_v62, %v542_v8  ;;  %818 = vrot.lane.b32.xlu0 %v10618_v6, %s10116_s23 }
  0xe3   : > { %v9792_v11 = vpop.f32.mrf.mxu0 }
  0xe4   : > { %702 = vst.msk [vmem:[%s10613_s22 + $0x18] sm:$0xff] %vm698_vm5, %v10626_v9  ;;  %v10634_v12 = vmax.f32 %v543_v10, 0.0  ;;  %824 = vrot.lane.b32.xlu1 %v10626_v9, %s10116_s23  ;;  %v564_v13 = vadd.f32 %v9792_v11, %v10605_v62 }
  0xe5   : > { %v555_v14 = vpop.f32.mrf.mxu0 }
  0xe6   : > { %700 = vst.msk [vmem:[%s10613_s22 + $0x8] sm:$0xff] %vm698_vm5, %v10634_v12  ;;  %820 = vrot.lane.b32.xlu0 %v10634_v12, %s10116_s23  ;;  %v10644_v15 = vmax.f32 %v564_v13, 0.0  ;;  %v556_v16 = vadd.f32 %v10605_v62, %v555_v14 }
  0xe7   : > { %v9793_v17 = vpop.f32.mrf.mxu0 }
  0xe8   : > { %705 = vst.msk [vmem:[%s10613_s22 + $0x30] sm:$0xff] %vm698_vm5, %v10644_v15  ;;  %v10650_v18 = vmax.f32 %v556_v16, 0.0  ;;  %v567_v19 = vadd.f32 %v9793_v17, %v10605_v62 }
  0xe9   : > { %v558_v20 = vpop.f32.mrf.mxu0 }
  0xea   : > { %703 = vst.msk [vmem:[%s10613_s22 + $0x20] sm:$0xff] %vm698_vm5, %v10650_v18  ;;  %v10656_v21 = vmax.f32 %v567_v19, 0.0  ;;  %v559_v22 = vadd.f32 %v10605_v62, %v558_v20  ;;  %830 = vrot.lane.b32.xlu0 %v10644_v15, %s10116_s23 }
  0xeb   : > { %v9796_v23 = vpop.f32.mrf.mxu0 }
  0xec   : > { %706 = vst.msk [vmem:[%s10613_s22 + $0x38] sm:$0xff] %vm698_vm5, %v10656_v21  ;;  %v10664_v24 = vmax.f32 %v559_v22, 0.0  ;;  %832 = vrot.lane.b32.xlu1 %v10656_v21, %s10116_s23  ;;  %v580_v25 = vadd.f32 %v9796_v23, %v10605_v62 }
  0xed   : > { %v571_v26 = vpop.f32.mrf.mxu0 }
  0xee   : > { %704 = vst.msk [vmem:[%s10613_s22 + $0x28] sm:$0xff] %vm698_vm5, %v10664_v24  ;;  %826 = vrot.lane.b32.xlu0 %v10650_v18, %s10116_s23  ;;  %v10674_v27 = vmax.f32 %v580_v25, 0.0  ;;  %v572_v28 = vadd.f32 %v10605_v62, %v571_v26 }
  0xef   : > { %v9797_v29 = vpop.f32.mrf.mxu0 }
  0xf0   : > { %14357 = vst [vmem:[#allocation10_spill] sm:$0xff] %v10674_v27  ;;  %828 = vrot.lane.b32.xlu1 %v10664_v24, %s10116_s23  ;;  %709 = vst.msk [vmem:[%s10613_s22 + $0x50] sm:$0xff] %vm698_vm5, %v10674_v27  ;;  %v10682_v30 = vmax.f32 %v572_v28, 0.0  ;;  %v583_v31 = vadd.f32 %v9797_v29, %v10605_v62 }
  0xf1   : > { %v574_v32 = vpop.f32.mrf.mxu0 }
  0xf2   : > { %14358 = vst [vmem:[#allocation11_spill] sm:$0xff] %v10682_v30  ;;  %707 = vst.msk [vmem:[%s10613_s22 + $0x40] sm:$0xff] %vm698_vm5, %v10682_v30  ;;  %v10688_v33 = vmax.f32 %v583_v31, 0.0  ;;  %v575_v34 = vadd.f32 %v10605_v62, %v574_v32  ;;  %838 = vrot.lane.b32.xlu0 %v10674_v27, %s10116_s23 }
  0xf3   : > { %v9800_v35 = vpop.f32.mrf.mxu0 }
  0xf4   : > { %14359 = vst [vmem:[#allocation12_spill] sm:$0xff] %v10688_v33  ;;  %710 = vst.msk [vmem:[%s10613_s22 + $0x58] sm:$0xff] %vm698_vm5, %v10688_v33  ;;  %v10696_v36 = vmax.f32 %v575_v34, 0.0  ;;  %v596_v37 = vadd.f32 %v9800_v35, %v10605_v62  ;;  %840 = vrot.lane.b32.xlu1 %v10688_v33, %s10116_s23 }
  0xf5   : > { %v587_v38 = vpop.f32.mrf.mxu0 }
  0xf6   : > { %14360 = vst [vmem:[#allocation13_spill] sm:$0xff] %v10696_v36  ;;  %708 = vst.msk [vmem:[%s10613_s22 + $0x48] sm:$0xff] %vm698_vm5, %v10696_v36  ;;  %v10704_v39 = vmax.f32 %v596_v37, 0.0  ;;  %v588_v40 = vadd.f32 %v10605_v62, %v587_v38  ;;  %834 = vrot.lane.b32.xlu0 %v10682_v30, %s10116_s23 }
  0xf7   : > { %v9801_v41 = vpop.f32.mrf.mxu0 }
  0xf8   : > { %14361 = vst [vmem:[#allocation14_spill] sm:$0xff] %v10704_v39  ;;  %713 = vst.msk [vmem:[%s10613_s22 + $0x70] sm:$0xff] %vm698_vm5, %v10704_v39  ;;  %v10712_v42 = vmax.f32 %v588_v40, 0.0  ;;  %v599_v43 = vadd.f32 %v9801_v41, %v10605_v62  ;;  %836 = vrot.lane.b32.xlu1 %v10696_v36, %s10116_s23 }
  0xf9   : > { %v590_v44 = vpop.f32.mrf.mxu0 }
  0xfa   : > { %14362 = vst [vmem:[#allocation15_spill] sm:$0xff] %v10712_v42  ;;  %711 = vst.msk [vmem:[%s10613_s22 + $0x60] sm:$0xff] %vm698_vm5, %v10712_v42  ;;  %v10720_v45 = vmax.f32 %v599_v43, 0.0  ;;  %v591_v46 = vadd.f32 %v10605_v62, %v590_v44  ;;  %846 = vrot.lane.b32.xlu0 %v10704_v39, %s10116_s23 }
  0xfb   : > { %v9804_v47 = vpop.f32.mrf.mxu0 }
  0xfc   : > { %14363 = vst [vmem:[#allocation16_spill] sm:$0xff] %v10720_v45  ;;  %714 = vst.msk [vmem:[%s10613_s22 + $0x78] sm:$0xff] %vm698_vm5, %v10720_v45  ;;  %v10728_v48 = vmax.f32 %v591_v46, 0.0  ;;  %v612_v49 = vadd.f32 %v9804_v47, %v10605_v62  ;;  %848 = vrot.lane.b32.xlu1 %v10720_v45, %s10116_s23 }
  0xfd   : > { %v603_v50 = vpop.f32.mrf.mxu0 }
  0xfe   : > { %14364 = vst [vmem:[#allocation17_spill] sm:$0xff] %v10728_v48  ;;  %712 = vst.msk [vmem:[%s10613_s22 + $0x68] sm:$0xff] %vm698_vm5, %v10728_v48  ;;  %v10736_v51 = vmax.f32 %v612_v49, 0.0  ;;  %v604_v52 = vadd.f32 %v10605_v62, %v603_v50  ;;  %842 = vrot.lane.b32.xlu0 %v10712_v42, %s10116_s23 }
  0xff   : > { %v9805_v53 = vpop.f32.mrf.mxu0 }
 0x100   : > { %14365 = vst [vmem:[#allocation18_spill] sm:$0xff] %v10736_v51  ;;  %717 = vst.msk [vmem:[%s10613_s22 + $0x90] sm:$0xff] %vm698_vm5, %v10736_v51  ;;  %v10744_v54 = vmax.f32 %v604_v52, 0.0  ;;  %v615_v55 = vadd.f32 %v9805_v53, %v10605_v62  ;;  %844 = vrot.lane.b32.xlu1 %v10728_v48, %s10116_s23 }
 0x101   : > { %v606_v56 = vpop.f32.mrf.mxu0 }
 0x102   : > { %14366 = vst [vmem:[#allocation19_spill] sm:$0xff] %v10744_v54  ;;  %715 = vst.msk [vmem:[%s10613_s22 + $0x80] sm:$0xff] %vm698_vm5, %v10744_v54  ;;  %v10752_v57 = vmax.f32 %v615_v55, 0.0  ;;  %v607_v58 = vadd.f32 %v10605_v62, %v606_v56  ;;  %854 = vrot.lane.b32.xlu0 %v10736_v51, %s10116_s23 }
 0x103   : > { %v9808_v59 = vpop.f32.mrf.mxu0 }
 0x104   : > { %14367 = vst [vmem:[#allocation20_spill] sm:$0xff] %v10752_v57  ;;  %718 = vst.msk [vmem:[%s10613_s22 + $0x98] sm:$0xff] %vm698_vm5, %v10752_v57  ;;  %v10760_v60 = vmax.f32 %v607_v58, 0.0  ;;  %v628_v61 = vadd.f32 %v9808_v59, %v10605_v62  ;;  %856 = vrot.lane.b32.xlu1 %v10752_v57, %s10116_s23 }
 0x105   : > { %v619_v63 = vpop.f32.mrf.mxu0 }
 0x106   : > { %14368 = vst [vmem:[#allocation21_spill] sm:$0xff] %v10760_v60  ;;  %716 = vst.msk [vmem:[%s10613_s22 + $0x88] sm:$0xff] %vm698_vm5, %v10760_v60  ;;  %v10768_v0 = vmax.f32 %v628_v61, 0.0  ;;  %v620_v1 = vadd.f32 %v10605_v62, %v619_v63  ;;  %850 = vrot.lane.b32.xlu0 %v10744_v54, %s10116_s23 }
 0x107   : > { %v9809_v4 = vpop.f32.mrf.mxu0 }
 0x108   : > { %14369 = vst [vmem:[#allocation22_spill] sm:$0xff] %v10768_v0  ;;  %721 = vst.msk [vmem:[%s10613_s22 + $0xb0] sm:$0xff] %vm698_vm5, %v10768_v0  ;;  %v10776_v5 = vmax.f32 %v620_v1, 0.0  ;;  %v631_v7 = vadd.f32 %v9809_v4, %v10605_v62  ;;  %852 = vrot.lane.b32.xlu1 %v10760_v60, %s10116_s23 }
 0x109   : > { %v622_v8 = vpop.f32.mrf.mxu0 }
 0x10a   : > { %14370 = vst [vmem:[#allocation23_spill] sm:$0xff] %v10776_v5  ;;  %719 = vst.msk [vmem:[%s10613_s22 + $0xa0] sm:$0xff] %vm698_vm5, %v10776_v5  ;;  %v10784_v10 = vmax.f32 %v631_v7, 0.0  ;;  %v623_v11 = vadd.f32 %v10605_v62, %v622_v8  ;;  %862 = vrot.lane.b32.xlu0 %v10768_v0, %s10116_s23 }
 0x10b   : > { %v9812_v13 = vpop.f32.mrf.mxu0 }
 0x10c   : > { %14371 = vst [vmem:[#allocation24_spill] sm:$0xff] %v10784_v10  ;;  %722 = vst.msk [vmem:[%s10613_s22 + $0xb8] sm:$0xff] %vm698_vm5, %v10784_v10  ;;  %v10792_v14 = vmax.f32 %v623_v11, 0.0  ;;  %v644_v16 = vadd.f32 %v9812_v13, %v10605_v62  ;;  %864 = vrot.lane.b32.xlu1 %v10784_v10, %s10116_s23 }
 0x10d   : > { %v635_v17 = vpop.f32.mrf.mxu0 }
 0x10e   : > { %14372 = vst [vmem:[#allocation25_spill] sm:$0xff] %v10792_v14  ;;  %720 = vst.msk [vmem:[%s10613_s22 + $0xa8] sm:$0xff] %vm698_vm5, %v10792_v14  ;;  %v10800_v19 = vmax.f32 %v644_v16, 0.0  ;;  %v636_v20 = vadd.f32 %v10605_v62, %v635_v17  ;;  %858 = vrot.lane.b32.xlu0 %v10776_v5, %s10116_s23 }
 0x10f   : > { %v9813_v22 = vpop.f32.mrf.mxu0 }
 0x110   : > { %14373 = vst [vmem:[#allocation26_spill] sm:$0xff] %v10800_v19  ;;  %725 = vst.msk [vmem:[%s10613_s22 + $0xd0] sm:$0xff] %vm698_vm5, %v10800_v19  ;;  %v10808_v23 = vmax.f32 %v636_v20, 0.0  ;;  %v647_v25 = vadd.f32 %v9813_v22, %v10605_v62  ;;  %860 = vrot.lane.b32.xlu1 %v10792_v14, %s10116_s23 }
 0x111   : > { %v638_v26 = vpop.f32.mrf.mxu0 }
 0x112   : > { %14374 = vst [vmem:[#allocation27_spill] sm:$0xff] %v10808_v23  ;;  %723 = vst.msk [vmem:[%s10613_s22 + $0xc0] sm:$0xff] %vm698_vm5, %v10808_v23  ;;  %v10816_v28 = vmax.f32 %v647_v25, 0.0  ;;  %v639_v29 = vadd.f32 %v10605_v62, %v638_v26  ;;  %870 = vrot.lane.b32.xlu0 %v10800_v19, %s10116_s23 }
 0x113   : > { %v9816_v31 = vpop.f32.mrf.mxu0 }
 0x114   : > { %14375 = vst [vmem:[#allocation28_spill] sm:$0xff] %v10816_v28  ;;  %726 = vst.msk [vmem:[%s10613_s22 + $0xd8] sm:$0xff] %vm698_vm5, %v10816_v28  ;;  %v10824_v32 = vmax.f32 %v639_v29, 0.0  ;;  %v660_v34 = vadd.f32 %v9816_v31, %v10605_v62  ;;  %872 = vrot.lane.b32.xlu1 %v10816_v28, %s10116_s23 }
 0x115   : > { %v651_v35 = vpop.f32.mrf.mxu0 }
 0x116   : > { %14376 = vst [vmem:[#allocation29_spill] sm:$0xff] %v10824_v32  ;;  %724 = vst.msk [vmem:[%s10613_s22 + $0xc8] sm:$0xff] %vm698_vm5, %v10824_v32  ;;  %v10832_v37 = vmax.f32 %v660_v34, 0.0  ;;  %v652_v38 = vadd.f32 %v10605_v62, %v651_v35  ;;  %866 = vrot.lane.b32.xlu0 %v10808_v23, %s10116_s23 }
 0x117   : > { %v9817_v40 = vpop.f32.mrf.mxu0 }
 0x118   : > { %14377 = vst [vmem:[#allocation30_spill] sm:$0xff] %v10832_v37  ;;  %729 = vst.msk [vmem:[%s10613_s22 + $0xf0] sm:$0xff] %vm698_vm5, %v10832_v37  ;;  %v10840_v41 = vmax.f32 %v652_v38, 0.0  ;;  %v663_v43 = vadd.f32 %v9817_v40, %v10605_v62  ;;  %868 = vrot.lane.b32.xlu1 %v10824_v32, %s10116_s23 }
 0x119   : > { %v654_v44 = vpop.f32.mrf.mxu0 }
 0x11a   : > { %14378 = vst [vmem:[#allocation31_spill] sm:$0xff] %v10840_v41  ;;  %727 = vst.msk [vmem:[%s10613_s22 + $0xe0] sm:$0xff] %vm698_vm5, %v10840_v41  ;;  %v10848_v46 = vmax.f32 %v663_v43, 0.0  ;;  %v655_v47 = vadd.f32 %v10605_v62, %v654_v44  ;;  %878 = vrot.lane.b32.xlu0 %v10832_v37, %s10116_s23 }
 0x11c   : > { %14379 = vst [vmem:[#allocation32_spill] sm:$0xff] %v10848_v46  ;;  %730 = vst.msk [vmem:[%s10613_s22 + $0xf8] sm:$0xff] %vm698_vm5, %v10848_v46  ;;  %v10856_v49 = vmax.f32 %v655_v47, 0.0  ;;  %880 = vrot.lane.b32.xlu1 %v10848_v46, %s10116_s23 }
 0x11e   : > { %14380 = vst [vmem:[#allocation33_spill] sm:$0xff] %v10856_v49  ;;  %728 = vst.msk [vmem:[%s10613_s22 + $0xe8] sm:$0xff] %vm698_vm5, %v10856_v49  ;;  %874 = vrot.lane.b32.xlu0 %v10840_v41, %s10116_s23  ;;  %vm5760_vm5 = vcmask 458144  }
 0x120   : > { %876 = vrot.lane.b32.xlu1 %v10856_v49, %s10116_s23  ;;  %s10131_s23 = smov 64  }
 0x152   : > { %v823_v62 = vpop.permute.xlu1 %822 }
 0x153   : > { %917 = vst.msk [vmem:[#allocation3 + $0x31] sm:$0xff] %vm452_vm2, %v823_v62 }
 0x154   : > { %v819_v50 = vpop.permute.xlu0 %818 }
 0x155   : > { %915 = vst.msk [vmem:[#allocation3 + $0x19] sm:$0xff] %vm452_vm2, %v819_v50 }
 0x156   : > { %v825_v52 = vpop.permute.xlu1 %824 }
 0x157   : > { %918 = vst.msk [vmem:[#allocation3 + $0x39] sm:$0xff] %vm452_vm2, %v825_v52 }
 0x158   : > { %v821_v53 = vpop.permute.xlu0 %820 }
 0x159   : > { %916 = vst.msk [vmem:[#allocation3 + $0x21] sm:$0xff] %vm452_vm2, %v821_v53 }
 0x15a   : > { %v1015_v55 = vld [vmem:[#allocation3 + $0x31] sm:$0xff] }
 0x15b   : > { %v1399_v56 = vld [vmem:[#allocation3 + $0x30] sm:$0xff]  ;;  %1083 = vrot.lane.b32.xlu0 %v1015_v55, %s10114_s28 }
 0x15c   : > { %983 = vst.msk [vmem:[#allocation4 + $0x20] sm:$0xff] %vm452_vm2, %v1399_v56  ;;  %v1397_v58 = vld [vmem:[#allocation3 + $0x18] sm:$0xff]  ;;  %v831_v59 = vpop.permute.xlu0 %830 }
 0x15d   : > { %921 = vst.msk [vmem:[#allocation3 + $0x61] sm:$0xff] %vm452_vm2, %v831_v59  ;;  %981 = vst.msk [vmem:[#allocation4 + $0x10] sm:$0xff] %vm452_vm2, %v1397_v58  ;;  %v1013_v26 = vld [vmem:[#allocation3 + $0x19] sm:$0xff] }
 0x15e   : > { %v1016_v61 = vld [vmem:[#allocation3 + $0x39] sm:$0xff]  ;;  %v833_v1 = vpop.permute.xlu1 %832 }
 0x15f   : > { %v1400_v63 = vld [vmem:[#allocation3 + $0x38] sm:$0xff]  ;;  %1085 = vrot.lane.b32.xlu1 %v1016_v61, %s10114_s28  ;;  %1465 = vrot.lane.b32.xlu0 %v1399_v56, %s10117_s24  ;;  %922 = vst.msk [vmem:[#allocation3 + $0x69] sm:$0xff] %vm452_vm2, %v833_v1 }
 0x160   : > { %984 = vst.msk [vmem:[#allocation4 + $0x28] sm:$0xff] %vm452_vm2, %v1400_v63  ;;  %v827_v4 = vpop.permute.xlu0 %826  ;;  %v10880_v7 = vld [vmem:[#allocation3 + $0x20] sm:$0xff]  ;;  %v1208_v53 = vld [vmem:[#allocation3 + $0x32] sm:$0xff] }
 0x161   : > { %919 = vst.msk [vmem:[#allocation3 + $0x49] sm:$0xff] %vm452_vm2, %v827_v4  ;;  %v1209_v8 = vld [vmem:[#allocation3 + $0x3a] sm:$0xff]  ;;  %982 = vst.msk [vmem:[#allocation4 + $0x18] sm:$0xff] %vm452_vm2, %v10880_v7 }
 0x162   : > { %v829_v11 = vpop.permute.xlu1 %828 }
 0x163   : > { %1278 = vrot.lane.b32.xlu1 %v1209_v8, %s10115_s29  ;;  %1658 = vrot.lane.b32.xlu0 %v1015_v55, %s10118_s25  ;;  %920 = vst.msk [vmem:[#allocation3 + $0x51] sm:$0xff] %vm452_vm2, %v829_v11  ;;  %v1014_v55 = vld [vmem:[#allocation3 + $0x21] sm:$0xff] }
 0x164   : > { %v10887_v13 = vld [vmem:[#allocation3 + $0x60] sm:$0xff]  ;;  %v839_v16 = vpop.permute.xlu0 %838 }
 0x165   : > { %925 = vst.msk [vmem:[#allocation3 + $0x91] sm:$0xff] %vm452_vm2, %v839_v16  ;;  %987 = vst.msk [vmem:[#allocation4 + $0x40] sm:$0xff] %vm452_vm2, %v10887_v13  ;;  %v1206_v16 = vld [vmem:[#allocation3 + $0x1a] sm:$0xff] }
 0x166   : > { %v10892_v17 = vld [vmem:[#allocation3 + $0x68] sm:$0xff]  ;;  %v841_v20 = vpop.permute.xlu1 %840 }
 0x167   : > { %1467 = vrot.lane.b32.xlu1 %v1400_v63, %s10117_s24  ;;  %2041 = vrot.lane.b32.xlu0 %v1399_v56, %s14353_s26  ;;  %926 = vst.msk [vmem:[#allocation3 + $0x99] sm:$0xff] %vm452_vm2, %v841_v20  ;;  %988 = vst.msk [vmem:[#allocation4 + $0x48] sm:$0xff] %vm452_vm2, %v10892_v17 }
 0x168   : > { %v10899_v22 = vld [vmem:[#allocation3 + $0x48] sm:$0xff]  ;;  %v835_v25 = vpop.permute.xlu0 %834 }
 0x169   : > { %923 = vst.msk [vmem:[#allocation3 + $0x79] sm:$0xff] %vm452_vm2, %v835_v25  ;;  %985 = vst.msk [vmem:[#allocation4 + $0x30] sm:$0xff] %vm452_vm2, %v10899_v22 }
 0x16a   : > { %v837_v29 = vpop.permute.xlu1 %836  ;;  %v10904_v31 = vld [vmem:[#allocation3 + $0x50] sm:$0xff] }
 0x16b   : > { %1660 = vrot.lane.b32.xlu1 %v1016_v61, %s10118_s25  ;;  %1079 = vrot.lane.b32.xlu0 %v1013_v26, %s10114_s28  ;;  %924 = vst.msk [vmem:[#allocation3 + $0x81] sm:$0xff] %vm452_vm2, %v837_v29  ;;  %986 = vst.msk [vmem:[#allocation4 + $0x38] sm:$0xff] %vm452_vm2, %v10904_v31 }
 0x16c   : > { %v847_v34 = vpop.permute.xlu0 %846  ;;  %v10911_v35 = vld [vmem:[#allocation3 + $0x90] sm:$0xff] }
 0x16d   : > { %929 = vst.msk [vmem:[#allocation3 + $0xc1] sm:$0xff] %vm452_vm2, %v847_v34  ;;  %991 = vst.msk [vmem:[#allocation4 + $0x60] sm:$0xff] %vm452_vm2, %v10911_v35 }
 0x16e   : > { %v849_v38 = vpop.permute.xlu1 %848  ;;  %v10916_v40 = vld [vmem:[#allocation3 + $0x98] sm:$0xff] }
 0x16f   : > { %1853 = vrot.lane.b32.xlu1 %v1209_v8, %s10120_s27  ;;  %1461 = vrot.lane.b32.xlu0 %v1397_v58, %s10117_s24  ;;  %930 = vst.msk [vmem:[#allocation3 + $0xc9] sm:$0xff] %vm452_vm2, %v849_v38  ;;  %992 = vst.msk [vmem:[#allocation4 + $0x68] sm:$0xff] %vm452_vm2, %v10916_v40 }
 0x170   : > { %v843_v43 = vpop.permute.xlu0 %842  ;;  %v10923_v44 = vld [vmem:[#allocation3 + $0x78] sm:$0xff] }
 0x171   : > { %927 = vst.msk [vmem:[#allocation3 + $0xa9] sm:$0xff] %vm452_vm2, %v843_v43  ;;  %989 = vst.msk [vmem:[#allocation4 + $0x50] sm:$0xff] %vm452_vm2, %v10923_v44 }
 0x172   : > { %v845_v47 = vpop.permute.xlu1 %844  ;;  %v10928_v62 = vld [vmem:[#allocation3 + $0x80] sm:$0xff] }
 0x173   : > { %2043 = vrot.lane.b32.xlu1 %v1400_v63, %s14353_s26  ;;  %1654 = vrot.lane.b32.xlu0 %v1013_v26, %s10118_s25  ;;  %928 = vst.msk [vmem:[#allocation3 + $0xb1] sm:$0xff] %vm452_vm2, %v845_v47  ;;  %990 = vst.msk [vmem:[#allocation4 + $0x58] sm:$0xff] %vm452_vm2, %v10928_v62  ;;  %v1207_v63 = vld [vmem:[#allocation3 + $0x22] sm:$0xff] }
 0x174   : > { %v855_v50 = vpop.permute.xlu0 %854  ;;  %v10935_v52 = vld [vmem:[#allocation3 + $0xc0] sm:$0xff] }
 0x175   : > { %933 = vst.msk [vmem:[#allocation3 + $0xf1] sm:$0xff] %vm452_vm2, %v855_v50  ;;  %995 = vst.msk [vmem:[#allocation4 + $0x80] sm:$0xff] %vm452_vm2, %v10935_v52 }
 0x176   : > { %v857_v56 = vpop.permute.xlu1 %856  ;;  %v10940_v58 = vld [vmem:[#allocation3 + $0xc8] sm:$0xff] }
 0x177   : > { %1276 = vrot.lane.b32.xlu0 %v1208_v53, %s10115_s29  ;;  %1081 = vrot.lane.b32.xlu1 %v1014_v55, %s10114_s28  ;;  %934 = vst.msk [vmem:[#allocation3 + $0xf9] sm:$0xff] %vm452_vm2, %v857_v56  ;;  %996 = vst.msk [vmem:[#allocation4 + $0x88] sm:$0xff] %vm452_vm2, %v10940_v58  ;;  %v1028_v49 = vld [vmem:[#allocation3 + $0xc9] sm:$0xff] }
 0x178   : > { %v851_v59 = vpop.permute.xlu0 %850  ;;  %v10947_v61 = vld [vmem:[#allocation3 + $0xa8] sm:$0xff] }
 0x179   : > { %931 = vst.msk [vmem:[#allocation3 + $0xd9] sm:$0xff] %vm452_vm2, %v851_v59  ;;  %993 = vst.msk [vmem:[#allocation4 + $0x70] sm:$0xff] %vm452_vm2, %v10947_v61  ;;  %v1020_v59 = vld [vmem:[#allocation3 + $0x69] sm:$0xff] }
 0x17a   : > { %v853_v1 = vpop.permute.xlu1 %852  ;;  %v10952_v4 = vld [vmem:[#allocation3 + $0xb0] sm:$0xff] }
 0x17b   : > { %1851 = vrot.lane.b32.xlu0 %v1208_v53, %s10120_s27  ;;  %1274 = vrot.lane.b32.xlu1 %v1207_v63, %s10115_s29  ;;  %932 = vst.msk [vmem:[#allocation3 + $0xe1] sm:$0xff] %vm452_vm2, %v853_v1  ;;  %994 = vst.msk [vmem:[#allocation4 + $0x78] sm:$0xff] %vm452_vm2, %v10952_v4 }
 0x17c   : > { %v863_v8 = vpop.permute.xlu0 %862  ;;  %v10959_v11 = vld [vmem:[#allocation3 + $0xf0] sm:$0xff] }
 0x17d   : > { %937 = vst.msk [vmem:[#allocation3 + $0x121] sm:$0xff] %vm452_vm2, %v863_v8  ;;  %999 = vst.msk [vmem:[#allocation4 + $0xa0] sm:$0xff] %vm452_vm2, %v10959_v11 }
 0x17e   : > { %v865_v20 = vpop.permute.xlu1 %864  ;;  %v10964_v25 = vld [vmem:[#allocation3 + $0xf8] sm:$0xff] }
 0x17f   : > { %1272 = vrot.lane.b32.xlu0 %v1206_v16, %s10115_s29  ;;  %1463 = vrot.lane.b32.xlu1 %v10880_v7, %s10117_s24  ;;  %938 = vst.msk [vmem:[#allocation3 + $0x129] sm:$0xff] %vm452_vm2, %v865_v20  ;;  %1000 = vst.msk [vmem:[#allocation4 + $0xa8] sm:$0xff] %vm452_vm2, %v10964_v25  ;;  %v1019_v7 = vld [vmem:[#allocation3 + $0x61] sm:$0xff]  ;;  %v1213_v20 = vld [vmem:[#allocation3 + $0x6a] sm:$0xff] }
 0x180   : > { %v859_v26 = vpop.permute.xlu0 %858  ;;  %v10972_v29 = vld [vmem:[#allocation3 + $0xd8] sm:$0xff] }
 0x181   : > { %935 = vst.msk [vmem:[#allocation3 + $0x109] sm:$0xff] %vm452_vm2, %v859_v26  ;;  %997 = vst.msk [vmem:[#allocation4 + $0x90] sm:$0xff] %vm452_vm2, %v10972_v29 }
 0x182   : > { %v861_v34 = vpop.permute.xlu1 %860  ;;  %v10977_v38 = vld [vmem:[#allocation3 + $0xe0] sm:$0xff] }
 0x183   : > { %1847 = vrot.lane.b32.xlu0 %v1206_v16, %s10120_s27  ;;  %1656 = vrot.lane.b32.xlu1 %v1014_v55, %s10118_s25  ;;  %936 = vst.msk [vmem:[#allocation3 + $0x111] sm:$0xff] %vm452_vm2, %v861_v34  ;;  %998 = vst.msk [vmem:[#allocation4 + $0x98] sm:$0xff] %vm452_vm2, %v10977_v38 }
 0x184   : > { %v871_v43 = vpop.permute.xlu0 %870  ;;  %v10984_v47 = vld [vmem:[#allocation3 + $0x120] sm:$0xff] }
 0x185   : > { %941 = vst.msk [vmem:[#allocation3 + $0x151] sm:$0xff] %vm452_vm2, %v871_v43  ;;  %1003 = vst.msk [vmem:[#allocation4 + $0xc0] sm:$0xff] %vm452_vm2, %v10984_v47 }
 0x186   : > { %v873_v50 = vpop.permute.xlu1 %872  ;;  %v10989_v53 = vld [vmem:[#allocation3 + $0x128] sm:$0xff] }
 0x187   : > { %1849 = vrot.lane.b32.xlu1 %v1207_v63, %s10120_s27  ;;  %1091 = vrot.lane.b32.xlu0 %v1019_v7, %s10114_s28  ;;  %942 = vst.msk [vmem:[#allocation3 + $0x159] sm:$0xff] %vm452_vm2, %v873_v50  ;;  %1004 = vst.msk [vmem:[#allocation4 + $0xc8] sm:$0xff] %vm452_vm2, %v10989_v53  ;;  %v1228_v32 = vld [vmem:[#allocation3 + $0x122] sm:$0xff] }
 0x188   : > { %v867_v55 = vpop.permute.xlu0 %866  ;;  %v10996_v56 = vld [vmem:[#allocation3 + $0x108] sm:$0xff] }
 0x189   : > { %939 = vst.msk [vmem:[#allocation3 + $0x139] sm:$0xff] %vm452_vm2, %v867_v55  ;;  %1001 = vst.msk [vmem:[#allocation4 + $0xb0] sm:$0xff] %vm452_vm2, %v10996_v56 }
 0x18a   : > { %v869_v1 = vpop.permute.xlu1 %868  ;;  %v11001_v8 = vld [vmem:[#allocation3 + $0x110] sm:$0xff] }
 0x18b   : > { %1093 = vrot.lane.b32.xlu1 %v1020_v59, %s10114_s28  ;;  %1473 = vrot.lane.b32.xlu0 %v10887_v13, %s10117_s24  ;;  %940 = vst.msk [vmem:[#allocation3 + $0x141] sm:$0xff] %vm452_vm2, %v869_v1  ;;  %1002 = vst.msk [vmem:[#allocation4 + $0xb8] sm:$0xff] %vm452_vm2, %v11001_v8 }
 0x18c   : > { %v879_v63 = vpop.permute.xlu0 %878  ;;  %v11009_v16 = vld [vmem:[#allocation3 + $0x150] sm:$0xff] }
 0x18d   : > { %945 = vst.msk [vmem:[#allocation3 + $0x181] sm:$0xff] %vm452_vm2, %v879_v63  ;;  %1007 = vst.msk [vmem:[#allocation4 + $0xe0] sm:$0xff] %vm452_vm2, %v11009_v16 }
 0x18e   : > { %v881_v26 = vpop.permute.xlu1 %880  ;;  %v11014_v34 = vld [vmem:[#allocation3 + $0x158] sm:$0xff] }
 0x18f   : > { %1286 = vrot.lane.b32.xlu1 %v1213_v20, %s10115_s29  ;;  %1666 = vrot.lane.b32.xlu0 %v1019_v7, %s10118_s25  ;;  %946 = vst.msk [vmem:[#allocation3 + $0x189] sm:$0xff] %vm452_vm2, %v881_v26  ;;  %1008 = vst.msk [vmem:[#allocation4 + $0xe8] sm:$0xff] %vm452_vm2, %v11014_v34  ;;  %v1017_v7 = vld [vmem:[#allocation3 + $0x49] sm:$0xff]  ;;  %v11296_v5 = vld [vmem:[#allocation3 + $0x152] sm:$0xff] }
 0x190   : > { %v875_v43 = vpop.permute.xlu0 %874  ;;  %v11021_v50 = vld [vmem:[#allocation3 + $0x138] sm:$0xff] }
 0x191   : > { %943 = vst.msk [vmem:[#allocation3 + $0x169] sm:$0xff] %vm452_vm2, %v875_v43  ;;  %1005 = vst.msk [vmem:[#allocation4 + $0xd0] sm:$0xff] %vm452_vm2, %v11021_v50  ;;  %v1212_v43 = vld [vmem:[#allocation3 + $0x62] sm:$0xff] }
 0x192   : > { %v877_v55 = vpop.permute.xlu1 %876  ;;  %v11026_v1 = vld [vmem:[#allocation3 + $0x140] sm:$0xff] }
 0x193   : > { %1475 = vrot.lane.b32.xlu1 %v10892_v17, %s10117_s24  ;;  %2049 = vrot.lane.b32.xlu0 %v10887_v13, %s14353_s26  ;;  %944 = vst.msk [vmem:[#allocation3 + $0x171] sm:$0xff] %vm452_vm2, %v877_v55  ;;  %1006 = vst.msk [vmem:[#allocation4 + $0xd8] sm:$0xff] %vm452_vm2, %v11026_v1  ;;  %v1018_v13 = vld [vmem:[#allocation3 + $0x51] sm:$0xff]  ;;  %v1217_v55 = vld [vmem:[#allocation3 + $0x9a] sm:$0xff] }
 0x194   : > { %v11294_v14 = vld [vmem:[#allocation3 + $0x141] sm:$0xff] }
 0x196   : > { %v11347_v51 = vld [vmem:[#allocation3 + $0x189] sm:$0xff] }
 0x197   : > { %1668 = vrot.lane.b32.xlu1 %v1020_v59, %s10118_s25  ;;  %1087 = vrot.lane.b32.xlu0 %v1017_v7, %s10114_s28  ;;  %v1211_v59 = vld [vmem:[#allocation3 + $0x52] sm:$0xff]  ;;  %v11356_v45 = vld [vmem:[#allocation3 + $0x18a] sm:$0xff]  ;;  %v11373_v27 = vld [vmem:[#allocation3 + $0x182] sm:$0xff] }
 0x198   : > { %v11037_v63 = vld [vmem:[#allocation3 + $0x168] sm:$0xff] }
 0x199   : > { %1009 = vst.msk [vmem:[#allocation4 + $0xf0] sm:$0xff] %vm452_vm2, %v11037_v63  ;;  %v11349_v60 = vld [vmem:[#allocation3 + $0x169] sm:$0xff] }
 0x19a   : > { %v11041_v26 = vld [vmem:[#allocation3 + $0x170] sm:$0xff] }
 0x19b   : > { %1861 = vrot.lane.b32.xlu1 %v1213_v20, %s10120_s27  ;;  %1469 = vrot.lane.b32.xlu0 %v10899_v22, %s10117_s24  ;;  %1010 = vst.msk [vmem:[#allocation4 + $0xf8] sm:$0xff] %vm452_vm2, %v11041_v26  ;;  %v1024_v20 = vld [vmem:[#allocation3 + $0x99] sm:$0xff]  ;;  %v11363_v48 = vld [vmem:[#allocation3 + $0x171] sm:$0xff] }
 0x19c   : > { %v11371_v33 = vld [vmem:[#allocation3 + $0x172] sm:$0xff]  ;;  %v11380_v30 = vld [vmem:[#allocation3 + $0x16a] sm:$0xff] }
 0x19f   : > { %2051 = vrot.lane.b32.xlu1 %v10892_v17, %s14353_s26  ;;  %1662 = vrot.lane.b32.xlu0 %v1017_v7, %s10118_s25  ;;  %v1210_v17 = vld [vmem:[#allocation3 + $0x4a] sm:$0xff]  ;;  %v1021_v7 = vld [vmem:[#allocation3 + $0x79] sm:$0xff] }
 0x1a3   : > { %1089 = vrot.lane.b32.xlu1 %v1018_v13, %s10114_s28  ;;  %2045 = vrot.lane.b32.xlu0 %v10899_v22, %s14353_s26  ;;  %v1023_v22 = vld [vmem:[#allocation3 + $0x91] sm:$0xff] }
 0x1a7   : > { %1282 = vrot.lane.b32.xlu1 %v1211_v59, %s10115_s29  ;;  %1284 = vrot.lane.b32.xlu0 %v1212_v43, %s10115_s29 }
 0x1ab   : > { %1471 = vrot.lane.b32.xlu1 %v10904_v31, %s10117_s24  ;;  %1859 = vrot.lane.b32.xlu0 %v1212_v43, %s10120_s27 }
 0x1af   : > { %1664 = vrot.lane.b32.xlu1 %v1018_v13, %s10118_s25  ;;  %1280 = vrot.lane.b32.xlu0 %v1210_v17, %s10115_s29  ;;  %v1022_v13 = vld [vmem:[#allocation3 + $0x81] sm:$0xff] }
 0x1b3   : > { %1857 = vrot.lane.b32.xlu1 %v1211_v59, %s10120_s27  ;;  %1855 = vrot.lane.b32.xlu0 %v1210_v17, %s10120_s27  ;;  %v1216_v59 = vld [vmem:[#allocation3 + $0x92] sm:$0xff] }
 0x1b7   : > { %2047 = vrot.lane.b32.xlu1 %v10904_v31, %s14353_s26  ;;  %1099 = vrot.lane.b32.xlu0 %v1023_v22, %s10114_s28 }
 0x1bb   : > { %1101 = vrot.lane.b32.xlu1 %v1024_v20, %s10114_s28  ;;  %1481 = vrot.lane.b32.xlu0 %v10911_v35, %s10117_s24 }
 0x1bf   : > { %1294 = vrot.lane.b32.xlu1 %v1217_v55, %s10115_s29  ;;  %1674 = vrot.lane.b32.xlu0 %v1023_v22, %s10118_s25  ;;  %v1215_v22 = vld [vmem:[#allocation3 + $0x82] sm:$0xff] }
 0x1c3   : > { %1483 = vrot.lane.b32.xlu1 %v10916_v40, %s10117_s24  ;;  %1095 = vrot.lane.b32.xlu0 %v1021_v7, %s10114_s28 }
 0x1c7   : > { %1676 = vrot.lane.b32.xlu1 %v1024_v20, %s10118_s25  ;;  %1477 = vrot.lane.b32.xlu0 %v10923_v44, %s10117_s24 }
 0x1cb   : > { %1869 = vrot.lane.b32.xlu1 %v1217_v55, %s10120_s27  ;;  %1670 = vrot.lane.b32.xlu0 %v1021_v7, %s10118_s25  ;;  %v1214_v7 = vld [vmem:[#allocation3 + $0x7a] sm:$0xff] }
 0x1cd   : > { %v1084_v31 = vpop.permute.xlu0 %1083 }
 0x1ce   : > { %1176 = vst.msk [vmem:[#allocation4 + $0x20] sm:$0xff] %vm1171_vm3, %v1084_v31 }
 0x1cf   : > { %1097 = vrot.lane.b32.xlu1 %v1022_v13, %s10114_s28  ;;  %1292 = vrot.lane.b32.xlu0 %v1216_v59, %s10115_s29 }
 0x1d1   : > { %v1086_v43 = vpop.permute.xlu1 %1085  ;;  %v1466_v17 = vpop.permute.xlu0 %1465 }
 0x1d2   : > { %1177 = vst.msk [vmem:[#allocation4 + $0x28] sm:$0xff] %vm1171_vm3, %v1086_v43 }
 0x1d3   : > { %1290 = vrot.lane.b32.xlu1 %v1215_v22, %s10115_s29  ;;  %1867 = vrot.lane.b32.xlu0 %v1216_v59, %s10120_s27  ;;  %v1027_v59 = vld [vmem:[#allocation3 + $0xc1] sm:$0xff] }
 0x1d5   : > { %v1279_v20 = vpop.permute.xlu1 %1278  ;;  %v1659_v55 = vpop.permute.xlu0 %1658 }
 0x1d6   : > { %1370 = vst.msk [vmem:[#allocation4 + $0x28] sm:$0xff] %vm1364_vm4, %v1279_v20 }
 0x1d7   : > { %1479 = vrot.lane.b32.xlu1 %v10928_v62, %s10117_s24  ;;  %1288 = vrot.lane.b32.xlu0 %v1214_v7, %s10115_s29 }
 0x1d9   : > { %v1468_v31 = vpop.permute.xlu1 %1467  ;;  %v2042_v3 = vpop.permute.xlu0 %2041 }
 0x1db   : > { %1672 = vrot.lane.b32.xlu1 %v1022_v13, %s10118_s25  ;;  %1863 = vrot.lane.b32.xlu0 %v1214_v7, %s10120_s27 }
 0x1dd   : > { %v1661_v43 = vpop.permute.xlu1 %1660  ;;  %v1080_v46 = vpop.permute.xlu0 %1079 }
 0x1de   : > { %1174 = vst.msk [vmem:[#allocation4 + $0x10] sm:$0xff] %vm1171_vm3, %v1080_v46  ;;  %v1221_v46 = vld [vmem:[#allocation3 + $0xca] sm:$0xff] }
 0x1df   : > { %1865 = vrot.lane.b32.xlu1 %v1215_v22, %s10120_s27  ;;  %1107 = vrot.lane.b32.xlu0 %v1027_v59, %s10114_s28 }
 0x1e1   : > { %v1854_v20 = vpop.permute.xlu1 %1853  ;;  %v1462_v37 = vpop.permute.xlu0 %1461 }
 0x1e2   : > { %1558 = vst.msk [vmem:[#allocation4] sm:$0xff] %vm1557_vm6, %v1462_v37  ;;  %v1025_v37 = vld [vmem:[#allocation3 + $0xa9] sm:$0xff] }
 0x1e3   : > { %1109 = vrot.lane.b32.xlu1 %v1028_v49, %s10114_s28  ;;  %1489 = vrot.lane.b32.xlu0 %v10935_v52, %s10117_s24 }
 0x1e5   : > { %v2044_v13 = vpop.permute.xlu1 %2043  ;;  %v1655_v7 = vpop.permute.xlu0 %1654 }
 0x1e6   : > { %1751 = vst.msk [vmem:[#allocation4] sm:$0xff] %vm1750_vm7, %v1655_v7 }
 0x1e7   : > { %1302 = vrot.lane.b32.xlu1 %v1221_v46, %s10115_s29  ;;  %1682 = vrot.lane.b32.xlu0 %v1027_v59, %s10118_s25 }
 0x1e9   : > { %v1082_v22 = vpop.permute.xlu1 %1081  ;;  %v1277_v41 = vpop.permute.xlu0 %1276 }
 0x1ea   : > { %1175 = vst.msk [vmem:[#allocation4 + $0x18] sm:$0xff] %vm1171_vm3, %v1082_v22 }
 0x1eb   : > { %1369 = vst.msk [vmem:[#allocation4 + $0x20] sm:$0xff] %vm1364_vm4, %v1277_v41  ;;  %1491 = vrot.lane.b32.xlu1 %v10940_v58, %s10117_s24  ;;  %1103 = vrot.lane.b32.xlu0 %v1025_v37, %s10114_s28 }
 0x1ed   : > { %v1275_v28 = vpop.permute.xlu1 %1274  ;;  %v1852_v19 = vpop.permute.xlu0 %1851 }
 0x1ee   : > { %1368 = vst.msk [vmem:[#allocation4 + $0x18] sm:$0xff] %vm1364_vm4, %v1275_v28 }
 0x1ef   : > { %1561 = vst.msk [vmem:[#allocation4 + $0x18] sm:$0xff] %vm1557_vm6, %v1468_v31  ;;  %1684 = vrot.lane.b32.xlu1 %v1028_v49, %s10118_s25  ;;  %1485 = vrot.lane.b32.xlu0 %v10947_v61, %s10117_s24  ;;  %v1026_v31 = vld [vmem:[#allocation3 + $0xb1] sm:$0xff] }
 0x1f0   : > { %1754 = vst.msk [vmem:[#allocation4 + $0x18] sm:$0xff] %vm1750_vm7, %v1661_v43  ;;  %v1220_v43 = vld [vmem:[#allocation3 + $0xc2] sm:$0xff] }
 0x1f1   : > { %v1464_v41 = vpop.permute.xlu1 %1463  ;;  %v1273_v59 = vpop.permute.xlu0 %1272  ;;  %1947 = vst.msk [vmem:[#allocation4 + $0x18] sm:$0xff] %vm1943_vm8, %v1854_v20 }
 0x1f2   : > { %1559 = vst.msk [vmem:[#allocation4 + $0x8] sm:$0xff] %vm1557_vm6, %v1464_v41  ;;  %v1031_v41 = vld [vmem:[#allocation3 + $0xf1] sm:$0xff] }
 0x1f3   : > { %1367 = vst.msk [vmem:[#allocation4 + $0x10] sm:$0xff] %vm1364_vm4, %v1273_v59  ;;  %1877 = vrot.lane.b32.xlu1 %v1221_v46, %s10120_s27  ;;  %1678 = vrot.lane.b32.xlu0 %v1025_v37, %s10118_s25  ;;  %v1218_v46 = vld [vmem:[#allocation3 + $0xaa] sm:$0xff] }
 0x1f4   : > { %1560 = vst.msk [vmem:[#allocation4 + $0x10] sm:$0xff] %vm1557_vm6, %v1466_v17 }
 0x1f5   : > { %1753 = vst.msk [vmem:[#allocation4 + $0x10] sm:$0xff] %vm1750_vm7, %v1659_v55  ;;  %v1657_v28 = vpop.permute.xlu1 %1656  ;;  %v1848_v49 = vpop.permute.xlu0 %1847  ;;  %v1219_v55 = vld [vmem:[#allocation3 + $0xb2] sm:$0xff] }
 0x1f6   : > { %1946 = vst.msk [vmem:[#allocation4 + $0x10] sm:$0xff] %vm1943_vm8, %v1852_v19  ;;  %1944 = vst.msk [vmem:[#allocation4] sm:$0xff] %vm1943_vm8, %v1848_v49  ;;  %v1032_v49 = vld [vmem:[#allocation3 + $0xf9] sm:$0xff] }
 0x1f7   : > { %1752 = vst.msk [vmem:[#allocation4 + $0x8] sm:$0xff] %vm1750_vm7, %v1657_v28  ;;  %1105 = vrot.lane.b32.xlu1 %v1026_v31, %s10114_s28  ;;  %1300 = vrot.lane.b32.xlu0 %v1220_v43, %s10115_s29 }
 0x1f8   : > { %2138 = vst.msk [vmem:[#allocation4] sm:$0xff] %vm2137_vm9, %v2042_v3 }
 0x1f9   : > { %v1850_v17 = vpop.permute.xlu1 %1849  ;;  %v1092_v20 = vpop.permute.xlu0 %1091 }
 0x1fa   : > { %1945 = vst.msk [vmem:[#allocation4 + $0x8] sm:$0xff] %vm1943_vm8, %v1850_v17  ;;  %v1225_v17 = vld [vmem:[#allocation3 + $0xfa] sm:$0xff] }
 0x1fb   : > { %1180 = vst.msk [vmem:[#allocation4 + $0x40] sm:$0xff] %vm1171_vm3, %v1092_v20  ;;  %1298 = vrot.lane.b32.xlu1 %v1219_v55, %s10115_s29  ;;  %1875 = vrot.lane.b32.xlu0 %v1220_v43, %s10120_s27 }
 0x1fc   : > { %2139 = vst.msk [vmem:[#allocation4 + $0x8] sm:$0xff] %vm2137_vm9, %v2044_v13 }
 0x1fd   : > { %v1094_v19 = vpop.permute.xlu1 %1093  ;;  %v1474_v7 = vpop.permute.xlu0 %1473 }
 0x1fe   : > { %1181 = vst.msk [vmem:[#allocation4 + $0x48] sm:$0xff] %vm1171_vm3, %v1094_v19  ;;  %v11147_v19 = vld [vmem:[#allocation3 + $0xd9] sm:$0xff] }
 0x1ff   : > { %1487 = vrot.lane.b32.xlu1 %v10952_v4, %s10117_s24  ;;  %1296 = vrot.lane.b32.xlu0 %v1218_v46, %s10115_s29 }
 0x201   : > { %v1287_v3 = vpop.permute.xlu1 %1286  ;;  %v1667_v22 = vpop.permute.xlu0 %1666 }
 0x202   : > { %1374 = vst.msk [vmem:[#allocation4 + $0x48] sm:$0xff] %vm1364_vm4, %v1287_v3 }
 0x203   : > { %1680 = vrot.lane.b32.xlu1 %v1026_v31, %s10118_s25  ;;  %1871 = vrot.lane.b32.xlu0 %v1218_v46, %s10120_s27 }
 0x205   : > { %v1476_v37 = vpop.permute.xlu1 %1475  ;;  %v2050_v13 = vpop.permute.xlu0 %2049 }
 0x207   : > { %1873 = vrot.lane.b32.xlu1 %v1219_v55, %s10120_s27  ;;  %1115 = vrot.lane.b32.xlu0 %v1031_v41, %s10114_s28 }
 0x209   : > { %v1669_v59 = vpop.permute.xlu1 %1668  ;;  %v1088_v28 = vpop.permute.xlu0 %1087 }
 0x20a   : > { %1178 = vst.msk [vmem:[#allocation4 + $0x30] sm:$0xff] %vm1171_vm3, %v1088_v28 }
 0x20b   : > { %1117 = vrot.lane.b32.xlu1 %v1032_v49, %s10114_s28  ;;  %1497 = vrot.lane.b32.xlu0 %v10959_v11, %s10117_s24 }
 0x20d   : > { %v1862_v31 = vpop.permute.xlu1 %1861  ;;  %v1470_v43 = vpop.permute.xlu0 %1469 }
 0x20e   : > { %1562 = vst.msk [vmem:[#allocation4 + $0x20] sm:$0xff] %vm1557_vm6, %v1470_v43 }
 0x20f   : > { %1310 = vrot.lane.b32.xlu1 %v1225_v17, %s10115_s29  ;;  %1690 = vrot.lane.b32.xlu0 %v1031_v41, %s10118_s25 }
 0x211   : > { %v2052_v20 = vpop.permute.xlu1 %2051  ;;  %v1663_v55 = vpop.permute.xlu0 %1662 }
 0x212   : > { %1755 = vst.msk [vmem:[#allocation4 + $0x20] sm:$0xff] %vm1750_vm7, %v1663_v55  ;;  %v11167_v55 = vld [vmem:[#allocation3 + $0xe1] sm:$0xff] }
 0x213   : > { %1499 = vrot.lane.b32.xlu1 %v10964_v25, %s10117_s24  ;;  %1111 = vrot.lane.b32.xlu0 %v11147_v19, %s10114_s28 }
 0x215   : > { %v1090_v46 = vpop.permute.xlu1 %1089  ;;  %v2046_v3 = vpop.permute.xlu0 %2045 }
 0x216   : > { %1179 = vst.msk [vmem:[#allocation4 + $0x38] sm:$0xff] %vm1171_vm3, %v1090_v46  ;;  %v1224_v46 = vld [vmem:[#allocation3 + $0xf2] sm:$0xff] }
 0x217   : > { %2140 = vst.msk [vmem:[#allocation4 + $0x10] sm:$0xff] %vm2137_vm9, %v2046_v3  ;;  %1692 = vrot.lane.b32.xlu1 %v1032_v49, %s10118_s25  ;;  %1493 = vrot.lane.b32.xlu0 %v10972_v29, %s10117_s24 }
 0x219   : > { %v1283_v41 = vpop.permute.xlu1 %1282  ;;  %v1285_v28 = vpop.permute.xlu0 %1284 }
 0x21a   : > { %1372 = vst.msk [vmem:[#allocation4 + $0x38] sm:$0xff] %vm1364_vm4, %v1283_v41  ;;  %1373 = vst.msk [vmem:[#allocation4 + $0x40] sm:$0xff] %vm1364_vm4, %v1285_v28  ;;  %v1222_v41 = vld [vmem:[#allocation3 + $0xda] sm:$0xff] }
 0x21b   : > { %1565 = vst.msk [vmem:[#allocation4 + $0x38] sm:$0xff] %vm1557_vm6, %v1476_v37  ;;  %1885 = vrot.lane.b32.xlu1 %v1225_v17, %s10120_s27  ;;  %1686 = vrot.lane.b32.xlu0 %v11147_v19, %s10118_s25 }
 0x21c   : > { %1758 = vst.msk [vmem:[#allocation4 + $0x38] sm:$0xff] %vm1750_vm7, %v1669_v59  ;;  %v1223_v59 = vld [vmem:[#allocation3 + $0xe2] sm:$0xff] }
 0x21d   : > { %1951 = vst.msk [vmem:[#allocation4 + $0x38] sm:$0xff] %vm1943_vm8, %v1862_v31  ;;  %v1472_v49 = vpop.permute.xlu1 %1471  ;;  %v1860_v43 = vpop.permute.xlu0 %1859 }
 0x21e   : > { %1563 = vst.msk [vmem:[#allocation4 + $0x28] sm:$0xff] %vm1557_vm6, %v1472_v49 }
 0x21f   : > { %1113 = vrot.lane.b32.xlu1 %v11167_v55, %s10114_s28  ;;  %1308 = vrot.lane.b32.xlu0 %v1224_v46, %s10115_s29 }
 0x221   : > { %v1665_v37 = vpop.permute.xlu1 %1664  ;;  %v1281_v17 = vpop.permute.xlu0 %1280 }
 0x222   : > { %1756 = vst.msk [vmem:[#allocation4 + $0x28] sm:$0xff] %vm1750_vm7, %v1665_v37 }
 0x223   : > { %1371 = vst.msk [vmem:[#allocation4 + $0x30] sm:$0xff] %vm1364_vm4, %v1281_v17  ;;  %1306 = vrot.lane.b32.xlu1 %v1223_v59, %s10115_s29  ;;  %1883 = vrot.lane.b32.xlu0 %v1224_v46, %s10120_s27  ;;  %v11198_v46 = vld [vmem:[#allocation3 + $0x129] sm:$0xff] }
 0x224   : > { %1564 = vst.msk [vmem:[#allocation4 + $0x30] sm:$0xff] %vm1557_vm6, %v1474_v7 }
 0x225   : > { %1757 = vst.msk [vmem:[#allocation4 + $0x30] sm:$0xff] %vm1750_vm7, %v1667_v22  ;;  %v1858_v31 = vpop.permute.xlu1 %1857  ;;  %v1856_v3 = vpop.permute.xlu0 %1855 }
 0x226   : > { %1950 = vst.msk [vmem:[#allocation4 + $0x30] sm:$0xff] %vm1943_vm8, %v1860_v43  ;;  %1949 = vst.msk [vmem:[#allocation4 + $0x28] sm:$0xff] %vm1943_vm8, %v1858_v31 }
 0x227   : > { %1948 = vst.msk [vmem:[#allocation4 + $0x20] sm:$0xff] %vm1943_vm8, %v1856_v3  ;;  %1495 = vrot.lane.b32.xlu1 %v10977_v38, %s10117_s24  ;;  %1304 = vrot.lane.b32.xlu0 %v1222_v41, %s10115_s29 }
 0x228   : > { %2143 = vst.msk [vmem:[#allocation4 + $0x28] sm:$0xff] %vm2137_vm9, %v2052_v20  ;;  %2142 = vst.msk [vmem:[#allocation4 + $0x20] sm:$0xff] %vm2137_vm9, %v2050_v13  ;;  %v11192_v13 = vld [vmem:[#allocation3 + $0x121] sm:$0xff] }
 0x229   : > { %v2048_v7 = vpop.permute.xlu1 %2047  ;;  %v1100_v22 = vpop.permute.xlu0 %1099 }
 0x22a   : > { %2141 = vst.msk [vmem:[#allocation4 + $0x18] sm:$0xff] %vm2137_vm9, %v2048_v7 }
 0x22b   : > { %1184 = vst.msk [vmem:[#allocation4 + $0x60] sm:$0xff] %vm1171_vm3, %v1100_v22  ;;  %1688 = vrot.lane.b32.xlu1 %v11167_v55, %s10118_s25  ;;  %1879 = vrot.lane.b32.xlu0 %v1222_v41, %s10120_s27  ;;  %v11209_v41 = vld [vmem:[#allocation3 + $0x109] sm:$0xff] }
 0x22d   : > { %v1102_v28 = vpop.permute.xlu1 %1101  ;;  %v1482_v20 = vpop.permute.xlu0 %1481 }
 0x22e   : > { %1185 = vst.msk [vmem:[#allocation4 + $0x68] sm:$0xff] %vm1171_vm3, %v1102_v28 }
 0x22f   : > { %1881 = vrot.lane.b32.xlu1 %v1223_v59, %s10120_s27  ;;  %1123 = vrot.lane.b32.xlu0 %v11192_v13, %s10114_s28  ;;  %v1229_v59 = vld [vmem:[#allocation3 + $0x12a] sm:$0xff] }
 0x231   : > { %v1295_v49 = vpop.permute.xlu1 %1294  ;;  %v1675_v43 = vpop.permute.xlu0 %1674 }
 0x232   : > { %1378 = vst.msk [vmem:[#allocation4 + $0x68] sm:$0xff] %vm1364_vm4, %v1295_v49 }
 0x233   : > { %1125 = vrot.lane.b32.xlu1 %v11198_v46, %s10114_s28  ;;  %1505 = vrot.lane.b32.xlu0 %v10984_v47, %s10117_s24 }
 0x235   : > { %v1484_v37 = vpop.permute.xlu1 %1483  ;;  %v1096_v17 = vpop.permute.xlu0 %1095 }
 0x236   : > { %1182 = vst.msk [vmem:[#allocation4 + $0x50] sm:$0xff] %vm1171_vm3, %v1096_v17 }
 0x237   : > { %1318 = vrot.lane.b32.xlu1 %v1229_v59, %s10115_s29  ;;  %1698 = vrot.lane.b32.xlu0 %v11192_v13, %s10118_s25 }
 0x239   : > { %v1677_v31 = vpop.permute.xlu1 %1676  ;;  %v1478_v3 = vpop.permute.xlu0 %1477 }
 0x23a   : > { %1566 = vst.msk [vmem:[#allocation4 + $0x40] sm:$0xff] %vm1557_vm6, %v1478_v3 }
 0x23b   : > { %1507 = vrot.lane.b32.xlu1 %v10989_v53, %s10117_s24  ;;  %1119 = vrot.lane.b32.xlu0 %v11209_v41, %s10114_s28 }
 0x23d   : > { %v1870_v7 = vpop.permute.xlu1 %1869  ;;  %v1671_v22 = vpop.permute.xlu0 %1670 }
 0x23e   : > { %1759 = vst.msk [vmem:[#allocation4 + $0x40] sm:$0xff] %vm1750_vm7, %v1671_v22  ;;  %v11226_v22 = vld [vmem:[#allocation3 + $0x111] sm:$0xff] }
 0x23f   : > { %1700 = vrot.lane.b32.xlu1 %v11198_v46, %s10118_s25  ;;  %1501 = vrot.lane.b32.xlu0 %v10996_v56, %s10117_s24 }
 0x241   : > { %v1098_v28 = vpop.permute.xlu1 %1097  ;;  %v1293_v49 = vpop.permute.xlu0 %1292 }
 0x242   : > { %1183 = vst.msk [vmem:[#allocation4 + $0x58] sm:$0xff] %vm1171_vm3, %v1098_v28 }
 0x243   : > { %1377 = vst.msk [vmem:[#allocation4 + $0x60] sm:$0xff] %vm1364_vm4, %v1293_v49  ;;  %1893 = vrot.lane.b32.xlu1 %v1229_v59, %s10120_s27  ;;  %1694 = vrot.lane.b32.xlu0 %v11209_v41, %s10118_s25  ;;  %v1227_v49 = vld [vmem:[#allocation3 + $0x112] sm:$0xff] }
 0x245   : > { %v1291_v17 = vpop.permute.xlu1 %1290  ;;  %v1868_v3 = vpop.permute.xlu0 %1867 }
 0x246   : > { %1376 = vst.msk [vmem:[#allocation4 + $0x58] sm:$0xff] %vm1364_vm4, %v1291_v17 }
 0x247   : > { %1569 = vst.msk [vmem:[#allocation4 + $0x58] sm:$0xff] %vm1557_vm6, %v1484_v37  ;;  %1121 = vrot.lane.b32.xlu1 %v11226_v22, %s10114_s28  ;;  %1316 = vrot.lane.b32.xlu0 %v1228_v32, %s10115_s29 }
 0x248   : > { %1762 = vst.msk [vmem:[#allocation4 + $0x58] sm:$0xff] %vm1750_vm7, %v1677_v31 }
 0x249   : > { %1955 = vst.msk [vmem:[#allocation4 + $0x58] sm:$0xff] %vm1943_vm8, %v1870_v7  ;;  %v1480_v59 = vpop.permute.xlu1 %1479  ;;  %v1289_v28 = vpop.permute.xlu0 %1288  ;;  %v11243_v7 = vld [vmem:[#allocation3 + $0x10a] sm:$0xff] }
 0x24a   : > { %1567 = vst.msk [vmem:[#allocation4 + $0x48] sm:$0xff] %vm1557_vm6, %v1480_v59 }
 0x24b   : > { %1375 = vst.msk [vmem:[#allocation4 + $0x50] sm:$0xff] %vm1364_vm4, %v1289_v28  ;;  %1314 = vrot.lane.b32.xlu1 %v1227_v49, %s10115_s29  ;;  %1891 = vrot.lane.b32.xlu0 %v1228_v32, %s10120_s27 }
 0x24c   : > { %1568 = vst.msk [vmem:[#allocation4 + $0x50] sm:$0xff] %vm1557_vm6, %v1482_v20 }
 0x24d   : > { %1761 = vst.msk [vmem:[#allocation4 + $0x50] sm:$0xff] %vm1750_vm7, %v1675_v43  ;;  %v1673_v37 = vpop.permute.xlu1 %1672  ;;  %v1864_v31 = vpop.permute.xlu0 %1863 }
 0x24e   : > { %1954 = vst.msk [vmem:[#allocation4 + $0x50] sm:$0xff] %vm1943_vm8, %v1868_v3  ;;  %1952 = vst.msk [vmem:[#allocation4 + $0x40] sm:$0xff] %vm1943_vm8, %v1864_v31  ;;  %v11256_v3 = vld [vmem:[#allocation3 + $0x151] sm:$0xff] }
 0x24f   : > { %1760 = vst.msk [vmem:[#allocation4 + $0x48] sm:$0xff] %vm1750_vm7, %v1673_v37  ;;  %1503 = vrot.lane.b32.xlu1 %v11001_v8, %s10117_s24  ;;  %1312 = vrot.lane.b32.xlu0 %v11243_v7, %s10115_s29  ;;  %v11262_v37 = vld [vmem:[#allocation3 + $0x159] sm:$0xff] }
 0x251   : > { %v1866_v20 = vpop.permute.xlu1 %1865  ;;  %v1108_v32 = vpop.permute.xlu0 %1107 }
 0x252   : > { %1953 = vst.msk [vmem:[#allocation4 + $0x48] sm:$0xff] %vm1943_vm8, %v1866_v20 }
 0x253   : > { %1188 = vst.msk [vmem:[#allocation4 + $0x80] sm:$0xff] %vm1171_vm3, %v1108_v32  ;;  %1696 = vrot.lane.b32.xlu1 %v11226_v22, %s10118_s25  ;;  %1887 = vrot.lane.b32.xlu0 %v11243_v7, %s10120_s27 }
 0x255   : > { %v1110_v43 = vpop.permute.xlu1 %1109  ;;  %v1490_v17 = vpop.permute.xlu0 %1489 }
 0x256   : > { %1189 = vst.msk [vmem:[#allocation4 + $0x88] sm:$0xff] %vm1171_vm3, %v1110_v43 }
 0x257   : > { %1889 = vrot.lane.b32.xlu1 %v1227_v49, %s10120_s27  ;;  %1131 = vrot.lane.b32.xlu0 %v11256_v3, %s10114_s28  ;;  %v11269_v49 = vld [vmem:[#allocation3 + $0x15a] sm:$0xff] }
 0x259   : > { %v1303_v59 = vpop.permute.xlu1 %1302  ;;  %v1683_v28 = vpop.permute.xlu0 %1682 }
 0x25a   : > { %1382 = vst.msk [vmem:[#allocation4 + $0x88] sm:$0xff] %vm1364_vm4, %v1303_v59  ;;  %v11276_v59 = vld [vmem:[#allocation3 + $0x139] sm:$0xff] }
 0x25b   : > { %1133 = vrot.lane.b32.xlu1 %v11262_v37, %s10114_s28  ;;  %1513 = vrot.lane.b32.xlu0 %v11009_v16, %s10117_s24 }
 0x25d   : > { %v1492_v31 = vpop.permute.xlu1 %1491  ;;  %v1104_v20 = vpop.permute.xlu0 %1103 }
 0x25e   : > { %1186 = vst.msk [vmem:[#allocation4 + $0x70] sm:$0xff] %vm1171_vm3, %v1104_v20 }
 0x25f   : > { %1326 = vrot.lane.b32.xlu1 %v11269_v49, %s10115_s29  ;;  %1706 = vrot.lane.b32.xlu0 %v11256_v3, %s10118_s25 }
 0x261   : > { %v1685_v32 = vpop.permute.xlu1 %1684  ;;  %v1486_v43 = vpop.permute.xlu0 %1485 }
 0x262   : > { %1570 = vst.msk [vmem:[#allocation4 + $0x60] sm:$0xff] %vm1557_vm6, %v1486_v43 }
 0x263   : > { %1515 = vrot.lane.b32.xlu1 %v11014_v34, %s10117_s24  ;;  %1127 = vrot.lane.b32.xlu0 %v11276_v59, %s10114_s28 }
 0x265   : > { %v1878_v20 = vpop.permute.xlu1 %1877  ;;  %v1679_v23 = vpop.permute.xlu0 %1678 }
 0x266   : > { %1763 = vst.msk [vmem:[#allocation4 + $0x60] sm:$0xff] %vm1750_vm7, %v1679_v23 }
 0x267   : > { %1708 = vrot.lane.b32.xlu1 %v11262_v37, %s10118_s25  ;;  %1509 = vrot.lane.b32.xlu0 %v11021_v50, %s10117_s24 }
 0x269   : > { %v1106_v10 = vpop.permute.xlu1 %1105  ;;  %v1301_v43 = vpop.permute.xlu0 %1300 }
 0x26a   : > { %1187 = vst.msk [vmem:[#allocation4 + $0x78] sm:$0xff] %vm1171_vm3, %v1106_v10 }
 0x26b   : > { %1381 = vst.msk [vmem:[#allocation4 + $0x80] sm:$0xff] %vm1364_vm4, %v1301_v43  ;;  %1901 = vrot.lane.b32.xlu1 %v11269_v49, %s10120_s27  ;;  %1702 = vrot.lane.b32.xlu0 %v11276_v59, %s10118_s25 }
 0x26d   : > { %v1299_v0 = vpop.permute.xlu1 %1298  ;;  %v1876_v23 = vpop.permute.xlu0 %1875 }
 0x26e   : > { %1380 = vst.msk [vmem:[#allocation4 + $0x78] sm:$0xff] %vm1364_vm4, %v1299_v0  ;;  %v11307_v0 = vld [vmem:[#allocation3 + $0x142] sm:$0xff] }
 0x26f   : > { %1573 = vst.msk [vmem:[#allocation4 + $0x78] sm:$0xff] %vm1557_vm6, %v1492_v31  ;;  %1129 = vrot.lane.b32.xlu1 %v11294_v14, %s10114_s28  ;;  %1324 = vrot.lane.b32.xlu0 %v11296_v5, %s10115_s29 }
 0x270   : > { %1766 = vst.msk [vmem:[#allocation4 + $0x78] sm:$0xff] %vm1750_vm7, %v1685_v32 }
 0x271   : > { %1959 = vst.msk [vmem:[#allocation4 + $0x78] sm:$0xff] %vm1943_vm8, %v1878_v20  ;;  %v1488_v10 = vpop.permute.xlu1 %1487  ;;  %v1297_v43 = vpop.permute.xlu0 %1296  ;;  %v11318_v20 = vld [vmem:[#allocation3 + $0x13a] sm:$0xff] }
 0x272   : > { %1571 = vst.msk [vmem:[#allocation4 + $0x68] sm:$0xff] %vm1557_vm6, %v1488_v10 }
 0x273   : > { %1379 = vst.msk [vmem:[#allocation4 + $0x70] sm:$0xff] %vm1364_vm4, %v1297_v43  ;;  %1322 = vrot.lane.b32.xlu1 %v11307_v0, %s10115_s29  ;;  %1899 = vrot.lane.b32.xlu0 %v11296_v5, %s10120_s27  ;;  %v11331_v43 = vld [vmem:[#allocation3 + $0x180] sm:$0xff] }
 0x274   : > { %1572 = vst.msk [vmem:[#allocation4 + $0x70] sm:$0xff] %vm1557_vm6, %v1490_v17 }
 0x275   : > { %1765 = vst.msk [vmem:[#allocation4 + $0x70] sm:$0xff] %vm1750_vm7, %v1683_v28  ;;  %v1681_v31 = vpop.permute.xlu1 %1680  ;;  %v1872_v32 = vpop.permute.xlu0 %1871 }
 0x276   : > { %1958 = vst.msk [vmem:[#allocation4 + $0x70] sm:$0xff] %vm1943_vm8, %v1876_v23  ;;  %1956 = vst.msk [vmem:[#allocation4 + $0x60] sm:$0xff] %vm1943_vm8, %v1872_v32 }
 0x277   : > { %1764 = vst.msk [vmem:[#allocation4 + $0x68] sm:$0xff] %vm1750_vm7, %v1681_v31  ;;  %1511 = vrot.lane.b32.xlu1 %v11026_v1, %s10117_s24  ;;  %1320 = vrot.lane.b32.xlu0 %v11318_v20, %s10115_s29 }
 0x279   : > { %v1874_v17 = vpop.permute.xlu1 %1873  ;;  %v1116_v10 = vpop.permute.xlu0 %1115 }
 0x27a   : > { %1957 = vst.msk [vmem:[#allocation4 + $0x68] sm:$0xff] %vm1943_vm8, %v1874_v17  ;;  %v11338_v17 = vld [vmem:[#allocation3 + $0x188] sm:$0xff] }
 0x27b   : > { %1192 = vst.msk [vmem:[#allocation4 + $0xa0] sm:$0xff] %vm1171_vm3, %v1116_v10  ;;  %1704 = vrot.lane.b32.xlu1 %v11294_v14, %s10118_s25  ;;  %1895 = vrot.lane.b32.xlu0 %v11318_v20, %s10120_s27  ;;  %v11340_v10 = vld [vmem:[#allocation3 + $0x181] sm:$0xff] }
 0x27d   : > { %v1118_v28 = vpop.permute.xlu1 %1117  ;;  %v1498_v23 = vpop.permute.xlu0 %1497 }
 0x27e   : > { %1193 = vst.msk [vmem:[#allocation4 + $0xa8] sm:$0xff] %vm1171_vm3, %v1118_v28 }
 0x27f   : > { %1897 = vrot.lane.b32.xlu1 %v11307_v0, %s10120_s27  ;;  %1521 = vrot.lane.b32.xlu0 %v11331_v43, %s10117_s24 }
 0x281   : > { %v1311_v31 = vpop.permute.xlu1 %1310  ;;  %v1691_v32 = vpop.permute.xlu0 %1690 }
 0x282   : > { %1386 = vst.msk [vmem:[#allocation4 + $0xa8] sm:$0xff] %vm1364_vm4, %v1311_v31 }
 0x283   : > { %1523 = vrot.lane.b32.xlu1 %v11338_v17, %s10117_s24  ;;  %1714 = vrot.lane.b32.xlu0 %v11340_v10, %s10118_s25 }
 0x285   : > { %v1500_v28 = vpop.permute.xlu1 %1499  ;;  %v1112_v57 = vpop.permute.xlu0 %1111 }
 0x286   : > { %1190 = vst.msk [vmem:[#allocation4 + $0x90] sm:$0xff] %vm1171_vm3, %v1112_v57 }
 0x287   : > { %1716 = vrot.lane.b32.xlu1 %v11347_v51, %s10118_s25  ;;  %1135 = vrot.lane.b32.xlu0 %v11349_v60, %s10114_s28 }
 0x289   : > { %v1693_v31 = vpop.permute.xlu1 %1692  ;;  %v1494_v54 = vpop.permute.xlu0 %1493 }
 0x28a   : > { %1574 = vst.msk [vmem:[#allocation4 + $0x80] sm:$0xff] %vm1557_vm6, %v1494_v54 }
 0x28b   : > { %1909 = vrot.lane.b32.xlu1 %v11356_v45, %s10120_s27  ;;  %1517 = vrot.lane.b32.xlu0 %v11037_v63, %s10117_s24 }
 0x28d   : > { %v1886_v57 = vpop.permute.xlu1 %1885  ;;  %v1687_v39 = vpop.permute.xlu0 %1686 }
 0x28e   : > { %1767 = vst.msk [vmem:[#allocation4 + $0x80] sm:$0xff] %vm1750_vm7, %v1687_v39 }
 0x28f   : > { %1137 = vrot.lane.b32.xlu1 %v11363_v48, %s10114_s28  ;;  %1710 = vrot.lane.b32.xlu0 %v11349_v60, %s10118_s25 }
 0x291   : > { %v1114_v54 = vpop.permute.xlu1 %1113  ;;  %v1309_v42 = vpop.permute.xlu0 %1308 }
 0x292   : > { %1191 = vst.msk [vmem:[#allocation4 + $0x98] sm:$0xff] %vm1171_vm3, %v1114_v54 }
 0x293   : > { %1385 = vst.msk [vmem:[#allocation4 + $0xa0] sm:$0xff] %vm1364_vm4, %v1309_v42  ;;  %1330 = vrot.lane.b32.xlu1 %v11371_v33, %s10115_s29  ;;  %1907 = vrot.lane.b32.xlu0 %v11373_v27, %s10120_s27 }
 0x295   : > { %v1307_v39 = vpop.permute.xlu1 %1306  ;;  %v1884_v36 = vpop.permute.xlu0 %1883 }
 0x296   : > { %1384 = vst.msk [vmem:[#allocation4 + $0x98] sm:$0xff] %vm1364_vm4, %v1307_v39 }
 0x297   : > { %1577 = vst.msk [vmem:[#allocation4 + $0x98] sm:$0xff] %vm1557_vm6, %v1500_v28  ;;  %1519 = vrot.lane.b32.xlu1 %v11041_v26, %s10117_s24  ;;  %1328 = vrot.lane.b32.xlu0 %v11380_v30, %s10115_s29 }
 0x298   : > { %1770 = vst.msk [vmem:[#allocation4 + $0x98] sm:$0xff] %vm1750_vm7, %v1693_v31 }
 0x299   : > { %1963 = vst.msk [vmem:[#allocation4 + $0x98] sm:$0xff] %vm1943_vm8, %v1886_v57  ;;  %v1496_v42 = vpop.permute.xlu1 %1495  ;;  %v1305_v54 = vpop.permute.xlu0 %1304 }
 0x29a   : > { %1575 = vst.msk [vmem:[#allocation4 + $0x88] sm:$0xff] %vm1557_vm6, %v1496_v42 }
 0x29b   : > { %1383 = vst.msk [vmem:[#allocation4 + $0x90] sm:$0xff] %vm1364_vm4, %v1305_v54  ;;  %1712 = vrot.lane.b32.xlu1 %v11363_v48, %s10118_s25  ;;  %1903 = vrot.lane.b32.xlu0 %v11380_v30, %s10120_s27 }
 0x29c   : > { %1576 = vst.msk [vmem:[#allocation4 + $0x90] sm:$0xff] %vm1557_vm6, %v1498_v23 }
 0x29d   : > { %1769 = vst.msk [vmem:[#allocation4 + $0x90] sm:$0xff] %vm1750_vm7, %v1691_v32  ;;  %v1689_v28 = vpop.permute.xlu1 %1688  ;;  %v1880_v31 = vpop.permute.xlu0 %1879 }
 0x29e   : > { %1962 = vst.msk [vmem:[#allocation4 + $0x90] sm:$0xff] %vm1943_vm8, %v1884_v36  ;;  %1960 = vst.msk [vmem:[#allocation4 + $0x80] sm:$0xff] %vm1943_vm8, %v1880_v31  ;;  %v2171_v31 = vld [vmem:[#allocation3 + $0x39] sm:$0xff] }
 0x29f   : > { %1768 = vst.msk [vmem:[#allocation4 + $0x88] sm:$0xff] %vm1750_vm7, %v1689_v28  ;;  %1905 = vrot.lane.b32.xlu1 %v11371_v33, %s10120_s27  ;;  %2053 = vrot.lane.b32.xlu0 %v10923_v44, %s14353_s26  ;;  %v2170_v28 = vld [vmem:[#allocation3 + $0x31] sm:$0xff] }
 0x2a1   : > { %v1882_v23 = vpop.permute.xlu1 %1881  ;;  %v1124_v57 = vpop.permute.xlu0 %1123 }
 0x2a2   : > { %1961 = vst.msk [vmem:[#allocation4 + $0x88] sm:$0xff] %vm1943_vm8, %v1882_v23  ;;  %v2172_v23 = vld [vmem:[#allocation3 + $0x49] sm:$0xff] }
 0x2a3   : > { %1196 = vst.msk [vmem:[#allocation4 + $0xc0] sm:$0xff] %vm1171_vm3, %v1124_v57  ;;  %2055 = vrot.lane.b32.xlu1 %v10928_v62, %s14353_s26  ;;  %2057 = vrot.lane.b32.xlu0 %v10911_v35, %s14353_s26 }
 0x2a5   : > { %v1126_v36 = vpop.permute.xlu1 %1125  ;;  %v1506_v32 = vpop.permute.xlu0 %1505 }
 0x2a6   : > { %1197 = vst.msk [vmem:[#allocation4 + $0xc8] sm:$0xff] %vm1171_vm3, %v1126_v36  ;;  %v2173_v36 = vld [vmem:[#allocation3 + $0x51] sm:$0xff] }
 0x2a7   : > { %2059 = vrot.lane.b32.xlu1 %v10916_v40, %s14353_s26  ;;  %2061 = vrot.lane.b32.xlu0 %v10947_v61, %s14353_s26 }
 0x2a9   : > { %v1319_v44 = vpop.permute.xlu1 %1318  ;;  %v1699_v39 = vpop.permute.xlu0 %1698 }
 0x2aa   : > { %1390 = vst.msk [vmem:[#allocation4 + $0xc8] sm:$0xff] %vm1364_vm4, %v1319_v44 }
 0x2ab   : > { %2063 = vrot.lane.b32.xlu1 %v10952_v4, %s14353_s26  ;;  %2065 = vrot.lane.b32.xlu0 %v10935_v52, %s14353_s26 }
 0x2ad   : > { %v1508_v35 = vpop.permute.xlu1 %1507  ;;  %v1120_v62 = vpop.permute.xlu0 %1119 }
 0x2ae   : > { %1194 = vst.msk [vmem:[#allocation4 + $0xb0] sm:$0xff] %vm1171_vm3, %v1120_v62  ;;  %v2176_v62 = vld [vmem:[#allocation3 + $0x79] sm:$0xff] }
 0x2af   : > { %2067 = vrot.lane.b32.xlu1 %v10940_v58, %s14353_s26  ;;  %2069 = vrot.lane.b32.xlu0 %v10972_v29, %s14353_s26 }
 0x2b1   : > { %v1701_v40 = vpop.permute.xlu1 %1700  ;;  %v1502_v61 = vpop.permute.xlu0 %1501 }
 0x2b2   : > { %1578 = vst.msk [vmem:[#allocation4 + $0xa0] sm:$0xff] %vm1557_vm6, %v1502_v61 }
 0x2b3   : > { %2071 = vrot.lane.b32.xlu1 %v10977_v38, %s14353_s26  ;;  %2073 = vrot.lane.b32.xlu0 %v10959_v11, %s14353_s26 }
 0x2b5   : > { %v1894_v52 = vpop.permute.xlu1 %1893  ;;  %v1695_v4 = vpop.permute.xlu0 %1694 }
 0x2b6   : > { %1771 = vst.msk [vmem:[#allocation4 + $0xa0] sm:$0xff] %vm1750_vm7, %v1695_v4  ;;  %v2178_v4 = vld [vmem:[#allocation3 + $0x91] sm:$0xff] }
 0x2b7   : > { %2075 = vrot.lane.b32.xlu1 %v10964_v25, %s14353_s26  ;;  %2077 = vrot.lane.b32.xlu0 %v10996_v56, %s14353_s26 }
 0x2b9   : > { %v1122_v58 = vpop.permute.xlu1 %1121  ;;  %v1317_v29 = vpop.permute.xlu0 %1316 }
 0x2ba   : > { %1195 = vst.msk [vmem:[#allocation4 + $0xb8] sm:$0xff] %vm1171_vm3, %v1122_v58 }
 0x2bb   : > { %1389 = vst.msk [vmem:[#allocation4 + $0xc0] sm:$0xff] %vm1364_vm4, %v1317_v29  ;;  %2079 = vrot.lane.b32.xlu1 %v11001_v8, %s14353_s26  ;;  %2081 = vrot.lane.b32.xlu0 %v10984_v47, %s14353_s26 }
 0x2bd   : > { %v1315_v11 = vpop.permute.xlu1 %1314  ;;  %v1892_v38 = vpop.permute.xlu0 %1891 }
 0x2be   : > { %1388 = vst.msk [vmem:[#allocation4 + $0xb8] sm:$0xff] %vm1364_vm4, %v1315_v11  ;;  %v2179_v11 = vld [vmem:[#allocation3 + $0x99] sm:$0xff] }
 0x2bf   : > { %1581 = vst.msk [vmem:[#allocation4 + $0xb8] sm:$0xff] %vm1557_vm6, %v1508_v35  ;;  %2083 = vrot.lane.b32.xlu1 %v10989_v53, %s14353_s26  ;;  %2085 = vrot.lane.b32.xlu0 %v11021_v50, %s14353_s26  ;;  %v2175_v35 = vld [vmem:[#allocation3 + $0x69] sm:$0xff] }
 0x2c0   : > { %1774 = vst.msk [vmem:[#allocation4 + $0xb8] sm:$0xff] %vm1750_vm7, %v1701_v40 }
 0x2c1   : > { %1967 = vst.msk [vmem:[#allocation4 + $0xb8] sm:$0xff] %vm1943_vm8, %v1894_v52  ;;  %v1504_v25 = vpop.permute.xlu1 %1503  ;;  %v1313_v56 = vpop.permute.xlu0 %1312  ;;  %v2177_v52 = vld [vmem:[#allocation3 + $0x81] sm:$0xff] }
 0x2c2   : > { %1579 = vst.msk [vmem:[#allocation4 + $0xa8] sm:$0xff] %vm1557_vm6, %v1504_v25 }
 0x2c3   : > { %1387 = vst.msk [vmem:[#allocation4 + $0xb0] sm:$0xff] %vm1364_vm4, %v1313_v56  ;;  %2087 = vrot.lane.b32.xlu1 %v11026_v1, %s14353_s26  ;;  %2089 = vrot.lane.b32.xlu0 %v11009_v16, %s14353_s26  ;;  %v2007_v16 = vld [vmem:[#allocation3 + $0x198] sm:$0xff] }
 0x2c4   : > { %1580 = vst.msk [vmem:[#allocation4 + $0xb0] sm:$0xff] %vm1557_vm6, %v1506_v32  ;;  %v2174_v32 = vld [vmem:[#allocation3 + $0x61] sm:$0xff] }
 0x2c5   : > { %1773 = vst.msk [vmem:[#allocation4 + $0xb0] sm:$0xff] %vm1750_vm7, %v1699_v39  ;;  %v1697_v47 = vpop.permute.xlu1 %1696  ;;  %v1888_v53 = vpop.permute.xlu0 %1887 }
 0x2c6   : > { %1966 = vst.msk [vmem:[#allocation4 + $0xb0] sm:$0xff] %vm1943_vm8, %v1892_v38  ;;  %1964 = vst.msk [vmem:[#allocation4 + $0xa0] sm:$0xff] %vm1943_vm8, %v1888_v53  ;;  %v2180_v38 = vld [vmem:[#allocation3 + $0xa9] sm:$0xff]  ;;  %v2182_v53 = vld [vmem:[#allocation3 + $0xc1] sm:$0xff] }
 0x2c7   : > { %1772 = vst.msk [vmem:[#allocation4 + $0xa8] sm:$0xff] %vm1750_vm7, %v1697_v47  ;;  %2091 = vrot.lane.b32.xlu1 %v11014_v34, %s14353_s26  ;;  %2093 = vrot.lane.b32.xlu0 %v11037_v63, %s14353_s26  ;;  %v2008_v34 = vld [vmem:[#allocation3 + $0x1a0] sm:$0xff]  ;;  %v2181_v47 = vld [vmem:[#allocation3 + $0xb1] sm:$0xff] }
 0x2c9   : > { %v1890_v8 = vpop.permute.xlu1 %1889  ;;  %v1132_v50 = vpop.permute.xlu0 %1131 }
 0x2ca   : > { %1965 = vst.msk [vmem:[#allocation4 + $0xa8] sm:$0xff] %vm1943_vm8, %v1890_v8 }
 0x2cb   : > { %1200 = vst.msk [vmem:[#allocation4 + $0xe0] sm:$0xff] %vm1171_vm3, %v1132_v50  ;;  %2095 = vrot.lane.b32.xlu1 %v11041_v26, %s14353_s26  ;;  %2097 = vrot.lane.b32.xlu0 %v11331_v43, %s14353_s26 }
 0x2cd   : > { %v1134_v1 = vpop.permute.xlu1 %1133  ;;  %v1514_v42 = vpop.permute.xlu0 %1513 }
 0x2ce   : > { %1201 = vst.msk [vmem:[#allocation4 + $0xe8] sm:$0xff] %vm1171_vm3, %v1134_v1 }
 0x2cf   : > { %2099 = vrot.lane.b32.xlu1 %v11338_v17, %s14353_s26  ;;  %2101 = vrot.lane.b32.xlu0 %v2007_v16, %s14353_s26  ;;  %v2183_v16 = vld [vmem:[#allocation3 + $0xc9] sm:$0xff] }
 0x2d1   : > { %v1327_v63 = vpop.permute.xlu1 %1326  ;;  %v1707_v54 = vpop.permute.xlu0 %1706 }
 0x2d2   : > { %1394 = vst.msk [vmem:[#allocation4 + $0xe8] sm:$0xff] %vm1364_vm4, %v1327_v63 }
 0x2d3   : > { %2103 = vrot.lane.b32.xlu1 %v2008_v34, %s14353_s26  ;;  %2234 = vrot.lane.b32.xlu0 %v2170_v28, %s10121_s16  ;;  %v2186_v34 = vld [vmem:[#allocation3 + $0xf1] sm:$0xff]  ;;  %v2187_v28 = vld [vmem:[#allocation3 + $0xf9] sm:$0xff]  ;;  %s10130_s26 = smov 60  }
 0x2d5   : > { %v1516_v26 = vpop.permute.xlu1 %1515  ;;  %v1128_v43 = vpop.permute.xlu0 %1127 }
 0x2d6   : > { %1198 = vst.msk [vmem:[#allocation4 + $0xd0] sm:$0xff] %vm1171_vm3, %v1128_v43 }
 0x2d7   : > { %2236 = vrot.lane.b32.xlu1 %v2171_v31, %s10121_s16  ;;  %2238 = vrot.lane.b32.xlu0 %v2172_v23, %s10121_s16 }
 0x2d9   : > { %v1709_v17 = vpop.permute.xlu1 %1708  ;;  %v1510_v57 = vpop.permute.xlu0 %1509 }
 0x2da   : > { %1582 = vst.msk [vmem:[#allocation4 + $0xc0] sm:$0xff] %vm1557_vm6, %v1510_v57 }
 0x2db   : > { %2240 = vrot.lane.b32.xlu1 %v2173_v36, %s10121_s16  ;;  %2242 = vrot.lane.b32.xlu0 %v2174_v32, %s10121_s16  ;;  %v2363_v36 = vld [vmem:[#allocation3 + $0x32] sm:$0xff] }
 0x2dd   : > { %v1902_v44 = vpop.permute.xlu1 %1901  ;;  %v1703_v39 = vpop.permute.xlu0 %1702 }
 0x2de   : > { %1775 = vst.msk [vmem:[#allocation4 + $0xc0] sm:$0xff] %vm1750_vm7, %v1703_v39  ;;  %v2364_v39 = vld [vmem:[#allocation3 + $0x3a] sm:$0xff] }
 0x2df   : > { %2244 = vrot.lane.b32.xlu1 %v2175_v35, %s10121_s16  ;;  %2246 = vrot.lane.b32.xlu0 %v2176_v62, %s10121_s16  ;;  %v2365_v35 = vld [vmem:[#allocation3 + $0x4a] sm:$0xff] }
 0x2e1   : > { %v1130_v40 = vpop.permute.xlu1 %1129  ;;  %v1325_v61 = vpop.permute.xlu0 %1324 }
 0x2e2   : > { %1199 = vst.msk [vmem:[#allocation4 + $0xd8] sm:$0xff] %vm1171_vm3, %v1130_v40 }
 0x2e3   : > { %1393 = vst.msk [vmem:[#allocation4 + $0xe0] sm:$0xff] %vm1364_vm4, %v1325_v61  ;;  %2248 = vrot.lane.b32.xlu1 %v2177_v52, %s10121_s16  ;;  %2250 = vrot.lane.b32.xlu0 %v2178_v4, %s10121_s16  ;;  %v2366_v61 = vld [vmem:[#allocation3 + $0x52] sm:$0xff]  ;;  %v2367_v52 = vld [vmem:[#allocation3 + $0x62] sm:$0xff] }
 0x2e5   : > { %v1323_v58 = vpop.permute.xlu1 %1322  ;;  %v1900_v29 = vpop.permute.xlu0 %1899 }
 0x2e6   : > { %1392 = vst.msk [vmem:[#allocation4 + $0xd8] sm:$0xff] %vm1364_vm4, %v1323_v58 }
 0x2e7   : > { %1585 = vst.msk [vmem:[#allocation4 + $0xd8] sm:$0xff] %vm1557_vm6, %v1516_v26  ;;  %2252 = vrot.lane.b32.xlu1 %v2179_v11, %s10121_s16  ;;  %2254 = vrot.lane.b32.xlu0 %v2180_v38, %s10121_s16  ;;  %v2369_v11 = vld [vmem:[#allocation3 + $0x7a] sm:$0xff] }
 0x2e8   : > { %1778 = vst.msk [vmem:[#allocation4 + $0xd8] sm:$0xff] %vm1750_vm7, %v1709_v17 }
 0x2e9   : > { %1971 = vst.msk [vmem:[#allocation4 + $0xd8] sm:$0xff] %vm1943_vm8, %v1902_v44  ;;  %v1512_v25 = vpop.permute.xlu1 %1511  ;;  %v1321_v56 = vpop.permute.xlu0 %1320 }
 0x2ea   : > { %1583 = vst.msk [vmem:[#allocation4 + $0xc8] sm:$0xff] %vm1557_vm6, %v1512_v25 }
 0x2eb   : > { %1391 = vst.msk [vmem:[#allocation4 + $0xd0] sm:$0xff] %vm1364_vm4, %v1321_v56  ;;  %2256 = vrot.lane.b32.xlu1 %v2181_v47, %s10121_s16  ;;  %2258 = vrot.lane.b32.xlu0 %v2182_v53, %s10121_s16  ;;  %v2370_v56 = vld [vmem:[#allocation3 + $0x82] sm:$0xff]  ;;  %v2371_v47 = vld [vmem:[#allocation3 + $0x92] sm:$0xff] }
 0x2ec   : > { %1584 = vst.msk [vmem:[#allocation4 + $0xd0] sm:$0xff] %vm1557_vm6, %v1514_v42 }
 0x2ed   : > { %1777 = vst.msk [vmem:[#allocation4 + $0xd0] sm:$0xff] %vm1750_vm7, %v1707_v54  ;;  %v1705_v8 = vpop.permute.xlu1 %1704  ;;  %v1896_v50 = vpop.permute.xlu0 %1895 }
 0x2ee   : > { %1970 = vst.msk [vmem:[#allocation4 + $0xd0] sm:$0xff] %vm1943_vm8, %v1900_v29  ;;  %1968 = vst.msk [vmem:[#allocation4 + $0xc0] sm:$0xff] %vm1943_vm8, %v1896_v50  ;;  %v2368_v29 = vld [vmem:[#allocation3 + $0x6a] sm:$0xff]  ;;  %v2372_v50 = vld [vmem:[#allocation3 + $0x9a] sm:$0xff] }
 0x2ef   : > { %1776 = vst.msk [vmem:[#allocation4 + $0xc8] sm:$0xff] %vm1750_vm7, %v1705_v8  ;;  %2260 = vrot.lane.b32.xlu1 %v2183_v16, %s10121_s16  ;;  %2262 = vrot.lane.b32.xlu0 %v11147_v19, %s10121_s16  ;;  %v2373_v16 = vld [vmem:[#allocation3 + $0xaa] sm:$0xff] }
 0x2f1   : > { %v1898_v1 = vpop.permute.xlu1 %1897  ;;  %v1522_v42 = vpop.permute.xlu0 %1521 }
 0x2f2   : > { %1969 = vst.msk [vmem:[#allocation4 + $0xc8] sm:$0xff] %vm1943_vm8, %v1898_v1 }
 0x2f3   : > { %2264 = vrot.lane.b32.xlu1 %v11167_v55, %s10121_s16  ;;  %2266 = vrot.lane.b32.xlu0 %v2186_v34, %s10121_s16  ;;  %v2374_v34 = vld [vmem:[#allocation3 + $0xb2] sm:$0xff] }
 0x2f5   : > { %v1524_v63 = vpop.permute.xlu1 %1523  ;;  %v1715_v54 = vpop.permute.xlu0 %1714 }
 0x2f7   : > { %2268 = vrot.lane.b32.xlu1 %v2187_v28, %s10121_s16  ;;  %2270 = vrot.lane.b32.xlu0 %v11209_v41, %s10121_s16 }
 0x2f9   : > { %v1717_v26 = vpop.permute.xlu1 %1716  ;;  %v1136_v19 = vpop.permute.xlu0 %1135 }
 0x2fa   : > { %1202 = vst.msk [vmem:[#allocation4 + $0xf0] sm:$0xff] %vm1171_vm3, %v1136_v19  ;;  %v2377_v19 = vld [vmem:[#allocation3 + $0xda] sm:$0xff] }
 0x2fb   : > { %2272 = vrot.lane.b32.xlu1 %v11226_v22, %s10121_s16  ;;  %2274 = vrot.lane.b32.xlu0 %v11192_v13, %s10121_s16 }
 0x2fd   : > { %v1910_v55 = vpop.permute.xlu1 %1909  ;;  %v1518_v43 = vpop.permute.xlu0 %1517 }
 0x2fe   : > { %1586 = vst.msk [vmem:[#allocation4 + $0xe0] sm:$0xff] %vm1557_vm6, %v1518_v43 }
 0x2ff   : > { %2276 = vrot.lane.b32.xlu1 %v11198_v46, %s10121_s16  ;;  %2278 = vrot.lane.b32.xlu0 %v11276_v59, %s10121_s16 }
 0x301   : > { %v1138_v41 = vpop.permute.xlu1 %1137  ;;  %v1711_v31 = vpop.permute.xlu0 %1710 }
 0x302   : > { %1203 = vst.msk [vmem:[#allocation4 + $0xf8] sm:$0xff] %vm1171_vm3, %v1138_v41  ;;  %v2378_v41 = vld [vmem:[#allocation3 + $0xe2] sm:$0xff] }
 0x303   : > { %1779 = vst.msk [vmem:[#allocation4 + $0xe0] sm:$0xff] %vm1750_vm7, %v1711_v31  ;;  %2280 = vrot.lane.b32.xlu1 %v11294_v14, %s10121_s16  ;;  %2282 = vrot.lane.b32.xlu0 %v11256_v3, %s10121_s16  ;;  %v2200_v3 = vld [vmem:[#allocation3 + $0x199] sm:$0xff] }
 0x304   : > { %v2379_v31 = vld [vmem:[#allocation3 + $0xf2] sm:$0xff] }
 0x305   : > { %v1331_v13 = vpop.permute.xlu1 %1330  ;;  %v1908_v22 = vpop.permute.xlu0 %1907 }
 0x306   : > { %1396 = vst.msk [vmem:[#allocation4 + $0xf8] sm:$0xff] %vm1364_vm4, %v1331_v13 }
 0x307   : > { %1589 = vst.msk [vmem:[#allocation4 + $0xf8] sm:$0xff] %vm1557_vm6, %v1524_v63  ;;  %2284 = vrot.lane.b32.xlu1 %v11262_v37, %s10121_s16  ;;  %2286 = vrot.lane.b32.xlu0 %v11349_v60, %s10121_s16  ;;  %v10024_v60 = vld [vmem:[%s14321_s5 + $0x10] ss:$0 sps:$4 sm:$0x33]   ;;  %v2375_v63 = vld [vmem:[#allocation3 + $0xc2] sm:$0xff] }
 0x308   : > { %1782 = vst.msk [vmem:[#allocation4 + $0xf8] sm:$0xff] %vm1750_vm7, %v1717_v26  ;;  %9937 = vmatprep.subr.msk.bf16.mxu1 %vm501_vm0, %v10024_v60  ;;  %v2681_v23 = vsel %vm501_vm0, %v10024_v60, 0  ;;  %v2376_v26 = vld [vmem:[#allocation3 + $0xca] sm:$0xff] }
 0x309   : > { %1975 = vst.msk [vmem:[#allocation4 + $0xf8] sm:$0xff] %vm1943_vm8, %v1910_v55  ;;  %v1520_v14 = vpop.permute.xlu1 %1519  ;;  %v1329_v46 = vpop.permute.xlu0 %1328  ;;  %9819 = vmatpush3.bf16.msra.mxu1 %v2681_v23 }
 0x30a   : > { %1587 = vst.msk [vmem:[#allocation4 + $0xe8] sm:$0xff] %vm1557_vm6, %v1520_v14  ;;  %v2380_v14 = vld [vmem:[#allocation3 + $0xfa] sm:$0xff] }
 0x30b   : > { %1395 = vst.msk [vmem:[#allocation4 + $0xf0] sm:$0xff] %vm1364_vm4, %v1329_v46  ;;  %2288 = vrot.lane.b32.xlu1 %v11363_v48, %s10121_s16  ;;  %2290 = vrot.lane.b32.xlu0 %v11340_v10, %s10121_s16  ;;  %v10025_v48 = vld [vmem:[%s14321_s5 + $0x8] sm:$0xff]   ;;  %v2201_v10 = vld [vmem:[#allocation3 + $0x1a1] sm:$0xff] }
 0x30c   : > { %1588 = vst.msk [vmem:[#allocation4 + $0xf0] sm:$0xff] %vm1557_vm6, %v1522_v42  ;;  %9820 = vmatprep.subr.bf16.mxu1 %v10025_v48 }
 0x30d   : > { %1781 = vst.msk [vmem:[#allocation4 + $0xf0] sm:$0xff] %vm1750_vm7, %v1715_v54  ;;  %v1713_v37 = vpop.permute.xlu1 %1712  ;;  %v1904_v59 = vpop.permute.xlu0 %1903  ;;  %9821 = vmatpush3.bf16.msra.mxu1 %v10025_v48  ;;  %v2384_v48 = vld [vmem:[#allocation3 + $0x12a] sm:$0xff] }
 0x30e   : > { %1974 = vst.msk [vmem:[#allocation4 + $0xf0] sm:$0xff] %vm1943_vm8, %v1908_v22  ;;  %1972 = vst.msk [vmem:[#allocation4 + $0xe0] sm:$0xff] %vm1943_vm8, %v1904_v59 }
 0x30f   : > { %1780 = vst.msk [vmem:[#allocation4 + $0xe8] sm:$0xff] %vm1750_vm7, %v1713_v37  ;;  %2292 = vrot.lane.b32.xlu1 %v11347_v51, %s10121_s16  ;;  %2294 = vrot.lane.b32.xlu0 %v2200_v3, %s10121_s16  ;;  %v10026_v51 = vld [vmem:[%s14321_s5] sm:$0xff]   ;;  %v2383_v37 = vld [vmem:[#allocation3 + $0x122] sm:$0xff] }
 0x310   : > { %9822 = vmatprep.subr.bf16.mxu1 %v10026_v51  ;;  %v2382_v3 = vld [vmem:[#allocation3 + $0x112] sm:$0xff] }
 0x311   : > { %v1906_v17 = vpop.permute.xlu1 %1905  ;;  %v2054_v57 = vpop.permute.xlu0 %2053  ;;  %9823 = vmatpush3.bf16.msra.mxu1 %v10026_v51 }
 0x312   : > { %1973 = vst.msk [vmem:[#allocation4 + $0xe8] sm:$0xff] %vm1943_vm8, %v1906_v17 }
 0x313   : > { %2144 = vst.msk [vmem:[#allocation4 + $0x30] sm:$0xff] %vm2137_vm9, %v2054_v57  ;;  %2296 = vrot.lane.b32.xlu1 %v2201_v10, %s10121_s16  ;;  %2427 = vrot.lane.b32.xlu0 %v2363_v36, %s10122_s21  ;;  %v14381_v36 = vmov 0.0  }
 0x314   : > { %3046 = vst.msk [vmem:[#allocation5 + $0x40] sm:$0xf] %vm3039_vm11, %v14381_v36  ;;  %3040 = vst.msk [vmem:[#allocation5 + $0x10] sm:$0xf] %vm3039_vm11, %v14381_v36 }
 0x315   : > { %v2056_v32 = vpop.permute.xlu1 %2055  ;;  %v2058_v44 = vpop.permute.xlu0 %2057  ;;  %3043 = vst.msk [vmem:[#allocation5 + $0x28] sm:$0xf] %vm3039_vm11, %v14381_v36  ;;  %3049 = vst.msk [vmem:[#allocation5 + $0x58] sm:$0xf] %vm3039_vm11, %v14381_v36 }
 0x316   : > { %2145 = vst.msk [vmem:[#allocation4 + $0x38] sm:$0xff] %vm2137_vm9, %v2056_v32  ;;  %2146 = vst.msk [vmem:[#allocation4 + $0x40] sm:$0xff] %vm2137_vm9, %v2058_v44 }
 0x317   : > { %2429 = vrot.lane.b32.xlu1 %v2364_v39, %s10122_s21  ;;  %2431 = vrot.lane.b32.xlu0 %v2365_v35, %s10122_s21  ;;  %3052 = vst.msk [vmem:[#allocation5 + $0x70] sm:$0xf] %vm3039_vm11, %v14381_v36  ;;  %3055 = vst.msk [vmem:[#allocation5 + $0x88] sm:$0xf] %vm3039_vm11, %v14381_v36 }
 0x318   : > { %3058 = vst.msk [vmem:[#allocation5 + $0xa0] sm:$0xf] %vm3039_vm11, %v14381_v36  ;;  %3061 = vst.msk [vmem:[#allocation5 + $0xb8] sm:$0xf] %vm3039_vm11, %v14381_v36 }
 0x319   : > { %v2060_v62 = vpop.permute.xlu1 %2059  ;;  %v2062_v40 = vpop.permute.xlu0 %2061  ;;  %3064 = vst.msk [vmem:[#allocation5 + $0xd0] sm:$0xf] %vm3039_vm11, %v14381_v36  ;;  %3067 = vst.msk [vmem:[#allocation5 + $0xe8] sm:$0xf] %vm3039_vm11, %v14381_v36 }
 0x31a   : > { %2147 = vst.msk [vmem:[#allocation4 + $0x48] sm:$0xff] %vm2137_vm9, %v2060_v62  ;;  %2148 = vst.msk [vmem:[#allocation4 + $0x50] sm:$0xff] %vm2137_vm9, %v2062_v40 }
 0x31b   : > { %2433 = vrot.lane.b32.xlu1 %v2366_v61, %s10122_s21  ;;  %2435 = vrot.lane.b32.xlu0 %v2367_v52, %s10122_s21  ;;  %3070 = vst.msk [vmem:[#allocation5 + $0x100] sm:$0xf] %vm3039_vm11, %v14381_v36  ;;  %3073 = vst.msk [vmem:[#allocation5 + $0x118] sm:$0xf] %vm3039_vm11, %v14381_v36  ;;  %v14386_v52 = vld [vmem:[#allocation15_spill] sm:$0xff] }
 0x31c   : > { %3076 = vst.msk [vmem:[#allocation5 + $0x130] sm:$0xf] %vm3039_vm11, %v14381_v36  ;;  %3079 = vst.msk [vmem:[#allocation5 + $0x148] sm:$0xf] %vm3039_vm11, %v14381_v36 }
 0x31d   : > { %v2064_v4 = vpop.permute.xlu1 %2063  ;;  %v2066_v58 = vpop.permute.xlu0 %2065  ;;  %3082 = vst.msk [vmem:[#allocation5 + $0x160] sm:$0xf] %vm3039_vm11, %v14381_v36  ;;  %3085 = vst.msk [vmem:[#allocation5 + $0x178] sm:$0xf] %vm3039_vm11, %v14381_v36 }
 0x31e   : > { %2149 = vst.msk [vmem:[#allocation4 + $0x58] sm:$0xff] %vm2137_vm9, %v2064_v4  ;;  %2150 = vst.msk [vmem:[#allocation4 + $0x60] sm:$0xff] %vm2137_vm9, %v2066_v58 }
 0x31f   : > { %2437 = vrot.lane.b32.xlu1 %v2368_v29, %s10122_s21  ;;  %2439 = vrot.lane.b32.xlu0 %v2369_v11, %s10122_s21  ;;  %3088 = vst.msk [vmem:[#allocation5 + $0x190] sm:$0xf] %vm3039_vm11, %v14381_v36  ;;  %3091 = vst.msk [vmem:[#allocation5 + $0x1a8] sm:$0xf] %vm3039_vm11, %v14381_v36  ;;  %v14387_v29 = vld [vmem:[#allocation17_spill] sm:$0xff]  ;;  %v14388_v11 = vld [vmem:[#allocation14_spill] sm:$0xff] }
 0x320   : > { %3094 = vst.msk [vmem:[#allocation5 + $0x1c0] sm:$0xf] %vm3039_vm11, %v14381_v36  ;;  %3097 = vst.msk [vmem:[#allocation5 + $0x1d8] sm:$0xf] %vm3039_vm11, %v14381_v36  ;;  %v14403_v36 = vld [vmem:[#allocation33_spill] sm:$0xff]  ;;  %vm6919_vm11 = vcmask 654944  }
 0x321   : > { %v2068_v38 = vpop.permute.xlu1 %2067  ;;  %v2070_v25 = vpop.permute.xlu0 %2069 }
 0x322   : > { %2151 = vst.msk [vmem:[#allocation4 + $0x68] sm:$0xff] %vm2137_vm9, %v2068_v38  ;;  %2152 = vst.msk [vmem:[#allocation4 + $0x70] sm:$0xff] %vm2137_vm9, %v2070_v25 }
 0x323   : > { %2441 = vrot.lane.b32.xlu1 %v2370_v56, %s10122_s21  ;;  %2443 = vrot.lane.b32.xlu0 %v2371_v47, %s10122_s21  ;;  %v14389_v56 = vld [vmem:[#allocation16_spill] sm:$0xff]  ;;  %v14390_v47 = vld [vmem:[#allocation19_spill] sm:$0xff] }
 0x325   : > { %v2072_v53 = vpop.permute.xlu1 %2071  ;;  %v2074_v8 = vpop.permute.xlu0 %2073 }
 0x326   : > { %2153 = vst.msk [vmem:[#allocation4 + $0x78] sm:$0xff] %vm2137_vm9, %v2072_v53  ;;  %2154 = vst.msk [vmem:[#allocation4 + $0x80] sm:$0xff] %vm2137_vm9, %v2074_v8 }
 0x327   : > { %2445 = vrot.lane.b32.xlu1 %v2372_v50, %s10122_s21  ;;  %2447 = vrot.lane.b32.xlu0 %v2373_v16, %s10122_s21  ;;  %v14391_v50 = vld [vmem:[#allocation21_spill] sm:$0xff]  ;;  %v14392_v16 = vld [vmem:[#allocation18_spill] sm:$0xff] }
 0x329   : > { %v2076_v1 = vpop.permute.xlu1 %2075  ;;  %v2078_v42 = vpop.permute.xlu0 %2077 }
 0x32a   : > { %2155 = vst.msk [vmem:[#allocation4 + $0x88] sm:$0xff] %vm2137_vm9, %v2076_v1  ;;  %2156 = vst.msk [vmem:[#allocation4 + $0x90] sm:$0xff] %vm2137_vm9, %v2078_v42 }
 0x32b   : > { %2449 = vrot.lane.b32.xlu1 %v2374_v34, %s10122_s21  ;;  %2451 = vrot.lane.b32.xlu0 %v2375_v63, %s10122_s21  ;;  %v14393_v34 = vld [vmem:[#allocation20_spill] sm:$0xff]  ;;  %v14394_v63 = vld [vmem:[#allocation23_spill] sm:$0xff] }
 0x32d   : > { %v2080_v54 = vpop.permute.xlu1 %2079  ;;  %v2082_v28 = vpop.permute.xlu0 %2081 }
 0x32e   : > { %2157 = vst.msk [vmem:[#allocation4 + $0x98] sm:$0xff] %vm2137_vm9, %v2080_v54  ;;  %2158 = vst.msk [vmem:[#allocation4 + $0xa0] sm:$0xff] %vm2137_vm9, %v2082_v28 }
 0x32f   : > { %2453 = vrot.lane.b32.xlu1 %v2376_v26, %s10122_s21  ;;  %2455 = vrot.lane.b32.xlu0 %v2377_v19, %s10122_s21  ;;  %v14395_v26 = vld [vmem:[#allocation25_spill] sm:$0xff]  ;;  %v14396_v19 = vld [vmem:[#allocation22_spill] sm:$0xff] }
 0x331   : > { %v2084_v55 = vpop.permute.xlu1 %2083  ;;  %v2086_v43 = vpop.permute.xlu0 %2085 }
 0x332   : > { %2159 = vst.msk [vmem:[#allocation4 + $0xa8] sm:$0xff] %vm2137_vm9, %v2084_v55  ;;  %2160 = vst.msk [vmem:[#allocation4 + $0xb0] sm:$0xff] %vm2137_vm9, %v2086_v43 }
 0x333   : > { %2457 = vrot.lane.b32.xlu1 %v2378_v41, %s10122_s21  ;;  %2459 = vrot.lane.b32.xlu0 %v2379_v31, %s10122_s21  ;;  %v14397_v41 = vld [vmem:[#allocation24_spill] sm:$0xff]  ;;  %v14398_v31 = vld [vmem:[#allocation27_spill] sm:$0xff] }
 0x335   : > { %v2088_v13 = vpop.permute.xlu1 %2087  ;;  %v2090_v22 = vpop.permute.xlu0 %2089 }
 0x336   : > { %2161 = vst.msk [vmem:[#allocation4 + $0xb8] sm:$0xff] %vm2137_vm9, %v2088_v13  ;;  %2162 = vst.msk [vmem:[#allocation4 + $0xc0] sm:$0xff] %vm2137_vm9, %v2090_v22 }
 0x337   : > { %2461 = vrot.lane.b32.xlu1 %v2380_v14, %s10122_s21  ;;  %2463 = vrot.lane.b32.xlu0 %v11243_v7, %s10122_s21  ;;  %v3227_v14 = vld [vmem:[#allocation5] sm:$0xff] }
 0x338   : > { %3259 = vst.msk [vmem:[#allocation6] sm:$0xff] %vm452_vm2, %v3227_v14 }
 0x339   : > { %v2092_v46 = vpop.permute.xlu1 %2091  ;;  %v2094_v60 = vpop.permute.xlu0 %2093 }
 0x33a   : > { %2163 = vst.msk [vmem:[#allocation4 + $0xc8] sm:$0xff] %vm2137_vm9, %v2092_v46  ;;  %2164 = vst.msk [vmem:[#allocation4 + $0xd0] sm:$0xff] %vm2137_vm9, %v2094_v60  ;;  %v3228_v46 = vld [vmem:[#allocation5 + $0x8] sm:$0xff]  ;;  %v14399_v60 = vld [vmem:[#allocation29_spill] sm:$0xff] }
 0x33b   : > { %2465 = vrot.lane.b32.xlu1 %v2382_v3, %s10122_s21  ;;  %2467 = vrot.lane.b32.xlu0 %v2383_v37, %s10122_s21  ;;  %v14400_v3 = vld [vmem:[#allocation26_spill] sm:$0xff]  ;;  %3260 = vst.msk [vmem:[#allocation6 + $0x8] sm:$0xff] %vm452_vm2, %v3228_v46 }
 0x33d   : > { %v2096_v59 = vpop.permute.xlu1 %2095  ;;  %v2098_v23 = vpop.permute.xlu0 %2097 }
 0x33e   : > { %2165 = vst.msk [vmem:[#allocation4 + $0xd8] sm:$0xff] %vm2137_vm9, %v2096_v59  ;;  %2166 = vst.msk [vmem:[#allocation4 + $0xe0] sm:$0xff] %vm2137_vm9, %v2098_v23  ;;  %v3229_v23 = vld [vmem:[#allocation5 + $0x18] sm:$0xff] }
 0x33f   : > { %2469 = vrot.lane.b32.xlu1 %v2384_v48, %s10122_s21  ;;  %2471 = vrot.lane.b32.xlu0 %v11318_v20, %s10122_s21  ;;  %v2393_v20 = vld [vmem:[#allocation3 + $0x19a] sm:$0xff]  ;;  %v3230_v48 = vld [vmem:[#allocation5 + $0x20] sm:$0xff]  ;;  %3261 = vst.msk [vmem:[#allocation6 + $0x10] sm:$0xff] %vm452_vm2, %v3229_v23 }
 0x340   : > { %3262 = vst.msk [vmem:[#allocation6 + $0x18] sm:$0xff] %vm452_vm2, %v3230_v48 }
 0x341   : > { %v2100_v7 = vpop.permute.xlu1 %2099  ;;  %v2102_v10 = vpop.permute.xlu0 %2101 }
 0x342   : > { %2167 = vst.msk [vmem:[#allocation4 + $0xe8] sm:$0xff] %vm2137_vm9, %v2100_v7  ;;  %2168 = vst.msk [vmem:[#allocation4 + $0xf0] sm:$0xff] %vm2137_vm9, %v2102_v10  ;;  %v14401_v7 = vld [vmem:[#allocation28_spill] sm:$0xff]  ;;  %v14402_v10 = vld [vmem:[#allocation31_spill] sm:$0xff] }
 0x343   : > { %2473 = vrot.lane.b32.xlu1 %v11307_v0, %s10122_s21  ;;  %2475 = vrot.lane.b32.xlu0 %v11296_v5, %s10122_s21 }
 0x345   : > { %v2104_v17 = vpop.permute.xlu1 %2103  ;;  %v2235_v57 = vpop.permute.xlu0 %2234 }
 0x346   : > { %2169 = vst.msk [vmem:[#allocation4 + $0xf8] sm:$0xff] %vm2137_vm9, %v2104_v17 }
 0x347   : > { %2331 = vst.msk [vmem:[#allocation4] sm:$0xff] %vm2330_vm10, %v2235_v57  ;;  %2477 = vrot.lane.b32.xlu1 %v11269_v49, %s10122_s21  ;;  %2479 = vrot.lane.b32.xlu0 %v11380_v30, %s10122_s21  ;;  %v2394_v30 = vld [vmem:[#allocation3 + $0x1a2] sm:$0xff] }
 0x349   : > { %v2237_v5 = vpop.permute.xlu1 %2236  ;;  %v2239_v0 = vpop.permute.xlu0 %2238 }
 0x34a   : > { %2332 = vst.msk [vmem:[#allocation4 + $0x8] sm:$0xff] %vm2330_vm10, %v2237_v5  ;;  %2333 = vst.msk [vmem:[#allocation4 + $0x10] sm:$0xff] %vm2330_vm10, %v2239_v0  ;;  %v14404_v5 = vld [vmem:[#allocation30_spill] sm:$0xff] }
 0x34b   : > { %2481 = vrot.lane.b32.xlu1 %v11371_v33, %s10122_s21  ;;  %2483 = vrot.lane.b32.xlu0 %v11373_v27, %s10122_s21  ;;  %v3291_v0 = vld [vmem:[#allocation5 + $0x1] sm:$0xff] }
 0x34d   : > { %v2241_v51 = vpop.permute.xlu1 %2240  ;;  %v2243_v32 = vpop.permute.xlu0 %2242 }
 0x34e   : > { %2334 = vst.msk [vmem:[#allocation4 + $0x18] sm:$0xff] %vm2330_vm10, %v2241_v51  ;;  %2335 = vst.msk [vmem:[#allocation4 + $0x20] sm:$0xff] %vm2330_vm10, %v2243_v32 }
 0x34f   : > { %2485 = vrot.lane.b32.xlu1 %v11356_v45, %s10122_s21  ;;  %2487 = vrot.lane.b32.xlu0 %v2393_v20, %s10122_s21 }
 0x351   : > { %v2245_v49 = vpop.permute.xlu1 %2244  ;;  %v2247_v44 = vpop.permute.xlu0 %2246 }
 0x352   : > { %2336 = vst.msk [vmem:[#allocation4 + $0x28] sm:$0xff] %vm2330_vm10, %v2245_v49  ;;  %2337 = vst.msk [vmem:[#allocation4 + $0x30] sm:$0xff] %vm2330_vm10, %v2247_v44  ;;  %v14405_v44 = vld [vmem:[#allocation32_spill] sm:$0xff] }
 0x353   : > { %2489 = vrot.lane.b32.xlu1 %v2394_v30, %s10122_s21  ;;  %3098 = vrot.lane.b32.xlu0 %v10618_v6, %s10123_s14 }
 0x355   : > { %v2249_v27 = vpop.permute.xlu1 %2248  ;;  %v2251_v33 = vpop.permute.xlu0 %2250 }
 0x356   : > { %2338 = vst.msk [vmem:[#allocation4 + $0x38] sm:$0xff] %vm2330_vm10, %v2249_v27  ;;  %2339 = vst.msk [vmem:[#allocation4 + $0x40] sm:$0xff] %vm2330_vm10, %v2251_v33  ;;  %v3292_v27 = vld [vmem:[#allocation5 + $0x9] sm:$0xff]  ;;  %v3293_v33 = vld [vmem:[#allocation5 + $0x19] sm:$0xff] }
 0x357   : > { %3100 = vrot.lane.b32.xlu1 %v10634_v12, %s10123_s14  ;;  %3102 = vrot.lane.b32.xlu0 %v10610_v2, %s10123_s14 }
 0x359   : > { %v2253_v45 = vpop.permute.xlu1 %2252  ;;  %v2255_v39 = vpop.permute.xlu0 %2254 }
 0x35a   : > { %2340 = vst.msk [vmem:[#allocation4 + $0x48] sm:$0xff] %vm2330_vm10, %v2253_v45  ;;  %2341 = vst.msk [vmem:[#allocation4 + $0x50] sm:$0xff] %vm2330_vm10, %v2255_v39 }
 0x35b   : > { %3104 = vrot.lane.b32.xlu1 %v10626_v9, %s10123_s14  ;;  %3106 = vrot.lane.b32.xlu0 %v10650_v18, %s10123_s14  ;;  %v14382_v9 = vld [vmem:[#allocation11_spill] sm:$0xff] }
 0x35d   : > { %v2257_v6 = vpop.permute.xlu1 %2256  ;;  %v2259_v35 = vpop.permute.xlu0 %2258 }
 0x35e   : > { %2342 = vst.msk [vmem:[#allocation4 + $0x58] sm:$0xff] %vm2330_vm10, %v2257_v6  ;;  %2343 = vst.msk [vmem:[#allocation4 + $0x60] sm:$0xff] %vm2330_vm10, %v2259_v35 }
 0x35f   : > { %3108 = vrot.lane.b32.xlu1 %v10664_v24, %s10123_s14  ;;  %3110 = vrot.lane.b32.xlu0 %v10644_v15, %s10123_s14  ;;  %v14383_v15 = vld [vmem:[#allocation13_spill] sm:$0xff]  ;;  %v14384_v24 = vld [vmem:[#allocation10_spill] sm:$0xff] }
 0x361   : > { %v2261_v2 = vpop.permute.xlu1 %2260  ;;  %v2263_v12 = vpop.permute.xlu0 %2262 }
 0x362   : > { %2344 = vst.msk [vmem:[#allocation4 + $0x68] sm:$0xff] %vm2330_vm10, %v2261_v2  ;;  %2345 = vst.msk [vmem:[#allocation4 + $0x70] sm:$0xff] %vm2330_vm10, %v2263_v12  ;;  %v3294_v12 = vld [vmem:[#allocation5 + $0x21] sm:$0xff] }
 0x363   : > { %3112 = vrot.lane.b32.xlu1 %v10656_v21, %s10123_s14  ;;  %3114 = vrot.lane.b32.xlu0 %v14382_v9, %s10123_s14  ;;  %v14385_v21 = vld [vmem:[#allocation12_spill] sm:$0xff] }
 0x365   : > { %v2265_v18 = vpop.permute.xlu1 %2264  ;;  %v2267_v62 = vpop.permute.xlu0 %2266 }
 0x366   : > { %2346 = vst.msk [vmem:[#allocation4 + $0x78] sm:$0xff] %vm2330_vm10, %v2265_v18  ;;  %2347 = vst.msk [vmem:[#allocation4 + $0x80] sm:$0xff] %vm2330_vm10, %v2267_v62 }
 0x367   : > { %3116 = vrot.lane.b32.xlu1 %v14383_v15, %s10123_s14  ;;  %3118 = vrot.lane.b32.xlu0 %v14384_v24, %s10123_s14 }
 0x369   : > { %v2269_v40 = vpop.permute.xlu1 %2268  ;;  %v2271_v61 = vpop.permute.xlu0 %2270 }
 0x36a   : > { %2348 = vst.msk [vmem:[#allocation4 + $0x88] sm:$0xff] %vm2330_vm10, %v2269_v40  ;;  %2349 = vst.msk [vmem:[#allocation4 + $0x90] sm:$0xff] %vm2330_vm10, %v2271_v61 }
 0x36b   : > { %3120 = vrot.lane.b32.xlu1 %v14385_v21, %s10123_s14  ;;  %3122 = vrot.lane.b32.xlu0 %v14386_v52, %s10123_s14 }
 0x36d   : > { %v2273_v4 = vpop.permute.xlu1 %2272  ;;  %v2275_v58 = vpop.permute.xlu0 %2274 }
 0x36e   : > { %2350 = vst.msk [vmem:[#allocation4 + $0x98] sm:$0xff] %vm2330_vm10, %v2273_v4  ;;  %2351 = vst.msk [vmem:[#allocation4 + $0xa0] sm:$0xff] %vm2330_vm10, %v2275_v58 }
 0x36f   : > { %3124 = vrot.lane.b32.xlu1 %v14387_v29, %s10123_s14  ;;  %3126 = vrot.lane.b32.xlu0 %v14388_v11, %s10123_s14 }
 0x371   : > { %v2277_v38 = vpop.permute.xlu1 %2276  ;;  %v2279_v25 = vpop.permute.xlu0 %2278 }
 0x372   : > { %2352 = vst.msk [vmem:[#allocation4 + $0xa8] sm:$0xff] %vm2330_vm10, %v2277_v38  ;;  %2353 = vst.msk [vmem:[#allocation4 + $0xb0] sm:$0xff] %vm2330_vm10, %v2279_v25 }
 0x373   : > { %3128 = vrot.lane.b32.xlu1 %v14389_v56, %s10123_s14  ;;  %3130 = vrot.lane.b32.xlu0 %v14390_v47, %s10123_s14 }
 0x375   : > { %v2281_v53 = vpop.permute.xlu1 %2280  ;;  %v2283_v8 = vpop.permute.xlu0 %2282 }
 0x376   : > { %2354 = vst.msk [vmem:[#allocation4 + $0xb8] sm:$0xff] %vm2330_vm10, %v2281_v53  ;;  %2355 = vst.msk [vmem:[#allocation4 + $0xc0] sm:$0xff] %vm2330_vm10, %v2283_v8 }
 0x377   : > { %3132 = vrot.lane.b32.xlu1 %v14391_v50, %s10123_s14  ;;  %3134 = vrot.lane.b32.xlu0 %v14392_v16, %s10123_s14 }
 0x379   : > { %v2285_v1 = vpop.permute.xlu1 %2284  ;;  %v2287_v42 = vpop.permute.xlu0 %2286 }
 0x37a   : > { %2356 = vst.msk [vmem:[#allocation4 + $0xc8] sm:$0xff] %vm2330_vm10, %v2285_v1  ;;  %2357 = vst.msk [vmem:[#allocation4 + $0xd0] sm:$0xff] %vm2330_vm10, %v2287_v42 }
 0x37b   : > { %3136 = vrot.lane.b32.xlu1 %v14393_v34, %s10123_s14  ;;  %3138 = vrot.lane.b32.xlu0 %v14394_v63, %s10123_s14 }
 0x37d   : > { %v2289_v54 = vpop.permute.xlu1 %2288  ;;  %v2291_v28 = vpop.permute.xlu0 %2290 }
 0x37e   : > { %2358 = vst.msk [vmem:[#allocation4 + $0xd8] sm:$0xff] %vm2330_vm10, %v2289_v54  ;;  %2359 = vst.msk [vmem:[#allocation4 + $0xe0] sm:$0xff] %vm2330_vm10, %v2291_v28 }
 0x37f   : > { %3140 = vrot.lane.b32.xlu1 %v14395_v26, %s10123_s14  ;;  %3142 = vrot.lane.b32.xlu0 %v14396_v19, %s10123_s14 }
 0x381   : > { %v2293_v55 = vpop.permute.xlu1 %2292  ;;  %v2295_v43 = vpop.permute.xlu0 %2294 }
 0x382   : > { %2360 = vst.msk [vmem:[#allocation4 + $0xe8] sm:$0xff] %vm2330_vm10, %v2293_v55  ;;  %2361 = vst.msk [vmem:[#allocation4 + $0xf0] sm:$0xff] %vm2330_vm10, %v2295_v43 }
 0x383   : > { %3144 = vrot.lane.b32.xlu1 %v14397_v41, %s10123_s14  ;;  %3146 = vrot.lane.b32.xlu0 %v14398_v31, %s10123_s14 }
 0x385   : > { %v2297_v13 = vpop.permute.xlu1 %2296  ;;  %v2428_v22 = vpop.permute.xlu0 %2427 }
 0x386   : > { %2362 = vst.msk [vmem:[#allocation4 + $0xf8] sm:$0xff] %vm2330_vm10, %v2297_v13 }
 0x387   : > { %2524 = vst.msk [vmem:[#allocation4] sm:$0xff] %vm2523_vm12, %v2428_v22  ;;  %3148 = vrot.lane.b32.xlu1 %v14399_v60, %s10123_s14  ;;  %3150 = vrot.lane.b32.xlu0 %v14400_v3, %s10123_s14 }
 0x389   : > { %v2430_v37 = vpop.permute.xlu1 %2429  ;;  %v2432_v59 = vpop.permute.xlu0 %2431 }
 0x38a   : > { %2525 = vst.msk [vmem:[#allocation4 + $0x8] sm:$0xff] %vm2523_vm12, %v2430_v37  ;;  %2526 = vst.msk [vmem:[#allocation4 + $0x10] sm:$0xff] %vm2523_vm12, %v2432_v59 }
 0x38b   : > { %3152 = vrot.lane.b32.xlu1 %v14401_v7, %s10123_s14  ;;  %3154 = vrot.lane.b32.xlu0 %v14402_v10, %s10123_s14 }
 0x38d   : > { %v2434_v17 = vpop.permute.xlu1 %2433  ;;  %v2436_v57 = vpop.permute.xlu0 %2435 }
 0x38e   : > { %2527 = vst.msk [vmem:[#allocation4 + $0x18] sm:$0xff] %vm2523_vm12, %v2434_v17  ;;  %2528 = vst.msk [vmem:[#allocation4 + $0x20] sm:$0xff] %vm2523_vm12, %v2436_v57  ;;  %v2556_v32 = vld [vmem:[#allocation4] sm:$0xff] }
 0x38f   : > { %3156 = vrot.lane.b32.xlu1 %v14403_v36, %s10123_s14  ;;  %3158 = vrot.lane.b32.xlu0 %v14404_v5, %s10123_s14 }
 0x391   : > { %v2438_v20 = vpop.permute.xlu1 %2437  ;;  %v2440_v51 = vpop.permute.xlu0 %2439  ;;  %v2557_v30 = vld [vmem:[#allocation4 + $0x8] sm:$0xff]  ;;  %v2558_v6 = vld [vmem:[#allocation4 + $0x10] sm:$0xff] }
 0x392   : > { %2529 = vst.msk [vmem:[#allocation4 + $0x28] sm:$0xff] %vm2523_vm12, %v2438_v20  ;;  %2530 = vst.msk [vmem:[#allocation4 + $0x30] sm:$0xff] %vm2523_vm12, %v2440_v51  ;;  %v2588_v49 = vpack.c.bf16 %v2557_v30, %v2556_v32 }
 0x393   : > { %3160 = vrot.lane.b32.xlu1 %v14405_v44, %s10123_s14  ;;  %3355 = vrot.lane.b32.xlu0 %v3291_v0, %s10114_s28  ;;  %s10129_s14 = smov 56  }
 0x394   : > { %9824 = vmatprep.mubr.msk.bf16.mxu1 %vm2631_vm13, %v2588_v49 }
 0x395   : > { %v2442_v45 = vpop.permute.xlu1 %2441  ;;  %v2444_v39 = vpop.permute.xlu0 %2443  ;;  %v2559_v35 = vld [vmem:[#allocation4 + $0x18] sm:$0xff]  ;;  %v2560_v62 = vld [vmem:[#allocation4 + $0x20] sm:$0xff] }
 0x396   : > { %2531 = vst.msk [vmem:[#allocation4 + $0x38] sm:$0xff] %vm2523_vm12, %v2442_v45  ;;  %2532 = vst.msk [vmem:[#allocation4 + $0x40] sm:$0xff] %vm2523_vm12, %v2444_v39  ;;  %v2589_v2 = vpack.c.bf16 %v2559_v35, %v2558_v6 }
 0x397   : > { %3357 = vrot.lane.b32.xlu1 %v3292_v27, %s10114_s28  ;;  %3359 = vrot.lane.b32.xlu0 %v3293_v33, %s10114_s28 }
 0x398   : > { %9825 = vmatmul.mubr.msk.bf16.vlgmr.msra.gmra.mxu1 %vm2631_vm13, %v2589_v2 }
 0x399   : > { %v2446_v9 = vpop.permute.xlu1 %2445  ;;  %v2448_v18 = vpop.permute.xlu0 %2447  ;;  %v2561_v15 = vld [vmem:[#allocation4 + $0x28] sm:$0xff]  ;;  %v2562_v21 = vld [vmem:[#allocation4 + $0x30] sm:$0xff] }
 0x39a   : > { %2533 = vst.msk [vmem:[#allocation4 + $0x48] sm:$0xff] %vm2523_vm12, %v2446_v9  ;;  %2534 = vst.msk [vmem:[#allocation4 + $0x50] sm:$0xff] %vm2523_vm12, %v2448_v18  ;;  %v2590_v24 = vpack.c.bf16 %v2561_v15, %v2560_v62 }
 0x39b   : > { %3361 = vrot.lane.b32.xlu1 %v3294_v12, %s10114_s28 }
 0x39c   : > { %9828 = vmatprep.mubr.msk.bf16.mxu1 %vm2631_vm13, %v2590_v24 }
 0x39d   : > { %v2450_v40 = vpop.permute.xlu1 %2449  ;;  %v2452_v61 = vpop.permute.xlu0 %2451  ;;  %v2563_v52 = vld [vmem:[#allocation4 + $0x38] sm:$0xff]  ;;  %v2564_v11 = vld [vmem:[#allocation4 + $0x40] sm:$0xff] }
 0x39e   : > { %2535 = vst.msk [vmem:[#allocation4 + $0x58] sm:$0xff] %vm2523_vm12, %v2450_v40  ;;  %2536 = vst.msk [vmem:[#allocation4 + $0x60] sm:$0xff] %vm2523_vm12, %v2452_v61  ;;  %v2591_v4 = vpack.c.bf16 %v2563_v52, %v2562_v21 }
 0x3a0   : > { %9829 = vmatmul.mubr.msk.bf16.gmra.mxu1 %vm2631_vm13, %v2591_v4 }
 0x3a1   : > { %v2454_v58 = vpop.permute.xlu1 %2453  ;;  %v2456_v29 = vpop.permute.xlu0 %2455  ;;  %v2565_v38 = vld [vmem:[#allocation4 + $0x48] sm:$0xff]  ;;  %v2566_v53 = vld [vmem:[#allocation4 + $0x50] sm:$0xff] }
 0x3a2   : > { %2537 = vst.msk [vmem:[#allocation4 + $0x68] sm:$0xff] %vm2523_vm12, %v2454_v58  ;;  %2538 = vst.msk [vmem:[#allocation4 + $0x70] sm:$0xff] %vm2523_vm12, %v2456_v29  ;;  %v2592_v25 = vpack.c.bf16 %v2565_v38, %v2564_v11 }
 0x3a4   : > { %9832 = vmatprep.mubr.msk.bf16.mxu1 %vm2631_vm13, %v2592_v25 }
 0x3a5   : > { %v2458_v56 = vpop.permute.xlu1 %2457  ;;  %v2460_v47 = vpop.permute.xlu0 %2459  ;;  %v2567_v8 = vld [vmem:[#allocation4 + $0x58] sm:$0xff]  ;;  %v2568_v42 = vld [vmem:[#allocation4 + $0x60] sm:$0xff] }
 0x3a6   : > { %2539 = vst.msk [vmem:[#allocation4 + $0x78] sm:$0xff] %vm2523_vm12, %v2458_v56  ;;  %2540 = vst.msk [vmem:[#allocation4 + $0x80] sm:$0xff] %vm2523_vm12, %v2460_v47  ;;  %v2593_v50 = vpack.c.bf16 %v2567_v8, %v2566_v53 }
 0x3a8   : > { %9833 = vmatmul.mubr.msk.bf16.gmra.mxu1 %vm2631_vm13, %v2593_v50 }
 0x3a9   : > { %v2462_v16 = vpop.permute.xlu1 %2461  ;;  %v2464_v1 = vpop.permute.xlu0 %2463  ;;  %v2569_v34 = vld [vmem:[#allocation4 + $0x68] sm:$0xff]  ;;  %v2570_v26 = vld [vmem:[#allocation4 + $0x70] sm:$0xff] }
 0x3aa   : > { %2541 = vst.msk [vmem:[#allocation4 + $0x88] sm:$0xff] %vm2523_vm12, %v2462_v16  ;;  %2542 = vst.msk [vmem:[#allocation4 + $0x90] sm:$0xff] %vm2523_vm12, %v2464_v1  ;;  %v2594_v63 = vpack.c.bf16 %v2569_v34, %v2568_v42 }
 0x3ac   : > { %9836 = vmatprep.mubr.msk.bf16.mxu1 %vm2631_vm13, %v2594_v63 }
 0x3ad   : > { %v2466_v54 = vpop.permute.xlu1 %2465  ;;  %v2468_v28 = vpop.permute.xlu0 %2467  ;;  %v2571_v19 = vld [vmem:[#allocation4 + $0x78] sm:$0xff]  ;;  %v2572_v31 = vld [vmem:[#allocation4 + $0x80] sm:$0xff] }
 0x3ae   : > { %2543 = vst.msk [vmem:[#allocation4 + $0x98] sm:$0xff] %vm2523_vm12, %v2466_v54  ;;  %2544 = vst.msk [vmem:[#allocation4 + $0xa0] sm:$0xff] %vm2523_vm12, %v2468_v28  ;;  %v2595_v55 = vpack.c.bf16 %v2571_v19, %v2570_v26 }
 0x3b0   : > { %9837 = vmatmul.mubr.msk.bf16.gmra.mxu1 %vm2631_vm13, %v2595_v55 }
 0x3b1   : > { %v2470_v43 = vpop.permute.xlu1 %2469  ;;  %v2472_v41 = vpop.permute.xlu0 %2471  ;;  %v2573_v13 = vld [vmem:[#allocation4 + $0x88] sm:$0xff]  ;;  %v2574_v60 = vld [vmem:[#allocation4 + $0x90] sm:$0xff] }
 0x3b2   : > { %2545 = vst.msk [vmem:[#allocation4 + $0xa8] sm:$0xff] %vm2523_vm12, %v2470_v43  ;;  %2546 = vst.msk [vmem:[#allocation4 + $0xb0] sm:$0xff] %vm2523_vm12, %v2472_v41  ;;  %v2596_v22 = vpack.c.bf16 %v2573_v13, %v2572_v31 }
 0x3b4   : > { %9840 = vmatprep.mubr.msk.bf16.mxu1 %vm2631_vm13, %v2596_v22 }
 0x3b5   : > { %v2474_v14 = vpop.permute.xlu1 %2473  ;;  %v2476_v46 = vpop.permute.xlu0 %2475  ;;  %v2575_v3 = vld [vmem:[#allocation4 + $0x98] sm:$0xff]  ;;  %v2576_v48 = vld [vmem:[#allocation4 + $0xa0] sm:$0xff] }
 0x3b6   : > { %2547 = vst.msk [vmem:[#allocation4 + $0xb8] sm:$0xff] %vm2523_vm12, %v2474_v14  ;;  %2548 = vst.msk [vmem:[#allocation4 + $0xc0] sm:$0xff] %vm2523_vm12, %v2476_v46  ;;  %v2597_v37 = vpack.c.bf16 %v2575_v3, %v2574_v60 }
 0x3b8   : > { %9841 = vmatmul.mubr.msk.bf16.gmra.mxu1 %vm2631_vm13, %v2597_v37 }
 0x3b9   : > { %v2478_v59 = vpop.permute.xlu1 %2477  ;;  %v2480_v23 = vpop.permute.xlu0 %2479  ;;  %v2577_v7 = vld [vmem:[#allocation4 + $0xa8] sm:$0xff]  ;;  %v2578_v36 = vld [vmem:[#allocation4 + $0xb0] sm:$0xff] }
 0x3ba   : > { %2549 = vst.msk [vmem:[#allocation4 + $0xc8] sm:$0xff] %vm2523_vm12, %v2478_v59  ;;  %2550 = vst.msk [vmem:[#allocation4 + $0xd0] sm:$0xff] %vm2523_vm12, %v2480_v23  ;;  %v2598_v10 = vpack.c.bf16 %v2577_v7, %v2576_v48 }
 0x3bc   : > { %9844 = vmatprep.mubr.msk.bf16.mxu1 %vm2631_vm13, %v2598_v10 }
 0x3bd   : > { %v2482_v17 = vpop.permute.xlu1 %2481  ;;  %v2484_v57 = vpop.permute.xlu0 %2483  ;;  %v2579_v5 = vld [vmem:[#allocation4 + $0xb8] sm:$0xff]  ;;  %v2580_v32 = vld [vmem:[#allocation4 + $0xc0] sm:$0xff] }
 0x3be   : > { %2551 = vst.msk [vmem:[#allocation4 + $0xd8] sm:$0xff] %vm2523_vm12, %v2482_v17  ;;  %2552 = vst.msk [vmem:[#allocation4 + $0xe0] sm:$0xff] %vm2523_vm12, %v2484_v57  ;;  %v2599_v0 = vpack.c.bf16 %v2579_v5, %v2578_v36 }
 0x3c0   : > { %9845 = vmatmul.mubr.msk.bf16.gmra.mxu1 %vm2631_vm13, %v2599_v0 }
 0x3c1   : > { %v2486_v20 = vpop.permute.xlu1 %2485  ;;  %v2488_v51 = vpop.permute.xlu0 %2487  ;;  %v2581_v30 = vld [vmem:[#allocation4 + $0xc8] sm:$0xff]  ;;  %v2582_v33 = vld [vmem:[#allocation4 + $0xd0] sm:$0xff] }
 0x3c2   : > { %2553 = vst.msk [vmem:[#allocation4 + $0xe8] sm:$0xff] %vm2523_vm12, %v2486_v20  ;;  %2554 = vst.msk [vmem:[#allocation4 + $0xf0] sm:$0xff] %vm2523_vm12, %v2488_v51  ;;  %v2600_v49 = vpack.c.bf16 %v2581_v30, %v2580_v32 }
 0x3c4   : > { %9848 = vmatprep.mubr.msk.bf16.mxu1 %vm2631_vm13, %v2600_v49 }
 0x3c5   : > { %v2490_v44 = vpop.permute.xlu1 %2489  ;;  %v3099_v27 = vpop.permute.xlu0 %3098  ;;  %v2583_v45 = vld [vmem:[#allocation4 + $0xd8] sm:$0xff]  ;;  %v2584_v2 = vld [vmem:[#allocation4 + $0xe0] sm:$0xff] }
 0x3c6   : > { %2555 = vst.msk [vmem:[#allocation4 + $0xf8] sm:$0xff] %vm2523_vm12, %v2490_v44  ;;  %v2601_v39 = vpack.c.bf16 %v2583_v45, %v2582_v33 }
 0x3c7   : > { %3195 = vst.msk [vmem:[#allocation5 + $0x32] sm:$0xff] %vm452_vm2, %v3099_v27 }
 0x3c8   : > { %9849 = vmatmul.mubr.msk.bf16.gmra.mxu1 %vm2631_vm13, %v2601_v39 }
 0x3c9   : > { %v3101_v6 = vpop.permute.xlu1 %3100  ;;  %v3103_v35 = vpop.permute.xlu0 %3102  ;;  %v2585_v12 = vld [vmem:[#allocation4 + $0xe8] sm:$0xff]  ;;  %v2586_v18 = vld [vmem:[#allocation4 + $0xf0] sm:$0xff] }
 0x3ca   : > { %3196 = vst.msk [vmem:[#allocation5 + $0x3a] sm:$0xff] %vm452_vm2, %v3101_v6  ;;  %3197 = vst.msk [vmem:[#allocation5 + $0x4a] sm:$0xff] %vm452_vm2, %v3103_v35  ;;  %v2602_v9 = vpack.c.bf16 %v2585_v12, %v2584_v2 }
 0x3cc   : > { %9852 = vmatprep.mubr.msk.bf16.mxu1 %vm2631_vm13, %v2602_v9 }
 0x3cd   : > { %v3105_v62 = vpop.permute.xlu1 %3104  ;;  %v3107_v15 = vpop.permute.xlu0 %3106  ;;  %v2587_v40 = vld [vmem:[#allocation4 + $0xf8] sm:$0xff] }
 0x3ce   : > { %v3295_v24 = vld [vmem:[#allocation5 + $0x31] sm:$0xff]  ;;  %3198 = vst.msk [vmem:[#allocation5 + $0x52] sm:$0xff] %vm452_vm2, %v3105_v62  ;;  %3199 = vst.msk [vmem:[#allocation5 + $0x62] sm:$0xff] %vm452_vm2, %v3107_v15  ;;  %v2603_v21 = vpack.c.bf16 %v2587_v40, %v2586_v18 }
 0x3cf   : > { %v3231_v61 = vld [vmem:[#allocation5 + $0x30] sm:$0xff]  ;;  %3363 = vrot.lane.b32.xlu0 %v3295_v24, %s10114_s28 }
 0x3d0   : > { %3263 = vst.msk [vmem:[#allocation6 + $0x20] sm:$0xff] %vm452_vm2, %v3231_v61  ;;  %9853 = vmatmul.mubr.msk.bf16.gmra.mxu1 %vm2631_vm13, %v2603_v21  ;;  %vm7306_vm13 = vcmask 720544  }
 0x3d1   : > { %v3109_v52 = vpop.permute.xlu1 %3108  ;;  %v3111_v4 = vpop.permute.xlu0 %3110  ;;  %v3296_v58 = vld [vmem:[#allocation5 + $0x39] sm:$0xff]  ;;  %v3297_v29 = vld [vmem:[#allocation5 + $0x49] sm:$0xff] }
 0x3d2   : > { %v3232_v11 = vld [vmem:[#allocation5 + $0x38] sm:$0xff]  ;;  %3200 = vst.msk [vmem:[#allocation5 + $0x6a] sm:$0xff] %vm452_vm2, %v3109_v52  ;;  %3201 = vst.msk [vmem:[#allocation5 + $0x7a] sm:$0xff] %vm452_vm2, %v3111_v4  ;;  %3365 = vrot.lane.b32.xlu1 %v3296_v58, %s10114_s28  ;;  %v3233_v38 = vld [vmem:[#allocation5 + $0x48] sm:$0xff] }
 0x3d3   : > { %3367 = vrot.lane.b32.xlu0 %v3297_v29, %s10114_s28  ;;  %3264 = vst.msk [vmem:[#allocation6 + $0x28] sm:$0xff] %vm452_vm2, %v3232_v11  ;;  %3265 = vst.msk [vmem:[#allocation6 + $0x30] sm:$0xff] %vm452_vm2, %v3233_v38 }
 0x3d5   : > { %v3113_v25 = vpop.permute.xlu1 %3112  ;;  %v3115_v56 = vpop.permute.xlu0 %3114  ;;  %v3298_v47 = vld [vmem:[#allocation5 + $0x51] sm:$0xff]  ;;  %v3299_v53 = vld [vmem:[#allocation5 + $0x61] sm:$0xff] }
 0x3d6   : > { %v3234_v8 = vld [vmem:[#allocation5 + $0x50] sm:$0xff]  ;;  %3202 = vst.msk [vmem:[#allocation5 + $0x82] sm:$0xff] %vm452_vm2, %v3113_v25  ;;  %3203 = vst.msk [vmem:[#allocation5 + $0x92] sm:$0xff] %vm452_vm2, %v3115_v56  ;;  %3369 = vrot.lane.b32.xlu1 %v3298_v47, %s10114_s28  ;;  %v3235_v50 = vld [vmem:[#allocation5 + $0x60] sm:$0xff] }
 0x3d7   : > { %3371 = vrot.lane.b32.xlu0 %v3299_v53, %s10114_s28  ;;  %3266 = vst.msk [vmem:[#allocation6 + $0x38] sm:$0xff] %vm452_vm2, %v3234_v8  ;;  %3267 = vst.msk [vmem:[#allocation6 + $0x40] sm:$0xff] %vm452_vm2, %v3235_v50  ;;  %v11968_v53 = vld [vmem:[%s14322_s6] ss:$0 sm:$0xff] }
 0x3d9   : > { %v3117_v16 = vpop.permute.xlu1 %3116  ;;  %v3119_v1 = vpop.permute.xlu0 %3118  ;;  %v3300_v42 = vld [vmem:[#allocation5 + $0x69] sm:$0xff]  ;;  %v3301_v34 = vld [vmem:[#allocation5 + $0x79] sm:$0xff] }
 0x3da   : > { %v3236_v63 = vld [vmem:[#allocation5 + $0x68] sm:$0xff]  ;;  %3204 = vst.msk [vmem:[#allocation5 + $0x9a] sm:$0xff] %vm452_vm2, %v3117_v16  ;;  %3205 = vst.msk [vmem:[#allocation5 + $0xaa] sm:$0xff] %vm452_vm2, %v3119_v1  ;;  %3373 = vrot.lane.b32.xlu1 %v3300_v42, %s10114_s28  ;;  %v3237_v54 = vld [vmem:[#allocation5 + $0x78] sm:$0xff] }
 0x3db   : > { %3375 = vrot.lane.b32.xlu0 %v3301_v34, %s10114_s28  ;;  %3268 = vst.msk [vmem:[#allocation6 + $0x48] sm:$0xff] %vm452_vm2, %v3236_v63  ;;  %3269 = vst.msk [vmem:[#allocation6 + $0x50] sm:$0xff] %vm452_vm2, %v3237_v54 }
 0x3dd   : > { %v3121_v28 = vpop.permute.xlu1 %3120  ;;  %v3123_v26 = vpop.permute.xlu0 %3122  ;;  %v3302_v19 = vld [vmem:[#allocation5 + $0x81] sm:$0xff]  ;;  %v11854_v43 = vld [vmem:[#allocation5 + $0x90] sm:$0xff] }
 0x3de   : > { %v3238_v55 = vld [vmem:[#allocation5 + $0x80] sm:$0xff]  ;;  %3206 = vst.msk [vmem:[#allocation5 + $0xb2] sm:$0xff] %vm452_vm2, %v3121_v28  ;;  %3207 = vst.msk [vmem:[#allocation5 + $0xc2] sm:$0xff] %vm452_vm2, %v3123_v26  ;;  %3377 = vrot.lane.b32.xlu1 %v3302_v19, %s10114_s28 }
 0x3df   : > { %3270 = vst.msk [vmem:[#allocation6 + $0x58] sm:$0xff] %vm452_vm2, %v3238_v55  ;;  %3271 = vst.msk [vmem:[#allocation6 + $0x60] sm:$0xff] %vm452_vm2, %v11854_v43 }
 0x3e1   : > { %v3125_v41 = vpop.permute.xlu1 %3124  ;;  %v3127_v31 = vpop.permute.xlu0 %3126  ;;  %v11860_v13 = vld [vmem:[#allocation5 + $0x98] sm:$0xff]  ;;  %v11862_v22 = vld [vmem:[#allocation5 + $0xa8] sm:$0xff] }
 0x3e2   : > { %3208 = vst.msk [vmem:[#allocation5 + $0xca] sm:$0xff] %vm452_vm2, %v3125_v41  ;;  %3209 = vst.msk [vmem:[#allocation5 + $0xda] sm:$0xff] %vm452_vm2, %v3127_v31 }
 0x3e3   : > { %3272 = vst.msk [vmem:[#allocation6 + $0x68] sm:$0xff] %vm452_vm2, %v11860_v13  ;;  %3273 = vst.msk [vmem:[#allocation6 + $0x70] sm:$0xff] %vm452_vm2, %v11862_v22 }
 0x3e5   : > { %v3129_v14 = vpop.permute.xlu1 %3128  ;;  %v3131_v46 = vpop.permute.xlu0 %3130  ;;  %v11870_v60 = vld [vmem:[#allocation5 + $0xb0] sm:$0xff]  ;;  %v11872_v3 = vld [vmem:[#allocation5 + $0xc0] sm:$0xff] }
 0x3e6   : > { %3210 = vst.msk [vmem:[#allocation5 + $0xe2] sm:$0xff] %vm452_vm2, %v3129_v14  ;;  %3211 = vst.msk [vmem:[#allocation5 + $0xf2] sm:$0xff] %vm452_vm2, %v3131_v46 }
 0x3e7   : > { %3274 = vst.msk [vmem:[#allocation6 + $0x78] sm:$0xff] %vm452_vm2, %v11870_v60  ;;  %3275 = vst.msk [vmem:[#allocation6 + $0x80] sm:$0xff] %vm452_vm2, %v11872_v3 }
 0x3e9   : > { %v3133_v37 = vpop.permute.xlu1 %3132  ;;  %v3135_v59 = vpop.permute.xlu0 %3134  ;;  %v11880_v23 = vld [vmem:[#allocation5 + $0xc8] sm:$0xff]  ;;  %v11882_v48 = vld [vmem:[#allocation5 + $0xd8] sm:$0xff] }
 0x3ea   : > { %3212 = vst.msk [vmem:[#allocation5 + $0xfa] sm:$0xff] %vm452_vm2, %v3133_v37  ;;  %3213 = vst.msk [vmem:[#allocation5 + $0x10a] sm:$0xff] %vm452_vm2, %v3135_v59 }
 0x3eb   : > { %3276 = vst.msk [vmem:[#allocation6 + $0x88] sm:$0xff] %vm452_vm2, %v11880_v23  ;;  %3277 = vst.msk [vmem:[#allocation6 + $0x90] sm:$0xff] %vm452_vm2, %v11882_v48 }
 0x3ed   : > { %v3137_v7 = vpop.permute.xlu1 %3136  ;;  %v3139_v10 = vpop.permute.xlu0 %3138  ;;  %v11890_v17 = vld [vmem:[#allocation5 + $0xe0] sm:$0xff]  ;;  %v11892_v57 = vld [vmem:[#allocation5 + $0xf0] sm:$0xff] }
 0x3ee   : > { %3214 = vst.msk [vmem:[#allocation5 + $0x112] sm:$0xff] %vm452_vm2, %v3137_v7  ;;  %3215 = vst.msk [vmem:[#allocation5 + $0x122] sm:$0xff] %vm452_vm2, %v3139_v10 }
 0x3ef   : > { %3278 = vst.msk [vmem:[#allocation6 + $0x98] sm:$0xff] %vm452_vm2, %v11890_v17  ;;  %3279 = vst.msk [vmem:[#allocation6 + $0xa0] sm:$0xff] %vm452_vm2, %v11892_v57 }
 0x3f1   : > { %v3141_v36 = vpop.permute.xlu1 %3140  ;;  %v3143_v5 = vpop.permute.xlu0 %3142  ;;  %v11900_v0 = vld [vmem:[#allocation5 + $0xf8] sm:$0xff]  ;;  %v11902_v20 = vld [vmem:[#allocation5 + $0x108] sm:$0xff] }
 0x3f2   : > { %3216 = vst.msk [vmem:[#allocation5 + $0x12a] sm:$0xff] %vm452_vm2, %v3141_v36  ;;  %3217 = vst.msk [vmem:[#allocation5 + $0x13a] sm:$0xff] %vm452_vm2, %v3143_v5 }
 0x3f3   : > { %3280 = vst.msk [vmem:[#allocation6 + $0xa8] sm:$0xff] %vm452_vm2, %v11900_v0  ;;  %3281 = vst.msk [vmem:[#allocation6 + $0xb0] sm:$0xff] %vm452_vm2, %v11902_v20 }
 0x3f5   : > { %v3145_v51 = vpop.permute.xlu1 %3144  ;;  %v3147_v32 = vpop.permute.xlu0 %3146  ;;  %v11910_v30 = vld [vmem:[#allocation5 + $0x110] sm:$0xff]  ;;  %v11912_v49 = vld [vmem:[#allocation5 + $0x120] sm:$0xff] }
 0x3f6   : > { %3218 = vst.msk [vmem:[#allocation5 + $0x142] sm:$0xff] %vm452_vm2, %v3145_v51  ;;  %3219 = vst.msk [vmem:[#allocation5 + $0x152] sm:$0xff] %vm452_vm2, %v3147_v32 }
 0x3f7   : > { %3282 = vst.msk [vmem:[#allocation6 + $0xb8] sm:$0xff] %vm452_vm2, %v11910_v30  ;;  %3283 = vst.msk [vmem:[#allocation6 + $0xc0] sm:$0xff] %vm452_vm2, %v11912_v49 }
 0x3f9   : > { %v3149_v44 = vpop.permute.xlu1 %3148  ;;  %v3151_v27 = vpop.permute.xlu0 %3150  ;;  %v11920_v33 = vld [vmem:[#allocation5 + $0x128] sm:$0xff]  ;;  %v11922_v45 = vld [vmem:[#allocation5 + $0x138] sm:$0xff] }
 0x3fa   : > { %3220 = vst.msk [vmem:[#allocation5 + $0x15a] sm:$0xff] %vm452_vm2, %v3149_v44  ;;  %3221 = vst.msk [vmem:[#allocation5 + $0x16a] sm:$0xff] %vm452_vm2, %v3151_v27 }
 0x3fb   : > { %3284 = vst.msk [vmem:[#allocation6 + $0xc8] sm:$0xff] %vm452_vm2, %v11920_v33  ;;  %3285 = vst.msk [vmem:[#allocation6 + $0xd0] sm:$0xff] %vm452_vm2, %v11922_v45 }
 0x3fd   : > { %v3153_v39 = vpop.permute.xlu1 %3152  ;;  %v3155_v6 = vpop.permute.xlu0 %3154  ;;  %v11930_v35 = vld [vmem:[#allocation5 + $0x140] sm:$0xff]  ;;  %v11932_v2 = vld [vmem:[#allocation5 + $0x150] sm:$0xff] }
 0x3fe   : > { %3222 = vst.msk [vmem:[#allocation5 + $0x172] sm:$0xff] %vm452_vm2, %v3153_v39  ;;  %3223 = vst.msk [vmem:[#allocation5 + $0x182] sm:$0xff] %vm452_vm2, %v3155_v6 }
 0x3ff   : > { %3286 = vst.msk [vmem:[#allocation6 + $0xd8] sm:$0xff] %vm452_vm2, %v11930_v35  ;;  %3287 = vst.msk [vmem:[#allocation6 + $0xe0] sm:$0xff] %vm452_vm2, %v11932_v2 }
 0x401   : > { %v3157_v12 = vpop.permute.xlu1 %3156  ;;  %v3159_v9 = vpop.permute.xlu0 %3158  ;;  %v11940_v18 = vld [vmem:[#allocation5 + $0x158] sm:$0xff]  ;;  %v11942_v62 = vld [vmem:[#allocation5 + $0x168] sm:$0xff] }
 0x402   : > { %3224 = vst.msk [vmem:[#allocation5 + $0x18a] sm:$0xff] %vm452_vm2, %v3157_v12  ;;  %3225 = vst.msk [vmem:[#allocation5 + $0x19a] sm:$0xff] %vm452_vm2, %v3159_v9 }
 0x403   : > { %3288 = vst.msk [vmem:[#allocation6 + $0xe8] sm:$0xff] %vm452_vm2, %v11940_v18  ;;  %3289 = vst.msk [vmem:[#allocation6 + $0xf0] sm:$0xff] %vm452_vm2, %v11942_v62 }
 0x405   : > { %v3161_v15 = vpop.permute.xlu1 %3160  ;;  %v3356_v24 = vpop.permute.xlu0 %3355  ;;  %v11948_v40 = vld [vmem:[#allocation5 + $0x170] sm:$0xff] }
 0x406   : > { %3226 = vst.msk [vmem:[#allocation5 + $0x1a2] sm:$0xff] %vm452_vm2, %v3161_v15  ;;  %3290 = vst.msk [vmem:[#allocation6 + $0xf8] sm:$0xff] %vm452_vm2, %v11948_v40 }
 0x407   : > { %3451 = vst.msk [vmem:[#allocation6] sm:$0xff] %vm1171_vm3, %v3356_v24 }
 0x409   : > { %v3358_v61 = vpop.permute.xlu1 %3357  ;;  %v3360_v21 = vpop.permute.xlu0 %3359 }
 0x40a   : > { %3452 = vst.msk [vmem:[#allocation6 + $0x8] sm:$0xff] %vm1171_vm3, %v3358_v61  ;;  %3453 = vst.msk [vmem:[#allocation6 + $0x10] sm:$0xff] %vm1171_vm3, %v3360_v21 }
 0x40d   : > { %v3362_v52 = vpop.permute.xlu1 %3361 }
 0x40e   : > { %3454 = vst.msk [vmem:[#allocation6 + $0x18] sm:$0xff] %vm1171_vm3, %v3362_v52 }
 0x441   : > { %v3364_v4 = vpop.permute.xlu0 %3363 }
 0x442   : > { %3455 = vst.msk [vmem:[#allocation6 + $0x20] sm:$0xff] %vm1171_vm3, %v3364_v4 }
 0x444   : > { %v3366_v58 = vpop.permute.xlu1 %3365 }
 0x445   : > { %v3368_v29 = vpop.permute.xlu0 %3367  ;;  %3456 = vst.msk [vmem:[#allocation6 + $0x28] sm:$0xff] %vm1171_vm3, %v3366_v58 }
 0x446   : > { %3457 = vst.msk [vmem:[#allocation6 + $0x30] sm:$0xff] %vm1171_vm3, %v3368_v29 }
 0x448   : > { %v3370_v11 = vpop.permute.xlu1 %3369 }
 0x449   : > { %v3372_v38 = vpop.permute.xlu0 %3371  ;;  %3458 = vst.msk [vmem:[#allocation6 + $0x38] sm:$0xff] %vm1171_vm3, %v3370_v11 }
 0x44a   : > { %3459 = vst.msk [vmem:[#allocation6 + $0x40] sm:$0xff] %vm1171_vm3, %v3372_v38 }
 0x44c   : > { %v3374_v25 = vpop.permute.xlu1 %3373 }
 0x44d   : > { %v3376_v56 = vpop.permute.xlu0 %3375  ;;  %3460 = vst.msk [vmem:[#allocation6 + $0x48] sm:$0xff] %vm1171_vm3, %v3374_v25 }
 0x44e   : > { %3461 = vst.msk [vmem:[#allocation6 + $0x50] sm:$0xff] %vm1171_vm3, %v3376_v56 }
 0x450   : > { %v3378_v47 = vpop.permute.xlu1 %3377 }
 0x451   : > { %3462 = vst.msk [vmem:[#allocation6 + $0x58] sm:$0xff] %vm1171_vm3, %v3378_v47 }
 0x458   : > { %v9826_v8 = vpop.f32.mrf.mxu1 }
 0x459   : > { %v2726_v50 = vadd.f32 %v9826_v8, %v11968_v53 }
 0x45a   : > { %v2717_v16 = vpop.f32.mrf.mxu1 }
 0x45b   : > { %v2846_v1 = vmax.f32 %v2726_v50, 0.0  ;;  %v2718_v42 = vadd.f32 %v11968_v53, %v2717_v16 }
 0x45c   : > { %v9827_v34 = vpop.f32.mrf.mxu1 }
 0x45d   : > { %v2729_v63 = vadd.f32 %v9827_v34, %v11968_v53  ;;  %2912 = vrot.lane.b32.xlu0 %v2846_v1, %s10115_s29  ;;  %v2844_v28 = vmax.f32 %v2718_v42, 0.0 }
 0x45e   : > { %v2720_v54 = vpop.f32.mrf.mxu1 }
 0x45f   : > { %v2847_v26 = vmax.f32 %v2729_v63, 0.0  ;;  %v2721_v19 = vadd.f32 %v11968_v53, %v2720_v54 }
 0x460   : > { %v9830_v55 = vpop.f32.mrf.mxu1 }
 0x461   : > { %v2742_v41 = vadd.f32 %v9830_v55, %v11968_v53  ;;  %2914 = vrot.lane.b32.xlu1 %v2847_v26, %s10115_s29  ;;  %2908 = vrot.lane.b32.xlu0 %v2844_v28, %s10115_s29  ;;  %v2845_v14 = vmax.f32 %v2721_v19, 0.0 }
 0x462   : > { %v2733_v31 = vpop.f32.mrf.mxu1 }
 0x463   : > { %v2850_v46 = vmax.f32 %v2742_v41, 0.0  ;;  %v2734_v37 = vadd.f32 %v11968_v53, %v2733_v31 }
 0x464   : > { %v9831_v59 = vpop.f32.mrf.mxu1 }
 0x465   : > { %v2745_v7 = vadd.f32 %v9831_v59, %v11968_v53  ;;  %2910 = vrot.lane.b32.xlu1 %v2845_v14, %s10115_s29  ;;  %2920 = vrot.lane.b32.xlu0 %v2850_v46, %s10115_s29  ;;  %v2848_v36 = vmax.f32 %v2734_v37, 0.0 }
 0x466   : > { %v2736_v10 = vpop.f32.mrf.mxu1 }
 0x467   : > { %v2851_v5 = vmax.f32 %v2745_v7, 0.0  ;;  %v2737_v51 = vadd.f32 %v11968_v53, %v2736_v10 }
 0x468   : > { %v9834_v32 = vpop.f32.mrf.mxu1 }
 0x469   : > { %v2758_v44 = vadd.f32 %v9834_v32, %v11968_v53  ;;  %2922 = vrot.lane.b32.xlu1 %v2851_v5, %s10115_s29  ;;  %2916 = vrot.lane.b32.xlu0 %v2848_v36, %s10115_s29  ;;  %v2849_v39 = vmax.f32 %v2737_v51, 0.0 }
 0x46a   : > { %v2749_v27 = vpop.f32.mrf.mxu1 }
 0x46b   : > { %v2854_v6 = vmax.f32 %v2758_v44, 0.0  ;;  %v2750_v12 = vadd.f32 %v11968_v53, %v2749_v27 }
 0x46c   : > { %v9835_v9 = vpop.f32.mrf.mxu1 }
 0x46d   : > { %v2761_v15 = vadd.f32 %v9835_v9, %v11968_v53  ;;  %2918 = vrot.lane.b32.xlu1 %v2849_v39, %s10115_s29  ;;  %2928 = vrot.lane.b32.xlu0 %v2854_v6, %s10115_s29  ;;  %v2852_v61 = vmax.f32 %v2750_v12, 0.0 }
 0x46e   : > { %v2752_v24 = vpop.f32.mrf.mxu1 }
 0x46f   : > { %v2855_v21 = vmax.f32 %v2761_v15, 0.0  ;;  %v2753_v52 = vadd.f32 %v11968_v53, %v2752_v24 }
 0x470   : > { %v9838_v4 = vpop.f32.mrf.mxu1 }
 0x471   : > { %v2774_v58 = vadd.f32 %v9838_v4, %v11968_v53  ;;  %2930 = vrot.lane.b32.xlu1 %v2855_v21, %s10115_s29  ;;  %2924 = vrot.lane.b32.xlu0 %v2852_v61, %s10115_s29  ;;  %v2853_v11 = vmax.f32 %v2753_v52, 0.0 }
 0x472   : > { %v2765_v29 = vpop.f32.mrf.mxu1 }
 0x473   : > { %v2858_v38 = vmax.f32 %v2774_v58, 0.0  ;;  %v2766_v25 = vadd.f32 %v11968_v53, %v2765_v29 }
 0x474   : > { %v9839_v56 = vpop.f32.mrf.mxu1 }
 0x475   : > { %v2777_v47 = vadd.f32 %v9839_v56, %v11968_v53  ;;  %2926 = vrot.lane.b32.xlu1 %v2853_v11, %s10115_s29  ;;  %2936 = vrot.lane.b32.xlu0 %v2858_v38, %s10115_s29  ;;  %v2856_v50 = vmax.f32 %v2766_v25, 0.0 }
 0x476   : > { %v2768_v8 = vpop.f32.mrf.mxu1 }
 0x477   : > { %v2859_v16 = vmax.f32 %v2777_v47, 0.0  ;;  %v2769_v1 = vadd.f32 %v11968_v53, %v2768_v8 }
 0x478   : > { %v9842_v42 = vpop.f32.mrf.mxu1 }
 0x479   : > { %v2790_v34 = vadd.f32 %v9842_v42, %v11968_v53  ;;  %2938 = vrot.lane.b32.xlu1 %v2859_v16, %s10115_s29  ;;  %2932 = vrot.lane.b32.xlu0 %v2856_v50, %s10115_s29  ;;  %v2857_v54 = vmax.f32 %v2769_v1, 0.0 }
 0x47a   : > { %v2781_v63 = vpop.f32.mrf.mxu1 }
 0x47b   : > { %v2862_v28 = vmax.f32 %v2790_v34, 0.0  ;;  %v2782_v26 = vadd.f32 %v11968_v53, %v2781_v63 }
 0x47c   : > { %v9843_v19 = vpop.f32.mrf.mxu1 }
 0x47d   : > { %v2793_v55 = vadd.f32 %v9843_v19, %v11968_v53  ;;  %2934 = vrot.lane.b32.xlu1 %v2857_v54, %s10115_s29  ;;  %2944 = vrot.lane.b32.xlu0 %v2862_v28, %s10115_s29  ;;  %v2860_v31 = vmax.f32 %v2782_v26, 0.0  ;;  %v3304_v54 = vld [vmem:[#allocation5 + $0x99] sm:$0xff]  ;;  %v3303_v19 = vld [vmem:[#allocation5 + $0x91] sm:$0xff] }
 0x47e   : > { %v2784_v41 = vpop.f32.mrf.mxu1 }
 0x47f   : > { %v2863_v14 = vmax.f32 %v2793_v55, 0.0  ;;  %v2785_v46 = vadd.f32 %v11968_v53, %v2784_v41  ;;  %v3305_v41 = vld [vmem:[#allocation5 + $0xa9] sm:$0xff] }
 0x480   : > { %v9846_v37 = vpop.f32.mrf.mxu1 }
 0x481   : > { %v2806_v59 = vadd.f32 %v9846_v37, %v11968_v53  ;;  %2946 = vrot.lane.b32.xlu1 %v2863_v14, %s10115_s29  ;;  %2940 = vrot.lane.b32.xlu0 %v2860_v31, %s10115_s29  ;;  %v2861_v10 = vmax.f32 %v2785_v46, 0.0  ;;  %v3306_v31 = vld [vmem:[#allocation5 + $0xb1] sm:$0xff]  ;;  %v3307_v14 = vld [vmem:[#allocation5 + $0xc1] sm:$0xff]  ;;  %v3308_v46 = vld [vmem:[#allocation5 + $0xc9] sm:$0xff] }
 0x482   : > { %v2797_v7 = vpop.f32.mrf.mxu1  ;;  %v3309_v37 = vld [vmem:[#allocation5 + $0xd9] sm:$0xff] }
 0x483   : > { %v2866_v36 = vmax.f32 %v2806_v59, 0.0  ;;  %v2798_v5 = vadd.f32 %v11968_v53, %v2797_v7  ;;  %v3311_v59 = vld [vmem:[#allocation5 + $0xf1] sm:$0xff]  ;;  %v3312_v7 = vld [vmem:[#allocation5 + $0xf9] sm:$0xff] }
 0x484   : > { %v9847_v51 = vpop.f32.mrf.mxu1 }
 0x485   : > { %v2809_v32 = vadd.f32 %v9847_v51, %v11968_v53  ;;  %2942 = vrot.lane.b32.xlu1 %v2861_v10, %s10115_s29  ;;  %2952 = vrot.lane.b32.xlu0 %v2866_v36, %s10115_s29  ;;  %v2864_v27 = vmax.f32 %v2798_v5, 0.0  ;;  %v3313_v10 = vld [vmem:[#allocation5 + $0x109] sm:$0xff]  ;;  %v3314_v36 = vld [vmem:[#allocation5 + $0x111] sm:$0xff]  ;;  %v3315_v5 = vld [vmem:[#allocation5 + $0x121] sm:$0xff] }
 0x486   : > { %v2800_v44 = vpop.f32.mrf.mxu1  ;;  %v3316_v51 = vld [vmem:[#allocation5 + $0x129] sm:$0xff] }
 0x487   : > { %v2867_v39 = vmax.f32 %v2809_v32, 0.0  ;;  %v2801_v6 = vadd.f32 %v11968_v53, %v2800_v44  ;;  %v3317_v32 = vld [vmem:[#allocation5 + $0x139] sm:$0xff]  ;;  %v3318_v44 = vld [vmem:[#allocation5 + $0x141] sm:$0xff] }
 0x488   : > { %v9850_v12 = vpop.f32.mrf.mxu1 }
 0x489   : > { %v2822_v9 = vadd.f32 %v9850_v12, %v11968_v53  ;;  %2954 = vrot.lane.b32.xlu1 %v2867_v39, %s10115_s29  ;;  %2948 = vrot.lane.b32.xlu0 %v2864_v27, %s10115_s29  ;;  %v2865_v24 = vmax.f32 %v2801_v6, 0.0  ;;  %v3319_v27 = vld [vmem:[#allocation5 + $0x151] sm:$0xff]  ;;  %v3320_v39 = vld [vmem:[#allocation5 + $0x159] sm:$0xff]  ;;  %v3321_v6 = vld [vmem:[#allocation5 + $0x169] sm:$0xff] }
 0x48a   : > { %v2813_v15 = vpop.f32.mrf.mxu1  ;;  %v3483_v12 = vld [vmem:[#allocation5 + $0x2] sm:$0xff] }
 0x48b   : > { %v2870_v61 = vmax.f32 %v2822_v9, 0.0  ;;  %v2814_v21 = vadd.f32 %v11968_v53, %v2813_v15  ;;  %v3322_v9 = vld [vmem:[#allocation5 + $0x171] sm:$0xff] }
 0x48c   : > { %v9851_v52 = vpop.f32.mrf.mxu1  ;;  %v3484_v15 = vld [vmem:[#allocation5 + $0xa] sm:$0xff] }
 0x48d   : > { %v2825_v4 = vadd.f32 %v9851_v52, %v11968_v53  ;;  %2950 = vrot.lane.b32.xlu1 %v2865_v24, %s10115_s29  ;;  %2960 = vrot.lane.b32.xlu0 %v2870_v61, %s10115_s29  ;;  %v2868_v29 = vmax.f32 %v2814_v21, 0.0  ;;  %v3485_v24 = vld [vmem:[#allocation5 + $0x1a] sm:$0xff]  ;;  %v3486_v61 = vld [vmem:[#allocation5 + $0x22] sm:$0xff]  ;;  %v3487_v21 = vld [vmem:[#allocation5 + $0x32] sm:$0xff] }
 0x48e   : > { %v2816_v58 = vpop.f32.mrf.mxu1 }
 0x48f   : > { %v2871_v11 = vmax.f32 %v2825_v4, 0.0  ;;  %v2817_v38 = vadd.f32 %v11968_v53, %v2816_v58  ;;  %v3488_v4 = vld [vmem:[#allocation5 + $0x3a] sm:$0xff]  ;;  %v3489_v58 = vld [vmem:[#allocation5 + $0x4a] sm:$0xff] }
 0x490   : > { %v9854_v25 = vpop.f32.mrf.mxu1 }
 0x491   : > { %v2838_v56 = vadd.f32 %v9854_v25, %v11968_v53  ;;  %2962 = vrot.lane.b32.xlu1 %v2871_v11, %s10115_s29  ;;  %2956 = vrot.lane.b32.xlu0 %v2868_v29, %s10115_s29  ;;  %v2869_v8 = vmax.f32 %v2817_v38, 0.0  ;;  %v3490_v38 = vld [vmem:[#allocation5 + $0x52] sm:$0xff]  ;;  %v3491_v25 = vld [vmem:[#allocation5 + $0x62] sm:$0xff] }
 0x492   : > { %v2829_v47 = vpop.f32.mrf.mxu1 }
 0x493   : > { %v2874_v50 = vmax.f32 %v2838_v56, 0.0  ;;  %v2830_v16 = vadd.f32 %v11968_v53, %v2829_v47 }
 0x494   : > { %v9855_v1 = vpop.f32.mrf.mxu1 }
 0x495   : > { %v2872_v42 = vmax.f32 %v2830_v16, 0.0  ;;  %2958 = vrot.lane.b32.xlu1 %v2869_v8, %s10115_s29  ;;  %2968 = vrot.lane.b32.xlu0 %v2874_v50, %s10115_s29  ;;  %v2841_v34 = vadd.f32 %v9855_v1, %v11968_v53  ;;  %v3492_v8 = vld [vmem:[#allocation5 + $0x6a] sm:$0xff]  ;;  %v3493_v50 = vld [vmem:[#allocation5 + $0x7a] sm:$0xff] }
 0x496   : > { %v2832_v63 = vpop.f32.mrf.mxu1 }
 0x497   : > { %v2875_v28 = vmax.f32 %v2841_v34, 0.0  ;;  %v2833_v26 = vadd.f32 %v11968_v53, %v2832_v63  ;;  %v3310_v53 = vld [vmem:[#allocation5 + $0xe1] sm:$0xff]  ;;  %v3495_v34 = vld [vmem:[#allocation5 + $0x92] sm:$0xff] }
 0x499   : > { %2964 = vrot.lane.b32.xlu0 %v2872_v42, %s10115_s29  ;;  %3381 = vrot.lane.b32.xlu1 %v3304_v54, %s10114_s28  ;;  %v2873_v55 = vmax.f32 %v2833_v26, 0.0  ;;  %v3494_v42 = vld [vmem:[#allocation5 + $0x82] sm:$0xff]  ;;  %v3497_v26 = vld [vmem:[#allocation5 + $0xaa] sm:$0xff] }
 0x49d   : > { %2970 = vrot.lane.b32.xlu1 %v2875_v28, %s10115_s29  ;;  %3379 = vrot.lane.b32.xlu0 %v3303_v19, %s10114_s28  ;;  %v3496_v28 = vld [vmem:[#allocation5 + $0x9a] sm:$0xff] }
 0x4a1   : > { %2966 = vrot.lane.b32.xlu1 %v2873_v55, %s10115_s29  ;;  %3383 = vrot.lane.b32.xlu0 %v3305_v41, %s10114_s28  ;;  %v3498_v41 = vld [vmem:[#allocation5 + $0xb2] sm:$0xff] }
 0x4a5   : > { %3385 = vrot.lane.b32.xlu1 %v3306_v31, %s10114_s28  ;;  %3387 = vrot.lane.b32.xlu0 %v3307_v14, %s10114_s28  ;;  %v3499_v31 = vld [vmem:[#allocation5 + $0xc2] sm:$0xff] }
 0x4a9   : > { %3389 = vrot.lane.b32.xlu1 %v3308_v46, %s10114_s28  ;;  %3391 = vrot.lane.b32.xlu0 %v3309_v37, %s10114_s28  ;;  %v3500_v37 = vld [vmem:[#allocation5 + $0xca] sm:$0xff] }
 0x4ad   : > { %3393 = vrot.lane.b32.xlu1 %v3310_v53, %s10114_s28  ;;  %3395 = vrot.lane.b32.xlu0 %v3311_v59, %s10114_s28  ;;  %v3501_v53 = vld [vmem:[#allocation5 + $0xda] sm:$0xff] }
 0x4b1   : > { %3397 = vrot.lane.b32.xlu1 %v3312_v7, %s10114_s28  ;;  %3399 = vrot.lane.b32.xlu0 %v3313_v10, %s10114_s28  ;;  %v3502_v10 = vld [vmem:[#allocation5 + $0xe2] sm:$0xff] }
 0x4b5   : > { %3401 = vrot.lane.b32.xlu1 %v3314_v36, %s10114_s28  ;;  %3403 = vrot.lane.b32.xlu0 %v3315_v5, %s10114_s28  ;;  %v3503_v36 = vld [vmem:[#allocation5 + $0xf2] sm:$0xff] }
 0x4b9   : > { %3405 = vrot.lane.b32.xlu1 %v3316_v51, %s10114_s28  ;;  %3407 = vrot.lane.b32.xlu0 %v3317_v32, %s10114_s28  ;;  %v3504_v32 = vld [vmem:[#allocation5 + $0xfa] sm:$0xff] }
 0x4bd   : > { %3409 = vrot.lane.b32.xlu1 %v3318_v44, %s10114_s28  ;;  %3411 = vrot.lane.b32.xlu0 %v3319_v27, %s10114_s28  ;;  %v3505_v44 = vld [vmem:[#allocation5 + $0x10a] sm:$0xff] }
 0x4c1   : > { %3413 = vrot.lane.b32.xlu1 %v3320_v39, %s10114_s28  ;;  %3415 = vrot.lane.b32.xlu0 %v3321_v6, %s10114_s28  ;;  %v3506_v6 = vld [vmem:[#allocation5 + $0x112] sm:$0xff] }
 0x4c5   : > { %3417 = vrot.lane.b32.xlu1 %v3322_v9, %s10114_s28  ;;  %3547 = vrot.lane.b32.xlu0 %v3483_v12, %s10115_s29  ;;  %v3507_v12 = vld [vmem:[#allocation5 + $0x122] sm:$0xff]  ;;  %s14406_s28 = smov 24  }
 0x4c9   : > { %3549 = vrot.lane.b32.xlu1 %v3484_v15, %s10115_s29  ;;  %3551 = vrot.lane.b32.xlu0 %v3485_v24, %s10115_s29  ;;  %v3508_v24 = vld [vmem:[#allocation5 + $0x12a] sm:$0xff] }
 0x4cd   : > { %3553 = vrot.lane.b32.xlu1 %v3486_v61, %s10115_s29  ;;  %3555 = vrot.lane.b32.xlu0 %v3487_v21, %s10115_s29  ;;  %v3509_v61 = vld [vmem:[#allocation5 + $0x13a] sm:$0xff] }
 0x4cf   : > { %v2913_v52 = vpop.permute.xlu0 %2912 }
 0x4d0   : > { %3007 = vst.msk [vmem:[%s10613_s22 + $0x10] sm:$0xff] %vm3004_vm14, %v2913_v52 }
 0x4d1   : > { %3557 = vrot.lane.b32.xlu1 %v3488_v4, %s10115_s29  ;;  %3559 = vrot.lane.b32.xlu0 %v3489_v58, %s10115_s29  ;;  %v3510_v4 = vld [vmem:[#allocation5 + $0x142] sm:$0xff]  ;;  %v3511_v58 = vld [vmem:[#allocation5 + $0x152] sm:$0xff] }
 0x4d3   : > { %v2915_v29 = vpop.permute.xlu1 %2914  ;;  %v2909_v11 = vpop.permute.xlu0 %2908 }
 0x4d4   : > { %3008 = vst.msk [vmem:[%s10613_s22 + $0x18] sm:$0xff] %vm3004_vm14, %v2915_v29  ;;  %3005 = vst.msk [vmem:[%s10613_s22] sm:$0xff] %vm3004_vm14, %v2909_v11 }
 0x4d5   : > { %3561 = vrot.lane.b32.xlu1 %v3490_v38, %s10115_s29  ;;  %3563 = vrot.lane.b32.xlu0 %v3491_v25, %s10115_s29  ;;  %v3512_v38 = vld [vmem:[#allocation5 + $0x15a] sm:$0xff]  ;;  %v3513_v25 = vld [vmem:[#allocation5 + $0x16a] sm:$0xff] }
 0x4d7   : > { %v2911_v56 = vpop.permute.xlu1 %2910  ;;  %v2921_v47 = vpop.permute.xlu0 %2920 }
 0x4d8   : > { %3006 = vst.msk [vmem:[%s10613_s22 + $0x8] sm:$0xff] %vm3004_vm14, %v2911_v56  ;;  %3011 = vst.msk [vmem:[%s10613_s22 + $0x30] sm:$0xff] %vm3004_vm14, %v2921_v47  ;;  %v3675_v56 = vld [vmem:[#allocation5 + $0x3] sm:$0xff] }
 0x4d9   : > { %3565 = vrot.lane.b32.xlu1 %v3492_v8, %s10115_s29  ;;  %3567 = vrot.lane.b32.xlu0 %v3493_v50, %s10115_s29  ;;  %v3514_v50 = vld [vmem:[#allocation5 + $0x172] sm:$0xff] }
 0x4db   : > { %v2923_v16 = vpop.permute.xlu1 %2922  ;;  %v2917_v1 = vpop.permute.xlu0 %2916 }
 0x4dc   : > { %3012 = vst.msk [vmem:[%s10613_s22 + $0x38] sm:$0xff] %vm3004_vm14, %v2923_v16  ;;  %3009 = vst.msk [vmem:[%s10613_s22 + $0x20] sm:$0xff] %vm3004_vm14, %v2917_v1  ;;  %v3676_v16 = vld [vmem:[#allocation5 + $0xb] sm:$0xff]  ;;  %v3677_v1 = vld [vmem:[#allocation5 + $0x1b] sm:$0xff] }
 0x4dd   : > { %3569 = vrot.lane.b32.xlu1 %v3494_v42, %s10115_s29  ;;  %3571 = vrot.lane.b32.xlu0 %v3495_v34, %s10115_s29 }
 0x4df   : > { %v2919_v63 = vpop.permute.xlu1 %2918  ;;  %v2929_v54 = vpop.permute.xlu0 %2928 }
 0x4e0   : > { %3010 = vst.msk [vmem:[%s10613_s22 + $0x28] sm:$0xff] %vm3004_vm14, %v2919_v63  ;;  %3015 = vst.msk [vmem:[%s10613_s22 + $0x50] sm:$0xff] %vm3004_vm14, %v2929_v54  ;;  %v3678_v63 = vld [vmem:[#allocation5 + $0x23] sm:$0xff] }
 0x4e1   : > { %3573 = vrot.lane.b32.xlu1 %v3496_v28, %s10115_s29  ;;  %3575 = vrot.lane.b32.xlu0 %v3497_v26, %s10115_s29  ;;  %v3679_v26 = vld [vmem:[#allocation5 + $0x33] sm:$0xff] }
 0x4e3   : > { %v2931_v19 = vpop.permute.xlu1 %2930  ;;  %v2925_v55 = vpop.permute.xlu0 %2924 }
 0x4e4   : > { %3016 = vst.msk [vmem:[%s10613_s22 + $0x58] sm:$0xff] %vm3004_vm14, %v2931_v19  ;;  %3013 = vst.msk [vmem:[%s10613_s22 + $0x40] sm:$0xff] %vm3004_vm14, %v2925_v55 }
 0x4e5   : > { %3577 = vrot.lane.b32.xlu1 %v3498_v41, %s10115_s29  ;;  %3579 = vrot.lane.b32.xlu0 %v3499_v31, %s10115_s29  ;;  %v3680_v41 = vld [vmem:[#allocation5 + $0x3b] sm:$0xff]  ;;  %v3681_v31 = vld [vmem:[#allocation5 + $0x4b] sm:$0xff] }
 0x4e7   : > { %v2927_v14 = vpop.permute.xlu1 %2926  ;;  %v2937_v46 = vpop.permute.xlu0 %2936 }
 0x4e8   : > { %3014 = vst.msk [vmem:[%s10613_s22 + $0x48] sm:$0xff] %vm3004_vm14, %v2927_v14  ;;  %3019 = vst.msk [vmem:[%s10613_s22 + $0x70] sm:$0xff] %vm3004_vm14, %v2937_v46 }
 0x4e9   : > { %3581 = vrot.lane.b32.xlu1 %v3500_v37, %s10115_s29  ;;  %3583 = vrot.lane.b32.xlu0 %v3501_v53, %s10115_s29  ;;  %v3682_v37 = vld [vmem:[#allocation5 + $0x53] sm:$0xff]  ;;  %v3683_v53 = vld [vmem:[#allocation5 + $0x63] sm:$0xff] }
 0x4eb   : > { %v2939_v59 = vpop.permute.xlu1 %2938  ;;  %v2933_v7 = vpop.permute.xlu0 %2932 }
 0x4ec   : > { %3020 = vst.msk [vmem:[%s10613_s22 + $0x78] sm:$0xff] %vm3004_vm14, %v2939_v59  ;;  %3017 = vst.msk [vmem:[%s10613_s22 + $0x60] sm:$0xff] %vm3004_vm14, %v2933_v7 }
 0x4ed   : > { %3585 = vrot.lane.b32.xlu1 %v3502_v10, %s10115_s29  ;;  %3587 = vrot.lane.b32.xlu0 %v3503_v36, %s10115_s29  ;;  %v3684_v10 = vld [vmem:[#allocation5 + $0x6b] sm:$0xff]  ;;  %v3685_v36 = vld [vmem:[#allocation5 + $0x7b] sm:$0xff] }
 0x4ef   : > { %v2935_v5 = vpop.permute.xlu1 %2934  ;;  %v2945_v51 = vpop.permute.xlu0 %2944 }
 0x4f0   : > { %3018 = vst.msk [vmem:[%s10613_s22 + $0x68] sm:$0xff] %vm3004_vm14, %v2935_v5  ;;  %3023 = vst.msk [vmem:[%s10613_s22 + $0x90] sm:$0xff] %vm3004_vm14, %v2945_v51 }
 0x4f1   : > { %3589 = vrot.lane.b32.xlu1 %v3504_v32, %s10115_s29  ;;  %3591 = vrot.lane.b32.xlu0 %v3505_v44, %s10115_s29  ;;  %v3686_v32 = vld [vmem:[#allocation5 + $0x83] sm:$0xff]  ;;  %v3687_v44 = vld [vmem:[#allocation5 + $0x93] sm:$0xff] }
 0x4f3   : > { %v2947_v27 = vpop.permute.xlu1 %2946  ;;  %v2941_v39 = vpop.permute.xlu0 %2940 }
 0x4f4   : > { %3024 = vst.msk [vmem:[%s10613_s22 + $0x98] sm:$0xff] %vm3004_vm14, %v2947_v27  ;;  %3021 = vst.msk [vmem:[%s10613_s22 + $0x80] sm:$0xff] %vm3004_vm14, %v2941_v39 }
 0x4f5   : > { %3593 = vrot.lane.b32.xlu1 %v3506_v6, %s10115_s29  ;;  %3595 = vrot.lane.b32.xlu0 %v3507_v12, %s10115_s29  ;;  %v3688_v6 = vld [vmem:[#allocation5 + $0x9b] sm:$0xff]  ;;  %v3689_v12 = vld [vmem:[#allocation5 + $0xab] sm:$0xff] }
 0x4f7   : > { %v2943_v9 = vpop.permute.xlu1 %2942  ;;  %v2953_v15 = vpop.permute.xlu0 %2952 }
 0x4f8   : > { %3022 = vst.msk [vmem:[%s10613_s22 + $0x88] sm:$0xff] %vm3004_vm14, %v2943_v9  ;;  %3027 = vst.msk [vmem:[%s10613_s22 + $0xb0] sm:$0xff] %vm3004_vm14, %v2953_v15 }
 0x4f9   : > { %3597 = vrot.lane.b32.xlu1 %v3508_v24, %s10115_s29  ;;  %3599 = vrot.lane.b32.xlu0 %v3509_v61, %s10115_s29  ;;  %v3690_v24 = vld [vmem:[#allocation5 + $0xb3] sm:$0xff]  ;;  %v3691_v61 = vld [vmem:[#allocation5 + $0xc3] sm:$0xff] }
 0x4fb   : > { %v2955_v21 = vpop.permute.xlu1 %2954  ;;  %v2949_v52 = vpop.permute.xlu0 %2948 }
 0x4fc   : > { %3028 = vst.msk [vmem:[%s10613_s22 + $0xb8] sm:$0xff] %vm3004_vm14, %v2955_v21  ;;  %3025 = vst.msk [vmem:[%s10613_s22 + $0xa0] sm:$0xff] %vm3004_vm14, %v2949_v52 }
 0x4fd   : > { %3601 = vrot.lane.b32.xlu1 %v3510_v4, %s10115_s29  ;;  %3603 = vrot.lane.b32.xlu0 %v3511_v58, %s10115_s29  ;;  %v3692_v4 = vld [vmem:[#allocation5 + $0xcb] sm:$0xff]  ;;  %v3693_v58 = vld [vmem:[#allocation5 + $0xdb] sm:$0xff] }
 0x4ff   : > { %v2951_v29 = vpop.permute.xlu1 %2950  ;;  %v2961_v11 = vpop.permute.xlu0 %2960 }
 0x500   : > { %3026 = vst.msk [vmem:[%s10613_s22 + $0xa8] sm:$0xff] %vm3004_vm14, %v2951_v29  ;;  %3031 = vst.msk [vmem:[%s10613_s22 + $0xd0] sm:$0xff] %vm3004_vm14, %v2961_v11 }
 0x501   : > { %3605 = vrot.lane.b32.xlu1 %v3512_v38, %s10115_s29  ;;  %3607 = vrot.lane.b32.xlu0 %v3513_v25, %s10115_s29  ;;  %v3694_v38 = vld [vmem:[#allocation5 + $0xe3] sm:$0xff]  ;;  %v3695_v25 = vld [vmem:[#allocation5 + $0xf3] sm:$0xff] }
 0x503   : > { %v2963_v47 = vpop.permute.xlu1 %2962  ;;  %v2957_v8 = vpop.permute.xlu0 %2956 }
 0x504   : > { %3032 = vst.msk [vmem:[%s10613_s22 + $0xd8] sm:$0xff] %vm3004_vm14, %v2963_v47  ;;  %3029 = vst.msk [vmem:[%s10613_s22 + $0xc0] sm:$0xff] %vm3004_vm14, %v2957_v8  ;;  %v3696_v8 = vld [vmem:[#allocation5 + $0xfb] sm:$0xff] }
 0x505   : > { %3609 = vrot.lane.b32.xlu1 %v3514_v50, %s10115_s29  ;;  %3739 = vrot.lane.b32.xlu0 %v3675_v56, %s10117_s24  ;;  %v3697_v50 = vld [vmem:[#allocation5 + $0x10b] sm:$0xff] }
 0x507   : > { %v2959_v42 = vpop.permute.xlu1 %2958  ;;  %v2969_v34 = vpop.permute.xlu0 %2968 }
 0x508   : > { %3030 = vst.msk [vmem:[%s10613_s22 + $0xc8] sm:$0xff] %vm3004_vm14, %v2959_v42  ;;  %3035 = vst.msk [vmem:[%s10613_s22 + $0xf0] sm:$0xff] %vm3004_vm14, %v2969_v34  ;;  %v3698_v42 = vld [vmem:[#allocation5 + $0x113] sm:$0xff]  ;;  %v3699_v34 = vld [vmem:[#allocation5 + $0x123] sm:$0xff] }
 0x509   : > { %3741 = vrot.lane.b32.xlu1 %v3676_v16, %s10117_s24  ;;  %3743 = vrot.lane.b32.xlu0 %v3677_v1, %s10117_s24 }
 0x50b   : > { %v3382_v54 = vpop.permute.xlu1 %3381  ;;  %v2965_v28 = vpop.permute.xlu0 %2964 }
 0x50c   : > { %3464 = vst.msk [vmem:[#allocation6 + $0x68] sm:$0xff] %vm1171_vm3, %v3382_v54 }
 0x50d   : > { %3033 = vst.msk [vmem:[%s10613_s22 + $0xe0] sm:$0xff] %vm3004_vm14, %v2965_v28  ;;  %3745 = vrot.lane.b32.xlu1 %v3678_v63, %s10117_s24  ;;  %3747 = vrot.lane.b32.xlu0 %v3679_v26, %s10117_s24  ;;  %v3700_v28 = vld [vmem:[#allocation5 + $0x12b] sm:$0xff]  ;;  %v3701_v26 = vld [vmem:[#allocation5 + $0x13b] sm:$0xff] }
 0x50f   : > { %v2971_v19 = vpop.permute.xlu1 %2970  ;;  %v3380_v55 = vpop.permute.xlu0 %3379 }
 0x510   : > { %3036 = vst.msk [vmem:[%s10613_s22 + $0xf8] sm:$0xff] %vm3004_vm14, %v2971_v19 }
 0x511   : > { %3463 = vst.msk [vmem:[#allocation6 + $0x60] sm:$0xff] %vm1171_vm3, %v3380_v55  ;;  %3749 = vrot.lane.b32.xlu1 %v3680_v41, %s10117_s24  ;;  %3751 = vrot.lane.b32.xlu0 %v3681_v31, %s10117_s24  ;;  %v3702_v41 = vld [vmem:[#allocation5 + $0x143] sm:$0xff]  ;;  %v3703_v31 = vld [vmem:[#allocation5 + $0x153] sm:$0xff] }
 0x513   : > { %v2967_v14 = vpop.permute.xlu1 %2966  ;;  %v3384_v46 = vpop.permute.xlu0 %3383 }
 0x514   : > { %3034 = vst.msk [vmem:[%s10613_s22 + $0xe8] sm:$0xff] %vm3004_vm14, %v2967_v14  ;;  %vm7499_vm14 = vcmask 753344  }
 0x515   : > { %3465 = vst.msk [vmem:[#allocation6 + $0x70] sm:$0xff] %vm1171_vm3, %v3384_v46  ;;  %3753 = vrot.lane.b32.xlu1 %v3682_v37, %s10117_s24  ;;  %3755 = vrot.lane.b32.xlu0 %v3683_v53, %s10117_s24  ;;  %v3704_v37 = vld [vmem:[#allocation5 + $0x15b] sm:$0xff]  ;;  %v3705_v53 = vld [vmem:[#allocation5 + $0x16b] sm:$0xff] }
 0x517   : > { %v3386_v59 = vpop.permute.xlu1 %3385  ;;  %v3388_v7 = vpop.permute.xlu0 %3387 }
 0x518   : > { %3466 = vst.msk [vmem:[#allocation6 + $0x78] sm:$0xff] %vm1171_vm3, %v3386_v59  ;;  %3467 = vst.msk [vmem:[#allocation6 + $0x80] sm:$0xff] %vm1171_vm3, %v3388_v7  ;;  %v3867_v59 = vld [vmem:[#allocation5 + $0x4] sm:$0xff] }
 0x519   : > { %3757 = vrot.lane.b32.xlu1 %v3684_v10, %s10117_s24  ;;  %3759 = vrot.lane.b32.xlu0 %v3685_v36, %s10117_s24  ;;  %v3706_v36 = vld [vmem:[#allocation5 + $0x173] sm:$0xff] }
 0x51b   : > { %v3390_v5 = vpop.permute.xlu1 %3389  ;;  %v3392_v51 = vpop.permute.xlu0 %3391 }
 0x51c   : > { %3468 = vst.msk [vmem:[#allocation6 + $0x88] sm:$0xff] %vm1171_vm3, %v3390_v5  ;;  %3469 = vst.msk [vmem:[#allocation6 + $0x90] sm:$0xff] %vm1171_vm3, %v3392_v51  ;;  %v3868_v5 = vld [vmem:[#allocation5 + $0xc] sm:$0xff]  ;;  %v3869_v51 = vld [vmem:[#allocation5 + $0x1c] sm:$0xff] }
 0x51d   : > { %3761 = vrot.lane.b32.xlu1 %v3686_v32, %s10117_s24  ;;  %3763 = vrot.lane.b32.xlu0 %v3687_v44, %s10117_s24 }
 0x51f   : > { %v3394_v27 = vpop.permute.xlu1 %3393  ;;  %v3396_v39 = vpop.permute.xlu0 %3395 }
 0x520   : > { %3470 = vst.msk [vmem:[#allocation6 + $0x98] sm:$0xff] %vm1171_vm3, %v3394_v27  ;;  %3471 = vst.msk [vmem:[#allocation6 + $0xa0] sm:$0xff] %vm1171_vm3, %v3396_v39  ;;  %v3870_v27 = vld [vmem:[#allocation5 + $0x24] sm:$0xff] }
 0x521   : > { %3765 = vrot.lane.b32.xlu1 %v3688_v6, %s10117_s24  ;;  %3767 = vrot.lane.b32.xlu0 %v3689_v12, %s10117_s24  ;;  %v3871_v12 = vld [vmem:[#allocation5 + $0x34] sm:$0xff] }
 0x523   : > { %v3398_v9 = vpop.permute.xlu1 %3397  ;;  %v3400_v15 = vpop.permute.xlu0 %3399 }
 0x524   : > { %3472 = vst.msk [vmem:[#allocation6 + $0xa8] sm:$0xff] %vm1171_vm3, %v3398_v9  ;;  %3473 = vst.msk [vmem:[#allocation6 + $0xb0] sm:$0xff] %vm1171_vm3, %v3400_v15 }
 0x525   : > { %3769 = vrot.lane.b32.xlu1 %v3690_v24, %s10117_s24  ;;  %3771 = vrot.lane.b32.xlu0 %v3691_v61, %s10117_s24  ;;  %v3872_v24 = vld [vmem:[#allocation5 + $0x3c] sm:$0xff]  ;;  %v3873_v61 = vld [vmem:[#allocation5 + $0x4c] sm:$0xff] }
 0x527   : > { %v3402_v21 = vpop.permute.xlu1 %3401  ;;  %v3404_v52 = vpop.permute.xlu0 %3403 }
 0x528   : > { %3474 = vst.msk [vmem:[#allocation6 + $0xb8] sm:$0xff] %vm1171_vm3, %v3402_v21  ;;  %3475 = vst.msk [vmem:[#allocation6 + $0xc0] sm:$0xff] %vm1171_vm3, %v3404_v52 }
 0x529   : > { %3773 = vrot.lane.b32.xlu1 %v3692_v4, %s10117_s24  ;;  %3775 = vrot.lane.b32.xlu0 %v3693_v58, %s10117_s24  ;;  %v3874_v4 = vld [vmem:[#allocation5 + $0x54] sm:$0xff]  ;;  %v3875_v58 = vld [vmem:[#allocation5 + $0x64] sm:$0xff] }
 0x52b   : > { %v3406_v29 = vpop.permute.xlu1 %3405  ;;  %v3408_v11 = vpop.permute.xlu0 %3407 }
 0x52c   : > { %3476 = vst.msk [vmem:[#allocation6 + $0xc8] sm:$0xff] %vm1171_vm3, %v3406_v29  ;;  %3477 = vst.msk [vmem:[#allocation6 + $0xd0] sm:$0xff] %vm1171_vm3, %v3408_v11 }
 0x52d   : > { %3777 = vrot.lane.b32.xlu1 %v3694_v38, %s10117_s24  ;;  %3779 = vrot.lane.b32.xlu0 %v3695_v25, %s10117_s24  ;;  %v3876_v38 = vld [vmem:[#allocation5 + $0x6c] sm:$0xff]  ;;  %v3877_v25 = vld [vmem:[#allocation5 + $0x7c] sm:$0xff] }
 0x52f   : > { %v3410_v56 = vpop.permute.xlu1 %3409  ;;  %v3412_v47 = vpop.permute.xlu0 %3411 }
 0x530   : > { %3478 = vst.msk [vmem:[#allocation6 + $0xd8] sm:$0xff] %vm1171_vm3, %v3410_v56  ;;  %3479 = vst.msk [vmem:[#allocation6 + $0xe0] sm:$0xff] %vm1171_vm3, %v3412_v47 }
 0x531   : > { %3781 = vrot.lane.b32.xlu1 %v3696_v8, %s10117_s24  ;;  %3783 = vrot.lane.b32.xlu0 %v3697_v50, %s10117_s24  ;;  %v3878_v8 = vld [vmem:[#allocation5 + $0x84] sm:$0xff]  ;;  %v3879_v50 = vld [vmem:[#allocation5 + $0x94] sm:$0xff] }
 0x533   : > { %v3414_v16 = vpop.permute.xlu1 %3413  ;;  %v3416_v1 = vpop.permute.xlu0 %3415 }
 0x534   : > { %3480 = vst.msk [vmem:[#allocation6 + $0xe8] sm:$0xff] %vm1171_vm3, %v3414_v16  ;;  %3481 = vst.msk [vmem:[#allocation6 + $0xf0] sm:$0xff] %vm1171_vm3, %v3416_v1 }
 0x535   : > { %3785 = vrot.lane.b32.xlu1 %v3698_v42, %s10117_s24  ;;  %3787 = vrot.lane.b32.xlu0 %v3699_v34, %s10117_s24  ;;  %v3880_v42 = vld [vmem:[#allocation5 + $0x9c] sm:$0xff]  ;;  %v3881_v34 = vld [vmem:[#allocation5 + $0xac] sm:$0xff] }
 0x537   : > { %v3418_v63 = vpop.permute.xlu1 %3417  ;;  %v3548_v54 = vpop.permute.xlu0 %3547 }
 0x538   : > { %3482 = vst.msk [vmem:[#allocation6 + $0xf8] sm:$0xff] %vm1171_vm3, %v3418_v63  ;;  %vm5374_vm3 = vcmask 392544  }
 0x539   : > { %3643 = vst.msk [vmem:[#allocation6] sm:$0xff] %vm1364_vm4, %v3548_v54  ;;  %3789 = vrot.lane.b32.xlu1 %v3700_v28, %s10117_s24  ;;  %3791 = vrot.lane.b32.xlu0 %v3701_v26, %s10117_s24  ;;  %v3882_v28 = vld [vmem:[#allocation5 + $0xb4] sm:$0xff]  ;;  %v3883_v26 = vld [vmem:[#allocation5 + $0xc4] sm:$0xff] }
 0x53b   : > { %v3550_v19 = vpop.permute.xlu1 %3549  ;;  %v3552_v55 = vpop.permute.xlu0 %3551 }
 0x53c   : > { %3644 = vst.msk [vmem:[#allocation6 + $0x8] sm:$0xff] %vm1364_vm4, %v3550_v19  ;;  %3645 = vst.msk [vmem:[#allocation6 + $0x10] sm:$0xff] %vm1364_vm4, %v3552_v55 }
 0x53d   : > { %3793 = vrot.lane.b32.xlu1 %v3702_v41, %s10117_s24  ;;  %3795 = vrot.lane.b32.xlu0 %v3703_v31, %s10117_s24  ;;  %v3884_v41 = vld [vmem:[#allocation5 + $0xcc] sm:$0xff]  ;;  %v3885_v31 = vld [vmem:[#allocation5 + $0xdc] sm:$0xff] }
 0x53f   : > { %v3554_v14 = vpop.permute.xlu1 %3553  ;;  %v3556_v46 = vpop.permute.xlu0 %3555 }
 0x540   : > { %3646 = vst.msk [vmem:[#allocation6 + $0x18] sm:$0xff] %vm1364_vm4, %v3554_v14  ;;  %3647 = vst.msk [vmem:[#allocation6 + $0x20] sm:$0xff] %vm1364_vm4, %v3556_v46 }
 0x541   : > { %3797 = vrot.lane.b32.xlu1 %v3704_v37, %s10117_s24  ;;  %3799 = vrot.lane.b32.xlu0 %v3705_v53, %s10117_s24  ;;  %v3886_v37 = vld [vmem:[#allocation5 + $0xe4] sm:$0xff]  ;;  %v3887_v53 = vld [vmem:[#allocation5 + $0xf4] sm:$0xff] }
 0x543   : > { %v3558_v7 = vpop.permute.xlu1 %3557  ;;  %v3560_v10 = vpop.permute.xlu0 %3559 }
 0x544   : > { %3648 = vst.msk [vmem:[#allocation6 + $0x28] sm:$0xff] %vm1364_vm4, %v3558_v7  ;;  %3649 = vst.msk [vmem:[#allocation6 + $0x30] sm:$0xff] %vm1364_vm4, %v3560_v10  ;;  %v3888_v10 = vld [vmem:[#allocation5 + $0xfc] sm:$0xff] }
 0x545   : > { %3801 = vrot.lane.b32.xlu1 %v3706_v36, %s10117_s24  ;;  %3931 = vrot.lane.b32.xlu0 %v3867_v59, %s10118_s25  ;;  %v3889_v36 = vld [vmem:[#allocation5 + $0x10c] sm:$0xff]  ;;  %s10124_s24 = smov 36  }
 0x547   : > { %v3562_v32 = vpop.permute.xlu1 %3561  ;;  %v3564_v44 = vpop.permute.xlu0 %3563 }
 0x548   : > { %3650 = vst.msk [vmem:[#allocation6 + $0x38] sm:$0xff] %vm1364_vm4, %v3562_v32  ;;  %3651 = vst.msk [vmem:[#allocation6 + $0x40] sm:$0xff] %vm1364_vm4, %v3564_v44  ;;  %v3890_v32 = vld [vmem:[#allocation5 + $0x114] sm:$0xff]  ;;  %v3891_v44 = vld [vmem:[#allocation5 + $0x124] sm:$0xff] }
 0x549   : > { %3933 = vrot.lane.b32.xlu1 %v3868_v5, %s10118_s25  ;;  %3935 = vrot.lane.b32.xlu0 %v3869_v51, %s10118_s25 }
 0x54b   : > { %v3566_v39 = vpop.permute.xlu1 %3565  ;;  %v3568_v6 = vpop.permute.xlu0 %3567 }
 0x54c   : > { %3652 = vst.msk [vmem:[#allocation6 + $0x48] sm:$0xff] %vm1364_vm4, %v3566_v39  ;;  %3653 = vst.msk [vmem:[#allocation6 + $0x50] sm:$0xff] %vm1364_vm4, %v3568_v6  ;;  %v3892_v6 = vld [vmem:[#allocation5 + $0x12c] sm:$0xff] }
 0x54d   : > { %3937 = vrot.lane.b32.xlu1 %v3870_v27, %s10118_s25  ;;  %3939 = vrot.lane.b32.xlu0 %v3871_v12, %s10118_s25  ;;  %v3893_v12 = vld [vmem:[#allocation5 + $0x13c] sm:$0xff] }
 0x54f   : > { %v3570_v9 = vpop.permute.xlu1 %3569  ;;  %v3572_v15 = vpop.permute.xlu0 %3571 }
 0x550   : > { %3654 = vst.msk [vmem:[#allocation6 + $0x58] sm:$0xff] %vm1364_vm4, %v3570_v9  ;;  %3655 = vst.msk [vmem:[#allocation6 + $0x60] sm:$0xff] %vm1364_vm4, %v3572_v15 }
 0x551   : > { %3941 = vrot.lane.b32.xlu1 %v3872_v24, %s10118_s25  ;;  %3943 = vrot.lane.b32.xlu0 %v3873_v61, %s10118_s25  ;;  %v3894_v24 = vld [vmem:[#allocation5 + $0x144] sm:$0xff]  ;;  %v3895_v61 = vld [vmem:[#allocation5 + $0x154] sm:$0xff] }
 0x553   : > { %v3574_v21 = vpop.permute.xlu1 %3573  ;;  %v3576_v52 = vpop.permute.xlu0 %3575 }
 0x554   : > { %3656 = vst.msk [vmem:[#allocation6 + $0x68] sm:$0xff] %vm1364_vm4, %v3574_v21  ;;  %3657 = vst.msk [vmem:[#allocation6 + $0x70] sm:$0xff] %vm1364_vm4, %v3576_v52 }
 0x555   : > { %3945 = vrot.lane.b32.xlu1 %v3874_v4, %s10118_s25  ;;  %3947 = vrot.lane.b32.xlu0 %v3875_v58, %s10118_s25  ;;  %v3896_v4 = vld [vmem:[#allocation5 + $0x15c] sm:$0xff]  ;;  %v3897_v58 = vld [vmem:[#allocation5 + $0x16c] sm:$0xff] }
 0x557   : > { %v3578_v29 = vpop.permute.xlu1 %3577  ;;  %v3580_v11 = vpop.permute.xlu0 %3579 }
 0x558   : > { %3658 = vst.msk [vmem:[#allocation6 + $0x78] sm:$0xff] %vm1364_vm4, %v3578_v29  ;;  %3659 = vst.msk [vmem:[#allocation6 + $0x80] sm:$0xff] %vm1364_vm4, %v3580_v11  ;;  %v4060_v29 = vld [vmem:[#allocation5 + $0x18] sm:$0xff] }
 0x559   : > { %3949 = vrot.lane.b32.xlu1 %v3876_v38, %s10118_s25  ;;  %3951 = vrot.lane.b32.xlu0 %v3877_v25, %s10118_s25  ;;  %v3898_v25 = vld [vmem:[#allocation5 + $0x174] sm:$0xff] }
 0x55b   : > { %v3582_v56 = vpop.permute.xlu1 %3581  ;;  %v3584_v47 = vpop.permute.xlu0 %3583 }
 0x55c   : > { %3660 = vst.msk [vmem:[#allocation6 + $0x88] sm:$0xff] %vm1364_vm4, %v3582_v56  ;;  %3661 = vst.msk [vmem:[#allocation6 + $0x90] sm:$0xff] %vm1364_vm4, %v3584_v47  ;;  %v4061_v56 = vld [vmem:[#allocation5 + $0x20] sm:$0xff] }
 0x55d   : > { %3953 = vrot.lane.b32.xlu1 %v3878_v8, %s10118_s25  ;;  %3955 = vrot.lane.b32.xlu0 %v3879_v50, %s10118_s25  ;;  %v4062_v50 = vld [vmem:[#allocation5 + $0x30] sm:$0xff] }
 0x55f   : > { %v3586_v16 = vpop.permute.xlu1 %3585  ;;  %v3588_v1 = vpop.permute.xlu0 %3587 }
 0x560   : > { %3662 = vst.msk [vmem:[#allocation6 + $0x98] sm:$0xff] %vm1364_vm4, %v3586_v16  ;;  %3663 = vst.msk [vmem:[#allocation6 + $0xa0] sm:$0xff] %vm1364_vm4, %v3588_v1 }
 0x561   : > { %3957 = vrot.lane.b32.xlu1 %v3880_v42, %s10118_s25  ;;  %3959 = vrot.lane.b32.xlu0 %v3881_v34, %s10118_s25  ;;  %v4063_v42 = vld [vmem:[#allocation5 + $0x38] sm:$0xff]  ;;  %v4064_v34 = vld [vmem:[#allocation5 + $0x48] sm:$0xff] }
 0x563   : > { %v3590_v63 = vpop.permute.xlu1 %3589  ;;  %v3592_v54 = vpop.permute.xlu0 %3591 }
 0x564   : > { %3664 = vst.msk [vmem:[#allocation6 + $0xa8] sm:$0xff] %vm1364_vm4, %v3590_v63  ;;  %3665 = vst.msk [vmem:[#allocation6 + $0xb0] sm:$0xff] %vm1364_vm4, %v3592_v54 }
 0x565   : > { %3961 = vrot.lane.b32.xlu1 %v3882_v28, %s10118_s25  ;;  %3963 = vrot.lane.b32.xlu0 %v3883_v26, %s10118_s25  ;;  %v4065_v28 = vld [vmem:[#allocation5 + $0x50] sm:$0xff]  ;;  %v4066_v26 = vld [vmem:[#allocation5 + $0x60] sm:$0xff] }
 0x567   : > { %v3594_v19 = vpop.permute.xlu1 %3593  ;;  %v3596_v55 = vpop.permute.xlu0 %3595 }
 0x568   : > { %3666 = vst.msk [vmem:[#allocation6 + $0xb8] sm:$0xff] %vm1364_vm4, %v3594_v19  ;;  %3667 = vst.msk [vmem:[#allocation6 + $0xc0] sm:$0xff] %vm1364_vm4, %v3596_v55 }
 0x569   : > { %3965 = vrot.lane.b32.xlu1 %v3884_v41, %s10118_s25  ;;  %3967 = vrot.lane.b32.xlu0 %v3885_v31, %s10118_s25  ;;  %v4067_v41 = vld [vmem:[#allocation5 + $0x68] sm:$0xff]  ;;  %v4068_v31 = vld [vmem:[#allocation5 + $0x78] sm:$0xff] }
 0x56b   : > { %v3598_v14 = vpop.permute.xlu1 %3597  ;;  %v3600_v46 = vpop.permute.xlu0 %3599 }
 0x56c   : > { %3668 = vst.msk [vmem:[#allocation6 + $0xc8] sm:$0xff] %vm1364_vm4, %v3598_v14  ;;  %3669 = vst.msk [vmem:[#allocation6 + $0xd0] sm:$0xff] %vm1364_vm4, %v3600_v46 }
 0x56d   : > { %3969 = vrot.lane.b32.xlu1 %v3886_v37, %s10118_s25  ;;  %3971 = vrot.lane.b32.xlu0 %v3887_v53, %s10118_s25  ;;  %v4069_v37 = vld [vmem:[#allocation5 + $0x80] sm:$0xff] }
 0x56f   : > { %v3602_v59 = vpop.permute.xlu1 %3601  ;;  %v3604_v7 = vpop.permute.xlu0 %3603 }
 0x570   : > { %3670 = vst.msk [vmem:[#allocation6 + $0xd8] sm:$0xff] %vm1364_vm4, %v3602_v59  ;;  %3671 = vst.msk [vmem:[#allocation6 + $0xe0] sm:$0xff] %vm1364_vm4, %v3604_v7 }
 0x571   : > { %3973 = vrot.lane.b32.xlu1 %v3888_v10, %s10118_s25  ;;  %3975 = vrot.lane.b32.xlu0 %v3889_v36, %s10118_s25 }
 0x573   : > { %v3606_v5 = vpop.permute.xlu1 %3605  ;;  %v3608_v51 = vpop.permute.xlu0 %3607 }
 0x574   : > { %3672 = vst.msk [vmem:[#allocation6 + $0xe8] sm:$0xff] %vm1364_vm4, %v3606_v5  ;;  %3673 = vst.msk [vmem:[#allocation6 + $0xf0] sm:$0xff] %vm1364_vm4, %v3608_v51 }
 0x575   : > { %3977 = vrot.lane.b32.xlu1 %v3890_v32, %s10118_s25  ;;  %3979 = vrot.lane.b32.xlu0 %v3891_v44, %s10118_s25 }
 0x577   : > { %v3610_v27 = vpop.permute.xlu1 %3609  ;;  %v3740_v39 = vpop.permute.xlu0 %3739 }
 0x578   : > { %3674 = vst.msk [vmem:[#allocation6 + $0xf8] sm:$0xff] %vm1364_vm4, %v3610_v27  ;;  %vm5567_vm4 = vcmask 425344  }
 0x579   : > { %3835 = vst.msk [vmem:[#allocation6] sm:$0xff] %vm1557_vm6, %v3740_v39  ;;  %3981 = vrot.lane.b32.xlu1 %v3892_v6, %s10118_s25  ;;  %3983 = vrot.lane.b32.xlu0 %v3893_v12, %s10118_s25  ;;  %v4255_v6 = vld [vmem:[#allocation5 + $0x39] sm:$0xff]  ;;  %v4256_v12 = vld [vmem:[#allocation5 + $0x49] sm:$0xff] }
 0x57b   : > { %v3742_v9 = vpop.permute.xlu1 %3741  ;;  %v3744_v15 = vpop.permute.xlu0 %3743 }
 0x57c   : > { %3836 = vst.msk [vmem:[#allocation6 + $0x8] sm:$0xff] %vm1557_vm6, %v3742_v9  ;;  %3837 = vst.msk [vmem:[#allocation6 + $0x10] sm:$0xff] %vm1557_vm6, %v3744_v15 }
 0x57d   : > { %3985 = vrot.lane.b32.xlu1 %v3894_v24, %s10118_s25  ;;  %3987 = vrot.lane.b32.xlu0 %v3895_v61, %s10118_s25  ;;  %v4257_v24 = vld [vmem:[#allocation5 + $0x51] sm:$0xff]  ;;  %v4258_v61 = vld [vmem:[#allocation5 + $0x61] sm:$0xff] }
 0x57f   : > { %v3746_v21 = vpop.permute.xlu1 %3745  ;;  %v3748_v52 = vpop.permute.xlu0 %3747 }
 0x580   : > { %3838 = vst.msk [vmem:[#allocation6 + $0x18] sm:$0xff] %vm1557_vm6, %v3746_v21  ;;  %3839 = vst.msk [vmem:[#allocation6 + $0x20] sm:$0xff] %vm1557_vm6, %v3748_v52 }
 0x581   : > { %3989 = vrot.lane.b32.xlu1 %v3896_v4, %s10118_s25  ;;  %3991 = vrot.lane.b32.xlu0 %v3897_v58, %s10118_s25  ;;  %v4259_v4 = vld [vmem:[#allocation5 + $0x69] sm:$0xff]  ;;  %v4260_v58 = vld [vmem:[#allocation5 + $0x79] sm:$0xff] }
 0x583   : > { %v3750_v11 = vpop.permute.xlu1 %3749  ;;  %v3752_v38 = vpop.permute.xlu0 %3751 }
 0x584   : > { %3840 = vst.msk [vmem:[#allocation6 + $0x28] sm:$0xff] %vm1557_vm6, %v3750_v11  ;;  %3841 = vst.msk [vmem:[#allocation6 + $0x30] sm:$0xff] %vm1557_vm6, %v3752_v38  ;;  %v4261_v38 = vld [vmem:[#allocation5 + $0x81] sm:$0xff] }
 0x585   : > { %3993 = vrot.lane.b32.xlu1 %v3898_v25, %s10118_s25  ;;  %4124 = vrot.lane.b32.xlu0 %v4060_v29, %s10120_s27  ;;  %v4262_v25 = vld [vmem:[#allocation5 + $0x91] sm:$0xff] }
 0x587   : > { %v3754_v47 = vpop.permute.xlu1 %3753  ;;  %v3756_v8 = vpop.permute.xlu0 %3755 }
 0x588   : > { %3842 = vst.msk [vmem:[#allocation6 + $0x38] sm:$0xff] %vm1557_vm6, %v3754_v47  ;;  %3843 = vst.msk [vmem:[#allocation6 + $0x40] sm:$0xff] %vm1557_vm6, %v3756_v8  ;;  %v4263_v8 = vld [vmem:[#allocation5 + $0x99] sm:$0xff] }
 0x589   : > { %4126 = vrot.lane.b32.xlu1 %v4061_v56, %s10120_s27  ;;  %4128 = vrot.lane.b32.xlu0 %v4062_v50, %s10120_s27  ;;  %v4264_v50 = vld [vmem:[#allocation5 + $0xa9] sm:$0xff] }
 0x58b   : > { %v3758_v16 = vpop.permute.xlu1 %3757  ;;  %v3760_v1 = vpop.permute.xlu0 %3759 }
 0x58c   : > { %3844 = vst.msk [vmem:[#allocation6 + $0x48] sm:$0xff] %vm1557_vm6, %v3758_v16  ;;  %3845 = vst.msk [vmem:[#allocation6 + $0x50] sm:$0xff] %vm1557_vm6, %v3760_v1 }
 0x58d   : > { %4130 = vrot.lane.b32.xlu1 %v4063_v42, %s10120_s27  ;;  %4132 = vrot.lane.b32.xlu0 %v4064_v34, %s10120_s27  ;;  %v4265_v42 = vld [vmem:[#allocation5 + $0xb1] sm:$0xff]  ;;  %v4266_v34 = vld [vmem:[#allocation5 + $0xc1] sm:$0xff] }
 0x58f   : > { %v3762_v63 = vpop.permute.xlu1 %3761  ;;  %v3764_v54 = vpop.permute.xlu0 %3763 }
 0x590   : > { %3846 = vst.msk [vmem:[#allocation6 + $0x58] sm:$0xff] %vm1557_vm6, %v3762_v63  ;;  %3847 = vst.msk [vmem:[#allocation6 + $0x60] sm:$0xff] %vm1557_vm6, %v3764_v54 }
 0x591   : > { %4134 = vrot.lane.b32.xlu1 %v4065_v28, %s10120_s27  ;;  %4136 = vrot.lane.b32.xlu0 %v4066_v26, %s10120_s27  ;;  %v4267_v28 = vld [vmem:[#allocation5 + $0xc9] sm:$0xff]  ;;  %v4268_v26 = vld [vmem:[#allocation5 + $0xd9] sm:$0xff] }
 0x593   : > { %v3766_v19 = vpop.permute.xlu1 %3765  ;;  %v3768_v55 = vpop.permute.xlu0 %3767 }
 0x594   : > { %3848 = vst.msk [vmem:[#allocation6 + $0x68] sm:$0xff] %vm1557_vm6, %v3766_v19  ;;  %3849 = vst.msk [vmem:[#allocation6 + $0x70] sm:$0xff] %vm1557_vm6, %v3768_v55 }
 0x595   : > { %4138 = vrot.lane.b32.xlu1 %v4067_v41, %s10120_s27  ;;  %4140 = vrot.lane.b32.xlu0 %v4068_v31, %s10120_s27  ;;  %v4269_v41 = vld [vmem:[#allocation5 + $0xe1] sm:$0xff]  ;;  %v4270_v31 = vld [vmem:[#allocation5 + $0xf1] sm:$0xff] }
 0x597   : > { %v3770_v14 = vpop.permute.xlu1 %3769  ;;  %v3772_v46 = vpop.permute.xlu0 %3771 }
 0x598   : > { %3850 = vst.msk [vmem:[#allocation6 + $0x78] sm:$0xff] %vm1557_vm6, %v3770_v14  ;;  %3851 = vst.msk [vmem:[#allocation6 + $0x80] sm:$0xff] %vm1557_vm6, %v3772_v46 }
 0x599   : > { %4142 = vrot.lane.b32.xlu1 %v4069_v37, %s10120_s27  ;;  %4144 = vrot.lane.b32.xlu0 %v11854_v43, %s10120_s27  ;;  %v4271_v37 = vld [vmem:[#allocation5 + $0xf9] sm:$0xff] }
 0x59b   : > { %v3774_v53 = vpop.permute.xlu1 %3773  ;;  %v3776_v59 = vpop.permute.xlu0 %3775 }
 0x59c   : > { %3852 = vst.msk [vmem:[#allocation6 + $0x88] sm:$0xff] %vm1557_vm6, %v3774_v53  ;;  %3853 = vst.msk [vmem:[#allocation6 + $0x90] sm:$0xff] %vm1557_vm6, %v3776_v59  ;;  %v4272_v53 = vld [vmem:[#allocation5 + $0x109] sm:$0xff] }
 0x59d   : > { %4146 = vrot.lane.b32.xlu1 %v11860_v13, %s10120_s27  ;;  %4148 = vrot.lane.b32.xlu0 %v11862_v22, %s10120_s27 }
 0x59f   : > { %v3778_v7 = vpop.permute.xlu1 %3777  ;;  %v3780_v10 = vpop.permute.xlu0 %3779 }
 0x5a0   : > { %3854 = vst.msk [vmem:[#allocation6 + $0x98] sm:$0xff] %vm1557_vm6, %v3778_v7  ;;  %3855 = vst.msk [vmem:[#allocation6 + $0xa0] sm:$0xff] %vm1557_vm6, %v3780_v10  ;;  %v4273_v10 = vld [vmem:[#allocation5 + $0x111] sm:$0xff] }
 0x5a1   : > { %4150 = vrot.lane.b32.xlu1 %v11870_v60, %s10120_s27  ;;  %4152 = vrot.lane.b32.xlu0 %v11872_v3, %s10120_s27 }
 0x5a3   : > { %v3782_v43 = vpop.permute.xlu1 %3781  ;;  %v3784_v36 = vpop.permute.xlu0 %3783 }
 0x5a4   : > { %3856 = vst.msk [vmem:[#allocation6 + $0xa8] sm:$0xff] %vm1557_vm6, %v3782_v43  ;;  %3857 = vst.msk [vmem:[#allocation6 + $0xb0] sm:$0xff] %vm1557_vm6, %v3784_v36  ;;  %v4274_v43 = vld [vmem:[#allocation5 + $0x121] sm:$0xff] }
 0x5a5   : > { %4154 = vrot.lane.b32.xlu1 %v11880_v23, %s10120_s27  ;;  %4156 = vrot.lane.b32.xlu0 %v11882_v48, %s10120_s27 }
 0x5a7   : > { %v3786_v13 = vpop.permute.xlu1 %3785  ;;  %v3788_v22 = vpop.permute.xlu0 %3787 }
 0x5a8   : > { %3858 = vst.msk [vmem:[#allocation6 + $0xb8] sm:$0xff] %vm1557_vm6, %v3786_v13  ;;  %3859 = vst.msk [vmem:[#allocation6 + $0xc0] sm:$0xff] %vm1557_vm6, %v3788_v22  ;;  %v4275_v22 = vld [vmem:[#allocation5 + $0x129] sm:$0xff] }
 0x5a9   : > { %4158 = vrot.lane.b32.xlu1 %v11890_v17, %s10120_s27  ;;  %4160 = vrot.lane.b32.xlu0 %v11892_v57, %s10120_s27 }
 0x5ab   : > { %v3790_v60 = vpop.permute.xlu1 %3789  ;;  %v3792_v3 = vpop.permute.xlu0 %3791 }
 0x5ac   : > { %3860 = vst.msk [vmem:[#allocation6 + $0xc8] sm:$0xff] %vm1557_vm6, %v3790_v60  ;;  %3861 = vst.msk [vmem:[#allocation6 + $0xd0] sm:$0xff] %vm1557_vm6, %v3792_v3  ;;  %v4276_v60 = vld [vmem:[#allocation5 + $0x139] sm:$0xff] }
 0x5ad   : > { %4162 = vrot.lane.b32.xlu1 %v11900_v0, %s10120_s27  ;;  %4164 = vrot.lane.b32.xlu0 %v11902_v20, %s10120_s27 }
 0x5af   : > { %v3794_v23 = vpop.permute.xlu1 %3793  ;;  %v3796_v48 = vpop.permute.xlu0 %3795 }
 0x5b0   : > { %3862 = vst.msk [vmem:[#allocation6 + $0xd8] sm:$0xff] %vm1557_vm6, %v3794_v23  ;;  %3863 = vst.msk [vmem:[#allocation6 + $0xe0] sm:$0xff] %vm1557_vm6, %v3796_v48  ;;  %v4277_v48 = vld [vmem:[#allocation5 + $0x141] sm:$0xff] }
 0x5b1   : > { %4166 = vrot.lane.b32.xlu1 %v11910_v30, %s10120_s27  ;;  %4168 = vrot.lane.b32.xlu0 %v11912_v49, %s10120_s27 }
 0x5b3   : > { %v3798_v17 = vpop.permute.xlu1 %3797  ;;  %v3800_v57 = vpop.permute.xlu0 %3799 }
 0x5b4   : > { %3864 = vst.msk [vmem:[#allocation6 + $0xe8] sm:$0xff] %vm1557_vm6, %v3798_v17  ;;  %3865 = vst.msk [vmem:[#allocation6 + $0xf0] sm:$0xff] %vm1557_vm6, %v3800_v57  ;;  %v4278_v17 = vld [vmem:[#allocation5 + $0x151] sm:$0xff] }
 0x5b5   : > { %4170 = vrot.lane.b32.xlu1 %v11920_v33, %s10120_s27  ;;  %4172 = vrot.lane.b32.xlu0 %v11922_v45, %s10120_s27 }
 0x5b7   : > { %v3802_v0 = vpop.permute.xlu1 %3801  ;;  %v3932_v20 = vpop.permute.xlu0 %3931 }
 0x5b8   : > { %3866 = vst.msk [vmem:[#allocation6 + $0xf8] sm:$0xff] %vm1557_vm6, %v3802_v0  ;;  %vm5953_vm6 = vcmask 490944  }
 0x5b9   : > { %4027 = vst.msk [vmem:[#allocation6] sm:$0xff] %vm1750_vm7, %v3932_v20  ;;  %4174 = vrot.lane.b32.xlu1 %v11930_v35, %s10120_s27  ;;  %4176 = vrot.lane.b32.xlu0 %v11932_v2, %s10120_s27  ;;  %v4090_v35 = vld [vmem:[#allocation5 + $0x180] sm:$0xff] }
 0x5ba   : > { %v4252_v2 = vld [vmem:[#allocation5 + $0x19] sm:$0xff] }
 0x5bb   : > { %v3934_v30 = vpop.permute.xlu1 %3933  ;;  %v3936_v49 = vpop.permute.xlu0 %3935  ;;  %v4279_v20 = vld [vmem:[#allocation5 + $0x159] sm:$0xff] }
 0x5bc   : > { %4028 = vst.msk [vmem:[#allocation6 + $0x8] sm:$0xff] %vm1750_vm7, %v3934_v30  ;;  %4029 = vst.msk [vmem:[#allocation6 + $0x10] sm:$0xff] %vm1750_vm7, %v3936_v49  ;;  %v4280_v30 = vld [vmem:[#allocation5 + $0x169] sm:$0xff] }
 0x5bd   : > { %4178 = vrot.lane.b32.xlu1 %v11940_v18, %s10120_s27  ;;  %4180 = vrot.lane.b32.xlu0 %v11942_v62, %s10120_s27  ;;  %v4091_v18 = vld [vmem:[#allocation5 + $0x188] sm:$0xff] }
 0x5be   : > { %v4253_v62 = vld [vmem:[#allocation5 + $0x21] sm:$0xff] }
 0x5bf   : > { %v3938_v33 = vpop.permute.xlu1 %3937  ;;  %v3940_v45 = vpop.permute.xlu0 %3939 }
 0x5c0   : > { %4030 = vst.msk [vmem:[#allocation6 + $0x18] sm:$0xff] %vm1750_vm7, %v3938_v33  ;;  %4031 = vst.msk [vmem:[#allocation6 + $0x20] sm:$0xff] %vm1750_vm7, %v3940_v45  ;;  %v4281_v45 = vld [vmem:[#allocation5 + $0x171] sm:$0xff] }
 0x5c1   : > { %4182 = vrot.lane.b32.xlu1 %v11948_v40, %s10120_s27  ;;  %4184 = vrot.lane.b32.xlu0 %v4090_v35, %s10120_s27  ;;  %v4254_v40 = vld [vmem:[#allocation5 + $0x31] sm:$0xff]  ;;  %v4282_v35 = vld [vmem:[#allocation5 + $0x181] sm:$0xff] }
 0x5c3   : > { %v3942_v5 = vpop.permute.xlu1 %3941  ;;  %v3944_v51 = vpop.permute.xlu0 %3943 }
 0x5c4   : > { %4032 = vst.msk [vmem:[#allocation6 + $0x28] sm:$0xff] %vm1750_vm7, %v3942_v5  ;;  %4033 = vst.msk [vmem:[#allocation6 + $0x30] sm:$0xff] %vm1750_vm7, %v3944_v51 }
 0x5c5   : > { %4186 = vrot.lane.b32.xlu1 %v4091_v18, %s10120_s27  ;;  %4316 = vrot.lane.b32.xlu0 %v4252_v2, %s14406_s28  ;;  %v4444_v2 = vld [vmem:[#allocation5 + $0x1a] sm:$0xff]  ;;  %v4283_v18 = vld [vmem:[#allocation5 + $0x189] sm:$0xff]  ;;  %s10125_s27 = smov 40  }
 0x5c7   : > { %v3946_v32 = vpop.permute.xlu1 %3945  ;;  %v3948_v44 = vpop.permute.xlu0 %3947 }
 0x5c8   : > { %4034 = vst.msk [vmem:[#allocation6 + $0x38] sm:$0xff] %vm1750_vm7, %v3946_v32  ;;  %4035 = vst.msk [vmem:[#allocation6 + $0x40] sm:$0xff] %vm1750_vm7, %v3948_v44 }
 0x5c9   : > { %4318 = vrot.lane.b32.xlu1 %v4253_v62, %s14406_s28  ;;  %4320 = vrot.lane.b32.xlu0 %v4254_v40, %s14406_s28  ;;  %v4445_v62 = vld [vmem:[#allocation5 + $0x22] sm:$0xff]  ;;  %v4446_v40 = vld [vmem:[#allocation5 + $0x32] sm:$0xff] }
 0x5cb   : > { %v3950_v27 = vpop.permute.xlu1 %3949  ;;  %v3952_v39 = vpop.permute.xlu0 %3951 }
 0x5cc   : > { %4036 = vst.msk [vmem:[#allocation6 + $0x48] sm:$0xff] %vm1750_vm7, %v3950_v27  ;;  %4037 = vst.msk [vmem:[#allocation6 + $0x50] sm:$0xff] %vm1750_vm7, %v3952_v39 }
 0x5cd   : > { %4322 = vrot.lane.b32.xlu1 %v4255_v6, %s14406_s28  ;;  %4324 = vrot.lane.b32.xlu0 %v4256_v12, %s14406_s28  ;;  %v4447_v6 = vld [vmem:[#allocation5 + $0x3a] sm:$0xff]  ;;  %v4448_v12 = vld [vmem:[#allocation5 + $0x4a] sm:$0xff] }
 0x5cf   : > { %v3954_v9 = vpop.permute.xlu1 %3953  ;;  %v3956_v15 = vpop.permute.xlu0 %3955 }
 0x5d0   : > { %4038 = vst.msk [vmem:[#allocation6 + $0x58] sm:$0xff] %vm1750_vm7, %v3954_v9  ;;  %4039 = vst.msk [vmem:[#allocation6 + $0x60] sm:$0xff] %vm1750_vm7, %v3956_v15 }
 0x5d1   : > { %4326 = vrot.lane.b32.xlu1 %v4257_v24, %s14406_s28  ;;  %4328 = vrot.lane.b32.xlu0 %v4258_v61, %s14406_s28  ;;  %v4449_v24 = vld [vmem:[#allocation5 + $0x52] sm:$0xff]  ;;  %v4450_v61 = vld [vmem:[#allocation5 + $0x62] sm:$0xff] }
 0x5d3   : > { %v3958_v21 = vpop.permute.xlu1 %3957  ;;  %v3960_v52 = vpop.permute.xlu0 %3959 }
 0x5d4   : > { %4040 = vst.msk [vmem:[#allocation6 + $0x68] sm:$0xff] %vm1750_vm7, %v3958_v21  ;;  %4041 = vst.msk [vmem:[#allocation6 + $0x70] sm:$0xff] %vm1750_vm7, %v3960_v52 }
 0x5d5   : > { %4330 = vrot.lane.b32.xlu1 %v4259_v4, %s14406_s28  ;;  %4332 = vrot.lane.b32.xlu0 %v4260_v58, %s14406_s28  ;;  %v4451_v4 = vld [vmem:[#allocation5 + $0x6a] sm:$0xff]  ;;  %v4452_v58 = vld [vmem:[#allocation5 + $0x7a] sm:$0xff] }
 0x5d7   : > { %v3962_v29 = vpop.permute.xlu1 %3961  ;;  %v3964_v11 = vpop.permute.xlu0 %3963 }
 0x5d8   : > { %4042 = vst.msk [vmem:[#allocation6 + $0x78] sm:$0xff] %vm1750_vm7, %v3962_v29  ;;  %4043 = vst.msk [vmem:[#allocation6 + $0x80] sm:$0xff] %vm1750_vm7, %v3964_v11 }
 0x5d9   : > { %4334 = vrot.lane.b32.xlu1 %v4261_v38, %s14406_s28  ;;  %4336 = vrot.lane.b32.xlu0 %v4262_v25, %s14406_s28  ;;  %v4453_v38 = vld [vmem:[#allocation5 + $0x82] sm:$0xff]  ;;  %v4454_v25 = vld [vmem:[#allocation5 + $0x92] sm:$0xff] }
 0x5db   : > { %v3966_v56 = vpop.permute.xlu1 %3965  ;;  %v3968_v47 = vpop.permute.xlu0 %3967 }
 0x5dc   : > { %4044 = vst.msk [vmem:[#allocation6 + $0x88] sm:$0xff] %vm1750_vm7, %v3966_v56  ;;  %4045 = vst.msk [vmem:[#allocation6 + $0x90] sm:$0xff] %vm1750_vm7, %v3968_v47 }
 0x5dd   : > { %4338 = vrot.lane.b32.xlu1 %v4263_v8, %s14406_s28  ;;  %4340 = vrot.lane.b32.xlu0 %v4264_v50, %s14406_s28  ;;  %v4455_v8 = vld [vmem:[#allocation5 + $0x9a] sm:$0xff]  ;;  %v4456_v50 = vld [vmem:[#allocation5 + $0xaa] sm:$0xff] }
 0x5df   : > { %v3970_v16 = vpop.permute.xlu1 %3969  ;;  %v3972_v1 = vpop.permute.xlu0 %3971 }
 0x5e0   : > { %4046 = vst.msk [vmem:[#allocation6 + $0x98] sm:$0xff] %vm1750_vm7, %v3970_v16  ;;  %4047 = vst.msk [vmem:[#allocation6 + $0xa0] sm:$0xff] %vm1750_vm7, %v3972_v1 }
 0x5e1   : > { %4342 = vrot.lane.b32.xlu1 %v4265_v42, %s14406_s28  ;;  %4344 = vrot.lane.b32.xlu0 %v4266_v34, %s14406_s28  ;;  %v4457_v42 = vld [vmem:[#allocation5 + $0xb2] sm:$0xff]  ;;  %v4458_v34 = vld [vmem:[#allocation5 + $0xc2] sm:$0xff] }
 0x5e3   : > { %v3974_v63 = vpop.permute.xlu1 %3973  ;;  %v3976_v54 = vpop.permute.xlu0 %3975 }
 0x5e4   : > { %4048 = vst.msk [vmem:[#allocation6 + $0xa8] sm:$0xff] %vm1750_vm7, %v3974_v63  ;;  %4049 = vst.msk [vmem:[#allocation6 + $0xb0] sm:$0xff] %vm1750_vm7, %v3976_v54 }
 0x5e5   : > { %4346 = vrot.lane.b32.xlu1 %v4267_v28, %s14406_s28  ;;  %4348 = vrot.lane.b32.xlu0 %v4268_v26, %s14406_s28  ;;  %v4459_v28 = vld [vmem:[#allocation5 + $0xca] sm:$0xff]  ;;  %v4460_v26 = vld [vmem:[#allocation5 + $0xda] sm:$0xff] }
 0x5e7   : > { %v3978_v19 = vpop.permute.xlu1 %3977  ;;  %v3980_v55 = vpop.permute.xlu0 %3979 }
 0x5e8   : > { %4050 = vst.msk [vmem:[#allocation6 + $0xb8] sm:$0xff] %vm1750_vm7, %v3978_v19  ;;  %4051 = vst.msk [vmem:[#allocation6 + $0xc0] sm:$0xff] %vm1750_vm7, %v3980_v55 }
 0x5e9   : > { %4350 = vrot.lane.b32.xlu1 %v4269_v41, %s14406_s28  ;;  %4352 = vrot.lane.b32.xlu0 %v4270_v31, %s14406_s28  ;;  %v4461_v41 = vld [vmem:[#allocation5 + $0xe2] sm:$0xff]  ;;  %v4462_v31 = vld [vmem:[#allocation5 + $0xf2] sm:$0xff] }
 0x5eb   : > { %v3982_v14 = vpop.permute.xlu1 %3981  ;;  %v3984_v46 = vpop.permute.xlu0 %3983 }
 0x5ec   : > { %4052 = vst.msk [vmem:[#allocation6 + $0xc8] sm:$0xff] %vm1750_vm7, %v3982_v14  ;;  %4053 = vst.msk [vmem:[#allocation6 + $0xd0] sm:$0xff] %vm1750_vm7, %v3984_v46 }
 0x5ed   : > { %4354 = vrot.lane.b32.xlu1 %v4271_v37, %s14406_s28  ;;  %4356 = vrot.lane.b32.xlu0 %v4272_v53, %s14406_s28  ;;  %v4463_v37 = vld [vmem:[#allocation5 + $0xfa] sm:$0xff]  ;;  %v4464_v53 = vld [vmem:[#allocation5 + $0x10a] sm:$0xff] }
 0x5ef   : > { %v3986_v59 = vpop.permute.xlu1 %3985  ;;  %v3988_v7 = vpop.permute.xlu0 %3987 }
 0x5f0   : > { %4054 = vst.msk [vmem:[#allocation6 + $0xd8] sm:$0xff] %vm1750_vm7, %v3986_v59  ;;  %4055 = vst.msk [vmem:[#allocation6 + $0xe0] sm:$0xff] %vm1750_vm7, %v3988_v7 }
 0x5f1   : > { %4358 = vrot.lane.b32.xlu1 %v4273_v10, %s14406_s28  ;;  %4360 = vrot.lane.b32.xlu0 %v4274_v43, %s14406_s28  ;;  %v4465_v10 = vld [vmem:[#allocation5 + $0x112] sm:$0xff]  ;;  %v4466_v43 = vld [vmem:[#allocation5 + $0x122] sm:$0xff] }
 0x5f3   : > { %v3990_v36 = vpop.permute.xlu1 %3989  ;;  %v3992_v13 = vpop.permute.xlu0 %3991 }
 0x5f4   : > { %4056 = vst.msk [vmem:[#allocation6 + $0xe8] sm:$0xff] %vm1750_vm7, %v3990_v36  ;;  %4057 = vst.msk [vmem:[#allocation6 + $0xf0] sm:$0xff] %vm1750_vm7, %v3992_v13 }
 0x5f5   : > { %4362 = vrot.lane.b32.xlu1 %v4275_v22, %s14406_s28  ;;  %4364 = vrot.lane.b32.xlu0 %v4276_v60, %s14406_s28  ;;  %v4467_v22 = vld [vmem:[#allocation5 + $0x12a] sm:$0xff]  ;;  %v4468_v60 = vld [vmem:[#allocation5 + $0x13a] sm:$0xff] }
 0x5f7   : > { %v3994_v3 = vpop.permute.xlu1 %3993  ;;  %v4125_v23 = vpop.permute.xlu0 %4124 }
 0x5f8   : > { %4058 = vst.msk [vmem:[#allocation6 + $0xf8] sm:$0xff] %vm1750_vm7, %v3994_v3  ;;  %vm6147_vm7 = vcmask 523744  }
 0x5f9   : > { %4220 = vst.msk [vmem:[#allocation6] sm:$0xff] %vm1943_vm8, %v4125_v23  ;;  %4366 = vrot.lane.b32.xlu1 %v4277_v48, %s14406_s28  ;;  %4368 = vrot.lane.b32.xlu0 %v4278_v17, %s14406_s28  ;;  %v4469_v48 = vld [vmem:[#allocation5 + $0x142] sm:$0xff]  ;;  %v4470_v17 = vld [vmem:[#allocation5 + $0x152] sm:$0xff] }
 0x5fb   : > { %v4127_v57 = vpop.permute.xlu1 %4126  ;;  %v4129_v0 = vpop.permute.xlu0 %4128 }
 0x5fc   : > { %4221 = vst.msk [vmem:[#allocation6 + $0x8] sm:$0xff] %vm1943_vm8, %v4127_v57  ;;  %4222 = vst.msk [vmem:[#allocation6 + $0x10] sm:$0xff] %vm1943_vm8, %v4129_v0 }
 0x5fd   : > { %4370 = vrot.lane.b32.xlu1 %v4279_v20, %s14406_s28  ;;  %4372 = vrot.lane.b32.xlu0 %v4280_v30, %s14406_s28  ;;  %v4471_v20 = vld [vmem:[#allocation5 + $0x15a] sm:$0xff]  ;;  %v4472_v30 = vld [vmem:[#allocation5 + $0x16a] sm:$0xff] }
 0x5ff   : > { %v4131_v49 = vpop.permute.xlu1 %4130  ;;  %v4133_v33 = vpop.permute.xlu0 %4132 }
 0x600   : > { %4223 = vst.msk [vmem:[#allocation6 + $0x18] sm:$0xff] %vm1943_vm8, %v4131_v49  ;;  %4224 = vst.msk [vmem:[#allocation6 + $0x20] sm:$0xff] %vm1943_vm8, %v4133_v33 }
 0x601   : > { %4374 = vrot.lane.b32.xlu1 %v4281_v45, %s14406_s28  ;;  %4376 = vrot.lane.b32.xlu0 %v4282_v35, %s14406_s28  ;;  %v4473_v45 = vld [vmem:[#allocation5 + $0x172] sm:$0xff]  ;;  %v4474_v35 = vld [vmem:[#allocation5 + $0x182] sm:$0xff] }
 0x603   : > { %v4135_v5 = vpop.permute.xlu1 %4134  ;;  %v4137_v51 = vpop.permute.xlu0 %4136 }
 0x604   : > { %4225 = vst.msk [vmem:[#allocation6 + $0x28] sm:$0xff] %vm1943_vm8, %v4135_v5  ;;  %4226 = vst.msk [vmem:[#allocation6 + $0x30] sm:$0xff] %vm1943_vm8, %v4137_v51 }
 0x605   : > { %4378 = vrot.lane.b32.xlu1 %v4283_v18, %s14406_s28  ;;  %4508 = vrot.lane.b32.xlu0 %v4444_v2, %s10121_s16  ;;  %v4636_v2 = vld [vmem:[#allocation5 + $0x1b] sm:$0xff]  ;;  %v4475_v18 = vld [vmem:[#allocation5 + $0x18a] sm:$0xff] }
 0x607   : > { %v4139_v32 = vpop.permute.xlu1 %4138  ;;  %v4141_v44 = vpop.permute.xlu0 %4140 }
 0x608   : > { %4227 = vst.msk [vmem:[#allocation6 + $0x38] sm:$0xff] %vm1943_vm8, %v4139_v32  ;;  %4228 = vst.msk [vmem:[#allocation6 + $0x40] sm:$0xff] %vm1943_vm8, %v4141_v44 }
 0x609   : > { %4510 = vrot.lane.b32.xlu1 %v4445_v62, %s10121_s16  ;;  %4512 = vrot.lane.b32.xlu0 %v4446_v40, %s10121_s16  ;;  %v4637_v62 = vld [vmem:[#allocation5 + $0x23] sm:$0xff]  ;;  %v4638_v40 = vld [vmem:[#allocation5 + $0x33] sm:$0xff] }
 0x60b   : > { %v4143_v27 = vpop.permute.xlu1 %4142  ;;  %v4145_v39 = vpop.permute.xlu0 %4144 }
 0x60c   : > { %4229 = vst.msk [vmem:[#allocation6 + $0x48] sm:$0xff] %vm1943_vm8, %v4143_v27  ;;  %4230 = vst.msk [vmem:[#allocation6 + $0x50] sm:$0xff] %vm1943_vm8, %v4145_v39 }
 0x60d   : > { %4514 = vrot.lane.b32.xlu1 %v4447_v6, %s10121_s16  ;;  %4516 = vrot.lane.b32.xlu0 %v4448_v12, %s10121_s16  ;;  %v4639_v6 = vld [vmem:[#allocation5 + $0x3b] sm:$0xff]  ;;  %v4640_v12 = vld [vmem:[#allocation5 + $0x4b] sm:$0xff] }
 0x60f   : > { %v4147_v9 = vpop.permute.xlu1 %4146  ;;  %v4149_v15 = vpop.permute.xlu0 %4148 }
 0x610   : > { %4231 = vst.msk [vmem:[#allocation6 + $0x58] sm:$0xff] %vm1943_vm8, %v4147_v9  ;;  %4232 = vst.msk [vmem:[#allocation6 + $0x60] sm:$0xff] %vm1943_vm8, %v4149_v15 }
 0x611   : > { %4518 = vrot.lane.b32.xlu1 %v4449_v24, %s10121_s16  ;;  %4520 = vrot.lane.b32.xlu0 %v4450_v61, %s10121_s16  ;;  %v4641_v24 = vld [vmem:[#allocation5 + $0x53] sm:$0xff]  ;;  %v4642_v61 = vld [vmem:[#allocation5 + $0x63] sm:$0xff] }
 0x613   : > { %v4151_v21 = vpop.permute.xlu1 %4150  ;;  %v4153_v52 = vpop.permute.xlu0 %4152 }
 0x614   : > { %4233 = vst.msk [vmem:[#allocation6 + $0x68] sm:$0xff] %vm1943_vm8, %v4151_v21  ;;  %4234 = vst.msk [vmem:[#allocation6 + $0x70] sm:$0xff] %vm1943_vm8, %v4153_v52 }
 0x615   : > { %4522 = vrot.lane.b32.xlu1 %v4451_v4, %s10121_s16  ;;  %4524 = vrot.lane.b32.xlu0 %v4452_v58, %s10121_s16  ;;  %v4643_v4 = vld [vmem:[#allocation5 + $0x6b] sm:$0xff]  ;;  %v4644_v58 = vld [vmem:[#allocation5 + $0x7b] sm:$0xff] }
 0x617   : > { %v4155_v29 = vpop.permute.xlu1 %4154  ;;  %v4157_v11 = vpop.permute.xlu0 %4156 }
 0x618   : > { %4235 = vst.msk [vmem:[#allocation6 + $0x78] sm:$0xff] %vm1943_vm8, %v4155_v29  ;;  %4236 = vst.msk [vmem:[#allocation6 + $0x80] sm:$0xff] %vm1943_vm8, %v4157_v11 }
 0x619   : > { %4526 = vrot.lane.b32.xlu1 %v4453_v38, %s10121_s16  ;;  %4528 = vrot.lane.b32.xlu0 %v4454_v25, %s10121_s16  ;;  %v4645_v38 = vld [vmem:[#allocation5 + $0x83] sm:$0xff]  ;;  %v4646_v25 = vld [vmem:[#allocation5 + $0x93] sm:$0xff] }
 0x61b   : > { %v4159_v56 = vpop.permute.xlu1 %4158  ;;  %v4161_v47 = vpop.permute.xlu0 %4160 }
 0x61c   : > { %4237 = vst.msk [vmem:[#allocation6 + $0x88] sm:$0xff] %vm1943_vm8, %v4159_v56  ;;  %4238 = vst.msk [vmem:[#allocation6 + $0x90] sm:$0xff] %vm1943_vm8, %v4161_v47 }
 0x61d   : > { %4530 = vrot.lane.b32.xlu1 %v4455_v8, %s10121_s16  ;;  %4532 = vrot.lane.b32.xlu0 %v4456_v50, %s10121_s16  ;;  %v4647_v8 = vld [vmem:[#allocation5 + $0x9b] sm:$0xff]  ;;  %v4648_v50 = vld [vmem:[#allocation5 + $0xab] sm:$0xff] }
 0x61f   : > { %v4163_v16 = vpop.permute.xlu1 %4162  ;;  %v4165_v1 = vpop.permute.xlu0 %4164 }
 0x620   : > { %4239 = vst.msk [vmem:[#allocation6 + $0x98] sm:$0xff] %vm1943_vm8, %v4163_v16  ;;  %4240 = vst.msk [vmem:[#allocation6 + $0xa0] sm:$0xff] %vm1943_vm8, %v4165_v1 }
 0x621   : > { %4534 = vrot.lane.b32.xlu1 %v4457_v42, %s10121_s16  ;;  %4536 = vrot.lane.b32.xlu0 %v4458_v34, %s10121_s16  ;;  %v4649_v42 = vld [vmem:[#allocation5 + $0xb3] sm:$0xff]  ;;  %v4650_v34 = vld [vmem:[#allocation5 + $0xc3] sm:$0xff] }
 0x623   : > { %v4167_v63 = vpop.permute.xlu1 %4166  ;;  %v4169_v54 = vpop.permute.xlu0 %4168 }
 0x624   : > { %4241 = vst.msk [vmem:[#allocation6 + $0xa8] sm:$0xff] %vm1943_vm8, %v4167_v63  ;;  %4242 = vst.msk [vmem:[#allocation6 + $0xb0] sm:$0xff] %vm1943_vm8, %v4169_v54 }
 0x625   : > { %4538 = vrot.lane.b32.xlu1 %v4459_v28, %s10121_s16  ;;  %4540 = vrot.lane.b32.xlu0 %v4460_v26, %s10121_s16  ;;  %v4651_v28 = vld [vmem:[#allocation5 + $0xcb] sm:$0xff]  ;;  %v4652_v26 = vld [vmem:[#allocation5 + $0xdb] sm:$0xff] }
 0x627   : > { %v4171_v19 = vpop.permute.xlu1 %4170  ;;  %v4173_v55 = vpop.permute.xlu0 %4172 }
 0x628   : > { %4243 = vst.msk [vmem:[#allocation6 + $0xb8] sm:$0xff] %vm1943_vm8, %v4171_v19  ;;  %4244 = vst.msk [vmem:[#allocation6 + $0xc0] sm:$0xff] %vm1943_vm8, %v4173_v55 }
 0x629   : > { %4542 = vrot.lane.b32.xlu1 %v4461_v41, %s10121_s16  ;;  %4544 = vrot.lane.b32.xlu0 %v4462_v31, %s10121_s16  ;;  %v4653_v41 = vld [vmem:[#allocation5 + $0xe3] sm:$0xff]  ;;  %v4654_v31 = vld [vmem:[#allocation5 + $0xf3] sm:$0xff] }
 0x62b   : > { %v4175_v14 = vpop.permute.xlu1 %4174  ;;  %v4177_v46 = vpop.permute.xlu0 %4176 }
 0x62c   : > { %4245 = vst.msk [vmem:[#allocation6 + $0xc8] sm:$0xff] %vm1943_vm8, %v4175_v14  ;;  %4246 = vst.msk [vmem:[#allocation6 + $0xd0] sm:$0xff] %vm1943_vm8, %v4177_v46 }
 0x62d   : > { %4546 = vrot.lane.b32.xlu1 %v4463_v37, %s10121_s16  ;;  %4548 = vrot.lane.b32.xlu0 %v4464_v53, %s10121_s16  ;;  %v4655_v37 = vld [vmem:[#allocation5 + $0xfb] sm:$0xff]  ;;  %v4656_v53 = vld [vmem:[#allocation5 + $0x10b] sm:$0xff] }
 0x62f   : > { %v4179_v59 = vpop.permute.xlu1 %4178  ;;  %v4181_v7 = vpop.permute.xlu0 %4180 }
 0x630   : > { %4247 = vst.msk [vmem:[#allocation6 + $0xd8] sm:$0xff] %vm1943_vm8, %v4179_v59  ;;  %4248 = vst.msk [vmem:[#allocation6 + $0xe0] sm:$0xff] %vm1943_vm8, %v4181_v7 }
 0x631   : > { %4550 = vrot.lane.b32.xlu1 %v4465_v10, %s10121_s16  ;;  %4552 = vrot.lane.b32.xlu0 %v4466_v43, %s10121_s16  ;;  %v4657_v10 = vld [vmem:[#allocation5 + $0x113] sm:$0xff]  ;;  %v4658_v43 = vld [vmem:[#allocation5 + $0x123] sm:$0xff] }
 0x633   : > { %v4183_v36 = vpop.permute.xlu1 %4182  ;;  %v4185_v13 = vpop.permute.xlu0 %4184 }
 0x634   : > { %4249 = vst.msk [vmem:[#allocation6 + $0xe8] sm:$0xff] %vm1943_vm8, %v4183_v36  ;;  %4250 = vst.msk [vmem:[#allocation6 + $0xf0] sm:$0xff] %vm1943_vm8, %v4185_v13 }
 0x635   : > { %4554 = vrot.lane.b32.xlu1 %v4467_v22, %s10121_s16  ;;  %4556 = vrot.lane.b32.xlu0 %v4468_v60, %s10121_s16  ;;  %v4659_v22 = vld [vmem:[#allocation5 + $0x12b] sm:$0xff]  ;;  %v4660_v60 = vld [vmem:[#allocation5 + $0x13b] sm:$0xff] }
 0x637   : > { %v4187_v3 = vpop.permute.xlu1 %4186  ;;  %v4317_v23 = vpop.permute.xlu0 %4316 }
 0x638   : > { %4251 = vst.msk [vmem:[#allocation6 + $0xf8] sm:$0xff] %vm1943_vm8, %v4187_v3  ;;  %vm6340_vm8 = vcmask 556544  }
 0x639   : > { %4412 = vst.msk [vmem:[#allocation6] sm:$0xff] %vm2137_vm9, %v4317_v23  ;;  %4558 = vrot.lane.b32.xlu1 %v4469_v48, %s10121_s16  ;;  %4560 = vrot.lane.b32.xlu0 %v4470_v17, %s10121_s16  ;;  %v4661_v48 = vld [vmem:[#allocation5 + $0x143] sm:$0xff]  ;;  %v4662_v17 = vld [vmem:[#allocation5 + $0x153] sm:$0xff] }
 0x63b   : > { %v4319_v57 = vpop.permute.xlu1 %4318  ;;  %v4321_v0 = vpop.permute.xlu0 %4320 }
 0x63c   : > { %4413 = vst.msk [vmem:[#allocation6 + $0x8] sm:$0xff] %vm2137_vm9, %v4319_v57  ;;  %4414 = vst.msk [vmem:[#allocation6 + $0x10] sm:$0xff] %vm2137_vm9, %v4321_v0 }
 0x63d   : > { %4562 = vrot.lane.b32.xlu1 %v4471_v20, %s10121_s16  ;;  %4564 = vrot.lane.b32.xlu0 %v4472_v30, %s10121_s16  ;;  %v4663_v20 = vld [vmem:[#allocation5 + $0x15b] sm:$0xff]  ;;  %v4664_v30 = vld [vmem:[#allocation5 + $0x16b] sm:$0xff] }
 0x63f   : > { %v4323_v49 = vpop.permute.xlu1 %4322  ;;  %v4325_v33 = vpop.permute.xlu0 %4324 }
 0x640   : > { %4415 = vst.msk [vmem:[#allocation6 + $0x18] sm:$0xff] %vm2137_vm9, %v4323_v49  ;;  %4416 = vst.msk [vmem:[#allocation6 + $0x20] sm:$0xff] %vm2137_vm9, %v4325_v33 }
 0x641   : > { %4566 = vrot.lane.b32.xlu1 %v4473_v45, %s10121_s16  ;;  %4568 = vrot.lane.b32.xlu0 %v4474_v35, %s10121_s16  ;;  %v4665_v45 = vld [vmem:[#allocation5 + $0x173] sm:$0xff]  ;;  %v4666_v35 = vld [vmem:[#allocation5 + $0x183] sm:$0xff] }
 0x643   : > { %v4327_v5 = vpop.permute.xlu1 %4326  ;;  %v4329_v51 = vpop.permute.xlu0 %4328 }
 0x644   : > { %4417 = vst.msk [vmem:[#allocation6 + $0x28] sm:$0xff] %vm2137_vm9, %v4327_v5  ;;  %4418 = vst.msk [vmem:[#allocation6 + $0x30] sm:$0xff] %vm2137_vm9, %v4329_v51 }
 0x645   : > { %4570 = vrot.lane.b32.xlu1 %v4475_v18, %s10121_s16  ;;  %4700 = vrot.lane.b32.xlu0 %v4636_v2, %s10122_s21  ;;  %v4828_v2 = vld [vmem:[#allocation5 + $0x1c] sm:$0xff]  ;;  %v4667_v18 = vld [vmem:[#allocation5 + $0x18b] sm:$0xff]  ;;  %s10126_s16 = smov 44  }
 0x647   : > { %v4331_v32 = vpop.permute.xlu1 %4330  ;;  %v4333_v44 = vpop.permute.xlu0 %4332 }
 0x648   : > { %4419 = vst.msk [vmem:[#allocation6 + $0x38] sm:$0xff] %vm2137_vm9, %v4331_v32  ;;  %4420 = vst.msk [vmem:[#allocation6 + $0x40] sm:$0xff] %vm2137_vm9, %v4333_v44 }
 0x649   : > { %4702 = vrot.lane.b32.xlu1 %v4637_v62, %s10122_s21  ;;  %4704 = vrot.lane.b32.xlu0 %v4638_v40, %s10122_s21  ;;  %v4829_v62 = vld [vmem:[#allocation5 + $0x24] sm:$0xff]  ;;  %v4830_v40 = vld [vmem:[#allocation5 + $0x34] sm:$0xff] }
 0x64b   : > { %v4335_v27 = vpop.permute.xlu1 %4334  ;;  %v4337_v39 = vpop.permute.xlu0 %4336 }
 0x64c   : > { %4421 = vst.msk [vmem:[#allocation6 + $0x48] sm:$0xff] %vm2137_vm9, %v4335_v27  ;;  %4422 = vst.msk [vmem:[#allocation6 + $0x50] sm:$0xff] %vm2137_vm9, %v4337_v39 }
 0x64d   : > { %4706 = vrot.lane.b32.xlu1 %v4639_v6, %s10122_s21  ;;  %4708 = vrot.lane.b32.xlu0 %v4640_v12, %s10122_s21  ;;  %v4831_v6 = vld [vmem:[#allocation5 + $0x3c] sm:$0xff]  ;;  %v4832_v12 = vld [vmem:[#allocation5 + $0x4c] sm:$0xff] }
 0x64f   : > { %v4339_v9 = vpop.permute.xlu1 %4338  ;;  %v4341_v15 = vpop.permute.xlu0 %4340 }
 0x650   : > { %4423 = vst.msk [vmem:[#allocation6 + $0x58] sm:$0xff] %vm2137_vm9, %v4339_v9  ;;  %4424 = vst.msk [vmem:[#allocation6 + $0x60] sm:$0xff] %vm2137_vm9, %v4341_v15 }
 0x651   : > { %4710 = vrot.lane.b32.xlu1 %v4641_v24, %s10122_s21  ;;  %4712 = vrot.lane.b32.xlu0 %v4642_v61, %s10122_s21  ;;  %v4833_v24 = vld [vmem:[#allocation5 + $0x54] sm:$0xff]  ;;  %v4834_v61 = vld [vmem:[#allocation5 + $0x64] sm:$0xff] }
 0x653   : > { %v4343_v21 = vpop.permute.xlu1 %4342  ;;  %v4345_v52 = vpop.permute.xlu0 %4344 }
 0x654   : > { %4425 = vst.msk [vmem:[#allocation6 + $0x68] sm:$0xff] %vm2137_vm9, %v4343_v21  ;;  %4426 = vst.msk [vmem:[#allocation6 + $0x70] sm:$0xff] %vm2137_vm9, %v4345_v52 }
 0x655   : > { %4714 = vrot.lane.b32.xlu1 %v4643_v4, %s10122_s21  ;;  %4716 = vrot.lane.b32.xlu0 %v4644_v58, %s10122_s21  ;;  %v4835_v4 = vld [vmem:[#allocation5 + $0x6c] sm:$0xff]  ;;  %v4836_v58 = vld [vmem:[#allocation5 + $0x7c] sm:$0xff] }
 0x657   : > { %v4347_v29 = vpop.permute.xlu1 %4346  ;;  %v4349_v11 = vpop.permute.xlu0 %4348 }
 0x658   : > { %4427 = vst.msk [vmem:[#allocation6 + $0x78] sm:$0xff] %vm2137_vm9, %v4347_v29  ;;  %4428 = vst.msk [vmem:[#allocation6 + $0x80] sm:$0xff] %vm2137_vm9, %v4349_v11 }
 0x659   : > { %4718 = vrot.lane.b32.xlu1 %v4645_v38, %s10122_s21  ;;  %4720 = vrot.lane.b32.xlu0 %v4646_v25, %s10122_s21  ;;  %v4837_v38 = vld [vmem:[#allocation5 + $0x84] sm:$0xff]  ;;  %v4838_v25 = vld [vmem:[#allocation5 + $0x94] sm:$0xff] }
 0x65b   : > { %v4351_v56 = vpop.permute.xlu1 %4350  ;;  %v4353_v47 = vpop.permute.xlu0 %4352 }
 0x65c   : > { %4429 = vst.msk [vmem:[#allocation6 + $0x88] sm:$0xff] %vm2137_vm9, %v4351_v56  ;;  %4430 = vst.msk [vmem:[#allocation6 + $0x90] sm:$0xff] %vm2137_vm9, %v4353_v47 }
 0x65d   : > { %4722 = vrot.lane.b32.xlu1 %v4647_v8, %s10122_s21  ;;  %4724 = vrot.lane.b32.xlu0 %v4648_v50, %s10122_s21  ;;  %v4839_v8 = vld [vmem:[#allocation5 + $0x9c] sm:$0xff]  ;;  %v4840_v50 = vld [vmem:[#allocation5 + $0xac] sm:$0xff] }
 0x65f   : > { %v4355_v16 = vpop.permute.xlu1 %4354  ;;  %v4357_v1 = vpop.permute.xlu0 %4356 }
 0x660   : > { %4431 = vst.msk [vmem:[#allocation6 + $0x98] sm:$0xff] %vm2137_vm9, %v4355_v16  ;;  %4432 = vst.msk [vmem:[#allocation6 + $0xa0] sm:$0xff] %vm2137_vm9, %v4357_v1 }
 0x661   : > { %4726 = vrot.lane.b32.xlu1 %v4649_v42, %s10122_s21  ;;  %4728 = vrot.lane.b32.xlu0 %v4650_v34, %s10122_s21  ;;  %v4841_v42 = vld [vmem:[#allocation5 + $0xb4] sm:$0xff]  ;;  %v4842_v34 = vld [vmem:[#allocation5 + $0xc4] sm:$0xff] }
 0x663   : > { %v4359_v63 = vpop.permute.xlu1 %4358  ;;  %v4361_v54 = vpop.permute.xlu0 %4360 }
 0x664   : > { %4433 = vst.msk [vmem:[#allocation6 + $0xa8] sm:$0xff] %vm2137_vm9, %v4359_v63  ;;  %4434 = vst.msk [vmem:[#allocation6 + $0xb0] sm:$0xff] %vm2137_vm9, %v4361_v54 }
 0x665   : > { %4730 = vrot.lane.b32.xlu1 %v4651_v28, %s10122_s21  ;;  %4732 = vrot.lane.b32.xlu0 %v4652_v26, %s10122_s21  ;;  %v4843_v28 = vld [vmem:[#allocation5 + $0xcc] sm:$0xff]  ;;  %v4844_v26 = vld [vmem:[#allocation5 + $0xdc] sm:$0xff] }
 0x667   : > { %v4363_v19 = vpop.permute.xlu1 %4362  ;;  %v4365_v55 = vpop.permute.xlu0 %4364 }
 0x668   : > { %4435 = vst.msk [vmem:[#allocation6 + $0xb8] sm:$0xff] %vm2137_vm9, %v4363_v19  ;;  %4436 = vst.msk [vmem:[#allocation6 + $0xc0] sm:$0xff] %vm2137_vm9, %v4365_v55 }
 0x669   : > { %4734 = vrot.lane.b32.xlu1 %v4653_v41, %s10122_s21  ;;  %4736 = vrot.lane.b32.xlu0 %v4654_v31, %s10122_s21  ;;  %v4845_v41 = vld [vmem:[#allocation5 + $0xe4] sm:$0xff]  ;;  %v4846_v31 = vld [vmem:[#allocation5 + $0xf4] sm:$0xff] }
 0x66b   : > { %v4367_v14 = vpop.permute.xlu1 %4366  ;;  %v4369_v46 = vpop.permute.xlu0 %4368 }
 0x66c   : > { %4437 = vst.msk [vmem:[#allocation6 + $0xc8] sm:$0xff] %vm2137_vm9, %v4367_v14  ;;  %4438 = vst.msk [vmem:[#allocation6 + $0xd0] sm:$0xff] %vm2137_vm9, %v4369_v46 }
 0x66d   : > { %4738 = vrot.lane.b32.xlu1 %v4655_v37, %s10122_s21  ;;  %4740 = vrot.lane.b32.xlu0 %v4656_v53, %s10122_s21  ;;  %v4847_v37 = vld [vmem:[#allocation5 + $0xfc] sm:$0xff]  ;;  %v4848_v53 = vld [vmem:[#allocation5 + $0x10c] sm:$0xff] }
 0x66f   : > { %v4371_v59 = vpop.permute.xlu1 %4370  ;;  %v4373_v7 = vpop.permute.xlu0 %4372 }
 0x670   : > { %4439 = vst.msk [vmem:[#allocation6 + $0xd8] sm:$0xff] %vm2137_vm9, %v4371_v59  ;;  %4440 = vst.msk [vmem:[#allocation6 + $0xe0] sm:$0xff] %vm2137_vm9, %v4373_v7 }
 0x671   : > { %4742 = vrot.lane.b32.xlu1 %v4657_v10, %s10122_s21  ;;  %4744 = vrot.lane.b32.xlu0 %v4658_v43, %s10122_s21  ;;  %v4849_v10 = vld [vmem:[#allocation5 + $0x114] sm:$0xff]  ;;  %v4850_v43 = vld [vmem:[#allocation5 + $0x124] sm:$0xff] }
 0x673   : > { %v4375_v36 = vpop.permute.xlu1 %4374  ;;  %v4377_v13 = vpop.permute.xlu0 %4376 }
 0x674   : > { %4441 = vst.msk [vmem:[#allocation6 + $0xe8] sm:$0xff] %vm2137_vm9, %v4375_v36  ;;  %4442 = vst.msk [vmem:[#allocation6 + $0xf0] sm:$0xff] %vm2137_vm9, %v4377_v13 }
 0x675   : > { %4746 = vrot.lane.b32.xlu1 %v4659_v22, %s10122_s21  ;;  %4748 = vrot.lane.b32.xlu0 %v4660_v60, %s10122_s21  ;;  %v4851_v22 = vld [vmem:[#allocation5 + $0x12c] sm:$0xff]  ;;  %v4852_v60 = vld [vmem:[#allocation5 + $0x13c] sm:$0xff] }
 0x677   : > { %v4379_v3 = vpop.permute.xlu1 %4378  ;;  %v4509_v23 = vpop.permute.xlu0 %4508 }
 0x678   : > { %4443 = vst.msk [vmem:[#allocation6 + $0xf8] sm:$0xff] %vm2137_vm9, %v4379_v3  ;;  %vm6533_vm9 = vcmask 589344  }
 0x679   : > { %4604 = vst.msk [vmem:[#allocation6] sm:$0xff] %vm2330_vm10, %v4509_v23  ;;  %4750 = vrot.lane.b32.xlu1 %v4661_v48, %s10122_s21  ;;  %4752 = vrot.lane.b32.xlu0 %v4662_v17, %s10122_s21  ;;  %v4853_v48 = vld [vmem:[#allocation5 + $0x144] sm:$0xff]  ;;  %v4854_v17 = vld [vmem:[#allocation5 + $0x154] sm:$0xff] }
 0x67b   : > { %v4511_v57 = vpop.permute.xlu1 %4510  ;;  %v4513_v0 = vpop.permute.xlu0 %4512 }
 0x67c   : > { %4605 = vst.msk [vmem:[#allocation6 + $0x8] sm:$0xff] %vm2330_vm10, %v4511_v57  ;;  %4606 = vst.msk [vmem:[#allocation6 + $0x10] sm:$0xff] %vm2330_vm10, %v4513_v0 }
 0x67d   : > { %4754 = vrot.lane.b32.xlu1 %v4663_v20, %s10122_s21  ;;  %4756 = vrot.lane.b32.xlu0 %v4664_v30, %s10122_s21  ;;  %v4855_v20 = vld [vmem:[#allocation5 + $0x15c] sm:$0xff]  ;;  %v4856_v30 = vld [vmem:[#allocation5 + $0x16c] sm:$0xff] }
 0x67f   : > { %v4515_v49 = vpop.permute.xlu1 %4514  ;;  %v4517_v33 = vpop.permute.xlu0 %4516 }
 0x680   : > { %4607 = vst.msk [vmem:[#allocation6 + $0x18] sm:$0xff] %vm2330_vm10, %v4515_v49  ;;  %4608 = vst.msk [vmem:[#allocation6 + $0x20] sm:$0xff] %vm2330_vm10, %v4517_v33 }
 0x681   : > { %4758 = vrot.lane.b32.xlu1 %v4665_v45, %s10122_s21  ;;  %4760 = vrot.lane.b32.xlu0 %v4666_v35, %s10122_s21  ;;  %v4857_v45 = vld [vmem:[#allocation5 + $0x174] sm:$0xff]  ;;  %v4858_v35 = vld [vmem:[#allocation5 + $0x184] sm:$0xff] }
 0x683   : > { %v4519_v5 = vpop.permute.xlu1 %4518  ;;  %v4521_v51 = vpop.permute.xlu0 %4520 }
 0x684   : > { %4609 = vst.msk [vmem:[#allocation6 + $0x28] sm:$0xff] %vm2330_vm10, %v4519_v5  ;;  %4610 = vst.msk [vmem:[#allocation6 + $0x30] sm:$0xff] %vm2330_vm10, %v4521_v51  ;;  %v4859_v51 = vld [vmem:[#allocation5 + $0x18c] sm:$0xff] }
 0x685   : > { %4762 = vrot.lane.b32.xlu1 %v4667_v18, %s10122_s21  ;;  %4892 = vrot.lane.b32.xlu0 %v4828_v2, %s10124_s24  ;;  %v5021_v18 = vld [vmem:[#allocation5 + $0x30] sm:$0xff]  ;;  %s10128_s21 = smov 52  }
 0x687   : > { %v4523_v32 = vpop.permute.xlu1 %4522  ;;  %v4525_v44 = vpop.permute.xlu0 %4524 }
 0x688   : > { %4611 = vst.msk [vmem:[#allocation6 + $0x38] sm:$0xff] %vm2330_vm10, %v4523_v32  ;;  %4612 = vst.msk [vmem:[#allocation6 + $0x40] sm:$0xff] %vm2330_vm10, %v4525_v44  ;;  %v5022_v44 = vld [vmem:[#allocation5 + $0x38] sm:$0xff] }
 0x689   : > { %4894 = vrot.lane.b32.xlu1 %v4829_v62, %s10124_s24  ;;  %4896 = vrot.lane.b32.xlu0 %v4830_v40, %s10124_s24  ;;  %v5023_v40 = vld [vmem:[#allocation5 + $0x48] sm:$0xff] }
 0x68b   : > { %v4527_v27 = vpop.permute.xlu1 %4526  ;;  %v4529_v39 = vpop.permute.xlu0 %4528 }
 0x68c   : > { %4613 = vst.msk [vmem:[#allocation6 + $0x48] sm:$0xff] %vm2330_vm10, %v4527_v27  ;;  %4614 = vst.msk [vmem:[#allocation6 + $0x50] sm:$0xff] %vm2330_vm10, %v4529_v39 }
 0x68d   : > { %4898 = vrot.lane.b32.xlu1 %v4831_v6, %s10124_s24  ;;  %4900 = vrot.lane.b32.xlu0 %v4832_v12, %s10124_s24  ;;  %v5024_v6 = vld [vmem:[#allocation5 + $0x50] sm:$0xff]  ;;  %v5025_v12 = vld [vmem:[#allocation5 + $0x60] sm:$0xff] }
 0x68f   : > { %v4531_v9 = vpop.permute.xlu1 %4530  ;;  %v4533_v15 = vpop.permute.xlu0 %4532 }
 0x690   : > { %4615 = vst.msk [vmem:[#allocation6 + $0x58] sm:$0xff] %vm2330_vm10, %v4531_v9  ;;  %4616 = vst.msk [vmem:[#allocation6 + $0x60] sm:$0xff] %vm2330_vm10, %v4533_v15 }
 0x691   : > { %4902 = vrot.lane.b32.xlu1 %v4833_v24, %s10124_s24  ;;  %4904 = vrot.lane.b32.xlu0 %v4834_v61, %s10124_s24  ;;  %v5026_v24 = vld [vmem:[#allocation5 + $0x68] sm:$0xff]  ;;  %v5027_v61 = vld [vmem:[#allocation5 + $0x78] sm:$0xff] }
 0x693   : > { %v4535_v21 = vpop.permute.xlu1 %4534  ;;  %v4537_v52 = vpop.permute.xlu0 %4536 }
 0x694   : > { %4617 = vst.msk [vmem:[#allocation6 + $0x68] sm:$0xff] %vm2330_vm10, %v4535_v21  ;;  %4618 = vst.msk [vmem:[#allocation6 + $0x70] sm:$0xff] %vm2330_vm10, %v4537_v52 }
 0x695   : > { %4906 = vrot.lane.b32.xlu1 %v4835_v4, %s10124_s24  ;;  %4908 = vrot.lane.b32.xlu0 %v4836_v58, %s10124_s24  ;;  %v5028_v4 = vld [vmem:[#allocation5 + $0x80] sm:$0xff]  ;;  %v5029_v58 = vld [vmem:[#allocation5 + $0x90] sm:$0xff] }
 0x697   : > { %v4539_v29 = vpop.permute.xlu1 %4538  ;;  %v4541_v11 = vpop.permute.xlu0 %4540 }
 0x698   : > { %4619 = vst.msk [vmem:[#allocation6 + $0x78] sm:$0xff] %vm2330_vm10, %v4539_v29  ;;  %4620 = vst.msk [vmem:[#allocation6 + $0x80] sm:$0xff] %vm2330_vm10, %v4541_v11 }
 0x699   : > { %4910 = vrot.lane.b32.xlu1 %v4837_v38, %s10124_s24  ;;  %4912 = vrot.lane.b32.xlu0 %v4838_v25, %s10124_s24  ;;  %v5030_v38 = vld [vmem:[#allocation5 + $0x98] sm:$0xff]  ;;  %v5031_v25 = vld [vmem:[#allocation5 + $0xa8] sm:$0xff] }
 0x69b   : > { %v4543_v56 = vpop.permute.xlu1 %4542  ;;  %v4545_v47 = vpop.permute.xlu0 %4544 }
 0x69c   : > { %4621 = vst.msk [vmem:[#allocation6 + $0x88] sm:$0xff] %vm2330_vm10, %v4543_v56  ;;  %4622 = vst.msk [vmem:[#allocation6 + $0x90] sm:$0xff] %vm2330_vm10, %v4545_v47 }
 0x69d   : > { %4914 = vrot.lane.b32.xlu1 %v4839_v8, %s10124_s24  ;;  %4916 = vrot.lane.b32.xlu0 %v4840_v50, %s10124_s24  ;;  %v5032_v8 = vld [vmem:[#allocation5 + $0xb0] sm:$0xff]  ;;  %v5033_v50 = vld [vmem:[#allocation5 + $0xc0] sm:$0xff] }
 0x69f   : > { %v4547_v16 = vpop.permute.xlu1 %4546  ;;  %v4549_v1 = vpop.permute.xlu0 %4548 }
 0x6a0   : > { %4623 = vst.msk [vmem:[#allocation6 + $0x98] sm:$0xff] %vm2330_vm10, %v4547_v16  ;;  %4624 = vst.msk [vmem:[#allocation6 + $0xa0] sm:$0xff] %vm2330_vm10, %v4549_v1 }
 0x6a1   : > { %4918 = vrot.lane.b32.xlu1 %v4841_v42, %s10124_s24  ;;  %4920 = vrot.lane.b32.xlu0 %v4842_v34, %s10124_s24  ;;  %v5034_v42 = vld [vmem:[#allocation5 + $0xc8] sm:$0xff]  ;;  %v5035_v34 = vld [vmem:[#allocation5 + $0xd8] sm:$0xff] }
 0x6a3   : > { %v4551_v63 = vpop.permute.xlu1 %4550  ;;  %v4553_v54 = vpop.permute.xlu0 %4552 }
 0x6a4   : > { %4625 = vst.msk [vmem:[#allocation6 + $0xa8] sm:$0xff] %vm2330_vm10, %v4551_v63  ;;  %4626 = vst.msk [vmem:[#allocation6 + $0xb0] sm:$0xff] %vm2330_vm10, %v4553_v54 }
 0x6a5   : > { %4922 = vrot.lane.b32.xlu1 %v4843_v28, %s10124_s24  ;;  %4924 = vrot.lane.b32.xlu0 %v4844_v26, %s10124_s24  ;;  %v5036_v28 = vld [vmem:[#allocation5 + $0xe0] sm:$0xff]  ;;  %v5037_v26 = vld [vmem:[#allocation5 + $0xf0] sm:$0xff] }
 0x6a7   : > { %v4555_v19 = vpop.permute.xlu1 %4554  ;;  %v4557_v55 = vpop.permute.xlu0 %4556 }
 0x6a8   : > { %4627 = vst.msk [vmem:[#allocation6 + $0xb8] sm:$0xff] %vm2330_vm10, %v4555_v19  ;;  %4628 = vst.msk [vmem:[#allocation6 + $0xc0] sm:$0xff] %vm2330_vm10, %v4557_v55 }
 0x6a9   : > { %4926 = vrot.lane.b32.xlu1 %v4845_v41, %s10124_s24  ;;  %4928 = vrot.lane.b32.xlu0 %v4846_v31, %s10124_s24  ;;  %v5038_v41 = vld [vmem:[#allocation5 + $0xf8] sm:$0xff]  ;;  %v5039_v31 = vld [vmem:[#allocation5 + $0x108] sm:$0xff] }
 0x6ab   : > { %v4559_v14 = vpop.permute.xlu1 %4558  ;;  %v4561_v46 = vpop.permute.xlu0 %4560 }
 0x6ac   : > { %4629 = vst.msk [vmem:[#allocation6 + $0xc8] sm:$0xff] %vm2330_vm10, %v4559_v14  ;;  %4630 = vst.msk [vmem:[#allocation6 + $0xd0] sm:$0xff] %vm2330_vm10, %v4561_v46 }
 0x6ad   : > { %4930 = vrot.lane.b32.xlu1 %v4847_v37, %s10124_s24  ;;  %4932 = vrot.lane.b32.xlu0 %v4848_v53, %s10124_s24  ;;  %v5040_v37 = vld [vmem:[#allocation5 + $0x110] sm:$0xff]  ;;  %v5041_v53 = vld [vmem:[#allocation5 + $0x120] sm:$0xff] }
 0x6af   : > { %v4563_v59 = vpop.permute.xlu1 %4562  ;;  %v4565_v7 = vpop.permute.xlu0 %4564 }
 0x6b0   : > { %4631 = vst.msk [vmem:[#allocation6 + $0xd8] sm:$0xff] %vm2330_vm10, %v4563_v59  ;;  %4632 = vst.msk [vmem:[#allocation6 + $0xe0] sm:$0xff] %vm2330_vm10, %v4565_v7 }
 0x6b1   : > { %4934 = vrot.lane.b32.xlu1 %v4849_v10, %s10124_s24  ;;  %4936 = vrot.lane.b32.xlu0 %v4850_v43, %s10124_s24  ;;  %v5042_v10 = vld [vmem:[#allocation5 + $0x128] sm:$0xff]  ;;  %v5043_v43 = vld [vmem:[#allocation5 + $0x138] sm:$0xff] }
 0x6b3   : > { %v4567_v36 = vpop.permute.xlu1 %4566  ;;  %v4569_v13 = vpop.permute.xlu0 %4568 }
 0x6b4   : > { %4633 = vst.msk [vmem:[#allocation6 + $0xe8] sm:$0xff] %vm2330_vm10, %v4567_v36  ;;  %4634 = vst.msk [vmem:[#allocation6 + $0xf0] sm:$0xff] %vm2330_vm10, %v4569_v13 }
 0x6b5   : > { %4938 = vrot.lane.b32.xlu1 %v4851_v22, %s10124_s24  ;;  %4940 = vrot.lane.b32.xlu0 %v4852_v60, %s10124_s24  ;;  %v5044_v22 = vld [vmem:[#allocation5 + $0x140] sm:$0xff]  ;;  %v5045_v60 = vld [vmem:[#allocation5 + $0x150] sm:$0xff] }
 0x6b7   : > { %v4571_v3 = vpop.permute.xlu1 %4570  ;;  %v4701_v23 = vpop.permute.xlu0 %4700 }
 0x6b8   : > { %4635 = vst.msk [vmem:[#allocation6 + $0xf8] sm:$0xff] %vm2330_vm10, %v4571_v3  ;;  %vm6726_vm10 = vcmask 622144  }
 0x6b9   : > { %4796 = vst.msk [vmem:[#allocation6] sm:$0xff] %vm2523_vm12, %v4701_v23  ;;  %4942 = vrot.lane.b32.xlu1 %v4853_v48, %s10124_s24  ;;  %4944 = vrot.lane.b32.xlu0 %v4854_v17, %s10124_s24  ;;  %v5046_v48 = vld [vmem:[#allocation5 + $0x158] sm:$0xff]  ;;  %v5047_v17 = vld [vmem:[#allocation5 + $0x168] sm:$0xff] }
 0x6bb   : > { %v4703_v57 = vpop.permute.xlu1 %4702  ;;  %v4705_v0 = vpop.permute.xlu0 %4704 }
 0x6bc   : > { %4797 = vst.msk [vmem:[#allocation6 + $0x8] sm:$0xff] %vm2523_vm12, %v4703_v57  ;;  %4798 = vst.msk [vmem:[#allocation6 + $0x10] sm:$0xff] %vm2523_vm12, %v4705_v0 }
 0x6bd   : > { %4946 = vrot.lane.b32.xlu1 %v4855_v20, %s10124_s24  ;;  %4948 = vrot.lane.b32.xlu0 %v4856_v30, %s10124_s24  ;;  %v5048_v20 = vld [vmem:[#allocation5 + $0x170] sm:$0xff]  ;;  %v5049_v30 = vld [vmem:[#allocation5 + $0x180] sm:$0xff] }
 0x6bf   : > { %v4707_v49 = vpop.permute.xlu1 %4706  ;;  %v4709_v33 = vpop.permute.xlu0 %4708 }
 0x6c0   : > { %4799 = vst.msk [vmem:[#allocation6 + $0x18] sm:$0xff] %vm2523_vm12, %v4707_v49  ;;  %4800 = vst.msk [vmem:[#allocation6 + $0x20] sm:$0xff] %vm2523_vm12, %v4709_v33 }
 0x6c1   : > { %4950 = vrot.lane.b32.xlu1 %v4857_v45, %s10124_s24  ;;  %4952 = vrot.lane.b32.xlu0 %v4858_v35, %s10124_s24  ;;  %v5050_v45 = vld [vmem:[#allocation5 + $0x188] sm:$0xff]  ;;  %v5051_v35 = vld [vmem:[#allocation5 + $0x198] sm:$0xff] }
 0x6c3   : > { %v4711_v2 = vpop.permute.xlu1 %4710  ;;  %v4713_v5 = vpop.permute.xlu0 %4712 }
 0x6c4   : > { %4801 = vst.msk [vmem:[#allocation6 + $0x28] sm:$0xff] %vm2523_vm12, %v4711_v2  ;;  %4802 = vst.msk [vmem:[#allocation6 + $0x30] sm:$0xff] %vm2523_vm12, %v4713_v5 }
 0x6c5   : > { %4954 = vrot.lane.b32.xlu1 %v4859_v51, %s10124_s24  ;;  %5085 = vrot.lane.b32.xlu0 %v5021_v18, %s10125_s27  ;;  %v5052_v51 = vld [vmem:[#allocation5 + $0x1a0] sm:$0xff]  ;;  %v5214_v18 = vld [vmem:[#allocation5 + $0x31] sm:$0xff]  ;;  %s10132_s24 = smov 68  }
 0x6c7   : > { %v4715_v62 = vpop.permute.xlu1 %4714  ;;  %v4717_v32 = vpop.permute.xlu0 %4716 }
 0x6c8   : > { %4803 = vst.msk [vmem:[#allocation6 + $0x38] sm:$0xff] %vm2523_vm12, %v4715_v62  ;;  %4804 = vst.msk [vmem:[#allocation6 + $0x40] sm:$0xff] %vm2523_vm12, %v4717_v32 }
 0x6c9   : > { %5087 = vrot.lane.b32.xlu1 %v5022_v44, %s10125_s27  ;;  %5089 = vrot.lane.b32.xlu0 %v5023_v40, %s10125_s27  ;;  %v5215_v44 = vld [vmem:[#allocation5 + $0x39] sm:$0xff]  ;;  %v5216_v40 = vld [vmem:[#allocation5 + $0x49] sm:$0xff] }
 0x6cb   : > { %v4719_v27 = vpop.permute.xlu1 %4718  ;;  %v4721_v39 = vpop.permute.xlu0 %4720 }
 0x6cc   : > { %4805 = vst.msk [vmem:[#allocation6 + $0x48] sm:$0xff] %vm2523_vm12, %v4719_v27  ;;  %4806 = vst.msk [vmem:[#allocation6 + $0x50] sm:$0xff] %vm2523_vm12, %v4721_v39 }
 0x6cd   : > { %5091 = vrot.lane.b32.xlu1 %v5024_v6, %s10125_s27  ;;  %5093 = vrot.lane.b32.xlu0 %v5025_v12, %s10125_s27  ;;  %v5217_v6 = vld [vmem:[#allocation5 + $0x51] sm:$0xff]  ;;  %v5218_v12 = vld [vmem:[#allocation5 + $0x61] sm:$0xff] }
 0x6cf   : > { %v4723_v9 = vpop.permute.xlu1 %4722  ;;  %v4725_v15 = vpop.permute.xlu0 %4724 }
 0x6d0   : > { %4807 = vst.msk [vmem:[#allocation6 + $0x58] sm:$0xff] %vm2523_vm12, %v4723_v9  ;;  %4808 = vst.msk [vmem:[#allocation6 + $0x60] sm:$0xff] %vm2523_vm12, %v4725_v15 }
 0x6d1   : > { %5095 = vrot.lane.b32.xlu1 %v5026_v24, %s10125_s27  ;;  %5097 = vrot.lane.b32.xlu0 %v5027_v61, %s10125_s27  ;;  %v5219_v24 = vld [vmem:[#allocation5 + $0x69] sm:$0xff]  ;;  %v5220_v61 = vld [vmem:[#allocation5 + $0x79] sm:$0xff] }
 0x6d3   : > { %v4727_v21 = vpop.permute.xlu1 %4726  ;;  %v4729_v52 = vpop.permute.xlu0 %4728 }
 0x6d4   : > { %4809 = vst.msk [vmem:[#allocation6 + $0x68] sm:$0xff] %vm2523_vm12, %v4727_v21  ;;  %4810 = vst.msk [vmem:[#allocation6 + $0x70] sm:$0xff] %vm2523_vm12, %v4729_v52 }
 0x6d5   : > { %5099 = vrot.lane.b32.xlu1 %v5028_v4, %s10125_s27  ;;  %5101 = vrot.lane.b32.xlu0 %v5029_v58, %s10125_s27  ;;  %v5221_v4 = vld [vmem:[#allocation5 + $0x81] sm:$0xff]  ;;  %v5222_v58 = vld [vmem:[#allocation5 + $0x91] sm:$0xff] }
 0x6d7   : > { %v4731_v29 = vpop.permute.xlu1 %4730  ;;  %v4733_v11 = vpop.permute.xlu0 %4732 }
 0x6d8   : > { %4811 = vst.msk [vmem:[#allocation6 + $0x78] sm:$0xff] %vm2523_vm12, %v4731_v29  ;;  %4812 = vst.msk [vmem:[#allocation6 + $0x80] sm:$0xff] %vm2523_vm12, %v4733_v11 }
 0x6d9   : > { %5103 = vrot.lane.b32.xlu1 %v5030_v38, %s10125_s27  ;;  %5105 = vrot.lane.b32.xlu0 %v5031_v25, %s10125_s27  ;;  %v5223_v38 = vld [vmem:[#allocation5 + $0x99] sm:$0xff]  ;;  %v5224_v25 = vld [vmem:[#allocation5 + $0xa9] sm:$0xff] }
 0x6db   : > { %v4735_v56 = vpop.permute.xlu1 %4734  ;;  %v4737_v47 = vpop.permute.xlu0 %4736 }
 0x6dc   : > { %4813 = vst.msk [vmem:[#allocation6 + $0x88] sm:$0xff] %vm2523_vm12, %v4735_v56  ;;  %4814 = vst.msk [vmem:[#allocation6 + $0x90] sm:$0xff] %vm2523_vm12, %v4737_v47 }
 0x6dd   : > { %5107 = vrot.lane.b32.xlu1 %v5032_v8, %s10125_s27  ;;  %5109 = vrot.lane.b32.xlu0 %v5033_v50, %s10125_s27  ;;  %v5225_v8 = vld [vmem:[#allocation5 + $0xb1] sm:$0xff]  ;;  %v5226_v50 = vld [vmem:[#allocation5 + $0xc1] sm:$0xff] }
 0x6df   : > { %v4739_v16 = vpop.permute.xlu1 %4738  ;;  %v4741_v1 = vpop.permute.xlu0 %4740 }
 0x6e0   : > { %4815 = vst.msk [vmem:[#allocation6 + $0x98] sm:$0xff] %vm2523_vm12, %v4739_v16  ;;  %4816 = vst.msk [vmem:[#allocation6 + $0xa0] sm:$0xff] %vm2523_vm12, %v4741_v1 }
 0x6e1   : > { %5111 = vrot.lane.b32.xlu1 %v5034_v42, %s10125_s27  ;;  %5113 = vrot.lane.b32.xlu0 %v5035_v34, %s10125_s27  ;;  %v5227_v42 = vld [vmem:[#allocation5 + $0xc9] sm:$0xff]  ;;  %v5228_v34 = vld [vmem:[#allocation5 + $0xd9] sm:$0xff] }
 0x6e3   : > { %v4743_v63 = vpop.permute.xlu1 %4742  ;;  %v4745_v54 = vpop.permute.xlu0 %4744 }
 0x6e4   : > { %4817 = vst.msk [vmem:[#allocation6 + $0xa8] sm:$0xff] %vm2523_vm12, %v4743_v63  ;;  %4818 = vst.msk [vmem:[#allocation6 + $0xb0] sm:$0xff] %vm2523_vm12, %v4745_v54 }
 0x6e5   : > { %5115 = vrot.lane.b32.xlu1 %v5036_v28, %s10125_s27  ;;  %5117 = vrot.lane.b32.xlu0 %v5037_v26, %s10125_s27  ;;  %v5229_v28 = vld [vmem:[#allocation5 + $0xe1] sm:$0xff]  ;;  %v5230_v26 = vld [vmem:[#allocation5 + $0xf1] sm:$0xff] }
 0x6e7   : > { %v4747_v19 = vpop.permute.xlu1 %4746  ;;  %v4749_v55 = vpop.permute.xlu0 %4748 }
 0x6e8   : > { %4819 = vst.msk [vmem:[#allocation6 + $0xb8] sm:$0xff] %vm2523_vm12, %v4747_v19  ;;  %4820 = vst.msk [vmem:[#allocation6 + $0xc0] sm:$0xff] %vm2523_vm12, %v4749_v55 }
 0x6e9   : > { %5119 = vrot.lane.b32.xlu1 %v5038_v41, %s10125_s27  ;;  %5121 = vrot.lane.b32.xlu0 %v5039_v31, %s10125_s27  ;;  %v5231_v41 = vld [vmem:[#allocation5 + $0xf9] sm:$0xff]  ;;  %v5232_v31 = vld [vmem:[#allocation5 + $0x109] sm:$0xff] }
 0x6eb   : > { %v4751_v14 = vpop.permute.xlu1 %4750  ;;  %v4753_v46 = vpop.permute.xlu0 %4752 }
 0x6ec   : > { %4821 = vst.msk [vmem:[#allocation6 + $0xc8] sm:$0xff] %vm2523_vm12, %v4751_v14  ;;  %4822 = vst.msk [vmem:[#allocation6 + $0xd0] sm:$0xff] %vm2523_vm12, %v4753_v46 }
 0x6ed   : > { %5123 = vrot.lane.b32.xlu1 %v5040_v37, %s10125_s27  ;;  %5125 = vrot.lane.b32.xlu0 %v5041_v53, %s10125_s27  ;;  %v5233_v37 = vld [vmem:[#allocation5 + $0x111] sm:$0xff]  ;;  %v5234_v53 = vld [vmem:[#allocation5 + $0x121] sm:$0xff] }
 0x6ef   : > { %v4755_v59 = vpop.permute.xlu1 %4754  ;;  %v4757_v7 = vpop.permute.xlu0 %4756 }
 0x6f0   : > { %4823 = vst.msk [vmem:[#allocation6 + $0xd8] sm:$0xff] %vm2523_vm12, %v4755_v59  ;;  %4824 = vst.msk [vmem:[#allocation6 + $0xe0] sm:$0xff] %vm2523_vm12, %v4757_v7 }
 0x6f1   : > { %5127 = vrot.lane.b32.xlu1 %v5042_v10, %s10125_s27  ;;  %5129 = vrot.lane.b32.xlu0 %v5043_v43, %s10125_s27  ;;  %v5235_v10 = vld [vmem:[#allocation5 + $0x129] sm:$0xff]  ;;  %v5236_v43 = vld [vmem:[#allocation5 + $0x139] sm:$0xff] }
 0x6f3   : > { %v4759_v36 = vpop.permute.xlu1 %4758  ;;  %v4761_v13 = vpop.permute.xlu0 %4760 }
 0x6f4   : > { %4825 = vst.msk [vmem:[#allocation6 + $0xe8] sm:$0xff] %vm2523_vm12, %v4759_v36  ;;  %4826 = vst.msk [vmem:[#allocation6 + $0xf0] sm:$0xff] %vm2523_vm12, %v4761_v13 }
 0x6f5   : > { %5131 = vrot.lane.b32.xlu1 %v5044_v22, %s10125_s27  ;;  %5133 = vrot.lane.b32.xlu0 %v5045_v60, %s10125_s27  ;;  %v5237_v22 = vld [vmem:[#allocation5 + $0x141] sm:$0xff]  ;;  %v5238_v60 = vld [vmem:[#allocation5 + $0x151] sm:$0xff] }
 0x6f7   : > { %v4763_v3 = vpop.permute.xlu1 %4762  ;;  %v4893_v23 = vpop.permute.xlu0 %4892 }
 0x6f8   : > { %4827 = vst.msk [vmem:[#allocation6 + $0xf8] sm:$0xff] %vm2523_vm12, %v4763_v3  ;;  %vm7113_vm12 = vcmask 687744  }
 0x6f9   : > { %4989 = vst.msk [vmem:[#allocation6] sm:$0xff] %vm4988_vm15, %v4893_v23  ;;  %5135 = vrot.lane.b32.xlu1 %v5046_v48, %s10125_s27  ;;  %5137 = vrot.lane.b32.xlu0 %v5047_v17, %s10125_s27  ;;  %v5239_v48 = vld [vmem:[#allocation5 + $0x159] sm:$0xff]  ;;  %v5240_v17 = vld [vmem:[#allocation5 + $0x169] sm:$0xff] }
 0x6fb   : > { %v4895_v57 = vpop.permute.xlu1 %4894  ;;  %v4897_v0 = vpop.permute.xlu0 %4896 }
 0x6fc   : > { %4990 = vst.msk [vmem:[#allocation6 + $0x8] sm:$0xff] %vm4988_vm15, %v4895_v57  ;;  %4991 = vst.msk [vmem:[#allocation6 + $0x10] sm:$0xff] %vm4988_vm15, %v4897_v0 }
 0x6fd   : > { %5139 = vrot.lane.b32.xlu1 %v5048_v20, %s10125_s27  ;;  %5141 = vrot.lane.b32.xlu0 %v5049_v30, %s10125_s27  ;;  %v5241_v20 = vld [vmem:[#allocation5 + $0x171] sm:$0xff]  ;;  %v5242_v30 = vld [vmem:[#allocation5 + $0x181] sm:$0xff] }
 0x6ff   : > { %v4899_v49 = vpop.permute.xlu1 %4898  ;;  %v4901_v33 = vpop.permute.xlu0 %4900 }
 0x700   : > { %4992 = vst.msk [vmem:[#allocation6 + $0x18] sm:$0xff] %vm4988_vm15, %v4899_v49  ;;  %4993 = vst.msk [vmem:[#allocation6 + $0x20] sm:$0xff] %vm4988_vm15, %v4901_v33 }
 0x701   : > { %5143 = vrot.lane.b32.xlu1 %v5050_v45, %s10125_s27  ;;  %5145 = vrot.lane.b32.xlu0 %v5051_v35, %s10125_s27  ;;  %v5243_v45 = vld [vmem:[#allocation5 + $0x189] sm:$0xff]  ;;  %v5244_v35 = vld [vmem:[#allocation5 + $0x199] sm:$0xff] }
 0x703   : > { %v4903_v2 = vpop.permute.xlu1 %4902  ;;  %v4905_v5 = vpop.permute.xlu0 %4904 }
 0x704   : > { %4994 = vst.msk [vmem:[#allocation6 + $0x28] sm:$0xff] %vm4988_vm15, %v4903_v2  ;;  %4995 = vst.msk [vmem:[#allocation6 + $0x30] sm:$0xff] %vm4988_vm15, %v4905_v5 }
 0x705   : > { %5147 = vrot.lane.b32.xlu1 %v5052_v51, %s10125_s27  ;;  %5278 = vrot.lane.b32.xlu0 %v5214_v18, %s10126_s16  ;;  %v5245_v51 = vld [vmem:[#allocation5 + $0x1a1] sm:$0xff]  ;;  %v5407_v18 = vld [vmem:[#allocation5 + $0x32] sm:$0xff]  ;;  %s10133_s27 = smov 72  }
 0x707   : > { %v4907_v62 = vpop.permute.xlu1 %4906  ;;  %v4909_v32 = vpop.permute.xlu0 %4908 }
 0x708   : > { %4996 = vst.msk [vmem:[#allocation6 + $0x38] sm:$0xff] %vm4988_vm15, %v4907_v62  ;;  %4997 = vst.msk [vmem:[#allocation6 + $0x40] sm:$0xff] %vm4988_vm15, %v4909_v32 }
 0x709   : > { %5280 = vrot.lane.b32.xlu1 %v5215_v44, %s10126_s16  ;;  %5282 = vrot.lane.b32.xlu0 %v5216_v40, %s10126_s16  ;;  %v5408_v44 = vld [vmem:[#allocation5 + $0x3a] sm:$0xff]  ;;  %v5409_v40 = vld [vmem:[#allocation5 + $0x4a] sm:$0xff] }
 0x70b   : > { %v4911_v27 = vpop.permute.xlu1 %4910  ;;  %v4913_v39 = vpop.permute.xlu0 %4912 }
 0x70c   : > { %4998 = vst.msk [vmem:[#allocation6 + $0x48] sm:$0xff] %vm4988_vm15, %v4911_v27  ;;  %4999 = vst.msk [vmem:[#allocation6 + $0x50] sm:$0xff] %vm4988_vm15, %v4913_v39 }
 0x70d   : > { %5284 = vrot.lane.b32.xlu1 %v5217_v6, %s10126_s16  ;;  %5286 = vrot.lane.b32.xlu0 %v5218_v12, %s10126_s16  ;;  %v5410_v6 = vld [vmem:[#allocation5 + $0x52] sm:$0xff]  ;;  %v5411_v12 = vld [vmem:[#allocation5 + $0x62] sm:$0xff] }
 0x70f   : > { %v4915_v9 = vpop.permute.xlu1 %4914  ;;  %v4917_v15 = vpop.permute.xlu0 %4916 }
 0x710   : > { %5000 = vst.msk [vmem:[#allocation6 + $0x58] sm:$0xff] %vm4988_vm15, %v4915_v9  ;;  %5001 = vst.msk [vmem:[#allocation6 + $0x60] sm:$0xff] %vm4988_vm15, %v4917_v15 }
 0x711   : > { %5288 = vrot.lane.b32.xlu1 %v5219_v24, %s10126_s16  ;;  %5290 = vrot.lane.b32.xlu0 %v5220_v61, %s10126_s16  ;;  %v5412_v24 = vld [vmem:[#allocation5 + $0x6a] sm:$0xff]  ;;  %v5413_v61 = vld [vmem:[#allocation5 + $0x7a] sm:$0xff] }
 0x713   : > { %v4919_v21 = vpop.permute.xlu1 %4918  ;;  %v4921_v52 = vpop.permute.xlu0 %4920 }
 0x714   : > { %5002 = vst.msk [vmem:[#allocation6 + $0x68] sm:$0xff] %vm4988_vm15, %v4919_v21  ;;  %5003 = vst.msk [vmem:[#allocation6 + $0x70] sm:$0xff] %vm4988_vm15, %v4921_v52 }
 0x715   : > { %5292 = vrot.lane.b32.xlu1 %v5221_v4, %s10126_s16  ;;  %5294 = vrot.lane.b32.xlu0 %v5222_v58, %s10126_s16  ;;  %v5414_v4 = vld [vmem:[#allocation5 + $0x82] sm:$0xff]  ;;  %v5415_v58 = vld [vmem:[#allocation5 + $0x92] sm:$0xff] }
 0x717   : > { %v4923_v29 = vpop.permute.xlu1 %4922  ;;  %v4925_v11 = vpop.permute.xlu0 %4924 }
 0x718   : > { %5004 = vst.msk [vmem:[#allocation6 + $0x78] sm:$0xff] %vm4988_vm15, %v4923_v29  ;;  %5005 = vst.msk [vmem:[#allocation6 + $0x80] sm:$0xff] %vm4988_vm15, %v4925_v11 }
 0x719   : > { %5296 = vrot.lane.b32.xlu1 %v5223_v38, %s10126_s16  ;;  %5298 = vrot.lane.b32.xlu0 %v5224_v25, %s10126_s16  ;;  %v5416_v38 = vld [vmem:[#allocation5 + $0x9a] sm:$0xff]  ;;  %v5417_v25 = vld [vmem:[#allocation5 + $0xaa] sm:$0xff] }
 0x71b   : > { %v4927_v56 = vpop.permute.xlu1 %4926  ;;  %v4929_v47 = vpop.permute.xlu0 %4928 }
 0x71c   : > { %5006 = vst.msk [vmem:[#allocation6 + $0x88] sm:$0xff] %vm4988_vm15, %v4927_v56  ;;  %5007 = vst.msk [vmem:[#allocation6 + $0x90] sm:$0xff] %vm4988_vm15, %v4929_v47 }
 0x71d   : > { %5300 = vrot.lane.b32.xlu1 %v5225_v8, %s10126_s16  ;;  %5302 = vrot.lane.b32.xlu0 %v5226_v50, %s10126_s16  ;;  %v5418_v8 = vld [vmem:[#allocation5 + $0xb2] sm:$0xff]  ;;  %v5419_v50 = vld [vmem:[#allocation5 + $0xc2] sm:$0xff] }
 0x71f   : > { %v4931_v16 = vpop.permute.xlu1 %4930  ;;  %v4933_v1 = vpop.permute.xlu0 %4932 }
 0x720   : > { %5008 = vst.msk [vmem:[#allocation6 + $0x98] sm:$0xff] %vm4988_vm15, %v4931_v16  ;;  %5009 = vst.msk [vmem:[#allocation6 + $0xa0] sm:$0xff] %vm4988_vm15, %v4933_v1 }
 0x721   : > { %5304 = vrot.lane.b32.xlu1 %v5227_v42, %s10126_s16  ;;  %5306 = vrot.lane.b32.xlu0 %v5228_v34, %s10126_s16  ;;  %v5420_v42 = vld [vmem:[#allocation5 + $0xca] sm:$0xff]  ;;  %v5421_v34 = vld [vmem:[#allocation5 + $0xda] sm:$0xff] }
 0x723   : > { %v4935_v63 = vpop.permute.xlu1 %4934  ;;  %v4937_v54 = vpop.permute.xlu0 %4936 }
 0x724   : > { %5010 = vst.msk [vmem:[#allocation6 + $0xa8] sm:$0xff] %vm4988_vm15, %v4935_v63  ;;  %5011 = vst.msk [vmem:[#allocation6 + $0xb0] sm:$0xff] %vm4988_vm15, %v4937_v54 }
 0x725   : > { %5308 = vrot.lane.b32.xlu1 %v5229_v28, %s10126_s16  ;;  %5310 = vrot.lane.b32.xlu0 %v5230_v26, %s10126_s16  ;;  %v5422_v28 = vld [vmem:[#allocation5 + $0xe2] sm:$0xff]  ;;  %v5423_v26 = vld [vmem:[#allocation5 + $0xf2] sm:$0xff] }
 0x727   : > { %v4939_v19 = vpop.permute.xlu1 %4938  ;;  %v4941_v55 = vpop.permute.xlu0 %4940 }
 0x728   : > { %5012 = vst.msk [vmem:[#allocation6 + $0xb8] sm:$0xff] %vm4988_vm15, %v4939_v19  ;;  %5013 = vst.msk [vmem:[#allocation6 + $0xc0] sm:$0xff] %vm4988_vm15, %v4941_v55 }
 0x729   : > { %5312 = vrot.lane.b32.xlu1 %v5231_v41, %s10126_s16  ;;  %5314 = vrot.lane.b32.xlu0 %v5232_v31, %s10126_s16  ;;  %v5424_v41 = vld [vmem:[#allocation5 + $0xfa] sm:$0xff]  ;;  %v5425_v31 = vld [vmem:[#allocation5 + $0x10a] sm:$0xff] }
 0x72b   : > { %v4943_v14 = vpop.permute.xlu1 %4942  ;;  %v4945_v46 = vpop.permute.xlu0 %4944 }
 0x72c   : > { %5014 = vst.msk [vmem:[#allocation6 + $0xc8] sm:$0xff] %vm4988_vm15, %v4943_v14  ;;  %5015 = vst.msk [vmem:[#allocation6 + $0xd0] sm:$0xff] %vm4988_vm15, %v4945_v46 }
 0x72d   : > { %5316 = vrot.lane.b32.xlu1 %v5233_v37, %s10126_s16  ;;  %5318 = vrot.lane.b32.xlu0 %v5234_v53, %s10126_s16  ;;  %v5426_v37 = vld [vmem:[#allocation5 + $0x112] sm:$0xff]  ;;  %v5427_v53 = vld [vmem:[#allocation5 + $0x122] sm:$0xff] }
 0x72f   : > { %v4947_v59 = vpop.permute.xlu1 %4946  ;;  %v4949_v7 = vpop.permute.xlu0 %4948 }
 0x730   : > { %5016 = vst.msk [vmem:[#allocation6 + $0xd8] sm:$0xff] %vm4988_vm15, %v4947_v59  ;;  %5017 = vst.msk [vmem:[#allocation6 + $0xe0] sm:$0xff] %vm4988_vm15, %v4949_v7 }
 0x731   : > { %5320 = vrot.lane.b32.xlu1 %v5235_v10, %s10126_s16  ;;  %5322 = vrot.lane.b32.xlu0 %v5236_v43, %s10126_s16  ;;  %v5428_v10 = vld [vmem:[#allocation5 + $0x12a] sm:$0xff]  ;;  %v5429_v43 = vld [vmem:[#allocation5 + $0x13a] sm:$0xff] }
 0x733   : > { %v4951_v36 = vpop.permute.xlu1 %4950  ;;  %v4953_v13 = vpop.permute.xlu0 %4952 }
 0x734   : > { %5018 = vst.msk [vmem:[#allocation6 + $0xe8] sm:$0xff] %vm4988_vm15, %v4951_v36  ;;  %5019 = vst.msk [vmem:[#allocation6 + $0xf0] sm:$0xff] %vm4988_vm15, %v4953_v13 }
 0x735   : > { %5324 = vrot.lane.b32.xlu1 %v5237_v22, %s10126_s16  ;;  %5326 = vrot.lane.b32.xlu0 %v5238_v60, %s10126_s16  ;;  %v5430_v22 = vld [vmem:[#allocation5 + $0x142] sm:$0xff]  ;;  %v5431_v60 = vld [vmem:[#allocation5 + $0x152] sm:$0xff] }
 0x737   : > { %v4955_v3 = vpop.permute.xlu1 %4954  ;;  %v5086_v23 = vpop.permute.xlu0 %5085 }
 0x738   : > { %5020 = vst.msk [vmem:[#allocation6 + $0xf8] sm:$0xff] %vm4988_vm15, %v4955_v3  ;;  %vm7692_vm15 = vcmask 786144  }
 0x739   : > { %5182 = vst.msk [vmem:[#allocation6] sm:$0xff] %vm5181_vm1, %v5086_v23  ;;  %5328 = vrot.lane.b32.xlu1 %v5239_v48, %s10126_s16  ;;  %5330 = vrot.lane.b32.xlu0 %v5240_v17, %s10126_s16  ;;  %v5432_v48 = vld [vmem:[#allocation5 + $0x15a] sm:$0xff]  ;;  %v5433_v17 = vld [vmem:[#allocation5 + $0x16a] sm:$0xff] }
 0x73b   : > { %v5088_v57 = vpop.permute.xlu1 %5087  ;;  %v5090_v0 = vpop.permute.xlu0 %5089 }
 0x73c   : > { %5183 = vst.msk [vmem:[#allocation6 + $0x8] sm:$0xff] %vm5181_vm1, %v5088_v57  ;;  %5184 = vst.msk [vmem:[#allocation6 + $0x10] sm:$0xff] %vm5181_vm1, %v5090_v0 }
 0x73d   : > { %5332 = vrot.lane.b32.xlu1 %v5241_v20, %s10126_s16  ;;  %5334 = vrot.lane.b32.xlu0 %v5242_v30, %s10126_s16  ;;  %v5434_v20 = vld [vmem:[#allocation5 + $0x172] sm:$0xff]  ;;  %v5435_v30 = vld [vmem:[#allocation5 + $0x182] sm:$0xff] }
 0x73f   : > { %v5092_v49 = vpop.permute.xlu1 %5091  ;;  %v5094_v33 = vpop.permute.xlu0 %5093 }
 0x740   : > { %5185 = vst.msk [vmem:[#allocation6 + $0x18] sm:$0xff] %vm5181_vm1, %v5092_v49  ;;  %5186 = vst.msk [vmem:[#allocation6 + $0x20] sm:$0xff] %vm5181_vm1, %v5094_v33 }
 0x741   : > { %5336 = vrot.lane.b32.xlu1 %v5243_v45, %s10126_s16  ;;  %5338 = vrot.lane.b32.xlu0 %v5244_v35, %s10126_s16  ;;  %v5436_v45 = vld [vmem:[#allocation5 + $0x18a] sm:$0xff]  ;;  %v5437_v35 = vld [vmem:[#allocation5 + $0x19a] sm:$0xff] }
 0x743   : > { %v5096_v2 = vpop.permute.xlu1 %5095  ;;  %v5098_v5 = vpop.permute.xlu0 %5097 }
 0x744   : > { %5187 = vst.msk [vmem:[#allocation6 + $0x28] sm:$0xff] %vm5181_vm1, %v5096_v2  ;;  %5188 = vst.msk [vmem:[#allocation6 + $0x30] sm:$0xff] %vm5181_vm1, %v5098_v5 }
 0x745   : > { %5340 = vrot.lane.b32.xlu1 %v5245_v51, %s10126_s16  ;;  %5471 = vrot.lane.b32.xlu0 %v5407_v18, %s10127_s17  ;;  %v5438_v51 = vld [vmem:[#allocation5 + $0x1a2] sm:$0xff]  ;;  %v5600_v18 = vld [vmem:[#allocation5 + $0x33] sm:$0xff]  ;;  %s10134_s16 = smov 76  }
 0x747   : > { %v5100_v62 = vpop.permute.xlu1 %5099  ;;  %v5102_v32 = vpop.permute.xlu0 %5101 }
 0x748   : > { %5189 = vst.msk [vmem:[#allocation6 + $0x38] sm:$0xff] %vm5181_vm1, %v5100_v62  ;;  %5190 = vst.msk [vmem:[#allocation6 + $0x40] sm:$0xff] %vm5181_vm1, %v5102_v32 }
 0x749   : > { %5473 = vrot.lane.b32.xlu1 %v5408_v44, %s10127_s17  ;;  %5475 = vrot.lane.b32.xlu0 %v5409_v40, %s10127_s17  ;;  %v5601_v44 = vld [vmem:[#allocation5 + $0x3b] sm:$0xff]  ;;  %v5602_v40 = vld [vmem:[#allocation5 + $0x4b] sm:$0xff] }
 0x74b   : > { %v5104_v27 = vpop.permute.xlu1 %5103  ;;  %v5106_v39 = vpop.permute.xlu0 %5105 }
 0x74c   : > { %5191 = vst.msk [vmem:[#allocation6 + $0x48] sm:$0xff] %vm5181_vm1, %v5104_v27  ;;  %5192 = vst.msk [vmem:[#allocation6 + $0x50] sm:$0xff] %vm5181_vm1, %v5106_v39 }
 0x74d   : > { %5477 = vrot.lane.b32.xlu1 %v5410_v6, %s10127_s17  ;;  %5479 = vrot.lane.b32.xlu0 %v5411_v12, %s10127_s17  ;;  %v5603_v6 = vld [vmem:[#allocation5 + $0x53] sm:$0xff]  ;;  %v5604_v12 = vld [vmem:[#allocation5 + $0x63] sm:$0xff] }
 0x74f   : > { %v5108_v9 = vpop.permute.xlu1 %5107  ;;  %v5110_v15 = vpop.permute.xlu0 %5109 }
 0x750   : > { %5193 = vst.msk [vmem:[#allocation6 + $0x58] sm:$0xff] %vm5181_vm1, %v5108_v9  ;;  %5194 = vst.msk [vmem:[#allocation6 + $0x60] sm:$0xff] %vm5181_vm1, %v5110_v15 }
 0x751   : > { %5481 = vrot.lane.b32.xlu1 %v5412_v24, %s10127_s17  ;;  %5483 = vrot.lane.b32.xlu0 %v5413_v61, %s10127_s17  ;;  %v5605_v24 = vld [vmem:[#allocation5 + $0x6b] sm:$0xff]  ;;  %v5606_v61 = vld [vmem:[#allocation5 + $0x7b] sm:$0xff] }
 0x753   : > { %v5112_v21 = vpop.permute.xlu1 %5111  ;;  %v5114_v52 = vpop.permute.xlu0 %5113 }
 0x754   : > { %5195 = vst.msk [vmem:[#allocation6 + $0x68] sm:$0xff] %vm5181_vm1, %v5112_v21  ;;  %5196 = vst.msk [vmem:[#allocation6 + $0x70] sm:$0xff] %vm5181_vm1, %v5114_v52 }
 0x755   : > { %5485 = vrot.lane.b32.xlu1 %v5414_v4, %s10127_s17  ;;  %5487 = vrot.lane.b32.xlu0 %v5415_v58, %s10127_s17  ;;  %v5607_v4 = vld [vmem:[#allocation5 + $0x83] sm:$0xff]  ;;  %v5608_v58 = vld [vmem:[#allocation5 + $0x93] sm:$0xff] }
 0x757   : > { %v5116_v29 = vpop.permute.xlu1 %5115  ;;  %v5118_v11 = vpop.permute.xlu0 %5117 }
 0x758   : > { %5197 = vst.msk [vmem:[#allocation6 + $0x78] sm:$0xff] %vm5181_vm1, %v5116_v29  ;;  %5198 = vst.msk [vmem:[#allocation6 + $0x80] sm:$0xff] %vm5181_vm1, %v5118_v11 }
 0x759   : > { %5489 = vrot.lane.b32.xlu1 %v5416_v38, %s10127_s17  ;;  %5491 = vrot.lane.b32.xlu0 %v5417_v25, %s10127_s17  ;;  %v5609_v38 = vld [vmem:[#allocation5 + $0x9b] sm:$0xff]  ;;  %v5610_v25 = vld [vmem:[#allocation5 + $0xab] sm:$0xff] }
 0x75b   : > { %v5120_v56 = vpop.permute.xlu1 %5119  ;;  %v5122_v47 = vpop.permute.xlu0 %5121 }
 0x75c   : > { %5199 = vst.msk [vmem:[#allocation6 + $0x88] sm:$0xff] %vm5181_vm1, %v5120_v56  ;;  %5200 = vst.msk [vmem:[#allocation6 + $0x90] sm:$0xff] %vm5181_vm1, %v5122_v47 }
 0x75d   : > { %5493 = vrot.lane.b32.xlu1 %v5418_v8, %s10127_s17  ;;  %5495 = vrot.lane.b32.xlu0 %v5419_v50, %s10127_s17  ;;  %v5611_v8 = vld [vmem:[#allocation5 + $0xb3] sm:$0xff]  ;;  %v5612_v50 = vld [vmem:[#allocation5 + $0xc3] sm:$0xff] }
 0x75f   : > { %v5124_v16 = vpop.permute.xlu1 %5123  ;;  %v5126_v1 = vpop.permute.xlu0 %5125 }
 0x760   : > { %5201 = vst.msk [vmem:[#allocation6 + $0x98] sm:$0xff] %vm5181_vm1, %v5124_v16  ;;  %5202 = vst.msk [vmem:[#allocation6 + $0xa0] sm:$0xff] %vm5181_vm1, %v5126_v1 }
 0x761   : > { %5497 = vrot.lane.b32.xlu1 %v5420_v42, %s10127_s17  ;;  %5499 = vrot.lane.b32.xlu0 %v5421_v34, %s10127_s17  ;;  %v5613_v42 = vld [vmem:[#allocation5 + $0xcb] sm:$0xff]  ;;  %v5614_v34 = vld [vmem:[#allocation5 + $0xdb] sm:$0xff] }
 0x763   : > { %v5128_v63 = vpop.permute.xlu1 %5127  ;;  %v5130_v54 = vpop.permute.xlu0 %5129 }
 0x764   : > { %5203 = vst.msk [vmem:[#allocation6 + $0xa8] sm:$0xff] %vm5181_vm1, %v5128_v63  ;;  %5204 = vst.msk [vmem:[#allocation6 + $0xb0] sm:$0xff] %vm5181_vm1, %v5130_v54 }
 0x765   : > { %5501 = vrot.lane.b32.xlu1 %v5422_v28, %s10127_s17  ;;  %5503 = vrot.lane.b32.xlu0 %v5423_v26, %s10127_s17  ;;  %v5615_v28 = vld [vmem:[#allocation5 + $0xe3] sm:$0xff]  ;;  %v5616_v26 = vld [vmem:[#allocation5 + $0xf3] sm:$0xff] }
 0x767   : > { %v5132_v19 = vpop.permute.xlu1 %5131  ;;  %v5134_v55 = vpop.permute.xlu0 %5133 }
 0x768   : > { %5205 = vst.msk [vmem:[#allocation6 + $0xb8] sm:$0xff] %vm5181_vm1, %v5132_v19  ;;  %5206 = vst.msk [vmem:[#allocation6 + $0xc0] sm:$0xff] %vm5181_vm1, %v5134_v55 }
 0x769   : > { %5505 = vrot.lane.b32.xlu1 %v5424_v41, %s10127_s17  ;;  %5507 = vrot.lane.b32.xlu0 %v5425_v31, %s10127_s17  ;;  %v5617_v41 = vld [vmem:[#allocation5 + $0xfb] sm:$0xff]  ;;  %v5618_v31 = vld [vmem:[#allocation5 + $0x10b] sm:$0xff] }
 0x76b   : > { %v5136_v14 = vpop.permute.xlu1 %5135  ;;  %v5138_v46 = vpop.permute.xlu0 %5137 }
 0x76c   : > { %5207 = vst.msk [vmem:[#allocation6 + $0xc8] sm:$0xff] %vm5181_vm1, %v5136_v14  ;;  %5208 = vst.msk [vmem:[#allocation6 + $0xd0] sm:$0xff] %vm5181_vm1, %v5138_v46 }
 0x76d   : > { %5509 = vrot.lane.b32.xlu1 %v5426_v37, %s10127_s17  ;;  %5511 = vrot.lane.b32.xlu0 %v5427_v53, %s10127_s17  ;;  %v5619_v37 = vld [vmem:[#allocation5 + $0x113] sm:$0xff]  ;;  %v5620_v53 = vld [vmem:[#allocation5 + $0x123] sm:$0xff] }
 0x76f   : > { %v5140_v59 = vpop.permute.xlu1 %5139  ;;  %v5142_v7 = vpop.permute.xlu0 %5141 }
 0x770   : > { %5209 = vst.msk [vmem:[#allocation6 + $0xd8] sm:$0xff] %vm5181_vm1, %v5140_v59  ;;  %5210 = vst.msk [vmem:[#allocation6 + $0xe0] sm:$0xff] %vm5181_vm1, %v5142_v7 }
 0x771   : > { %5513 = vrot.lane.b32.xlu1 %v5428_v10, %s10127_s17  ;;  %5515 = vrot.lane.b32.xlu0 %v5429_v43, %s10127_s17  ;;  %v5621_v10 = vld [vmem:[#allocation5 + $0x12b] sm:$0xff]  ;;  %v5622_v43 = vld [vmem:[#allocation5 + $0x13b] sm:$0xff] }
 0x773   : > { %v5144_v36 = vpop.permute.xlu1 %5143  ;;  %v5146_v13 = vpop.permute.xlu0 %5145 }
 0x774   : > { %5211 = vst.msk [vmem:[#allocation6 + $0xe8] sm:$0xff] %vm5181_vm1, %v5144_v36  ;;  %5212 = vst.msk [vmem:[#allocation6 + $0xf0] sm:$0xff] %vm5181_vm1, %v5146_v13 }
 0x775   : > { %5517 = vrot.lane.b32.xlu1 %v5430_v22, %s10127_s17  ;;  %5519 = vrot.lane.b32.xlu0 %v5431_v60, %s10127_s17  ;;  %v5623_v22 = vld [vmem:[#allocation5 + $0x143] sm:$0xff]  ;;  %v5624_v60 = vld [vmem:[#allocation5 + $0x153] sm:$0xff] }
 0x777   : > { %v5148_v3 = vpop.permute.xlu1 %5147  ;;  %v5279_v23 = vpop.permute.xlu0 %5278 }
 0x778   : > { %5213 = vst.msk [vmem:[#allocation6 + $0xf8] sm:$0xff] %vm5181_vm1, %v5148_v3  ;;  %vm7885_vm1 = vcmask 818944  }
 0x779   : > { %5375 = vst.msk [vmem:[#allocation6] sm:$0xff] %vm5374_vm3, %v5279_v23  ;;  %5521 = vrot.lane.b32.xlu1 %v5432_v48, %s10127_s17  ;;  %5523 = vrot.lane.b32.xlu0 %v5433_v17, %s10127_s17  ;;  %v5625_v48 = vld [vmem:[#allocation5 + $0x15b] sm:$0xff]  ;;  %v5626_v17 = vld [vmem:[#allocation5 + $0x16b] sm:$0xff] }
 0x77b   : > { %v5281_v57 = vpop.permute.xlu1 %5280  ;;  %v5283_v0 = vpop.permute.xlu0 %5282 }
 0x77c   : > { %5376 = vst.msk [vmem:[#allocation6 + $0x8] sm:$0xff] %vm5374_vm3, %v5281_v57  ;;  %5377 = vst.msk [vmem:[#allocation6 + $0x10] sm:$0xff] %vm5374_vm3, %v5283_v0 }
 0x77d   : > { %5525 = vrot.lane.b32.xlu1 %v5434_v20, %s10127_s17  ;;  %5527 = vrot.lane.b32.xlu0 %v5435_v30, %s10127_s17  ;;  %v5627_v20 = vld [vmem:[#allocation5 + $0x173] sm:$0xff]  ;;  %v5628_v30 = vld [vmem:[#allocation5 + $0x183] sm:$0xff] }
 0x77f   : > { %v5285_v49 = vpop.permute.xlu1 %5284  ;;  %v5287_v33 = vpop.permute.xlu0 %5286 }
 0x780   : > { %5378 = vst.msk [vmem:[#allocation6 + $0x18] sm:$0xff] %vm5374_vm3, %v5285_v49  ;;  %5379 = vst.msk [vmem:[#allocation6 + $0x20] sm:$0xff] %vm5374_vm3, %v5287_v33 }
 0x781   : > { %5529 = vrot.lane.b32.xlu1 %v5436_v45, %s10127_s17  ;;  %5531 = vrot.lane.b32.xlu0 %v5437_v35, %s10127_s17  ;;  %v5629_v45 = vld [vmem:[#allocation5 + $0x18b] sm:$0xff]  ;;  %v5630_v35 = vld [vmem:[#allocation5 + $0x19b] sm:$0xff] }
 0x783   : > { %v5289_v2 = vpop.permute.xlu1 %5288  ;;  %v5291_v5 = vpop.permute.xlu0 %5290 }
 0x784   : > { %5380 = vst.msk [vmem:[#allocation6 + $0x28] sm:$0xff] %vm5374_vm3, %v5289_v2  ;;  %5381 = vst.msk [vmem:[#allocation6 + $0x30] sm:$0xff] %vm5374_vm3, %v5291_v5 }
 0x785   : > { %5533 = vrot.lane.b32.xlu1 %v5438_v51, %s10127_s17  ;;  %5664 = vrot.lane.b32.xlu0 %v5600_v18, %s10128_s21  ;;  %v5631_v51 = vld [vmem:[#allocation5 + $0x1a3] sm:$0xff]  ;;  %v5793_v18 = vld [vmem:[#allocation5 + $0x34] sm:$0xff]  ;;  %s10135_s17 = smov 80  }
 0x787   : > { %v5293_v62 = vpop.permute.xlu1 %5292  ;;  %v5295_v32 = vpop.permute.xlu0 %5294 }
 0x788   : > { %5382 = vst.msk [vmem:[#allocation6 + $0x38] sm:$0xff] %vm5374_vm3, %v5293_v62  ;;  %5383 = vst.msk [vmem:[#allocation6 + $0x40] sm:$0xff] %vm5374_vm3, %v5295_v32 }
 0x789   : > { %5666 = vrot.lane.b32.xlu1 %v5601_v44, %s10128_s21  ;;  %5668 = vrot.lane.b32.xlu0 %v5602_v40, %s10128_s21  ;;  %v5794_v44 = vld [vmem:[#allocation5 + $0x3c] sm:$0xff]  ;;  %v5795_v40 = vld [vmem:[#allocation5 + $0x4c] sm:$0xff] }
 0x78b   : > { %v5297_v27 = vpop.permute.xlu1 %5296  ;;  %v5299_v39 = vpop.permute.xlu0 %5298 }
 0x78c   : > { %5384 = vst.msk [vmem:[#allocation6 + $0x48] sm:$0xff] %vm5374_vm3, %v5297_v27  ;;  %5385 = vst.msk [vmem:[#allocation6 + $0x50] sm:$0xff] %vm5374_vm3, %v5299_v39 }
 0x78d   : > { %5670 = vrot.lane.b32.xlu1 %v5603_v6, %s10128_s21  ;;  %5672 = vrot.lane.b32.xlu0 %v5604_v12, %s10128_s21  ;;  %v5796_v6 = vld [vmem:[#allocation5 + $0x54] sm:$0xff]  ;;  %v5797_v12 = vld [vmem:[#allocation5 + $0x64] sm:$0xff] }
 0x78f   : > { %v5301_v9 = vpop.permute.xlu1 %5300  ;;  %v5303_v15 = vpop.permute.xlu0 %5302 }
 0x790   : > { %5386 = vst.msk [vmem:[#allocation6 + $0x58] sm:$0xff] %vm5374_vm3, %v5301_v9  ;;  %5387 = vst.msk [vmem:[#allocation6 + $0x60] sm:$0xff] %vm5374_vm3, %v5303_v15 }
 0x791   : > { %5674 = vrot.lane.b32.xlu1 %v5605_v24, %s10128_s21  ;;  %5676 = vrot.lane.b32.xlu0 %v5606_v61, %s10128_s21  ;;  %v5798_v24 = vld [vmem:[#allocation5 + $0x6c] sm:$0xff]  ;;  %v5799_v61 = vld [vmem:[#allocation5 + $0x7c] sm:$0xff] }
 0x793   : > { %v5305_v21 = vpop.permute.xlu1 %5304  ;;  %v5307_v52 = vpop.permute.xlu0 %5306 }
 0x794   : > { %5388 = vst.msk [vmem:[#allocation6 + $0x68] sm:$0xff] %vm5374_vm3, %v5305_v21  ;;  %5389 = vst.msk [vmem:[#allocation6 + $0x70] sm:$0xff] %vm5374_vm3, %v5307_v52 }
 0x795   : > { %5678 = vrot.lane.b32.xlu1 %v5607_v4, %s10128_s21  ;;  %5680 = vrot.lane.b32.xlu0 %v5608_v58, %s10128_s21  ;;  %v5800_v4 = vld [vmem:[#allocation5 + $0x84] sm:$0xff]  ;;  %v5801_v58 = vld [vmem:[#allocation5 + $0x94] sm:$0xff] }
 0x797   : > { %v5309_v29 = vpop.permute.xlu1 %5308  ;;  %v5311_v11 = vpop.permute.xlu0 %5310 }
 0x798   : > { %5390 = vst.msk [vmem:[#allocation6 + $0x78] sm:$0xff] %vm5374_vm3, %v5309_v29  ;;  %5391 = vst.msk [vmem:[#allocation6 + $0x80] sm:$0xff] %vm5374_vm3, %v5311_v11 }
 0x799   : > { %5682 = vrot.lane.b32.xlu1 %v5609_v38, %s10128_s21  ;;  %5684 = vrot.lane.b32.xlu0 %v5610_v25, %s10128_s21  ;;  %v5802_v38 = vld [vmem:[#allocation5 + $0x9c] sm:$0xff]  ;;  %v5803_v25 = vld [vmem:[#allocation5 + $0xac] sm:$0xff] }
 0x79b   : > { %v5313_v56 = vpop.permute.xlu1 %5312  ;;  %v5315_v47 = vpop.permute.xlu0 %5314 }
 0x79c   : > { %5392 = vst.msk [vmem:[#allocation6 + $0x88] sm:$0xff] %vm5374_vm3, %v5313_v56  ;;  %5393 = vst.msk [vmem:[#allocation6 + $0x90] sm:$0xff] %vm5374_vm3, %v5315_v47 }
 0x79d   : > { %5686 = vrot.lane.b32.xlu1 %v5611_v8, %s10128_s21  ;;  %5688 = vrot.lane.b32.xlu0 %v5612_v50, %s10128_s21  ;;  %v5804_v8 = vld [vmem:[#allocation5 + $0xb4] sm:$0xff]  ;;  %v5805_v50 = vld [vmem:[#allocation5 + $0xc4] sm:$0xff] }
 0x79f   : > { %v5317_v16 = vpop.permute.xlu1 %5316  ;;  %v5319_v1 = vpop.permute.xlu0 %5318 }
 0x7a0   : > { %5394 = vst.msk [vmem:[#allocation6 + $0x98] sm:$0xff] %vm5374_vm3, %v5317_v16  ;;  %5395 = vst.msk [vmem:[#allocation6 + $0xa0] sm:$0xff] %vm5374_vm3, %v5319_v1 }
 0x7a1   : > { %5690 = vrot.lane.b32.xlu1 %v5613_v42, %s10128_s21  ;;  %5692 = vrot.lane.b32.xlu0 %v5614_v34, %s10128_s21  ;;  %v5806_v42 = vld [vmem:[#allocation5 + $0xcc] sm:$0xff]  ;;  %v5807_v34 = vld [vmem:[#allocation5 + $0xdc] sm:$0xff] }
 0x7a3   : > { %v5321_v63 = vpop.permute.xlu1 %5320  ;;  %v5323_v54 = vpop.permute.xlu0 %5322 }
 0x7a4   : > { %5396 = vst.msk [vmem:[#allocation6 + $0xa8] sm:$0xff] %vm5374_vm3, %v5321_v63  ;;  %5397 = vst.msk [vmem:[#allocation6 + $0xb0] sm:$0xff] %vm5374_vm3, %v5323_v54 }
 0x7a5   : > { %5694 = vrot.lane.b32.xlu1 %v5615_v28, %s10128_s21  ;;  %5696 = vrot.lane.b32.xlu0 %v5616_v26, %s10128_s21  ;;  %v5808_v28 = vld [vmem:[#allocation5 + $0xe4] sm:$0xff]  ;;  %v5809_v26 = vld [vmem:[#allocation5 + $0xf4] sm:$0xff] }
 0x7a7   : > { %v5325_v19 = vpop.permute.xlu1 %5324  ;;  %v5327_v55 = vpop.permute.xlu0 %5326 }
 0x7a8   : > { %5398 = vst.msk [vmem:[#allocation6 + $0xb8] sm:$0xff] %vm5374_vm3, %v5325_v19  ;;  %5399 = vst.msk [vmem:[#allocation6 + $0xc0] sm:$0xff] %vm5374_vm3, %v5327_v55 }
 0x7a9   : > { %5698 = vrot.lane.b32.xlu1 %v5617_v41, %s10128_s21  ;;  %5700 = vrot.lane.b32.xlu0 %v5618_v31, %s10128_s21  ;;  %v5810_v41 = vld [vmem:[#allocation5 + $0xfc] sm:$0xff]  ;;  %v5811_v31 = vld [vmem:[#allocation5 + $0x10c] sm:$0xff] }
 0x7ab   : > { %v5329_v14 = vpop.permute.xlu1 %5328  ;;  %v5331_v46 = vpop.permute.xlu0 %5330 }
 0x7ac   : > { %5400 = vst.msk [vmem:[#allocation6 + $0xc8] sm:$0xff] %vm5374_vm3, %v5329_v14  ;;  %5401 = vst.msk [vmem:[#allocation6 + $0xd0] sm:$0xff] %vm5374_vm3, %v5331_v46 }
 0x7ad   : > { %5702 = vrot.lane.b32.xlu1 %v5619_v37, %s10128_s21  ;;  %5704 = vrot.lane.b32.xlu0 %v5620_v53, %s10128_s21  ;;  %v5812_v37 = vld [vmem:[#allocation5 + $0x114] sm:$0xff]  ;;  %v5813_v53 = vld [vmem:[#allocation5 + $0x124] sm:$0xff] }
 0x7af   : > { %v5333_v59 = vpop.permute.xlu1 %5332  ;;  %v5335_v7 = vpop.permute.xlu0 %5334 }
 0x7b0   : > { %5402 = vst.msk [vmem:[#allocation6 + $0xd8] sm:$0xff] %vm5374_vm3, %v5333_v59  ;;  %5403 = vst.msk [vmem:[#allocation6 + $0xe0] sm:$0xff] %vm5374_vm3, %v5335_v7 }
 0x7b1   : > { %5706 = vrot.lane.b32.xlu1 %v5621_v10, %s10128_s21  ;;  %5708 = vrot.lane.b32.xlu0 %v5622_v43, %s10128_s21  ;;  %v5814_v10 = vld [vmem:[#allocation5 + $0x12c] sm:$0xff]  ;;  %v5815_v43 = vld [vmem:[#allocation5 + $0x13c] sm:$0xff] }
 0x7b3   : > { %v5337_v36 = vpop.permute.xlu1 %5336  ;;  %v5339_v13 = vpop.permute.xlu0 %5338 }
 0x7b4   : > { %5404 = vst.msk [vmem:[#allocation6 + $0xe8] sm:$0xff] %vm5374_vm3, %v5337_v36  ;;  %5405 = vst.msk [vmem:[#allocation6 + $0xf0] sm:$0xff] %vm5374_vm3, %v5339_v13 }
 0x7b5   : > { %5710 = vrot.lane.b32.xlu1 %v5623_v22, %s10128_s21  ;;  %5712 = vrot.lane.b32.xlu0 %v5624_v60, %s10128_s21  ;;  %v5816_v22 = vld [vmem:[#allocation5 + $0x144] sm:$0xff]  ;;  %v5817_v60 = vld [vmem:[#allocation5 + $0x154] sm:$0xff] }
 0x7b7   : > { %v5341_v3 = vpop.permute.xlu1 %5340  ;;  %v5472_v23 = vpop.permute.xlu0 %5471 }
 0x7b8   : > { %5406 = vst.msk [vmem:[#allocation6 + $0xf8] sm:$0xff] %vm5374_vm3, %v5341_v3  ;;  %vm8025_vm3 = vcmask 818176  }
 0x7b9   : > { %5568 = vst.msk [vmem:[#allocation6] sm:$0xff] %vm5567_vm4, %v5472_v23  ;;  %5714 = vrot.lane.b32.xlu1 %v5625_v48, %s10128_s21  ;;  %5716 = vrot.lane.b32.xlu0 %v5626_v17, %s10128_s21  ;;  %v5818_v48 = vld [vmem:[#allocation5 + $0x15c] sm:$0xff]  ;;  %v5819_v17 = vld [vmem:[#allocation5 + $0x16c] sm:$0xff] }
 0x7bb   : > { %v5474_v57 = vpop.permute.xlu1 %5473  ;;  %v5476_v0 = vpop.permute.xlu0 %5475 }
 0x7bc   : > { %5569 = vst.msk [vmem:[#allocation6 + $0x8] sm:$0xff] %vm5567_vm4, %v5474_v57  ;;  %5570 = vst.msk [vmem:[#allocation6 + $0x10] sm:$0xff] %vm5567_vm4, %v5476_v0 }
 0x7bd   : > { %5718 = vrot.lane.b32.xlu1 %v5627_v20, %s10128_s21  ;;  %5720 = vrot.lane.b32.xlu0 %v5628_v30, %s10128_s21  ;;  %v5820_v20 = vld [vmem:[#allocation5 + $0x174] sm:$0xff]  ;;  %v5821_v30 = vld [vmem:[#allocation5 + $0x184] sm:$0xff] }
 0x7bf   : > { %v5478_v49 = vpop.permute.xlu1 %5477  ;;  %v5480_v33 = vpop.permute.xlu0 %5479 }
 0x7c0   : > { %5571 = vst.msk [vmem:[#allocation6 + $0x18] sm:$0xff] %vm5567_vm4, %v5478_v49  ;;  %5572 = vst.msk [vmem:[#allocation6 + $0x20] sm:$0xff] %vm5567_vm4, %v5480_v33 }
 0x7c1   : > { %5722 = vrot.lane.b32.xlu1 %v5629_v45, %s10128_s21  ;;  %5724 = vrot.lane.b32.xlu0 %v5630_v35, %s10128_s21  ;;  %v5822_v45 = vld [vmem:[#allocation5 + $0x18c] sm:$0xff]  ;;  %v5823_v35 = vld [vmem:[#allocation5 + $0x19c] sm:$0xff] }
 0x7c3   : > { %v5482_v2 = vpop.permute.xlu1 %5481  ;;  %v5484_v5 = vpop.permute.xlu0 %5483 }
 0x7c4   : > { %5573 = vst.msk [vmem:[#allocation6 + $0x28] sm:$0xff] %vm5567_vm4, %v5482_v2  ;;  %5574 = vst.msk [vmem:[#allocation6 + $0x30] sm:$0xff] %vm5567_vm4, %v5484_v5 }
 0x7c5   : > { %5726 = vrot.lane.b32.xlu1 %v5631_v51, %s10128_s21  ;;  %5857 = vrot.lane.b32.xlu0 %v5793_v18, %s10129_s14  ;;  %v5824_v51 = vld [vmem:[#allocation5 + $0x1a4] sm:$0xff]  ;;  %s10137_s21 = smov 88  }
 0x7c6   : > { %v5987_v18 = vld [vmem:[#allocation5 + $0x48] sm:$0xff] }
 0x7c7   : > { %v5486_v62 = vpop.permute.xlu1 %5485  ;;  %v5488_v32 = vpop.permute.xlu0 %5487 }
 0x7c8   : > { %5575 = vst.msk [vmem:[#allocation6 + $0x38] sm:$0xff] %vm5567_vm4, %v5486_v62  ;;  %5576 = vst.msk [vmem:[#allocation6 + $0x40] sm:$0xff] %vm5567_vm4, %v5488_v32 }
 0x7c9   : > { %5859 = vrot.lane.b32.xlu1 %v5794_v44, %s10129_s14  ;;  %5861 = vrot.lane.b32.xlu0 %v5795_v40, %s10129_s14  ;;  %v5988_v44 = vld [vmem:[#allocation5 + $0x50] sm:$0xff]  ;;  %v5989_v40 = vld [vmem:[#allocation5 + $0x60] sm:$0xff] }
 0x7cb   : > { %v5490_v27 = vpop.permute.xlu1 %5489  ;;  %v5492_v39 = vpop.permute.xlu0 %5491 }
 0x7cc   : > { %5577 = vst.msk [vmem:[#allocation6 + $0x48] sm:$0xff] %vm5567_vm4, %v5490_v27  ;;  %5578 = vst.msk [vmem:[#allocation6 + $0x50] sm:$0xff] %vm5567_vm4, %v5492_v39 }
 0x7cd   : > { %5863 = vrot.lane.b32.xlu1 %v5796_v6, %s10129_s14  ;;  %5865 = vrot.lane.b32.xlu0 %v5797_v12, %s10129_s14  ;;  %v5990_v6 = vld [vmem:[#allocation5 + $0x68] sm:$0xff]  ;;  %v5991_v12 = vld [vmem:[#allocation5 + $0x78] sm:$0xff] }
 0x7cf   : > { %v5494_v9 = vpop.permute.xlu1 %5493  ;;  %v5496_v15 = vpop.permute.xlu0 %5495 }
 0x7d0   : > { %5579 = vst.msk [vmem:[#allocation6 + $0x58] sm:$0xff] %vm5567_vm4, %v5494_v9  ;;  %5580 = vst.msk [vmem:[#allocation6 + $0x60] sm:$0xff] %vm5567_vm4, %v5496_v15 }
 0x7d1   : > { %5867 = vrot.lane.b32.xlu1 %v5798_v24, %s10129_s14  ;;  %5869 = vrot.lane.b32.xlu0 %v5799_v61, %s10129_s14  ;;  %v5992_v24 = vld [vmem:[#allocation5 + $0x80] sm:$0xff]  ;;  %v5993_v61 = vld [vmem:[#allocation5 + $0x90] sm:$0xff] }
 0x7d3   : > { %v5498_v21 = vpop.permute.xlu1 %5497  ;;  %v5500_v52 = vpop.permute.xlu0 %5499 }
 0x7d4   : > { %5581 = vst.msk [vmem:[#allocation6 + $0x68] sm:$0xff] %vm5567_vm4, %v5498_v21  ;;  %5582 = vst.msk [vmem:[#allocation6 + $0x70] sm:$0xff] %vm5567_vm4, %v5500_v52 }
 0x7d5   : > { %5871 = vrot.lane.b32.xlu1 %v5800_v4, %s10129_s14  ;;  %5873 = vrot.lane.b32.xlu0 %v5801_v58, %s10129_s14  ;;  %v5994_v4 = vld [vmem:[#allocation5 + $0x98] sm:$0xff]  ;;  %v5995_v58 = vld [vmem:[#allocation5 + $0xa8] sm:$0xff] }
 0x7d7   : > { %v5502_v29 = vpop.permute.xlu1 %5501  ;;  %v5504_v11 = vpop.permute.xlu0 %5503 }
 0x7d8   : > { %5583 = vst.msk [vmem:[#allocation6 + $0x78] sm:$0xff] %vm5567_vm4, %v5502_v29  ;;  %5584 = vst.msk [vmem:[#allocation6 + $0x80] sm:$0xff] %vm5567_vm4, %v5504_v11 }
 0x7d9   : > { %5875 = vrot.lane.b32.xlu1 %v5802_v38, %s10129_s14  ;;  %5877 = vrot.lane.b32.xlu0 %v5803_v25, %s10129_s14  ;;  %v5996_v38 = vld [vmem:[#allocation5 + $0xb0] sm:$0xff]  ;;  %v5997_v25 = vld [vmem:[#allocation5 + $0xc0] sm:$0xff] }
 0x7db   : > { %v5506_v56 = vpop.permute.xlu1 %5505  ;;  %v5508_v47 = vpop.permute.xlu0 %5507 }
 0x7dc   : > { %5585 = vst.msk [vmem:[#allocation6 + $0x88] sm:$0xff] %vm5567_vm4, %v5506_v56  ;;  %5586 = vst.msk [vmem:[#allocation6 + $0x90] sm:$0xff] %vm5567_vm4, %v5508_v47 }
 0x7dd   : > { %5879 = vrot.lane.b32.xlu1 %v5804_v8, %s10129_s14  ;;  %5881 = vrot.lane.b32.xlu0 %v5805_v50, %s10129_s14  ;;  %v5998_v8 = vld [vmem:[#allocation5 + $0xc8] sm:$0xff]  ;;  %v5999_v50 = vld [vmem:[#allocation5 + $0xd8] sm:$0xff] }
 0x7df   : > { %v5510_v16 = vpop.permute.xlu1 %5509  ;;  %v5512_v1 = vpop.permute.xlu0 %5511 }
 0x7e0   : > { %5587 = vst.msk [vmem:[#allocation6 + $0x98] sm:$0xff] %vm5567_vm4, %v5510_v16  ;;  %5588 = vst.msk [vmem:[#allocation6 + $0xa0] sm:$0xff] %vm5567_vm4, %v5512_v1 }
 0x7e1   : > { %5883 = vrot.lane.b32.xlu1 %v5806_v42, %s10129_s14  ;;  %5885 = vrot.lane.b32.xlu0 %v5807_v34, %s10129_s14  ;;  %v6000_v42 = vld [vmem:[#allocation5 + $0xe0] sm:$0xff]  ;;  %v6001_v34 = vld [vmem:[#allocation5 + $0xf0] sm:$0xff] }
 0x7e3   : > { %v5514_v63 = vpop.permute.xlu1 %5513  ;;  %v5516_v54 = vpop.permute.xlu0 %5515 }
 0x7e4   : > { %5589 = vst.msk [vmem:[#allocation6 + $0xa8] sm:$0xff] %vm5567_vm4, %v5514_v63  ;;  %5590 = vst.msk [vmem:[#allocation6 + $0xb0] sm:$0xff] %vm5567_vm4, %v5516_v54 }
 0x7e5   : > { %5887 = vrot.lane.b32.xlu1 %v5808_v28, %s10129_s14  ;;  %5889 = vrot.lane.b32.xlu0 %v5809_v26, %s10129_s14  ;;  %v6002_v28 = vld [vmem:[#allocation5 + $0xf8] sm:$0xff]  ;;  %v6003_v26 = vld [vmem:[#allocation5 + $0x108] sm:$0xff] }
 0x7e7   : > { %v5518_v19 = vpop.permute.xlu1 %5517  ;;  %v5520_v55 = vpop.permute.xlu0 %5519 }
 0x7e8   : > { %5591 = vst.msk [vmem:[#allocation6 + $0xb8] sm:$0xff] %vm5567_vm4, %v5518_v19  ;;  %5592 = vst.msk [vmem:[#allocation6 + $0xc0] sm:$0xff] %vm5567_vm4, %v5520_v55 }
 0x7e9   : > { %5891 = vrot.lane.b32.xlu1 %v5810_v41, %s10129_s14  ;;  %5893 = vrot.lane.b32.xlu0 %v5811_v31, %s10129_s14  ;;  %v6004_v41 = vld [vmem:[#allocation5 + $0x110] sm:$0xff]  ;;  %v6005_v31 = vld [vmem:[#allocation5 + $0x120] sm:$0xff] }
 0x7eb   : > { %v5522_v14 = vpop.permute.xlu1 %5521  ;;  %v5524_v46 = vpop.permute.xlu0 %5523 }
 0x7ec   : > { %5593 = vst.msk [vmem:[#allocation6 + $0xc8] sm:$0xff] %vm5567_vm4, %v5522_v14  ;;  %5594 = vst.msk [vmem:[#allocation6 + $0xd0] sm:$0xff] %vm5567_vm4, %v5524_v46 }
 0x7ed   : > { %5895 = vrot.lane.b32.xlu1 %v5812_v37, %s10129_s14  ;;  %5897 = vrot.lane.b32.xlu0 %v5813_v53, %s10129_s14  ;;  %v6006_v37 = vld [vmem:[#allocation5 + $0x128] sm:$0xff]  ;;  %v6007_v53 = vld [vmem:[#allocation5 + $0x138] sm:$0xff] }
 0x7ef   : > { %v5526_v59 = vpop.permute.xlu1 %5525  ;;  %v5528_v7 = vpop.permute.xlu0 %5527 }
 0x7f0   : > { %5595 = vst.msk [vmem:[#allocation6 + $0xd8] sm:$0xff] %vm5567_vm4, %v5526_v59  ;;  %5596 = vst.msk [vmem:[#allocation6 + $0xe0] sm:$0xff] %vm5567_vm4, %v5528_v7 }
 0x7f1   : > { %5899 = vrot.lane.b32.xlu1 %v5814_v10, %s10129_s14  ;;  %5901 = vrot.lane.b32.xlu0 %v5815_v43, %s10129_s14  ;;  %v6008_v10 = vld [vmem:[#allocation5 + $0x140] sm:$0xff]  ;;  %v6009_v43 = vld [vmem:[#allocation5 + $0x150] sm:$0xff] }
 0x7f3   : > { %v5530_v36 = vpop.permute.xlu1 %5529  ;;  %v5532_v13 = vpop.permute.xlu0 %5531 }
 0x7f4   : > { %5597 = vst.msk [vmem:[#allocation6 + $0xe8] sm:$0xff] %vm5567_vm4, %v5530_v36  ;;  %5598 = vst.msk [vmem:[#allocation6 + $0xf0] sm:$0xff] %vm5567_vm4, %v5532_v13 }
 0x7f5   : > { %5903 = vrot.lane.b32.xlu1 %v5816_v22, %s10129_s14  ;;  %5905 = vrot.lane.b32.xlu0 %v5817_v60, %s10129_s14  ;;  %v6010_v22 = vld [vmem:[#allocation5 + $0x158] sm:$0xff]  ;;  %v6011_v60 = vld [vmem:[#allocation5 + $0x168] sm:$0xff] }
 0x7f7   : > { %v5534_v3 = vpop.permute.xlu1 %5533  ;;  %v5665_v23 = vpop.permute.xlu0 %5664 }
 0x7f8   : > { %5599 = vst.msk [vmem:[#allocation6 + $0xf8] sm:$0xff] %vm5567_vm4, %v5534_v3 }
 0x7f9   : > { %5761 = vst.msk [vmem:[#allocation6] sm:$0xff] %vm5760_vm5, %v5665_v23  ;;  %5907 = vrot.lane.b32.xlu1 %v5818_v48, %s10129_s14  ;;  %5909 = vrot.lane.b32.xlu0 %v5819_v17, %s10129_s14  ;;  %v6012_v48 = vld [vmem:[#allocation5 + $0x170] sm:$0xff]  ;;  %v6013_v17 = vld [vmem:[#allocation5 + $0x180] sm:$0xff] }
 0x7fb   : > { %v5667_v57 = vpop.permute.xlu1 %5666  ;;  %v5669_v0 = vpop.permute.xlu0 %5668 }
 0x7fc   : > { %5762 = vst.msk [vmem:[#allocation6 + $0x8] sm:$0xff] %vm5760_vm5, %v5667_v57  ;;  %5763 = vst.msk [vmem:[#allocation6 + $0x10] sm:$0xff] %vm5760_vm5, %v5669_v0 }
 0x7fd   : > { %5911 = vrot.lane.b32.xlu1 %v5820_v20, %s10129_s14  ;;  %5913 = vrot.lane.b32.xlu0 %v5821_v30, %s10129_s14  ;;  %v6014_v20 = vld [vmem:[#allocation5 + $0x188] sm:$0xff]  ;;  %v6015_v30 = vld [vmem:[#allocation5 + $0x198] sm:$0xff] }
 0x7ff   : > { %v5671_v49 = vpop.permute.xlu1 %5670  ;;  %v5673_v33 = vpop.permute.xlu0 %5672 }
 0x800   : > { %5764 = vst.msk [vmem:[#allocation6 + $0x18] sm:$0xff] %vm5760_vm5, %v5671_v49  ;;  %5765 = vst.msk [vmem:[#allocation6 + $0x20] sm:$0xff] %vm5760_vm5, %v5673_v33  ;;  %v6017_v49 = vld [vmem:[#allocation5 + $0x1b0] sm:$0xff] }
 0x801   : > { %5915 = vrot.lane.b32.xlu1 %v5822_v45, %s10129_s14  ;;  %5917 = vrot.lane.b32.xlu0 %v5823_v35, %s10129_s14  ;;  %v6016_v35 = vld [vmem:[#allocation5 + $0x1a0] sm:$0xff] }
 0x803   : > { %v5675_v2 = vpop.permute.xlu1 %5674  ;;  %v5677_v5 = vpop.permute.xlu0 %5676 }
 0x804   : > { %5766 = vst.msk [vmem:[#allocation6 + $0x28] sm:$0xff] %vm5760_vm5, %v5675_v2  ;;  %5767 = vst.msk [vmem:[#allocation6 + $0x30] sm:$0xff] %vm5760_vm5, %v5677_v5  ;;  %v6018_v2 = vld [vmem:[#allocation5 + $0x1b8] sm:$0xff] }
 0x805   : > { %5919 = vrot.lane.b32.xlu1 %v5824_v51, %s10129_s14  ;;  %6051 = vrot.lane.b32.xlu0 %v5987_v18, %s10130_s26  ;;  %v6180_v18 = vld [vmem:[#allocation5 + $0x49] sm:$0xff]  ;;  %s10139_s14 = smov 96  }
 0x807   : > { %v5679_v62 = vpop.permute.xlu1 %5678  ;;  %v5681_v32 = vpop.permute.xlu0 %5680 }
 0x808   : > { %5768 = vst.msk [vmem:[#allocation6 + $0x38] sm:$0xff] %vm5760_vm5, %v5679_v62  ;;  %5769 = vst.msk [vmem:[#allocation6 + $0x40] sm:$0xff] %vm5760_vm5, %v5681_v32 }
 0x809   : > { %6053 = vrot.lane.b32.xlu1 %v5988_v44, %s10130_s26  ;;  %6055 = vrot.lane.b32.xlu0 %v5989_v40, %s10130_s26  ;;  %v6181_v44 = vld [vmem:[#allocation5 + $0x51] sm:$0xff]  ;;  %v6182_v40 = vld [vmem:[#allocation5 + $0x61] sm:$0xff] }
 0x80b   : > { %v5683_v27 = vpop.permute.xlu1 %5682  ;;  %v5685_v39 = vpop.permute.xlu0 %5684 }
 0x80c   : > { %5770 = vst.msk [vmem:[#allocation6 + $0x48] sm:$0xff] %vm5760_vm5, %v5683_v27  ;;  %5771 = vst.msk [vmem:[#allocation6 + $0x50] sm:$0xff] %vm5760_vm5, %v5685_v39 }
 0x80d   : > { %6057 = vrot.lane.b32.xlu1 %v5990_v6, %s10130_s26  ;;  %6059 = vrot.lane.b32.xlu0 %v5991_v12, %s10130_s26  ;;  %v6183_v6 = vld [vmem:[#allocation5 + $0x69] sm:$0xff]  ;;  %v6184_v12 = vld [vmem:[#allocation5 + $0x79] sm:$0xff] }
 0x80f   : > { %v5687_v9 = vpop.permute.xlu1 %5686  ;;  %v5689_v15 = vpop.permute.xlu0 %5688 }
 0x810   : > { %5772 = vst.msk [vmem:[#allocation6 + $0x58] sm:$0xff] %vm5760_vm5, %v5687_v9  ;;  %5773 = vst.msk [vmem:[#allocation6 + $0x60] sm:$0xff] %vm5760_vm5, %v5689_v15 }
 0x811   : > { %6061 = vrot.lane.b32.xlu1 %v5992_v24, %s10130_s26  ;;  %6063 = vrot.lane.b32.xlu0 %v5993_v61, %s10130_s26  ;;  %v6185_v24 = vld [vmem:[#allocation5 + $0x81] sm:$0xff]  ;;  %v6186_v61 = vld [vmem:[#allocation5 + $0x91] sm:$0xff] }
 0x813   : > { %v5691_v21 = vpop.permute.xlu1 %5690  ;;  %v5693_v52 = vpop.permute.xlu0 %5692 }
 0x814   : > { %5774 = vst.msk [vmem:[#allocation6 + $0x68] sm:$0xff] %vm5760_vm5, %v5691_v21  ;;  %5775 = vst.msk [vmem:[#allocation6 + $0x70] sm:$0xff] %vm5760_vm5, %v5693_v52 }
 0x815   : > { %6065 = vrot.lane.b32.xlu1 %v5994_v4, %s10130_s26  ;;  %6067 = vrot.lane.b32.xlu0 %v5995_v58, %s10130_s26  ;;  %v6187_v4 = vld [vmem:[#allocation5 + $0x99] sm:$0xff]  ;;  %v6188_v58 = vld [vmem:[#allocation5 + $0xa9] sm:$0xff] }
 0x817   : > { %v5695_v29 = vpop.permute.xlu1 %5694  ;;  %v5697_v11 = vpop.permute.xlu0 %5696 }
 0x818   : > { %5776 = vst.msk [vmem:[#allocation6 + $0x78] sm:$0xff] %vm5760_vm5, %v5695_v29  ;;  %5777 = vst.msk [vmem:[#allocation6 + $0x80] sm:$0xff] %vm5760_vm5, %v5697_v11 }
 0x819   : > { %6069 = vrot.lane.b32.xlu1 %v5996_v38, %s10130_s26  ;;  %6071 = vrot.lane.b32.xlu0 %v5997_v25, %s10130_s26  ;;  %v6189_v38 = vld [vmem:[#allocation5 + $0xb1] sm:$0xff]  ;;  %v6190_v25 = vld [vmem:[#allocation5 + $0xc1] sm:$0xff] }
 0x81b   : > { %v5699_v56 = vpop.permute.xlu1 %5698  ;;  %v5701_v47 = vpop.permute.xlu0 %5700 }
 0x81c   : > { %5778 = vst.msk [vmem:[#allocation6 + $0x88] sm:$0xff] %vm5760_vm5, %v5699_v56  ;;  %5779 = vst.msk [vmem:[#allocation6 + $0x90] sm:$0xff] %vm5760_vm5, %v5701_v47 }
 0x81d   : > { %6073 = vrot.lane.b32.xlu1 %v5998_v8, %s10130_s26  ;;  %6075 = vrot.lane.b32.xlu0 %v5999_v50, %s10130_s26  ;;  %v6191_v8 = vld [vmem:[#allocation5 + $0xc9] sm:$0xff]  ;;  %v6192_v50 = vld [vmem:[#allocation5 + $0xd9] sm:$0xff] }
 0x81f   : > { %v5703_v16 = vpop.permute.xlu1 %5702  ;;  %v5705_v1 = vpop.permute.xlu0 %5704 }
 0x820   : > { %5780 = vst.msk [vmem:[#allocation6 + $0x98] sm:$0xff] %vm5760_vm5, %v5703_v16  ;;  %5781 = vst.msk [vmem:[#allocation6 + $0xa0] sm:$0xff] %vm5760_vm5, %v5705_v1 }
 0x821   : > { %6077 = vrot.lane.b32.xlu1 %v6000_v42, %s10130_s26  ;;  %6079 = vrot.lane.b32.xlu0 %v6001_v34, %s10130_s26  ;;  %v6193_v42 = vld [vmem:[#allocation5 + $0xe1] sm:$0xff]  ;;  %v6194_v34 = vld [vmem:[#allocation5 + $0xf1] sm:$0xff] }
 0x823   : > { %v5707_v63 = vpop.permute.xlu1 %5706  ;;  %v5709_v54 = vpop.permute.xlu0 %5708 }
 0x824   : > { %5782 = vst.msk [vmem:[#allocation6 + $0xa8] sm:$0xff] %vm5760_vm5, %v5707_v63  ;;  %5783 = vst.msk [vmem:[#allocation6 + $0xb0] sm:$0xff] %vm5760_vm5, %v5709_v54 }
 0x825   : > { %6081 = vrot.lane.b32.xlu1 %v6002_v28, %s10130_s26  ;;  %6083 = vrot.lane.b32.xlu0 %v6003_v26, %s10130_s26  ;;  %v6195_v28 = vld [vmem:[#allocation5 + $0xf9] sm:$0xff]  ;;  %v6196_v26 = vld [vmem:[#allocation5 + $0x109] sm:$0xff] }
 0x827   : > { %v5711_v19 = vpop.permute.xlu1 %5710  ;;  %v5713_v55 = vpop.permute.xlu0 %5712 }
 0x828   : > { %5784 = vst.msk [vmem:[#allocation6 + $0xb8] sm:$0xff] %vm5760_vm5, %v5711_v19  ;;  %5785 = vst.msk [vmem:[#allocation6 + $0xc0] sm:$0xff] %vm5760_vm5, %v5713_v55 }
 0x829   : > { %6085 = vrot.lane.b32.xlu1 %v6004_v41, %s10130_s26  ;;  %6087 = vrot.lane.b32.xlu0 %v6005_v31, %s10130_s26  ;;  %v6197_v41 = vld [vmem:[#allocation5 + $0x111] sm:$0xff]  ;;  %v6198_v31 = vld [vmem:[#allocation5 + $0x121] sm:$0xff] }
 0x82b   : > { %v5715_v14 = vpop.permute.xlu1 %5714  ;;  %v5717_v46 = vpop.permute.xlu0 %5716 }
 0x82c   : > { %5786 = vst.msk [vmem:[#allocation6 + $0xc8] sm:$0xff] %vm5760_vm5, %v5715_v14  ;;  %5787 = vst.msk [vmem:[#allocation6 + $0xd0] sm:$0xff] %vm5760_vm5, %v5717_v46 }
 0x82d   : > { %6089 = vrot.lane.b32.xlu1 %v6006_v37, %s10130_s26  ;;  %6091 = vrot.lane.b32.xlu0 %v6007_v53, %s10130_s26  ;;  %v6199_v37 = vld [vmem:[#allocation5 + $0x129] sm:$0xff]  ;;  %v6200_v53 = vld [vmem:[#allocation5 + $0x139] sm:$0xff] }
 0x82f   : > { %v5719_v59 = vpop.permute.xlu1 %5718  ;;  %v5721_v7 = vpop.permute.xlu0 %5720 }
 0x830   : > { %5788 = vst.msk [vmem:[#allocation6 + $0xd8] sm:$0xff] %vm5760_vm5, %v5719_v59  ;;  %5789 = vst.msk [vmem:[#allocation6 + $0xe0] sm:$0xff] %vm5760_vm5, %v5721_v7 }
 0x831   : > { %6093 = vrot.lane.b32.xlu1 %v6008_v10, %s10130_s26  ;;  %6095 = vrot.lane.b32.xlu0 %v6009_v43, %s10130_s26  ;;  %v6201_v10 = vld [vmem:[#allocation5 + $0x141] sm:$0xff]  ;;  %v6202_v43 = vld [vmem:[#allocation5 + $0x151] sm:$0xff] }
 0x833   : > { %v5723_v36 = vpop.permute.xlu1 %5722  ;;  %v5725_v13 = vpop.permute.xlu0 %5724 }
 0x834   : > { %5790 = vst.msk [vmem:[#allocation6 + $0xe8] sm:$0xff] %vm5760_vm5, %v5723_v36  ;;  %5791 = vst.msk [vmem:[#allocation6 + $0xf0] sm:$0xff] %vm5760_vm5, %v5725_v13 }
 0x835   : > { %6097 = vrot.lane.b32.xlu1 %v6010_v22, %s10130_s26  ;;  %6099 = vrot.lane.b32.xlu0 %v6011_v60, %s10130_s26  ;;  %v6203_v22 = vld [vmem:[#allocation5 + $0x159] sm:$0xff]  ;;  %v6204_v60 = vld [vmem:[#allocation5 + $0x169] sm:$0xff] }
 0x837   : > { %v5727_v3 = vpop.permute.xlu1 %5726  ;;  %v5858_v23 = vpop.permute.xlu0 %5857 }
 0x838   : > { %5792 = vst.msk [vmem:[#allocation6 + $0xf8] sm:$0xff] %vm5760_vm5, %v5727_v3 }
 0x839   : > { %5954 = vst.msk [vmem:[#allocation6] sm:$0xff] %vm5953_vm6, %v5858_v23  ;;  %6101 = vrot.lane.b32.xlu1 %v6012_v48, %s10130_s26  ;;  %6103 = vrot.lane.b32.xlu0 %v6013_v17, %s10130_s26  ;;  %v6205_v48 = vld [vmem:[#allocation5 + $0x171] sm:$0xff]  ;;  %v6206_v17 = vld [vmem:[#allocation5 + $0x181] sm:$0xff] }
 0x83b   : > { %v5860_v57 = vpop.permute.xlu1 %5859  ;;  %v5862_v0 = vpop.permute.xlu0 %5861 }
 0x83c   : > { %5955 = vst.msk [vmem:[#allocation6 + $0x8] sm:$0xff] %vm5953_vm6, %v5860_v57  ;;  %5956 = vst.msk [vmem:[#allocation6 + $0x10] sm:$0xff] %vm5953_vm6, %v5862_v0 }
 0x83d   : > { %6105 = vrot.lane.b32.xlu1 %v6014_v20, %s10130_s26  ;;  %6107 = vrot.lane.b32.xlu0 %v6015_v30, %s10130_s26  ;;  %v6207_v20 = vld [vmem:[#allocation5 + $0x189] sm:$0xff]  ;;  %v6208_v30 = vld [vmem:[#allocation5 + $0x199] sm:$0xff] }
 0x83f   : > { %v5864_v33 = vpop.permute.xlu1 %5863  ;;  %v5866_v45 = vpop.permute.xlu0 %5865 }
 0x840   : > { %5957 = vst.msk [vmem:[#allocation6 + $0x18] sm:$0xff] %vm5953_vm6, %v5864_v33  ;;  %5958 = vst.msk [vmem:[#allocation6 + $0x20] sm:$0xff] %vm5953_vm6, %v5866_v45 }
 0x841   : > { %6109 = vrot.lane.b32.xlu1 %v6016_v35, %s10130_s26  ;;  %6111 = vrot.lane.b32.xlu0 %v6017_v49, %s10130_s26  ;;  %v6210_v49 = vld [vmem:[#allocation5 + $0x1b1] sm:$0xff]  ;;  %v6209_v35 = vld [vmem:[#allocation5 + $0x1a1] sm:$0xff] }
 0x843   : > { %v5868_v5 = vpop.permute.xlu1 %5867  ;;  %v5870_v51 = vpop.permute.xlu0 %5869 }
 0x844   : > { %5959 = vst.msk [vmem:[#allocation6 + $0x28] sm:$0xff] %vm5953_vm6, %v5868_v5  ;;  %5960 = vst.msk [vmem:[#allocation6 + $0x30] sm:$0xff] %vm5953_vm6, %v5870_v51 }
 0x845   : > { %6113 = vrot.lane.b32.xlu1 %v6018_v2, %s10130_s26  ;;  %6244 = vrot.lane.b32.xlu0 %v6180_v18, %s10131_s23  ;;  %v6211_v2 = vld [vmem:[#allocation5 + $0x1b9] sm:$0xff]  ;;  %v6373_v18 = vld [vmem:[#allocation5 + $0x4a] sm:$0xff]  ;;  %s10136_s26 = smov 84  }
 0x847   : > { %v5872_v62 = vpop.permute.xlu1 %5871  ;;  %v5874_v32 = vpop.permute.xlu0 %5873 }
 0x848   : > { %5961 = vst.msk [vmem:[#allocation6 + $0x38] sm:$0xff] %vm5953_vm6, %v5872_v62  ;;  %5962 = vst.msk [vmem:[#allocation6 + $0x40] sm:$0xff] %vm5953_vm6, %v5874_v32 }
 0x849   : > { %6246 = vrot.lane.b32.xlu1 %v6181_v44, %s10131_s23  ;;  %6248 = vrot.lane.b32.xlu0 %v6182_v40, %s10131_s23  ;;  %v6374_v44 = vld [vmem:[#allocation5 + $0x52] sm:$0xff]  ;;  %v6375_v40 = vld [vmem:[#allocation5 + $0x62] sm:$0xff] }
 0x84b   : > { %v5876_v27 = vpop.permute.xlu1 %5875  ;;  %v5878_v39 = vpop.permute.xlu0 %5877 }
 0x84c   : > { %5963 = vst.msk [vmem:[#allocation6 + $0x48] sm:$0xff] %vm5953_vm6, %v5876_v27  ;;  %5964 = vst.msk [vmem:[#allocation6 + $0x50] sm:$0xff] %vm5953_vm6, %v5878_v39 }
 0x84d   : > { %6250 = vrot.lane.b32.xlu1 %v6183_v6, %s10131_s23  ;;  %6252 = vrot.lane.b32.xlu0 %v6184_v12, %s10131_s23  ;;  %v6376_v6 = vld [vmem:[#allocation5 + $0x6a] sm:$0xff]  ;;  %v6377_v12 = vld [vmem:[#allocation5 + $0x7a] sm:$0xff] }
 0x84f   : > { %v5880_v9 = vpop.permute.xlu1 %5879  ;;  %v5882_v15 = vpop.permute.xlu0 %5881 }
 0x850   : > { %5965 = vst.msk [vmem:[#allocation6 + $0x58] sm:$0xff] %vm5953_vm6, %v5880_v9  ;;  %5966 = vst.msk [vmem:[#allocation6 + $0x60] sm:$0xff] %vm5953_vm6, %v5882_v15 }
 0x851   : > { %6254 = vrot.lane.b32.xlu1 %v6185_v24, %s10131_s23  ;;  %6256 = vrot.lane.b32.xlu0 %v6186_v61, %s10131_s23  ;;  %v6378_v24 = vld [vmem:[#allocation5 + $0x82] sm:$0xff]  ;;  %v6379_v61 = vld [vmem:[#allocation5 + $0x92] sm:$0xff] }
 0x853   : > { %v5884_v21 = vpop.permute.xlu1 %5883  ;;  %v5886_v52 = vpop.permute.xlu0 %5885 }
 0x854   : > { %5967 = vst.msk [vmem:[#allocation6 + $0x68] sm:$0xff] %vm5953_vm6, %v5884_v21  ;;  %5968 = vst.msk [vmem:[#allocation6 + $0x70] sm:$0xff] %vm5953_vm6, %v5886_v52 }
 0x855   : > { %6258 = vrot.lane.b32.xlu1 %v6187_v4, %s10131_s23  ;;  %6260 = vrot.lane.b32.xlu0 %v6188_v58, %s10131_s23  ;;  %v6380_v4 = vld [vmem:[#allocation5 + $0x9a] sm:$0xff]  ;;  %v6381_v58 = vld [vmem:[#allocation5 + $0xaa] sm:$0xff] }
 0x857   : > { %v5888_v29 = vpop.permute.xlu1 %5887  ;;  %v5890_v11 = vpop.permute.xlu0 %5889 }
 0x858   : > { %5969 = vst.msk [vmem:[#allocation6 + $0x78] sm:$0xff] %vm5953_vm6, %v5888_v29  ;;  %5970 = vst.msk [vmem:[#allocation6 + $0x80] sm:$0xff] %vm5953_vm6, %v5890_v11 }
 0x859   : > { %6262 = vrot.lane.b32.xlu1 %v6189_v38, %s10131_s23  ;;  %6264 = vrot.lane.b32.xlu0 %v6190_v25, %s10131_s23  ;;  %v6382_v38 = vld [vmem:[#allocation5 + $0xb2] sm:$0xff]  ;;  %v6383_v25 = vld [vmem:[#allocation5 + $0xc2] sm:$0xff] }
 0x85b   : > { %v5892_v56 = vpop.permute.xlu1 %5891  ;;  %v5894_v47 = vpop.permute.xlu0 %5893 }
 0x85c   : > { %5971 = vst.msk [vmem:[#allocation6 + $0x88] sm:$0xff] %vm5953_vm6, %v5892_v56  ;;  %5972 = vst.msk [vmem:[#allocation6 + $0x90] sm:$0xff] %vm5953_vm6, %v5894_v47 }
 0x85d   : > { %6266 = vrot.lane.b32.xlu1 %v6191_v8, %s10131_s23  ;;  %6268 = vrot.lane.b32.xlu0 %v6192_v50, %s10131_s23  ;;  %v6384_v8 = vld [vmem:[#allocation5 + $0xca] sm:$0xff]  ;;  %v6385_v50 = vld [vmem:[#allocation5 + $0xda] sm:$0xff] }
 0x85f   : > { %v5896_v16 = vpop.permute.xlu1 %5895  ;;  %v5898_v1 = vpop.permute.xlu0 %5897 }
 0x860   : > { %5973 = vst.msk [vmem:[#allocation6 + $0x98] sm:$0xff] %vm5953_vm6, %v5896_v16  ;;  %5974 = vst.msk [vmem:[#allocation6 + $0xa0] sm:$0xff] %vm5953_vm6, %v5898_v1 }
 0x861   : > { %6270 = vrot.lane.b32.xlu1 %v6193_v42, %s10131_s23  ;;  %6272 = vrot.lane.b32.xlu0 %v6194_v34, %s10131_s23  ;;  %v6386_v42 = vld [vmem:[#allocation5 + $0xe2] sm:$0xff]  ;;  %v6387_v34 = vld [vmem:[#allocation5 + $0xf2] sm:$0xff] }
 0x863   : > { %v5900_v63 = vpop.permute.xlu1 %5899  ;;  %v5902_v54 = vpop.permute.xlu0 %5901 }
 0x864   : > { %5975 = vst.msk [vmem:[#allocation6 + $0xa8] sm:$0xff] %vm5953_vm6, %v5900_v63  ;;  %5976 = vst.msk [vmem:[#allocation6 + $0xb0] sm:$0xff] %vm5953_vm6, %v5902_v54 }
 0x865   : > { %6274 = vrot.lane.b32.xlu1 %v6195_v28, %s10131_s23  ;;  %6276 = vrot.lane.b32.xlu0 %v6196_v26, %s10131_s23  ;;  %v6388_v28 = vld [vmem:[#allocation5 + $0xfa] sm:$0xff]  ;;  %v6389_v26 = vld [vmem:[#allocation5 + $0x10a] sm:$0xff] }
 0x867   : > { %v5904_v19 = vpop.permute.xlu1 %5903  ;;  %v5906_v55 = vpop.permute.xlu0 %5905 }
 0x868   : > { %5977 = vst.msk [vmem:[#allocation6 + $0xb8] sm:$0xff] %vm5953_vm6, %v5904_v19  ;;  %5978 = vst.msk [vmem:[#allocation6 + $0xc0] sm:$0xff] %vm5953_vm6, %v5906_v55 }
 0x869   : > { %6278 = vrot.lane.b32.xlu1 %v6197_v41, %s10131_s23  ;;  %6280 = vrot.lane.b32.xlu0 %v6198_v31, %s10131_s23  ;;  %v6390_v41 = vld [vmem:[#allocation5 + $0x112] sm:$0xff]  ;;  %v6391_v31 = vld [vmem:[#allocation5 + $0x122] sm:$0xff] }
 0x86b   : > { %v5908_v14 = vpop.permute.xlu1 %5907  ;;  %v5910_v46 = vpop.permute.xlu0 %5909 }
 0x86c   : > { %5979 = vst.msk [vmem:[#allocation6 + $0xc8] sm:$0xff] %vm5953_vm6, %v5908_v14  ;;  %5980 = vst.msk [vmem:[#allocation6 + $0xd0] sm:$0xff] %vm5953_vm6, %v5910_v46 }
 0x86d   : > { %6282 = vrot.lane.b32.xlu1 %v6199_v37, %s10131_s23  ;;  %6284 = vrot.lane.b32.xlu0 %v6200_v53, %s10131_s23  ;;  %v6392_v37 = vld [vmem:[#allocation5 + $0x12a] sm:$0xff]  ;;  %v6393_v53 = vld [vmem:[#allocation5 + $0x13a] sm:$0xff] }
 0x86f   : > { %v5912_v59 = vpop.permute.xlu1 %5911  ;;  %v5914_v7 = vpop.permute.xlu0 %5913 }
 0x870   : > { %5981 = vst.msk [vmem:[#allocation6 + $0xd8] sm:$0xff] %vm5953_vm6, %v5912_v59  ;;  %5982 = vst.msk [vmem:[#allocation6 + $0xe0] sm:$0xff] %vm5953_vm6, %v5914_v7 }
 0x871   : > { %6286 = vrot.lane.b32.xlu1 %v6201_v10, %s10131_s23  ;;  %6288 = vrot.lane.b32.xlu0 %v6202_v43, %s10131_s23  ;;  %v6394_v10 = vld [vmem:[#allocation5 + $0x142] sm:$0xff]  ;;  %v6395_v43 = vld [vmem:[#allocation5 + $0x152] sm:$0xff] }
 0x873   : > { %v5916_v36 = vpop.permute.xlu1 %5915  ;;  %v5918_v13 = vpop.permute.xlu0 %5917 }
 0x874   : > { %5983 = vst.msk [vmem:[#allocation6 + $0xe8] sm:$0xff] %vm5953_vm6, %v5916_v36  ;;  %5984 = vst.msk [vmem:[#allocation6 + $0xf0] sm:$0xff] %vm5953_vm6, %v5918_v13 }
 0x875   : > { %6290 = vrot.lane.b32.xlu1 %v6203_v22, %s10131_s23  ;;  %6292 = vrot.lane.b32.xlu0 %v6204_v60, %s10131_s23  ;;  %v6396_v22 = vld [vmem:[#allocation5 + $0x15a] sm:$0xff]  ;;  %v6397_v60 = vld [vmem:[#allocation5 + $0x16a] sm:$0xff] }
 0x877   : > { %v5920_v3 = vpop.permute.xlu1 %5919  ;;  %v6052_v23 = vpop.permute.xlu0 %6051 }
 0x878   : > { %5985 = vst.msk [vmem:[#allocation6 + $0xf8] sm:$0xff] %vm5953_vm6, %v5920_v3 }
 0x879   : > { %6148 = vst.msk [vmem:[#allocation6] sm:$0xff] %vm6147_vm7, %v6052_v23  ;;  %6294 = vrot.lane.b32.xlu1 %v6205_v48, %s10131_s23  ;;  %6296 = vrot.lane.b32.xlu0 %v6206_v17, %s10131_s23  ;;  %v6398_v48 = vld [vmem:[#allocation5 + $0x172] sm:$0xff]  ;;  %v6399_v17 = vld [vmem:[#allocation5 + $0x182] sm:$0xff] }
 0x87b   : > { %v6054_v57 = vpop.permute.xlu1 %6053  ;;  %v6056_v0 = vpop.permute.xlu0 %6055 }
 0x87c   : > { %6149 = vst.msk [vmem:[#allocation6 + $0x8] sm:$0xff] %vm6147_vm7, %v6054_v57  ;;  %6150 = vst.msk [vmem:[#allocation6 + $0x10] sm:$0xff] %vm6147_vm7, %v6056_v0 }
 0x87d   : > { %6298 = vrot.lane.b32.xlu1 %v6207_v20, %s10131_s23  ;;  %6300 = vrot.lane.b32.xlu0 %v6208_v30, %s10131_s23  ;;  %v6400_v20 = vld [vmem:[#allocation5 + $0x18a] sm:$0xff]  ;;  %v6401_v30 = vld [vmem:[#allocation5 + $0x19a] sm:$0xff] }
 0x87f   : > { %v6058_v33 = vpop.permute.xlu1 %6057  ;;  %v6060_v45 = vpop.permute.xlu0 %6059 }
 0x880   : > { %6151 = vst.msk [vmem:[#allocation6 + $0x18] sm:$0xff] %vm6147_vm7, %v6058_v33  ;;  %6152 = vst.msk [vmem:[#allocation6 + $0x20] sm:$0xff] %vm6147_vm7, %v6060_v45 }
 0x881   : > { %6302 = vrot.lane.b32.xlu1 %v6209_v35, %s10131_s23  ;;  %6304 = vrot.lane.b32.xlu0 %v6210_v49, %s10131_s23  ;;  %v6403_v49 = vld [vmem:[#allocation5 + $0x1b2] sm:$0xff]  ;;  %v6402_v35 = vld [vmem:[#allocation5 + $0x1a2] sm:$0xff] }
 0x883   : > { %v6062_v5 = vpop.permute.xlu1 %6061  ;;  %v6064_v51 = vpop.permute.xlu0 %6063 }
 0x884   : > { %6153 = vst.msk [vmem:[#allocation6 + $0x28] sm:$0xff] %vm6147_vm7, %v6062_v5  ;;  %6154 = vst.msk [vmem:[#allocation6 + $0x30] sm:$0xff] %vm6147_vm7, %v6064_v51 }
 0x885   : > { %6306 = vrot.lane.b32.xlu1 %v6211_v2, %s10131_s23  ;;  %6437 = vrot.lane.b32.xlu0 %v6373_v18, %s10132_s24  ;;  %v6404_v2 = vld [vmem:[#allocation5 + $0x1ba] sm:$0xff]  ;;  %v6566_v18 = vld [vmem:[#allocation5 + $0x4b] sm:$0xff] }
 0x887   : > { %v6066_v62 = vpop.permute.xlu1 %6065  ;;  %v6068_v32 = vpop.permute.xlu0 %6067 }
 0x888   : > { %6155 = vst.msk [vmem:[#allocation6 + $0x38] sm:$0xff] %vm6147_vm7, %v6066_v62  ;;  %6156 = vst.msk [vmem:[#allocation6 + $0x40] sm:$0xff] %vm6147_vm7, %v6068_v32 }
 0x889   : > { %6439 = vrot.lane.b32.xlu1 %v6374_v44, %s10132_s24  ;;  %6441 = vrot.lane.b32.xlu0 %v6375_v40, %s10132_s24  ;;  %v6567_v44 = vld [vmem:[#allocation5 + $0x53] sm:$0xff]  ;;  %v13128_v40 = vld [vmem:[#allocation5 + $0x63] sm:$0xff] }
 0x88b   : > { %v6070_v27 = vpop.permute.xlu1 %6069  ;;  %v6072_v39 = vpop.permute.xlu0 %6071 }
 0x88c   : > { %6157 = vst.msk [vmem:[#allocation6 + $0x48] sm:$0xff] %vm6147_vm7, %v6070_v27  ;;  %6158 = vst.msk [vmem:[#allocation6 + $0x50] sm:$0xff] %vm6147_vm7, %v6072_v39 }
 0x88d   : > { %6443 = vrot.lane.b32.xlu1 %v6376_v6, %s10132_s24  ;;  %6445 = vrot.lane.b32.xlu0 %v6377_v12, %s10132_s24  ;;  %v13135_v6 = vld [vmem:[#allocation5 + $0x6b] sm:$0xff]  ;;  %v13137_v12 = vld [vmem:[#allocation5 + $0x7b] sm:$0xff] }
 0x88f   : > { %v6074_v9 = vpop.permute.xlu1 %6073  ;;  %v6076_v15 = vpop.permute.xlu0 %6075 }
 0x890   : > { %6159 = vst.msk [vmem:[#allocation6 + $0x58] sm:$0xff] %vm6147_vm7, %v6074_v9  ;;  %6160 = vst.msk [vmem:[#allocation6 + $0x60] sm:$0xff] %vm6147_vm7, %v6076_v15 }
 0x891   : > { %6447 = vrot.lane.b32.xlu1 %v6378_v24, %s10132_s24  ;;  %6449 = vrot.lane.b32.xlu0 %v6379_v61, %s10132_s24  ;;  %v13145_v24 = vld [vmem:[#allocation5 + $0x83] sm:$0xff]  ;;  %v13147_v61 = vld [vmem:[#allocation5 + $0x93] sm:$0xff] }
 0x893   : > { %v6078_v21 = vpop.permute.xlu1 %6077  ;;  %v6080_v52 = vpop.permute.xlu0 %6079 }
 0x894   : > { %6161 = vst.msk [vmem:[#allocation6 + $0x68] sm:$0xff] %vm6147_vm7, %v6078_v21  ;;  %6162 = vst.msk [vmem:[#allocation6 + $0x70] sm:$0xff] %vm6147_vm7, %v6080_v52 }
 0x895   : > { %6451 = vrot.lane.b32.xlu1 %v6380_v4, %s10132_s24  ;;  %6453 = vrot.lane.b32.xlu0 %v6381_v58, %s10132_s24  ;;  %v13155_v4 = vld [vmem:[#allocation5 + $0x9b] sm:$0xff]  ;;  %v13157_v58 = vld [vmem:[#allocation5 + $0xab] sm:$0xff] }
 0x897   : > { %v6082_v29 = vpop.permute.xlu1 %6081  ;;  %v6084_v11 = vpop.permute.xlu0 %6083 }
 0x898   : > { %6163 = vst.msk [vmem:[#allocation6 + $0x78] sm:$0xff] %vm6147_vm7, %v6082_v29  ;;  %6164 = vst.msk [vmem:[#allocation6 + $0x80] sm:$0xff] %vm6147_vm7, %v6084_v11 }
 0x899   : > { %6455 = vrot.lane.b32.xlu1 %v6382_v38, %s10132_s24  ;;  %6457 = vrot.lane.b32.xlu0 %v6383_v25, %s10132_s24  ;;  %v13165_v38 = vld [vmem:[#allocation5 + $0xb3] sm:$0xff]  ;;  %v13167_v25 = vld [vmem:[#allocation5 + $0xc3] sm:$0xff] }
 0x89b   : > { %v6086_v56 = vpop.permute.xlu1 %6085  ;;  %v6088_v47 = vpop.permute.xlu0 %6087 }
 0x89c   : > { %6165 = vst.msk [vmem:[#allocation6 + $0x88] sm:$0xff] %vm6147_vm7, %v6086_v56  ;;  %6166 = vst.msk [vmem:[#allocation6 + $0x90] sm:$0xff] %vm6147_vm7, %v6088_v47 }
 0x89d   : > { %6459 = vrot.lane.b32.xlu1 %v6384_v8, %s10132_s24  ;;  %6461 = vrot.lane.b32.xlu0 %v6385_v50, %s10132_s24  ;;  %v13175_v8 = vld [vmem:[#allocation5 + $0xcb] sm:$0xff]  ;;  %v13177_v50 = vld [vmem:[#allocation5 + $0xdb] sm:$0xff] }
 0x89f   : > { %v6090_v16 = vpop.permute.xlu1 %6089  ;;  %v6092_v1 = vpop.permute.xlu0 %6091 }
 0x8a0   : > { %6167 = vst.msk [vmem:[#allocation6 + $0x98] sm:$0xff] %vm6147_vm7, %v6090_v16  ;;  %6168 = vst.msk [vmem:[#allocation6 + $0xa0] sm:$0xff] %vm6147_vm7, %v6092_v1 }
 0x8a1   : > { %6463 = vrot.lane.b32.xlu1 %v6386_v42, %s10132_s24  ;;  %6465 = vrot.lane.b32.xlu0 %v6387_v34, %s10132_s24  ;;  %v13185_v42 = vld [vmem:[#allocation5 + $0xe3] sm:$0xff]  ;;  %v6580_v34 = vld [vmem:[#allocation5 + $0xf3] sm:$0xff] }
 0x8a3   : > { %v6094_v63 = vpop.permute.xlu1 %6093  ;;  %v6096_v54 = vpop.permute.xlu0 %6095 }
 0x8a4   : > { %6169 = vst.msk [vmem:[#allocation6 + $0xa8] sm:$0xff] %vm6147_vm7, %v6094_v63  ;;  %6170 = vst.msk [vmem:[#allocation6 + $0xb0] sm:$0xff] %vm6147_vm7, %v6096_v54 }
 0x8a5   : > { %6467 = vrot.lane.b32.xlu1 %v6388_v28, %s10132_s24  ;;  %6469 = vrot.lane.b32.xlu0 %v6389_v26, %s10132_s24  ;;  %v6581_v28 = vld [vmem:[#allocation5 + $0xfb] sm:$0xff]  ;;  %v6582_v26 = vld [vmem:[#allocation5 + $0x10b] sm:$0xff] }
 0x8a7   : > { %v6098_v19 = vpop.permute.xlu1 %6097  ;;  %v6100_v55 = vpop.permute.xlu0 %6099 }
 0x8a8   : > { %6171 = vst.msk [vmem:[#allocation6 + $0xb8] sm:$0xff] %vm6147_vm7, %v6098_v19  ;;  %6172 = vst.msk [vmem:[#allocation6 + $0xc0] sm:$0xff] %vm6147_vm7, %v6100_v55 }
 0x8a9   : > { %6471 = vrot.lane.b32.xlu1 %v6390_v41, %s10132_s24  ;;  %6473 = vrot.lane.b32.xlu0 %v6391_v31, %s10132_s24  ;;  %v6583_v41 = vld [vmem:[#allocation5 + $0x113] sm:$0xff]  ;;  %v6584_v31 = vld [vmem:[#allocation5 + $0x123] sm:$0xff] }
 0x8ab   : > { %v6102_v14 = vpop.permute.xlu1 %6101  ;;  %v6104_v46 = vpop.permute.xlu0 %6103 }
 0x8ac   : > { %6173 = vst.msk [vmem:[#allocation6 + $0xc8] sm:$0xff] %vm6147_vm7, %v6102_v14  ;;  %6174 = vst.msk [vmem:[#allocation6 + $0xd0] sm:$0xff] %vm6147_vm7, %v6104_v46 }
 0x8ad   : > { %6475 = vrot.lane.b32.xlu1 %v6392_v37, %s10132_s24  ;;  %6477 = vrot.lane.b32.xlu0 %v6393_v53, %s10132_s24  ;;  %v6585_v37 = vld [vmem:[#allocation5 + $0x12b] sm:$0xff]  ;;  %v6586_v53 = vld [vmem:[#allocation5 + $0x13b] sm:$0xff] }
 0x8af   : > { %v6106_v59 = vpop.permute.xlu1 %6105  ;;  %v6108_v7 = vpop.permute.xlu0 %6107 }
 0x8b0   : > { %6175 = vst.msk [vmem:[#allocation6 + $0xd8] sm:$0xff] %vm6147_vm7, %v6106_v59  ;;  %6176 = vst.msk [vmem:[#allocation6 + $0xe0] sm:$0xff] %vm6147_vm7, %v6108_v7 }
 0x8b1   : > { %6479 = vrot.lane.b32.xlu1 %v6394_v10, %s10132_s24  ;;  %6481 = vrot.lane.b32.xlu0 %v6395_v43, %s10132_s24  ;;  %v6587_v10 = vld [vmem:[#allocation5 + $0x143] sm:$0xff]  ;;  %v6588_v43 = vld [vmem:[#allocation5 + $0x153] sm:$0xff] }
 0x8b3   : > { %v6110_v36 = vpop.permute.xlu1 %6109  ;;  %v6112_v13 = vpop.permute.xlu0 %6111 }
 0x8b4   : > { %6177 = vst.msk [vmem:[#allocation6 + $0xe8] sm:$0xff] %vm6147_vm7, %v6110_v36  ;;  %6178 = vst.msk [vmem:[#allocation6 + $0xf0] sm:$0xff] %vm6147_vm7, %v6112_v13 }
 0x8b5   : > { %6483 = vrot.lane.b32.xlu1 %v6396_v22, %s10132_s24  ;;  %6485 = vrot.lane.b32.xlu0 %v6397_v60, %s10132_s24  ;;  %v6589_v22 = vld [vmem:[#allocation5 + $0x15b] sm:$0xff]  ;;  %v6590_v60 = vld [vmem:[#allocation5 + $0x16b] sm:$0xff] }
 0x8b7   : > { %v6114_v3 = vpop.permute.xlu1 %6113  ;;  %v6245_v23 = vpop.permute.xlu0 %6244 }
 0x8b8   : > { %6179 = vst.msk [vmem:[#allocation6 + $0xf8] sm:$0xff] %vm6147_vm7, %v6114_v3 }
 0x8b9   : > { %6341 = vst.msk [vmem:[#allocation6] sm:$0xff] %vm6340_vm8, %v6245_v23  ;;  %6487 = vrot.lane.b32.xlu1 %v6398_v48, %s10132_s24  ;;  %6489 = vrot.lane.b32.xlu0 %v6399_v17, %s10132_s24  ;;  %v6591_v48 = vld [vmem:[#allocation5 + $0x173] sm:$0xff]  ;;  %v6592_v17 = vld [vmem:[#allocation5 + $0x183] sm:$0xff] }
 0x8bb   : > { %v6247_v57 = vpop.permute.xlu1 %6246  ;;  %v6249_v0 = vpop.permute.xlu0 %6248 }
 0x8bc   : > { %6342 = vst.msk [vmem:[#allocation6 + $0x8] sm:$0xff] %vm6340_vm8, %v6247_v57  ;;  %6343 = vst.msk [vmem:[#allocation6 + $0x10] sm:$0xff] %vm6340_vm8, %v6249_v0 }
 0x8bd   : > { %6491 = vrot.lane.b32.xlu1 %v6400_v20, %s10132_s24  ;;  %6493 = vrot.lane.b32.xlu0 %v6401_v30, %s10132_s24  ;;  %v6593_v20 = vld [vmem:[#allocation5 + $0x18b] sm:$0xff]  ;;  %v6594_v30 = vld [vmem:[#allocation5 + $0x19b] sm:$0xff] }
 0x8bf   : > { %v6251_v33 = vpop.permute.xlu1 %6250  ;;  %v6253_v45 = vpop.permute.xlu0 %6252 }
 0x8c0   : > { %6344 = vst.msk [vmem:[#allocation6 + $0x18] sm:$0xff] %vm6340_vm8, %v6251_v33  ;;  %6345 = vst.msk [vmem:[#allocation6 + $0x20] sm:$0xff] %vm6340_vm8, %v6253_v45 }
 0x8c1   : > { %6495 = vrot.lane.b32.xlu1 %v6402_v35, %s10132_s24  ;;  %6497 = vrot.lane.b32.xlu0 %v6403_v49, %s10132_s24  ;;  %v6596_v49 = vld [vmem:[#allocation5 + $0x1b3] sm:$0xff]  ;;  %v6595_v35 = vld [vmem:[#allocation5 + $0x1a3] sm:$0xff] }
 0x8c3   : > { %v6255_v5 = vpop.permute.xlu1 %6254  ;;  %v6257_v51 = vpop.permute.xlu0 %6256 }
 0x8c4   : > { %6346 = vst.msk [vmem:[#allocation6 + $0x28] sm:$0xff] %vm6340_vm8, %v6255_v5  ;;  %6347 = vst.msk [vmem:[#allocation6 + $0x30] sm:$0xff] %vm6340_vm8, %v6257_v51 }
 0x8c5   : > { %6499 = vrot.lane.b32.xlu1 %v6404_v2, %s10132_s24  ;;  %6630 = vrot.lane.b32.xlu0 %v6566_v18, %s10133_s27  ;;  %v6597_v2 = vld [vmem:[#allocation5 + $0x1bb] sm:$0xff]  ;;  %v6759_v18 = vld [vmem:[#allocation5 + $0x4c] sm:$0xff] }
 0x8c7   : > { %v6259_v62 = vpop.permute.xlu1 %6258  ;;  %v6261_v32 = vpop.permute.xlu0 %6260 }
 0x8c8   : > { %6348 = vst.msk [vmem:[#allocation6 + $0x38] sm:$0xff] %vm6340_vm8, %v6259_v62  ;;  %6349 = vst.msk [vmem:[#allocation6 + $0x40] sm:$0xff] %vm6340_vm8, %v6261_v32 }
 0x8c9   : > { %6632 = vrot.lane.b32.xlu1 %v6567_v44, %s10133_s27  ;;  %6634 = vrot.lane.b32.xlu0 %v13128_v40, %s10133_s27  ;;  %v6760_v44 = vld [vmem:[#allocation5 + $0x54] sm:$0xff] }
 0x8cb   : > { %v6263_v27 = vpop.permute.xlu1 %6262  ;;  %v6265_v39 = vpop.permute.xlu0 %6264 }
 0x8cc   : > { %6350 = vst.msk [vmem:[#allocation6 + $0x48] sm:$0xff] %vm6340_vm8, %v6263_v27  ;;  %6351 = vst.msk [vmem:[#allocation6 + $0x50] sm:$0xff] %vm6340_vm8, %v6265_v39  ;;  %v13228_v27 = vld [vmem:[#allocation5 + $0x64] sm:$0xff] }
 0x8cd   : > { %6636 = vrot.lane.b32.xlu1 %v13135_v6, %s10133_s27  ;;  %6638 = vrot.lane.b32.xlu0 %v13137_v12, %s10133_s27 }
 0x8cf   : > { %v6267_v9 = vpop.permute.xlu1 %6266  ;;  %v6269_v15 = vpop.permute.xlu0 %6268 }
 0x8d0   : > { %6352 = vst.msk [vmem:[#allocation6 + $0x58] sm:$0xff] %vm6340_vm8, %v6267_v9  ;;  %6353 = vst.msk [vmem:[#allocation6 + $0x60] sm:$0xff] %vm6340_vm8, %v6269_v15  ;;  %v13235_v15 = vld [vmem:[#allocation5 + $0x6c] sm:$0xff] }
 0x8d1   : > { %6640 = vrot.lane.b32.xlu1 %v13145_v24, %s10133_s27  ;;  %6642 = vrot.lane.b32.xlu0 %v13147_v61, %s10133_s27 }
 0x8d3   : > { %v6271_v21 = vpop.permute.xlu1 %6270  ;;  %v6273_v52 = vpop.permute.xlu0 %6272 }
 0x8d4   : > { %6354 = vst.msk [vmem:[#allocation6 + $0x68] sm:$0xff] %vm6340_vm8, %v6271_v21  ;;  %6355 = vst.msk [vmem:[#allocation6 + $0x70] sm:$0xff] %vm6340_vm8, %v6273_v52  ;;  %v13237_v21 = vld [vmem:[#allocation5 + $0x7c] sm:$0xff] }
 0x8d5   : > { %6644 = vrot.lane.b32.xlu1 %v13155_v4, %s10133_s27  ;;  %6646 = vrot.lane.b32.xlu0 %v13157_v58, %s10133_s27 }
 0x8d7   : > { %v6275_v29 = vpop.permute.xlu1 %6274  ;;  %v6277_v11 = vpop.permute.xlu0 %6276 }
 0x8d8   : > { %6356 = vst.msk [vmem:[#allocation6 + $0x78] sm:$0xff] %vm6340_vm8, %v6275_v29  ;;  %6357 = vst.msk [vmem:[#allocation6 + $0x80] sm:$0xff] %vm6340_vm8, %v6277_v11  ;;  %v13245_v11 = vld [vmem:[#allocation5 + $0x84] sm:$0xff] }
 0x8d9   : > { %6648 = vrot.lane.b32.xlu1 %v13165_v38, %s10133_s27  ;;  %6650 = vrot.lane.b32.xlu0 %v13167_v25, %s10133_s27 }
 0x8db   : > { %v6279_v56 = vpop.permute.xlu1 %6278  ;;  %v6281_v47 = vpop.permute.xlu0 %6280 }
 0x8dc   : > { %6358 = vst.msk [vmem:[#allocation6 + $0x88] sm:$0xff] %vm6340_vm8, %v6279_v56  ;;  %6359 = vst.msk [vmem:[#allocation6 + $0x90] sm:$0xff] %vm6340_vm8, %v6281_v47  ;;  %v13247_v56 = vld [vmem:[#allocation5 + $0x94] sm:$0xff] }
 0x8dd   : > { %6652 = vrot.lane.b32.xlu1 %v13175_v8, %s10133_s27  ;;  %6654 = vrot.lane.b32.xlu0 %v13177_v50, %s10133_s27 }
 0x8df   : > { %v6283_v16 = vpop.permute.xlu1 %6282  ;;  %v6285_v1 = vpop.permute.xlu0 %6284 }
 0x8e0   : > { %6360 = vst.msk [vmem:[#allocation6 + $0x98] sm:$0xff] %vm6340_vm8, %v6283_v16  ;;  %6361 = vst.msk [vmem:[#allocation6 + $0xa0] sm:$0xff] %vm6340_vm8, %v6285_v1  ;;  %v13255_v1 = vld [vmem:[#allocation5 + $0x9c] sm:$0xff] }
 0x8e1   : > { %6656 = vrot.lane.b32.xlu1 %v13185_v42, %s10133_s27  ;;  %6658 = vrot.lane.b32.xlu0 %v6580_v34, %s10133_s27  ;;  %v13257_v34 = vld [vmem:[#allocation5 + $0xac] sm:$0xff] }
 0x8e3   : > { %v6287_v63 = vpop.permute.xlu1 %6286  ;;  %v6289_v54 = vpop.permute.xlu0 %6288 }
 0x8e4   : > { %6362 = vst.msk [vmem:[#allocation6 + $0xa8] sm:$0xff] %vm6340_vm8, %v6287_v63  ;;  %6363 = vst.msk [vmem:[#allocation6 + $0xb0] sm:$0xff] %vm6340_vm8, %v6289_v54 }
 0x8e5   : > { %6660 = vrot.lane.b32.xlu1 %v6581_v28, %s10133_s27  ;;  %6662 = vrot.lane.b32.xlu0 %v6582_v26, %s10133_s27  ;;  %v13265_v28 = vld [vmem:[#allocation5 + $0xb4] sm:$0xff]  ;;  %v13267_v26 = vld [vmem:[#allocation5 + $0xc4] sm:$0xff] }
 0x8e7   : > { %v6291_v19 = vpop.permute.xlu1 %6290  ;;  %v6293_v55 = vpop.permute.xlu0 %6292 }
 0x8e8   : > { %6364 = vst.msk [vmem:[#allocation6 + $0xb8] sm:$0xff] %vm6340_vm8, %v6291_v19  ;;  %6365 = vst.msk [vmem:[#allocation6 + $0xc0] sm:$0xff] %vm6340_vm8, %v6293_v55 }
 0x8e9   : > { %6664 = vrot.lane.b32.xlu1 %v6583_v41, %s10133_s27  ;;  %6666 = vrot.lane.b32.xlu0 %v6584_v31, %s10133_s27  ;;  %v13275_v41 = vld [vmem:[#allocation5 + $0xcc] sm:$0xff]  ;;  %v13277_v31 = vld [vmem:[#allocation5 + $0xdc] sm:$0xff] }
 0x8eb   : > { %v6295_v14 = vpop.permute.xlu1 %6294  ;;  %v6297_v46 = vpop.permute.xlu0 %6296 }
 0x8ec   : > { %6366 = vst.msk [vmem:[#allocation6 + $0xc8] sm:$0xff] %vm6340_vm8, %v6295_v14  ;;  %6367 = vst.msk [vmem:[#allocation6 + $0xd0] sm:$0xff] %vm6340_vm8, %v6297_v46 }
 0x8ed   : > { %6668 = vrot.lane.b32.xlu1 %v6585_v37, %s10133_s27  ;;  %6670 = vrot.lane.b32.xlu0 %v6586_v53, %s10133_s27  ;;  %v13285_v37 = vld [vmem:[#allocation5 + $0xe4] sm:$0xff]  ;;  %v13287_v53 = vld [vmem:[#allocation5 + $0xf4] sm:$0xff] }
 0x8ef   : > { %v6299_v59 = vpop.permute.xlu1 %6298  ;;  %v6301_v7 = vpop.permute.xlu0 %6300 }
 0x8f0   : > { %6368 = vst.msk [vmem:[#allocation6 + $0xd8] sm:$0xff] %vm6340_vm8, %v6299_v59  ;;  %6369 = vst.msk [vmem:[#allocation6 + $0xe0] sm:$0xff] %vm6340_vm8, %v6301_v7 }
 0x8f1   : > { %6672 = vrot.lane.b32.xlu1 %v6587_v10, %s10133_s27  ;;  %6674 = vrot.lane.b32.xlu0 %v6588_v43, %s10133_s27  ;;  %v13295_v10 = vld [vmem:[#allocation5 + $0xfc] sm:$0xff]  ;;  %v13297_v43 = vld [vmem:[#allocation5 + $0x10c] sm:$0xff] }
 0x8f3   : > { %v6303_v36 = vpop.permute.xlu1 %6302  ;;  %v6305_v13 = vpop.permute.xlu0 %6304 }
 0x8f4   : > { %6370 = vst.msk [vmem:[#allocation6 + $0xe8] sm:$0xff] %vm6340_vm8, %v6303_v36  ;;  %6371 = vst.msk [vmem:[#allocation6 + $0xf0] sm:$0xff] %vm6340_vm8, %v6305_v13 }
 0x8f5   : > { %6676 = vrot.lane.b32.xlu1 %v6589_v22, %s10133_s27  ;;  %6678 = vrot.lane.b32.xlu0 %v6590_v60, %s10133_s27  ;;  %v13305_v22 = vld [vmem:[#allocation5 + $0x114] sm:$0xff]  ;;  %v6777_v60 = vld [vmem:[#allocation5 + $0x124] sm:$0xff] }
 0x8f7   : > { %v6307_v3 = vpop.permute.xlu1 %6306  ;;  %v6438_v23 = vpop.permute.xlu0 %6437 }
 0x8f8   : > { %6372 = vst.msk [vmem:[#allocation6 + $0xf8] sm:$0xff] %vm6340_vm8, %v6307_v3 }
 0x8f9   : > { %6534 = vst.msk [vmem:[#allocation6] sm:$0xff] %vm6533_vm9, %v6438_v23  ;;  %6680 = vrot.lane.b32.xlu1 %v6591_v48, %s10133_s27  ;;  %6682 = vrot.lane.b32.xlu0 %v6592_v17, %s10133_s27  ;;  %v6778_v48 = vld [vmem:[#allocation5 + $0x12c] sm:$0xff]  ;;  %v6779_v17 = vld [vmem:[#allocation5 + $0x13c] sm:$0xff] }
 0x8fb   : > { %v6440_v57 = vpop.permute.xlu1 %6439  ;;  %v6442_v0 = vpop.permute.xlu0 %6441 }
 0x8fc   : > { %6535 = vst.msk [vmem:[#allocation6 + $0x8] sm:$0xff] %vm6533_vm9, %v6440_v57  ;;  %6536 = vst.msk [vmem:[#allocation6 + $0x10] sm:$0xff] %vm6533_vm9, %v6442_v0 }
 0x8fd   : > { %6684 = vrot.lane.b32.xlu1 %v6593_v20, %s10133_s27  ;;  %6686 = vrot.lane.b32.xlu0 %v6594_v30, %s10133_s27  ;;  %v6780_v20 = vld [vmem:[#allocation5 + $0x144] sm:$0xff]  ;;  %v6781_v30 = vld [vmem:[#allocation5 + $0x154] sm:$0xff] }
 0x8ff   : > { %v6444_v33 = vpop.permute.xlu1 %6443  ;;  %v6446_v45 = vpop.permute.xlu0 %6445 }
 0x900   : > { %6537 = vst.msk [vmem:[#allocation6 + $0x18] sm:$0xff] %vm6533_vm9, %v6444_v33  ;;  %6538 = vst.msk [vmem:[#allocation6 + $0x20] sm:$0xff] %vm6533_vm9, %v6446_v45  ;;  %v6782_v45 = vld [vmem:[#allocation5 + $0x15c] sm:$0xff] }
 0x901   : > { %6688 = vrot.lane.b32.xlu1 %v6595_v35, %s10133_s27  ;;  %6690 = vrot.lane.b32.xlu0 %v6596_v49, %s10133_s27  ;;  %v6783_v35 = vld [vmem:[#allocation5 + $0x16c] sm:$0xff] }
 0x903   : > { %v6448_v5 = vpop.permute.xlu1 %6447  ;;  %v6450_v51 = vpop.permute.xlu0 %6449 }
 0x904   : > { %6539 = vst.msk [vmem:[#allocation6 + $0x28] sm:$0xff] %vm6533_vm9, %v6448_v5  ;;  %6540 = vst.msk [vmem:[#allocation6 + $0x30] sm:$0xff] %vm6533_vm9, %v6450_v51  ;;  %v6784_v51 = vld [vmem:[#allocation5 + $0x174] sm:$0xff] }
 0x905   : > { %6692 = vrot.lane.b32.xlu1 %v6597_v2, %s10133_s27  ;;  %6823 = vrot.lane.b32.xlu0 %v6759_v18, %s10134_s16  ;;  %v6785_v18 = vld [vmem:[#allocation5 + $0x184] sm:$0xff] }
 0x907   : > { %v6452_v62 = vpop.permute.xlu1 %6451  ;;  %v6454_v32 = vpop.permute.xlu0 %6453 }
 0x908   : > { %6541 = vst.msk [vmem:[#allocation6 + $0x38] sm:$0xff] %vm6533_vm9, %v6452_v62  ;;  %6542 = vst.msk [vmem:[#allocation6 + $0x40] sm:$0xff] %vm6533_vm9, %v6454_v32 }
 0x909   : > { %6825 = vrot.lane.b32.xlu1 %v6760_v44, %s10134_s16  ;;  %6827 = vrot.lane.b32.xlu0 %v13228_v27, %s10134_s16  ;;  %v6786_v44 = vld [vmem:[#allocation5 + $0x18c] sm:$0xff] }
 0x90b   : > { %v6456_v39 = vpop.permute.xlu1 %6455  ;;  %v6458_v9 = vpop.permute.xlu0 %6457 }
 0x90c   : > { %6543 = vst.msk [vmem:[#allocation6 + $0x48] sm:$0xff] %vm6533_vm9, %v6456_v39  ;;  %6544 = vst.msk [vmem:[#allocation6 + $0x50] sm:$0xff] %vm6533_vm9, %v6458_v9  ;;  %v6787_v39 = vld [vmem:[#allocation5 + $0x19c] sm:$0xff]  ;;  %v6789_v9 = vld [vmem:[#allocation5 + $0x1b4] sm:$0xff] }
 0x90d   : > { %6829 = vrot.lane.b32.xlu1 %v13235_v15, %s10134_s16  ;;  %6831 = vrot.lane.b32.xlu0 %v13237_v21, %s10134_s16 }
 0x90f   : > { %v6460_v52 = vpop.permute.xlu1 %6459  ;;  %v6462_v29 = vpop.permute.xlu0 %6461 }
 0x910   : > { %6545 = vst.msk [vmem:[#allocation6 + $0x58] sm:$0xff] %vm6533_vm9, %v6460_v52  ;;  %6546 = vst.msk [vmem:[#allocation6 + $0x60] sm:$0xff] %vm6533_vm9, %v6462_v29 }
 0x911   : > { %6833 = vrot.lane.b32.xlu1 %v13245_v11, %s10134_s16  ;;  %6835 = vrot.lane.b32.xlu0 %v13247_v56, %s10134_s16 }
 0x913   : > { %v6464_v47 = vpop.permute.xlu1 %6463  ;;  %v6466_v16 = vpop.permute.xlu0 %6465 }
 0x914   : > { %6547 = vst.msk [vmem:[#allocation6 + $0x68] sm:$0xff] %vm6533_vm9, %v6464_v47  ;;  %6548 = vst.msk [vmem:[#allocation6 + $0x70] sm:$0xff] %vm6533_vm9, %v6466_v16  ;;  %v6788_v47 = vld [vmem:[#allocation5 + $0x1a4] sm:$0xff]  ;;  %v6790_v16 = vld [vmem:[#allocation5 + $0x1bc] sm:$0xff] }
 0x915   : > { %6837 = vrot.lane.b32.xlu1 %v13255_v1, %s10134_s16  ;;  %6839 = vrot.lane.b32.xlu0 %v13257_v34, %s10134_s16 }
 0x917   : > { %v6468_v63 = vpop.permute.xlu1 %6467  ;;  %v6470_v54 = vpop.permute.xlu0 %6469 }
 0x918   : > { %6549 = vst.msk [vmem:[#allocation6 + $0x78] sm:$0xff] %vm6533_vm9, %v6468_v63  ;;  %6550 = vst.msk [vmem:[#allocation6 + $0x80] sm:$0xff] %vm6533_vm9, %v6470_v54 }
 0x919   : > { %6841 = vrot.lane.b32.xlu1 %v13265_v28, %s10134_s16  ;;  %6843 = vrot.lane.b32.xlu0 %v13267_v26, %s10134_s16 }
 0x91b   : > { %v6472_v19 = vpop.permute.xlu1 %6471  ;;  %v6474_v55 = vpop.permute.xlu0 %6473 }
 0x91c   : > { %6551 = vst.msk [vmem:[#allocation6 + $0x88] sm:$0xff] %vm6533_vm9, %v6472_v19  ;;  %6552 = vst.msk [vmem:[#allocation6 + $0x90] sm:$0xff] %vm6533_vm9, %v6474_v55  ;;  %v6953_v19 = vld [vmem:[#allocation5 + $0x60] sm:$0xff] }
 0x91d   : > { %6845 = vrot.lane.b32.xlu1 %v13275_v41, %s10134_s16  ;;  %6847 = vrot.lane.b32.xlu0 %v13277_v31, %s10134_s16 }
 0x91f   : > { %v6476_v14 = vpop.permute.xlu1 %6475  ;;  %v6478_v46 = vpop.permute.xlu0 %6477 }
 0x920   : > { %6553 = vst.msk [vmem:[#allocation6 + $0x98] sm:$0xff] %vm6533_vm9, %v6476_v14  ;;  %6554 = vst.msk [vmem:[#allocation6 + $0xa0] sm:$0xff] %vm6533_vm9, %v6478_v46  ;;  %v6954_v46 = vld [vmem:[#allocation5 + $0x68] sm:$0xff] }
 0x921   : > { %6849 = vrot.lane.b32.xlu1 %v13285_v37, %s10134_s16  ;;  %6851 = vrot.lane.b32.xlu0 %v13287_v53, %s10134_s16 }
 0x923   : > { %v6480_v59 = vpop.permute.xlu1 %6479  ;;  %v6482_v7 = vpop.permute.xlu0 %6481 }
 0x924   : > { %6555 = vst.msk [vmem:[#allocation6 + $0xa8] sm:$0xff] %vm6533_vm9, %v6480_v59  ;;  %6556 = vst.msk [vmem:[#allocation6 + $0xb0] sm:$0xff] %vm6533_vm9, %v6482_v7  ;;  %v6955_v59 = vld [vmem:[#allocation5 + $0x78] sm:$0xff] }
 0x925   : > { %6853 = vrot.lane.b32.xlu1 %v13295_v10, %s10134_s16  ;;  %6855 = vrot.lane.b32.xlu0 %v13297_v43, %s10134_s16 }
 0x927   : > { %v6484_v36 = vpop.permute.xlu1 %6483  ;;  %v6486_v13 = vpop.permute.xlu0 %6485 }
 0x928   : > { %6557 = vst.msk [vmem:[#allocation6 + $0xb8] sm:$0xff] %vm6533_vm9, %v6484_v36  ;;  %6558 = vst.msk [vmem:[#allocation6 + $0xc0] sm:$0xff] %vm6533_vm9, %v6486_v13  ;;  %v6956_v13 = vld [vmem:[#allocation5 + $0x80] sm:$0xff] }
 0x929   : > { %6857 = vrot.lane.b32.xlu1 %v13305_v22, %s10134_s16  ;;  %6859 = vrot.lane.b32.xlu0 %v6777_v60, %s10134_s16  ;;  %v6957_v60 = vld [vmem:[#allocation5 + $0x90] sm:$0xff] }
 0x92b   : > { %v6488_v3 = vpop.permute.xlu1 %6487  ;;  %v6490_v23 = vpop.permute.xlu0 %6489 }
 0x92c   : > { %6559 = vst.msk [vmem:[#allocation6 + $0xc8] sm:$0xff] %vm6533_vm9, %v6488_v3  ;;  %6560 = vst.msk [vmem:[#allocation6 + $0xd0] sm:$0xff] %vm6533_vm9, %v6490_v23 }
 0x92d   : > { %6861 = vrot.lane.b32.xlu1 %v6778_v48, %s10134_s16  ;;  %6863 = vrot.lane.b32.xlu0 %v6779_v17, %s10134_s16  ;;  %v6958_v48 = vld [vmem:[#allocation5 + $0x98] sm:$0xff]  ;;  %v6959_v17 = vld [vmem:[#allocation5 + $0xa8] sm:$0xff] }
 0x92f   : > { %v6492_v57 = vpop.permute.xlu1 %6491  ;;  %v6494_v0 = vpop.permute.xlu0 %6493 }
 0x930   : > { %6561 = vst.msk [vmem:[#allocation6 + $0xd8] sm:$0xff] %vm6533_vm9, %v6492_v57  ;;  %6562 = vst.msk [vmem:[#allocation6 + $0xe0] sm:$0xff] %vm6533_vm9, %v6494_v0 }
 0x931   : > { %6865 = vrot.lane.b32.xlu1 %v6780_v20, %s10134_s16  ;;  %6867 = vrot.lane.b32.xlu0 %v6781_v30, %s10134_s16  ;;  %v6960_v20 = vld [vmem:[#allocation5 + $0xb0] sm:$0xff]  ;;  %v6961_v30 = vld [vmem:[#allocation5 + $0xc0] sm:$0xff] }
 0x933   : > { %v6496_v49 = vpop.permute.xlu1 %6495  ;;  %v6498_v33 = vpop.permute.xlu0 %6497 }
 0x934   : > { %6563 = vst.msk [vmem:[#allocation6 + $0xe8] sm:$0xff] %vm6533_vm9, %v6496_v49  ;;  %6564 = vst.msk [vmem:[#allocation6 + $0xf0] sm:$0xff] %vm6533_vm9, %v6498_v33 }
 0x935   : > { %6869 = vrot.lane.b32.xlu1 %v6782_v45, %s10134_s16  ;;  %6871 = vrot.lane.b32.xlu0 %v6783_v35, %s10134_s16  ;;  %v6962_v45 = vld [vmem:[#allocation5 + $0xc8] sm:$0xff]  ;;  %v6963_v35 = vld [vmem:[#allocation5 + $0xd8] sm:$0xff] }
 0x937   : > { %v6500_v2 = vpop.permute.xlu1 %6499  ;;  %v6631_v5 = vpop.permute.xlu0 %6630 }
 0x938   : > { %6565 = vst.msk [vmem:[#allocation6 + $0xf8] sm:$0xff] %vm6533_vm9, %v6500_v2 }
 0x939   : > { %6727 = vst.msk [vmem:[#allocation6] sm:$0xff] %vm6726_vm10, %v6631_v5  ;;  %6873 = vrot.lane.b32.xlu1 %v6784_v51, %s10134_s16  ;;  %6875 = vrot.lane.b32.xlu0 %v6785_v18, %s10134_s16  ;;  %v6964_v51 = vld [vmem:[#allocation5 + $0xe0] sm:$0xff]  ;;  %v6965_v18 = vld [vmem:[#allocation5 + $0xf0] sm:$0xff] }
 0x93b   : > { %v6633_v62 = vpop.permute.xlu1 %6632  ;;  %v6635_v32 = vpop.permute.xlu0 %6634 }
 0x93c   : > { %6728 = vst.msk [vmem:[#allocation6 + $0x8] sm:$0xff] %vm6726_vm10, %v6633_v62  ;;  %6729 = vst.msk [vmem:[#allocation6 + $0x10] sm:$0xff] %vm6726_vm10, %v6635_v32 }
 0x93d   : > { %6877 = vrot.lane.b32.xlu1 %v6786_v44, %s10134_s16  ;;  %6879 = vrot.lane.b32.xlu0 %v6787_v39, %s10134_s16  ;;  %v6966_v44 = vld [vmem:[#allocation5 + $0xf8] sm:$0xff]  ;;  %v6967_v39 = vld [vmem:[#allocation5 + $0x108] sm:$0xff] }
 0x93f   : > { %v6637_v52 = vpop.permute.xlu1 %6636  ;;  %v6639_v29 = vpop.permute.xlu0 %6638 }
 0x940   : > { %6730 = vst.msk [vmem:[#allocation6 + $0x18] sm:$0xff] %vm6726_vm10, %v6637_v52  ;;  %6731 = vst.msk [vmem:[#allocation6 + $0x20] sm:$0xff] %vm6726_vm10, %v6639_v29  ;;  %v6968_v29 = vld [vmem:[#allocation5 + $0x110] sm:$0xff] }
 0x941   : > { %6881 = vrot.lane.b32.xlu1 %v6788_v47, %s10134_s16  ;;  %6883 = vrot.lane.b32.xlu0 %v6789_v9, %s10134_s16  ;;  %v6969_v47 = vld [vmem:[#allocation5 + $0x120] sm:$0xff] }
 0x943   : > { %v6641_v63 = vpop.permute.xlu1 %6640  ;;  %v6643_v54 = vpop.permute.xlu0 %6642 }
 0x944   : > { %6732 = vst.msk [vmem:[#allocation6 + $0x28] sm:$0xff] %vm6726_vm10, %v6641_v63  ;;  %6733 = vst.msk [vmem:[#allocation6 + $0x30] sm:$0xff] %vm6726_vm10, %v6643_v54  ;;  %v6970_v54 = vld [vmem:[#allocation5 + $0x128] sm:$0xff] }
 0x945   : > { %6885 = vrot.lane.b32.xlu1 %v6790_v16, %s10134_s16  ;;  %7017 = vrot.lane.b32.xlu0 %v6953_v19, %s10135_s17  ;;  %v6971_v19 = vld [vmem:[#allocation5 + $0x138] sm:$0xff]  ;;  %s10138_s16 = smov 92  }
 0x947   : > { %v6645_v55 = vpop.permute.xlu1 %6644  ;;  %v6647_v14 = vpop.permute.xlu0 %6646 }
 0x948   : > { %6734 = vst.msk [vmem:[#allocation6 + $0x38] sm:$0xff] %vm6726_vm10, %v6645_v55  ;;  %6735 = vst.msk [vmem:[#allocation6 + $0x40] sm:$0xff] %vm6726_vm10, %v6647_v14 }
 0x949   : > { %7019 = vrot.lane.b32.xlu1 %v6954_v46, %s10135_s17  ;;  %7021 = vrot.lane.b32.xlu0 %v6955_v59, %s10135_s17  ;;  %v6972_v46 = vld [vmem:[#allocation5 + $0x140] sm:$0xff]  ;;  %v6973_v59 = vld [vmem:[#allocation5 + $0x150] sm:$0xff] }
 0x94b   : > { %v6649_v7 = vpop.permute.xlu1 %6648  ;;  %v6651_v36 = vpop.permute.xlu0 %6650 }
 0x94c   : > { %6736 = vst.msk [vmem:[#allocation6 + $0x48] sm:$0xff] %vm6726_vm10, %v6649_v7  ;;  %6737 = vst.msk [vmem:[#allocation6 + $0x50] sm:$0xff] %vm6726_vm10, %v6651_v36 }
 0x94d   : > { %7023 = vrot.lane.b32.xlu1 %v6956_v13, %s10135_s17  ;;  %7025 = vrot.lane.b32.xlu0 %v6957_v60, %s10135_s17  ;;  %v6974_v13 = vld [vmem:[#allocation5 + $0x158] sm:$0xff]  ;;  %v6975_v60 = vld [vmem:[#allocation5 + $0x168] sm:$0xff] }
 0x94f   : > { %v6653_v3 = vpop.permute.xlu1 %6652  ;;  %v6655_v23 = vpop.permute.xlu0 %6654 }
 0x950   : > { %6738 = vst.msk [vmem:[#allocation6 + $0x58] sm:$0xff] %vm6726_vm10, %v6653_v3  ;;  %6739 = vst.msk [vmem:[#allocation6 + $0x60] sm:$0xff] %vm6726_vm10, %v6655_v23 }
 0x951   : > { %7027 = vrot.lane.b32.xlu1 %v6958_v48, %s10135_s17  ;;  %7029 = vrot.lane.b32.xlu0 %v6959_v17, %s10135_s17  ;;  %v6976_v48 = vld [vmem:[#allocation5 + $0x170] sm:$0xff]  ;;  %v6977_v17 = vld [vmem:[#allocation5 + $0x180] sm:$0xff] }
 0x953   : > { %v6657_v57 = vpop.permute.xlu1 %6656  ;;  %v6659_v0 = vpop.permute.xlu0 %6658 }
 0x954   : > { %6740 = vst.msk [vmem:[#allocation6 + $0x68] sm:$0xff] %vm6726_vm10, %v6657_v57  ;;  %6741 = vst.msk [vmem:[#allocation6 + $0x70] sm:$0xff] %vm6726_vm10, %v6659_v0 }
 0x955   : > { %7031 = vrot.lane.b32.xlu1 %v6960_v20, %s10135_s17  ;;  %7033 = vrot.lane.b32.xlu0 %v6961_v30, %s10135_s17  ;;  %v6978_v20 = vld [vmem:[#allocation5 + $0x188] sm:$0xff]  ;;  %v6979_v30 = vld [vmem:[#allocation5 + $0x198] sm:$0xff] }
 0x957   : > { %v6661_v49 = vpop.permute.xlu1 %6660  ;;  %v6663_v33 = vpop.permute.xlu0 %6662 }
 0x958   : > { %6742 = vst.msk [vmem:[#allocation6 + $0x78] sm:$0xff] %vm6726_vm10, %v6661_v49  ;;  %6743 = vst.msk [vmem:[#allocation6 + $0x80] sm:$0xff] %vm6726_vm10, %v6663_v33  ;;  %v6981_v49 = vld [vmem:[#allocation5 + $0x1b0] sm:$0xff] }
 0x959   : > { %7035 = vrot.lane.b32.xlu1 %v6962_v45, %s10135_s17  ;;  %7037 = vrot.lane.b32.xlu0 %v6963_v35, %s10135_s17  ;;  %v6980_v35 = vld [vmem:[#allocation5 + $0x1a0] sm:$0xff] }
 0x95b   : > { %v6665_v2 = vpop.permute.xlu1 %6664  ;;  %v6667_v5 = vpop.permute.xlu0 %6666 }
 0x95c   : > { %6744 = vst.msk [vmem:[#allocation6 + $0x88] sm:$0xff] %vm6726_vm10, %v6665_v2  ;;  %6745 = vst.msk [vmem:[#allocation6 + $0x90] sm:$0xff] %vm6726_vm10, %v6667_v5  ;;  %v10027_v2 = vld [vmem:[%s14323_s7 + $0x30] ss:$0 sps:$4 sm:$0x33]  }
 0x95d   : > { %7039 = vrot.lane.b32.xlu1 %v6964_v51, %s10135_s17  ;;  %7041 = vrot.lane.b32.xlu0 %v6965_v18, %s10135_s17  ;;  %v8075_v18 = vsel %vm501_vm0, %v10027_v2, 0 }
 0x95e   : > { %9938 = vmatprep.subr.msk.bf16.mxu0 %vm501_vm0, %v10027_v2 }
 0x95f   : > { %v6669_v62 = vpop.permute.xlu1 %6668  ;;  %v6671_v32 = vpop.permute.xlu0 %6670  ;;  %9857 = vmatpush3.bf16.msra.mxu0 %v8075_v18  ;;  %v7346_v18 = vld [vmem:[#allocation5 + $0xb2] sm:$0xff] }
 0x960   : > { %6746 = vst.msk [vmem:[#allocation6 + $0x98] sm:$0xff] %vm6726_vm10, %v6669_v62  ;;  %6747 = vst.msk [vmem:[#allocation6 + $0xa0] sm:$0xff] %vm6726_vm10, %v6671_v32  ;;  %v7146_v62 = vld [vmem:[#allocation5 + $0x61] sm:$0xff]  ;;  %v7147_v32 = vld [vmem:[#allocation5 + $0x69] sm:$0xff] }
 0x961   : > { %7043 = vrot.lane.b32.xlu1 %v6966_v44, %s10135_s17  ;;  %7045 = vrot.lane.b32.xlu0 %v6967_v39, %s10135_s17  ;;  %v10028_v44 = vld [vmem:[%s14323_s7 + $0x28] sm:$0xff]  }
 0x962   : > { %9858 = vmatprep.subr.bf16.mxu0 %v10028_v44 }
 0x963   : > { %v6673_v9 = vpop.permute.xlu1 %6672  ;;  %v6675_v52 = vpop.permute.xlu0 %6674  ;;  %9859 = vmatpush3.bf16.msra.mxu0 %v10028_v44 }
 0x964   : > { %6748 = vst.msk [vmem:[#allocation6 + $0xa8] sm:$0xff] %vm6726_vm10, %v6673_v9  ;;  %6749 = vst.msk [vmem:[#allocation6 + $0xb0] sm:$0xff] %vm6726_vm10, %v6675_v52  ;;  %v7148_v52 = vld [vmem:[#allocation5 + $0x79] sm:$0xff] }
 0x965   : > { %7047 = vrot.lane.b32.xlu1 %v6968_v29, %s10135_s17  ;;  %7049 = vrot.lane.b32.xlu0 %v6969_v47, %s10135_s17  ;;  %v7149_v29 = vld [vmem:[#allocation5 + $0x81] sm:$0xff] }
 0x966   : > { %v10029_v47 = vld [vmem:[%s14323_s7 + $0x20] sm:$0xff]  }
 0x967   : > { %v6677_v16 = vpop.permute.xlu1 %6676  ;;  %v6679_v63 = vpop.permute.xlu0 %6678  ;;  %9860 = vmatprep.subr.bf16.mxu0 %v10029_v47 }
 0x968   : > { %6750 = vst.msk [vmem:[#allocation6 + $0xb8] sm:$0xff] %vm6726_vm10, %v6677_v16  ;;  %6751 = vst.msk [vmem:[#allocation6 + $0xc0] sm:$0xff] %vm6726_vm10, %v6679_v63  ;;  %9861 = vmatpush3.bf16.msra.mxu0 %v10029_v47 }
 0x969   : > { %7051 = vrot.lane.b32.xlu1 %v6970_v54, %s10135_s17  ;;  %7053 = vrot.lane.b32.xlu0 %v6971_v19, %s10135_s17  ;;  %v7339_v54 = vld [vmem:[#allocation5 + $0x62] sm:$0xff]  ;;  %v7340_v19 = vld [vmem:[#allocation5 + $0x6a] sm:$0xff] }
 0x96b   : > { %v6681_v55 = vpop.permute.xlu1 %6680  ;;  %v6683_v14 = vpop.permute.xlu0 %6682 }
 0x96c   : > { %6752 = vst.msk [vmem:[#allocation6 + $0xc8] sm:$0xff] %vm6726_vm10, %v6681_v55  ;;  %6753 = vst.msk [vmem:[#allocation6 + $0xd0] sm:$0xff] %vm6726_vm10, %v6683_v14  ;;  %v10030_v55 = vld [vmem:[%s14323_s7 + $0x18] sm:$0xff]  }
 0x96d   : > { %7055 = vrot.lane.b32.xlu1 %v6972_v46, %s10135_s17  ;;  %7057 = vrot.lane.b32.xlu0 %v6973_v59, %s10135_s17  ;;  %v7341_v59 = vld [vmem:[#allocation5 + $0x7a] sm:$0xff] }
 0x96e   : > { %9862 = vmatprep.subr.bf16.mxu0 %v10030_v55 }
 0x96f   : > { %v6685_v7 = vpop.permute.xlu1 %6684  ;;  %v6687_v36 = vpop.permute.xlu0 %6686  ;;  %9863 = vmatpush3.bf16.msra.mxu0 %v10030_v55 }
 0x970   : > { %6754 = vst.msk [vmem:[#allocation6 + $0xd8] sm:$0xff] %vm6726_vm10, %v6685_v7  ;;  %6755 = vst.msk [vmem:[#allocation6 + $0xe0] sm:$0xff] %vm6726_vm10, %v6687_v36  ;;  %v7342_v7 = vld [vmem:[#allocation5 + $0x82] sm:$0xff]  ;;  %v10031_v36 = vld [vmem:[%s14323_s7 + $0x10] sm:$0xff]  }
 0x971   : > { %7059 = vrot.lane.b32.xlu1 %v6974_v13, %s10135_s17  ;;  %7061 = vrot.lane.b32.xlu0 %v6975_v60, %s10135_s17 }
 0x972   : > { %9864 = vmatprep.subr.bf16.mxu0 %v10031_v36 }
 0x973   : > { %v6689_v3 = vpop.permute.xlu1 %6688  ;;  %v6691_v23 = vpop.permute.xlu0 %6690  ;;  %9865 = vmatpush3.bf16.msra.mxu0 %v10031_v36 }
 0x974   : > { %6756 = vst.msk [vmem:[#allocation6 + $0xe8] sm:$0xff] %vm6726_vm10, %v6689_v3  ;;  %6757 = vst.msk [vmem:[#allocation6 + $0xf0] sm:$0xff] %vm6726_vm10, %v6691_v23  ;;  %v10032_v3 = vld [vmem:[%s14323_s7 + $0x8] sm:$0xff]  }
 0x975   : > { %7063 = vrot.lane.b32.xlu1 %v6976_v48, %s10135_s17  ;;  %7065 = vrot.lane.b32.xlu0 %v6977_v17, %s10135_s17 }
 0x976   : > { %9866 = vmatprep.subr.bf16.mxu0 %v10032_v3 }
 0x977   : > { %v6693_v57 = vpop.permute.xlu1 %6692  ;;  %v6824_v0 = vpop.permute.xlu0 %6823  ;;  %9867 = vmatpush3.bf16.msra.mxu0 %v10032_v3 }
 0x978   : > { %6758 = vst.msk [vmem:[#allocation6 + $0xf8] sm:$0xff] %vm6726_vm10, %v6693_v57 }
 0x979   : > { %6920 = vst.msk [vmem:[#allocation6] sm:$0xff] %vm6919_vm11, %v6824_v0  ;;  %7067 = vrot.lane.b32.xlu1 %v6978_v20, %s10135_s17  ;;  %7069 = vrot.lane.b32.xlu0 %v6979_v30, %s10135_s17 }
 0x97b   : > { %v6826_v33 = vpop.permute.xlu1 %6825  ;;  %v6828_v45 = vpop.permute.xlu0 %6827 }
 0x97c   : > { %6921 = vst.msk [vmem:[#allocation6 + $0x8] sm:$0xff] %vm6919_vm11, %v6826_v33  ;;  %6922 = vst.msk [vmem:[#allocation6 + $0x10] sm:$0xff] %vm6919_vm11, %v6828_v45  ;;  %v7343_v45 = vld [vmem:[#allocation5 + $0x92] sm:$0xff] }
 0x97d   : > { %7071 = vrot.lane.b32.xlu1 %v6980_v35, %s10135_s17  ;;  %7073 = vrot.lane.b32.xlu0 %v6981_v49, %s10135_s17  ;;  %v7344_v35 = vld [vmem:[#allocation5 + $0x9a] sm:$0xff] }
 0x97f   : > { %v6830_v5 = vpop.permute.xlu1 %6829  ;;  %v6832_v51 = vpop.permute.xlu0 %6831 }
 0x980   : > { %6923 = vst.msk [vmem:[#allocation6 + $0x18] sm:$0xff] %vm6919_vm11, %v6830_v5  ;;  %6924 = vst.msk [vmem:[#allocation6 + $0x20] sm:$0xff] %vm6919_vm11, %v6832_v51  ;;  %v7345_v51 = vld [vmem:[#allocation5 + $0xaa] sm:$0xff] }
 0x981   : > { %7210 = vrot.lane.b32.xlu1 %v7146_v62, %s10136_s26  ;;  %7212 = vrot.lane.b32.xlu0 %v7147_v32, %s10136_s26 }
 0x983   : > { %v6834_v39 = vpop.permute.xlu1 %6833  ;;  %v6836_v9 = vpop.permute.xlu0 %6835 }
 0x984   : > { %6925 = vst.msk [vmem:[#allocation6 + $0x28] sm:$0xff] %vm6919_vm11, %v6834_v39  ;;  %6926 = vst.msk [vmem:[#allocation6 + $0x30] sm:$0xff] %vm6919_vm11, %v6836_v9 }
 0x985   : > { %7214 = vrot.lane.b32.xlu1 %v7148_v52, %s10136_s26  ;;  %7216 = vrot.lane.b32.xlu0 %v7149_v29, %s10136_s26 }
 0x987   : > { %v6838_v16 = vpop.permute.xlu1 %6837  ;;  %v6840_v63 = vpop.permute.xlu0 %6839 }
 0x988   : > { %6927 = vst.msk [vmem:[#allocation6 + $0x38] sm:$0xff] %vm6919_vm11, %v6838_v16  ;;  %6928 = vst.msk [vmem:[#allocation6 + $0x40] sm:$0xff] %vm6919_vm11, %v6840_v63 }
 0x989   : > { %7403 = vrot.lane.b32.xlu1 %v7339_v54, %s10137_s21  ;;  %7405 = vrot.lane.b32.xlu0 %v7340_v19, %s10137_s21  ;;  %v7347_v54 = vld [vmem:[#allocation5 + $0xc2] sm:$0xff]  ;;  %v7348_v19 = vld [vmem:[#allocation5 + $0xca] sm:$0xff] }
 0x98b   : > { %v6842_v14 = vpop.permute.xlu1 %6841  ;;  %v6844_v46 = vpop.permute.xlu0 %6843 }
 0x98c   : > { %6929 = vst.msk [vmem:[#allocation6 + $0x48] sm:$0xff] %vm6919_vm11, %v6842_v14  ;;  %6930 = vst.msk [vmem:[#allocation6 + $0x50] sm:$0xff] %vm6919_vm11, %v6844_v46  ;;  %v7349_v46 = vld [vmem:[#allocation5 + $0xda] sm:$0xff] }
 0x98d   : > { %7407 = vrot.lane.b32.xlu1 %v7341_v59, %s10137_s21  ;;  %7409 = vrot.lane.b32.xlu0 %v7342_v7, %s10137_s21  ;;  %v7350_v59 = vld [vmem:[#allocation5 + $0xe2] sm:$0xff] }
 0x98f   : > { %v6846_v13 = vpop.permute.xlu1 %6845  ;;  %v6848_v60 = vpop.permute.xlu0 %6847 }
 0x990   : > { %6931 = vst.msk [vmem:[#allocation6 + $0x58] sm:$0xff] %vm6919_vm11, %v6846_v13  ;;  %6932 = vst.msk [vmem:[#allocation6 + $0x60] sm:$0xff] %vm6919_vm11, %v6848_v60 }
 0x991   : > { %7596 = vrot.lane.b32.xlu1 %v13128_v40, %s10138_s16  ;;  %7598 = vrot.lane.b32.xlu0 %v13135_v6, %s10138_s16  ;;  %v10033_v40 = vld [vmem:[%s14323_s7] sm:$0xff]  }
 0x992   : > { %9868 = vmatprep.subr.bf16.mxu0 %v10033_v40 }
 0x993   : > { %v6850_v23 = vpop.permute.xlu1 %6849  ;;  %v6852_v48 = vpop.permute.xlu0 %6851  ;;  %9869 = vmatpush3.bf16.msra.mxu0 %v10033_v40 }
 0x994   : > { %6933 = vst.msk [vmem:[#allocation6 + $0x68] sm:$0xff] %vm6919_vm11, %v6850_v23  ;;  %6934 = vst.msk [vmem:[#allocation6 + $0x70] sm:$0xff] %vm6919_vm11, %v6852_v48 }
 0x995   : > { %7600 = vrot.lane.b32.xlu1 %v13137_v12, %s10138_s16  ;;  %7602 = vrot.lane.b32.xlu0 %v13145_v24, %s10138_s16 }
 0x997   : > { %v6854_v6 = vpop.permute.xlu1 %6853  ;;  %v6856_v17 = vpop.permute.xlu0 %6855 }
 0x998   : > { %6935 = vst.msk [vmem:[#allocation6 + $0x78] sm:$0xff] %vm6919_vm11, %v6854_v6  ;;  %6936 = vst.msk [vmem:[#allocation6 + $0x80] sm:$0xff] %vm6919_vm11, %v6856_v17 }
 0x999   : > { %7789 = vrot.lane.b32.xlu1 %v13228_v27, %s10139_s14  ;;  %7791 = vrot.lane.b32.xlu0 %v13235_v15, %s10139_s14  ;;  %v7150_v27 = vld [vmem:[#allocation5 + $0x91] sm:$0xff]  ;;  %v7151_v15 = vld [vmem:[#allocation5 + $0x99] sm:$0xff] }
 0x99b   : > { %v6858_v12 = vpop.permute.xlu1 %6857  ;;  %v6860_v24 = vpop.permute.xlu0 %6859 }
 0x99c   : > { %6937 = vst.msk [vmem:[#allocation6 + $0x88] sm:$0xff] %vm6919_vm11, %v6858_v12  ;;  %6938 = vst.msk [vmem:[#allocation6 + $0x90] sm:$0xff] %vm6919_vm11, %v6860_v24  ;;  %v7351_v12 = vld [vmem:[#allocation5 + $0xf2] sm:$0xff]  ;;  %v7352_v24 = vld [vmem:[#allocation5 + $0xfa] sm:$0xff] }
 0x99d   : > { %7793 = vrot.lane.b32.xlu1 %v13237_v21, %s10139_s14  ;;  %7795 = vrot.lane.b32.xlu0 %v13245_v11, %s10139_s14  ;;  %v7152_v21 = vld [vmem:[#allocation5 + $0xa9] sm:$0xff]  ;;  %v7153_v11 = vld [vmem:[#allocation5 + $0xb1] sm:$0xff] }
 0x99f   : > { %v6862_v57 = vpop.permute.xlu1 %6861  ;;  %v6864_v0 = vpop.permute.xlu0 %6863 }
 0x9a0   : > { %6939 = vst.msk [vmem:[#allocation6 + $0x98] sm:$0xff] %vm6919_vm11, %v6862_v57  ;;  %6940 = vst.msk [vmem:[#allocation6 + $0xa0] sm:$0xff] %vm6919_vm11, %v6864_v0 }
 0x9a1   : > { %7218 = vrot.lane.b32.xlu1 %v7150_v27, %s10136_s26  ;;  %7220 = vrot.lane.b32.xlu0 %v7151_v15, %s10136_s26  ;;  %v7353_v27 = vld [vmem:[#allocation5 + $0x10a] sm:$0xff]  ;;  %v7354_v15 = vld [vmem:[#allocation5 + $0x112] sm:$0xff] }
 0x9a3   : > { %v6866_v20 = vpop.permute.xlu1 %6865  ;;  %v6868_v30 = vpop.permute.xlu0 %6867 }
 0x9a4   : > { %6941 = vst.msk [vmem:[#allocation6 + $0xa8] sm:$0xff] %vm6919_vm11, %v6866_v20  ;;  %6942 = vst.msk [vmem:[#allocation6 + $0xb0] sm:$0xff] %vm6919_vm11, %v6868_v30 }
 0x9a5   : > { %7222 = vrot.lane.b32.xlu1 %v7152_v21, %s10136_s26  ;;  %7224 = vrot.lane.b32.xlu0 %v7153_v11, %s10136_s26  ;;  %v7544_v21 = vld [vmem:[#allocation5 + $0xf3] sm:$0xff]  ;;  %v7545_v11 = vld [vmem:[#allocation5 + $0xfb] sm:$0xff] }
 0x9a7   : > { %v6870_v49 = vpop.permute.xlu1 %6869  ;;  %v6872_v33 = vpop.permute.xlu0 %6871 }
 0x9a8   : > { %6943 = vst.msk [vmem:[#allocation6 + $0xb8] sm:$0xff] %vm6919_vm11, %v6870_v49  ;;  %6944 = vst.msk [vmem:[#allocation6 + $0xc0] sm:$0xff] %vm6919_vm11, %v6872_v33 }
 0x9a9   : > { %7411 = vrot.lane.b32.xlu1 %v7343_v45, %s10137_s21  ;;  %7413 = vrot.lane.b32.xlu0 %v7344_v35, %s10137_s21  ;;  %v7546_v45 = vld [vmem:[#allocation5 + $0x10b] sm:$0xff]  ;;  %v7547_v35 = vld [vmem:[#allocation5 + $0x113] sm:$0xff] }
 0x9ab   : > { %v6874_v2 = vpop.permute.xlu1 %6873  ;;  %v6876_v5 = vpop.permute.xlu0 %6875 }
 0x9ac   : > { %6945 = vst.msk [vmem:[#allocation6 + $0xc8] sm:$0xff] %vm6919_vm11, %v6874_v2  ;;  %6946 = vst.msk [vmem:[#allocation6 + $0xd0] sm:$0xff] %vm6919_vm11, %v6876_v5 }
 0x9ad   : > { %7415 = vrot.lane.b32.xlu1 %v7345_v51, %s10137_s21  ;;  %7417 = vrot.lane.b32.xlu0 %v7346_v18, %s10137_s21 }
 0x9af   : > { %v6878_v62 = vpop.permute.xlu1 %6877  ;;  %v6880_v32 = vpop.permute.xlu0 %6879 }
 0x9b0   : > { %6947 = vst.msk [vmem:[#allocation6 + $0xd8] sm:$0xff] %vm6919_vm11, %v6878_v62  ;;  %6948 = vst.msk [vmem:[#allocation6 + $0xe0] sm:$0xff] %vm6919_vm11, %v6880_v32 }
 0x9b1   : > { %7604 = vrot.lane.b32.xlu1 %v13147_v61, %s10138_s16  ;;  %7606 = vrot.lane.b32.xlu0 %v13155_v4, %s10138_s16 }
 0x9b3   : > { %v6882_v44 = vpop.permute.xlu1 %6881  ;;  %v6884_v39 = vpop.permute.xlu0 %6883 }
 0x9b4   : > { %6949 = vst.msk [vmem:[#allocation6 + $0xe8] sm:$0xff] %vm6919_vm11, %v6882_v44  ;;  %6950 = vst.msk [vmem:[#allocation6 + $0xf0] sm:$0xff] %vm6919_vm11, %v6884_v39 }
 0x9b5   : > { %7608 = vrot.lane.b32.xlu1 %v13157_v58, %s10138_s16  ;;  %7610 = vrot.lane.b32.xlu0 %v13165_v38, %s10138_s16 }
 0x9b7   : > { %v6886_v9 = vpop.permute.xlu1 %6885  ;;  %v7018_v52 = vpop.permute.xlu0 %7017 }
 0x9b8   : > { %6951 = vst.msk [vmem:[#allocation6 + $0xf8] sm:$0xff] %vm6919_vm11, %v6886_v9 }
 0x9b9   : > { %7114 = vst.msk [vmem:[#allocation6] sm:$0xff] %vm7113_vm12, %v7018_v52  ;;  %7797 = vrot.lane.b32.xlu1 %v13247_v56, %s10139_s14  ;;  %7799 = vrot.lane.b32.xlu0 %v13255_v1, %s10139_s14  ;;  %v7154_v56 = vld [vmem:[#allocation5 + $0xc1] sm:$0xff]  ;;  %v7155_v1 = vld [vmem:[#allocation5 + $0xc9] sm:$0xff] }
 0x9bb   : > { %v7020_v61 = vpop.permute.xlu1 %7019  ;;  %v7022_v4 = vpop.permute.xlu0 %7021 }
 0x9bc   : > { %7115 = vst.msk [vmem:[#allocation6 + $0x8] sm:$0xff] %vm7113_vm12, %v7020_v61  ;;  %7116 = vst.msk [vmem:[#allocation6 + $0x10] sm:$0xff] %vm7113_vm12, %v7022_v4  ;;  %v7355_v61 = vld [vmem:[#allocation5 + $0x122] sm:$0xff]  ;;  %v7356_v4 = vld [vmem:[#allocation5 + $0x12a] sm:$0xff] }
 0x9bd   : > { %7801 = vrot.lane.b32.xlu1 %v13257_v34, %s10139_s14  ;;  %7803 = vrot.lane.b32.xlu0 %v13265_v28, %s10139_s14  ;;  %v7156_v34 = vld [vmem:[#allocation5 + $0xd9] sm:$0xff]  ;;  %v7157_v28 = vld [vmem:[#allocation5 + $0xe1] sm:$0xff] }
 0x9bf   : > { %v7024_v58 = vpop.permute.xlu1 %7023  ;;  %v7026_v38 = vpop.permute.xlu0 %7025 }
 0x9c0   : > { %7117 = vst.msk [vmem:[#allocation6 + $0x18] sm:$0xff] %vm7113_vm12, %v7024_v58  ;;  %7118 = vst.msk [vmem:[#allocation6 + $0x20] sm:$0xff] %vm7113_vm12, %v7026_v38 }
 0x9c1   : > { %7226 = vrot.lane.b32.xlu1 %v7154_v56, %s10136_s26  ;;  %7228 = vrot.lane.b32.xlu0 %v7155_v1, %s10136_s26  ;;  %v7357_v56 = vld [vmem:[#allocation5 + $0x13a] sm:$0xff]  ;;  %v7358_v1 = vld [vmem:[#allocation5 + $0x142] sm:$0xff] }
 0x9c3   : > { %v7028_v29 = vpop.permute.xlu1 %7027  ;;  %v7030_v47 = vpop.permute.xlu0 %7029 }
 0x9c4   : > { %7119 = vst.msk [vmem:[#allocation6 + $0x28] sm:$0xff] %vm7113_vm12, %v7028_v29  ;;  %7120 = vst.msk [vmem:[#allocation6 + $0x30] sm:$0xff] %vm7113_vm12, %v7030_v47 }
 0x9c5   : > { %7230 = vrot.lane.b32.xlu1 %v7156_v34, %s10136_s26  ;;  %7232 = vrot.lane.b32.xlu0 %v7157_v28, %s10136_s26  ;;  %v7548_v34 = vld [vmem:[#allocation5 + $0x123] sm:$0xff]  ;;  %v7549_v28 = vld [vmem:[#allocation5 + $0x12b] sm:$0xff] }
 0x9c7   : > { %v7032_v16 = vpop.permute.xlu1 %7031  ;;  %v7034_v63 = vpop.permute.xlu0 %7033 }
 0x9c8   : > { %7121 = vst.msk [vmem:[#allocation6 + $0x38] sm:$0xff] %vm7113_vm12, %v7032_v16  ;;  %7122 = vst.msk [vmem:[#allocation6 + $0x40] sm:$0xff] %vm7113_vm12, %v7034_v63 }
 0x9c9   : > { %7419 = vrot.lane.b32.xlu1 %v7347_v54, %s10137_s21  ;;  %7421 = vrot.lane.b32.xlu0 %v7348_v19, %s10137_s21 }
 0x9cb   : > { %v7036_v55 = vpop.permute.xlu1 %7035  ;;  %v7038_v14 = vpop.permute.xlu0 %7037 }
 0x9cc   : > { %7123 = vst.msk [vmem:[#allocation6 + $0x48] sm:$0xff] %vm7113_vm12, %v7036_v55  ;;  %7124 = vst.msk [vmem:[#allocation6 + $0x50] sm:$0xff] %vm7113_vm12, %v7038_v14  ;;  %v7550_v55 = vld [vmem:[#allocation5 + $0x13b] sm:$0xff]  ;;  %v7551_v14 = vld [vmem:[#allocation5 + $0x143] sm:$0xff] }
 0x9cd   : > { %7423 = vrot.lane.b32.xlu1 %v7349_v46, %s10137_s21  ;;  %7425 = vrot.lane.b32.xlu0 %v7350_v59, %s10137_s21 }
 0x9cf   : > { %v7040_v7 = vpop.permute.xlu1 %7039  ;;  %v7042_v36 = vpop.permute.xlu0 %7041 }
 0x9d0   : > { %7125 = vst.msk [vmem:[#allocation6 + $0x58] sm:$0xff] %vm7113_vm12, %v7040_v7  ;;  %7126 = vst.msk [vmem:[#allocation6 + $0x60] sm:$0xff] %vm7113_vm12, %v7042_v36 }
 0x9d1   : > { %7612 = vrot.lane.b32.xlu1 %v13167_v25, %s10138_s16  ;;  %7614 = vrot.lane.b32.xlu0 %v13175_v8, %s10138_s16 }
 0x9d3   : > { %v7044_v13 = vpop.permute.xlu1 %7043  ;;  %v7046_v60 = vpop.permute.xlu0 %7045 }
 0x9d4   : > { %7127 = vst.msk [vmem:[#allocation6 + $0x68] sm:$0xff] %vm7113_vm12, %v7044_v13  ;;  %7128 = vst.msk [vmem:[#allocation6 + $0x70] sm:$0xff] %vm7113_vm12, %v7046_v60  ;;  %v7741_v60 = vld [vmem:[#allocation5 + $0x124] sm:$0xff] }
 0x9d5   : > { %7616 = vrot.lane.b32.xlu1 %v13177_v50, %s10138_s16  ;;  %7618 = vrot.lane.b32.xlu0 %v13185_v42, %s10138_s16 }
 0x9d7   : > { %v7048_v3 = vpop.permute.xlu1 %7047  ;;  %v7050_v23 = vpop.permute.xlu0 %7049 }
 0x9d8   : > { %7129 = vst.msk [vmem:[#allocation6 + $0x78] sm:$0xff] %vm7113_vm12, %v7048_v3  ;;  %7130 = vst.msk [vmem:[#allocation6 + $0x80] sm:$0xff] %vm7113_vm12, %v7050_v23  ;;  %v7742_v3 = vld [vmem:[#allocation5 + $0x12c] sm:$0xff] }
 0x9d9   : > { %7805 = vrot.lane.b32.xlu1 %v13267_v26, %s10139_s14  ;;  %7807 = vrot.lane.b32.xlu0 %v13275_v41, %s10139_s14  ;;  %v7158_v26 = vld [vmem:[#allocation5 + $0xf1] sm:$0xff]  ;;  %v7159_v41 = vld [vmem:[#allocation5 + $0xf9] sm:$0xff] }
 0x9db   : > { %v7052_v25 = vpop.permute.xlu1 %7051  ;;  %v7054_v8 = vpop.permute.xlu0 %7053 }
 0x9dc   : > { %7131 = vst.msk [vmem:[#allocation6 + $0x88] sm:$0xff] %vm7113_vm12, %v7052_v25  ;;  %7132 = vst.msk [vmem:[#allocation6 + $0x90] sm:$0xff] %vm7113_vm12, %v7054_v8 }
 0x9dd   : > { %7809 = vrot.lane.b32.xlu1 %v13277_v31, %s10139_s14  ;;  %7811 = vrot.lane.b32.xlu0 %v13285_v37, %s10139_s14  ;;  %v7160_v31 = vld [vmem:[#allocation5 + $0x109] sm:$0xff]  ;;  %v7161_v37 = vld [vmem:[#allocation5 + $0x111] sm:$0xff] }
 0x9df   : > { %v7056_v50 = vpop.permute.xlu1 %7055  ;;  %v7058_v42 = vpop.permute.xlu0 %7057 }
 0x9e0   : > { %7133 = vst.msk [vmem:[#allocation6 + $0x98] sm:$0xff] %vm7113_vm12, %v7056_v50  ;;  %7134 = vst.msk [vmem:[#allocation6 + $0xa0] sm:$0xff] %vm7113_vm12, %v7058_v42  ;;  %v7743_v50 = vld [vmem:[#allocation5 + $0x13c] sm:$0xff]  ;;  %v7744_v42 = vld [vmem:[#allocation5 + $0x144] sm:$0xff] }
 0x9e1   : > { %7234 = vrot.lane.b32.xlu1 %v7158_v26, %s10136_s26  ;;  %7236 = vrot.lane.b32.xlu0 %v7159_v41, %s10136_s26 }
 0x9e3   : > { %v7060_v48 = vpop.permute.xlu1 %7059  ;;  %v7062_v40 = vpop.permute.xlu0 %7061 }
 0x9e4   : > { %7135 = vst.msk [vmem:[#allocation6 + $0xa8] sm:$0xff] %vm7113_vm12, %v7060_v48  ;;  %7136 = vst.msk [vmem:[#allocation6 + $0xb0] sm:$0xff] %vm7113_vm12, %v7062_v40  ;;  %v7166_v48 = vld [vmem:[#allocation5 + $0x151] sm:$0xff]  ;;  %v7167_v40 = vld [vmem:[#allocation5 + $0x159] sm:$0xff] }
 0x9e5   : > { %7238 = vrot.lane.b32.xlu1 %v7160_v31, %s10136_s26  ;;  %7240 = vrot.lane.b32.xlu0 %v7161_v37, %s10136_s26 }
 0x9e7   : > { %v7064_v6 = vpop.permute.xlu1 %7063  ;;  %v7066_v17 = vpop.permute.xlu0 %7065 }
 0x9e8   : > { %7137 = vst.msk [vmem:[#allocation6 + $0xb8] sm:$0xff] %vm7113_vm12, %v7064_v6  ;;  %7138 = vst.msk [vmem:[#allocation6 + $0xc0] sm:$0xff] %vm7113_vm12, %v7066_v17  ;;  %v7168_v6 = vld [vmem:[#allocation5 + $0x169] sm:$0xff]  ;;  %v7169_v17 = vld [vmem:[#allocation5 + $0x171] sm:$0xff] }
 0x9e9   : > { %7427 = vrot.lane.b32.xlu1 %v7351_v12, %s10137_s21  ;;  %7429 = vrot.lane.b32.xlu0 %v7352_v24, %s10137_s21 }
 0x9eb   : > { %v7068_v57 = vpop.permute.xlu1 %7067  ;;  %v7070_v0 = vpop.permute.xlu0 %7069 }
 0x9ec   : > { %7139 = vst.msk [vmem:[#allocation6 + $0xc8] sm:$0xff] %vm7113_vm12, %v7068_v57  ;;  %7140 = vst.msk [vmem:[#allocation6 + $0xd0] sm:$0xff] %vm7113_vm12, %v7070_v0  ;;  %v7359_v57 = vld [vmem:[#allocation5 + $0x152] sm:$0xff]  ;;  %v7360_v0 = vld [vmem:[#allocation5 + $0x15a] sm:$0xff] }
 0x9ed   : > { %7431 = vrot.lane.b32.xlu1 %v7353_v27, %s10137_s21  ;;  %7433 = vrot.lane.b32.xlu0 %v7354_v15, %s10137_s21 }
 0x9ef   : > { %v7072_v20 = vpop.permute.xlu1 %7071  ;;  %v7074_v30 = vpop.permute.xlu0 %7073 }
 0x9f0   : > { %7141 = vst.msk [vmem:[#allocation6 + $0xd8] sm:$0xff] %vm7113_vm12, %v7072_v20  ;;  %7142 = vst.msk [vmem:[#allocation6 + $0xe0] sm:$0xff] %vm7113_vm12, %v7074_v30  ;;  %v7361_v20 = vld [vmem:[#allocation5 + $0x16a] sm:$0xff]  ;;  %v7362_v30 = vld [vmem:[#allocation5 + $0x172] sm:$0xff] }
 0x9f1   : > { %7620 = vrot.lane.b32.xlu1 %v7544_v21, %s10138_s16  ;;  %7622 = vrot.lane.b32.xlu0 %v7545_v11, %s10138_s16 }
 0x9f3   : > { %v7211_v49 = vpop.permute.xlu1 %7210  ;;  %v7213_v33 = vpop.permute.xlu0 %7212 }
 0x9f4   : > { %7307 = vst.msk [vmem:[#allocation6] sm:$0xff] %vm7306_vm13, %v7211_v49  ;;  %7308 = vst.msk [vmem:[#allocation6 + $0x8] sm:$0xff] %vm7306_vm13, %v7213_v33  ;;  %v7552_v49 = vld [vmem:[#allocation5 + $0x153] sm:$0xff]  ;;  %v7553_v33 = vld [vmem:[#allocation5 + $0x15b] sm:$0xff] }
 0x9f5   : > { %7624 = vrot.lane.b32.xlu1 %v7546_v45, %s10138_s16  ;;  %7626 = vrot.lane.b32.xlu0 %v7547_v35, %s10138_s16 }
 0x9f7   : > { %v7215_v2 = vpop.permute.xlu1 %7214  ;;  %v7217_v5 = vpop.permute.xlu0 %7216 }
 0x9f8   : > { %7309 = vst.msk [vmem:[#allocation6 + $0x10] sm:$0xff] %vm7306_vm13, %v7215_v2  ;;  %7310 = vst.msk [vmem:[#allocation6 + $0x18] sm:$0xff] %vm7306_vm13, %v7217_v5 }
 0x9f9   : > { %7813 = vrot.lane.b32.xlu1 %v13287_v53, %s10139_s14  ;;  %7815 = vrot.lane.b32.xlu0 %v13295_v10, %s10139_s14  ;;  %v7162_v53 = vld [vmem:[#allocation5 + $0x121] sm:$0xff]  ;;  %v7163_v10 = vld [vmem:[#allocation5 + $0x129] sm:$0xff] }
 0x9fb   : > { %v7404_v51 = vpop.permute.xlu1 %7403  ;;  %v7406_v18 = vpop.permute.xlu0 %7405 }
 0x9fc   : > { %7500 = vst.msk [vmem:[#allocation6] sm:$0xff] %vm7499_vm14, %v7404_v51  ;;  %7501 = vst.msk [vmem:[#allocation6 + $0x8] sm:$0xff] %vm7499_vm14, %v7406_v18  ;;  %v7554_v51 = vld [vmem:[#allocation5 + $0x16b] sm:$0xff]  ;;  %v7555_v18 = vld [vmem:[#allocation5 + $0x173] sm:$0xff] }
 0x9fd   : > { %7817 = vrot.lane.b32.xlu1 %v13297_v43, %s10139_s14  ;;  %7819 = vrot.lane.b32.xlu0 %v13305_v22, %s10139_s14  ;;  %v7164_v43 = vld [vmem:[#allocation5 + $0x139] sm:$0xff]  ;;  %v7165_v22 = vld [vmem:[#allocation5 + $0x141] sm:$0xff] }
 0x9ff   : > { %v7408_v62 = vpop.permute.xlu1 %7407  ;;  %v7410_v32 = vpop.permute.xlu0 %7409 }
 0xa00   : > { %7502 = vst.msk [vmem:[#allocation6 + $0x10] sm:$0xff] %vm7499_vm14, %v7408_v62  ;;  %7503 = vst.msk [vmem:[#allocation6 + $0x18] sm:$0xff] %vm7499_vm14, %v7410_v32 }
 0xa01   : > { %7242 = vrot.lane.b32.xlu1 %v7162_v53, %s10136_s26  ;;  %7244 = vrot.lane.b32.xlu0 %v7163_v10, %s10136_s26 }
 0xa03   : > { %v7597_v44 = vpop.permute.xlu1 %7596  ;;  %v7599_v39 = vpop.permute.xlu0 %7598 }
 0xa04   : > { %7693 = vst.msk [vmem:[#allocation6] sm:$0xff] %vm7692_vm15, %v7597_v44  ;;  %7694 = vst.msk [vmem:[#allocation6 + $0x8] sm:$0xff] %vm7692_vm15, %v7599_v39  ;;  %v7745_v39 = vld [vmem:[#allocation5 + $0x154] sm:$0xff] }
 0xa05   : > { %7246 = vrot.lane.b32.xlu1 %v7164_v43, %s10136_s26  ;;  %7248 = vrot.lane.b32.xlu0 %v7165_v22, %s10136_s26  ;;  %v7746_v43 = vld [vmem:[#allocation5 + $0x15c] sm:$0xff] }
 0xa07   : > { %v7601_v9 = vpop.permute.xlu1 %7600  ;;  %v7603_v52 = vpop.permute.xlu0 %7602 }
 0xa08   : > { %7695 = vst.msk [vmem:[#allocation6 + $0x10] sm:$0xff] %vm7692_vm15, %v7601_v9  ;;  %7696 = vst.msk [vmem:[#allocation6 + $0x18] sm:$0xff] %vm7692_vm15, %v7603_v52 }
 0xa09   : > { %7435 = vrot.lane.b32.xlu1 %v7355_v61, %s10137_s21  ;;  %7437 = vrot.lane.b32.xlu0 %v7356_v4, %s10137_s21  ;;  %v7747_v61 = vld [vmem:[#allocation5 + $0x16c] sm:$0xff]  ;;  %v7748_v4 = vld [vmem:[#allocation5 + $0x174] sm:$0xff] }
 0xa0b   : > { %v7790_v58 = vpop.permute.xlu1 %7789  ;;  %v7792_v38 = vpop.permute.xlu0 %7791 }
 0xa0c   : > { %7886 = vst.msk [vmem:[#allocation6] sm:$0xff] %vm7885_vm1, %v7790_v58  ;;  %7887 = vst.msk [vmem:[#allocation6 + $0x8] sm:$0xff] %vm7885_vm1, %v7792_v38 }
 0xa0d   : > { %7439 = vrot.lane.b32.xlu1 %v7357_v56, %s10137_s21  ;;  %7441 = vrot.lane.b32.xlu0 %v7358_v1, %s10137_s21  ;;  %v7170_v56 = vld [vmem:[#allocation5 + $0x181] sm:$0xff]  ;;  %v7171_v1 = vld [vmem:[#allocation5 + $0x189] sm:$0xff] }
 0xa0f   : > { %v7794_v29 = vpop.permute.xlu1 %7793  ;;  %v7796_v47 = vpop.permute.xlu0 %7795 }
 0xa10   : > { %7888 = vst.msk [vmem:[#allocation6 + $0x10] sm:$0xff] %vm7885_vm1, %v7794_v29  ;;  %7889 = vst.msk [vmem:[#allocation6 + $0x18] sm:$0xff] %vm7885_vm1, %v7796_v47 }
 0xa11   : > { %7628 = vrot.lane.b32.xlu1 %v7548_v34, %s10138_s16  ;;  %7630 = vrot.lane.b32.xlu0 %v7549_v28, %s10138_s16  ;;  %v7172_v34 = vld [vmem:[#allocation5 + $0x199] sm:$0xff]  ;;  %v7173_v28 = vld [vmem:[#allocation5 + $0x1a1] sm:$0xff] }
 0xa13   : > { %v7219_v16 = vpop.permute.xlu1 %7218  ;;  %v7221_v63 = vpop.permute.xlu0 %7220  ;;  %v7918_v54 = vld [vmem:[#allocation6] sm:$0xff]  ;;  %v7919_v19 = vld [vmem:[#allocation6 + $0x8] sm:$0xff] }
 0xa14   : > { %7311 = vst.msk [vmem:[#allocation6 + $0x20] sm:$0xff] %vm7306_vm13, %v7219_v16  ;;  %7312 = vst.msk [vmem:[#allocation6 + $0x28] sm:$0xff] %vm7306_vm13, %v7221_v63  ;;  %v7950_v46 = vpack.c.bf16 %v7919_v19, %v7918_v54  ;;  %v7363_v54 = vld [vmem:[#allocation5 + $0x182] sm:$0xff]  ;;  %v7364_v19 = vld [vmem:[#allocation5 + $0x18a] sm:$0xff] }
 0xa15   : > { %7632 = vrot.lane.b32.xlu1 %v7550_v55, %s10138_s16  ;;  %7634 = vrot.lane.b32.xlu0 %v7551_v14, %s10138_s16  ;;  %v9111_v55 = vld [vmem:[%s14319_s3] sm:$0x3] }
 0xa16   : > { %9870 = vmatprep.mubr.msk.bf16.mxu0 %vm8025_vm3, %v7950_v46  ;;  %v9168_v14 = vsel %vm501_vm0, %v9111_v55, 0  ;;  %9939 = vmatprep.subr.msk.bf16.mxu1 %vm501_vm0, %v9111_v55  ;;  %vm8398_vm0 = vcmask 195712  }
 0xa17   : > { %v7223_v59 = vpop.permute.xlu1 %7222  ;;  %v7225_v7 = vpop.permute.xlu0 %7224  ;;  %v7920_v36 = vld [vmem:[#allocation6 + $0x10] sm:$0xff]  ;;  %v7921_v13 = vld [vmem:[#allocation6 + $0x18] sm:$0xff]  ;;  %9903 = vmatpush3.bf16.msra.mxu1 %v9168_v14 }
 0xa18   : > { %7313 = vst.msk [vmem:[#allocation6 + $0x30] sm:$0xff] %vm7306_vm13, %v7223_v59  ;;  %7314 = vst.msk [vmem:[#allocation6 + $0x38] sm:$0xff] %vm7306_vm13, %v7225_v7  ;;  %v7951_v23 = vpack.c.bf16 %v7921_v13, %v7920_v36  ;;  %v7365_v7 = vld [vmem:[#allocation5 + $0x19a] sm:$0xff]  ;;  %v7366_v36 = vld [vmem:[#allocation5 + $0x1a2] sm:$0xff] }
 0xa19   : > { %7821 = vrot.lane.b32.xlu1 %v7741_v60, %s10139_s14  ;;  %7823 = vrot.lane.b32.xlu0 %v7742_v3, %s10139_s14  ;;  %v7556_v3 = vld [vmem:[#allocation5 + $0x183] sm:$0xff] }
 0xa1a   : > { %9871 = vmatmul.mubr.msk.bf16.vlgmr.msra.gmra.mxu0 %vm8025_vm3, %v7951_v23  ;;  %v7557_v23 = vld [vmem:[#allocation5 + $0x18b] sm:$0xff] }
 0xa1b   : > { %v7412_v25 = vpop.permute.xlu1 %7411  ;;  %v7414_v8 = vpop.permute.xlu0 %7413 }
 0xa1c   : > { %7504 = vst.msk [vmem:[#allocation6 + $0x20] sm:$0xff] %vm7499_vm14, %v7412_v25  ;;  %7505 = vst.msk [vmem:[#allocation6 + $0x28] sm:$0xff] %vm7499_vm14, %v7414_v8 }
 0xa1d   : > { %7825 = vrot.lane.b32.xlu1 %v7743_v50, %s10139_s14  ;;  %7827 = vrot.lane.b32.xlu0 %v7744_v42, %s10139_s14 }
 0xa1f   : > { %v7416_v26 = vpop.permute.xlu1 %7415  ;;  %v7418_v41 = vpop.permute.xlu0 %7417 }
 0xa20   : > { %7506 = vst.msk [vmem:[#allocation6 + $0x30] sm:$0xff] %vm7499_vm14, %v7416_v26  ;;  %7507 = vst.msk [vmem:[#allocation6 + $0x38] sm:$0xff] %vm7499_vm14, %v7418_v41  ;;  %v7558_v26 = vld [vmem:[#allocation5 + $0x19b] sm:$0xff]  ;;  %v7559_v41 = vld [vmem:[#allocation5 + $0x1a3] sm:$0xff] }
 0xa21   : > { %7250 = vrot.lane.b32.xlu1 %v7166_v48, %s10136_s26  ;;  %7252 = vrot.lane.b32.xlu0 %v7167_v40, %s10136_s26 }
 0xa23   : > { %v7605_v31 = vpop.permute.xlu1 %7604  ;;  %v7607_v37 = vpop.permute.xlu0 %7606 }
 0xa24   : > { %7697 = vst.msk [vmem:[#allocation6 + $0x20] sm:$0xff] %vm7692_vm15, %v7605_v31  ;;  %7698 = vst.msk [vmem:[#allocation6 + $0x28] sm:$0xff] %vm7692_vm15, %v7607_v37 }
 0xa25   : > { %7254 = vrot.lane.b32.xlu1 %v7168_v6, %s10136_s26  ;;  %7256 = vrot.lane.b32.xlu0 %v7169_v17, %s10136_s26  ;;  %v7749_v17 = vld [vmem:[#allocation5 + $0x184] sm:$0xff] }
 0xa27   : > { %v7609_v12 = vpop.permute.xlu1 %7608  ;;  %v7611_v24 = vpop.permute.xlu0 %7610 }
 0xa28   : > { %7699 = vst.msk [vmem:[#allocation6 + $0x30] sm:$0xff] %vm7692_vm15, %v7609_v12  ;;  %7700 = vst.msk [vmem:[#allocation6 + $0x38] sm:$0xff] %vm7692_vm15, %v7611_v24  ;;  %v7750_v12 = vld [vmem:[#allocation5 + $0x18c] sm:$0xff] }
 0xa29   : > { %7443 = vrot.lane.b32.xlu1 %v7359_v57, %s10137_s21  ;;  %7445 = vrot.lane.b32.xlu0 %v7360_v0, %s10137_s21 }
 0xa2b   : > { %v7798_v27 = vpop.permute.xlu1 %7797  ;;  %v7800_v15 = vpop.permute.xlu0 %7799 }
 0xa2c   : > { %7890 = vst.msk [vmem:[#allocation6 + $0x20] sm:$0xff] %vm7885_vm1, %v7798_v27  ;;  %7891 = vst.msk [vmem:[#allocation6 + $0x28] sm:$0xff] %vm7885_vm1, %v7800_v15  ;;  %v7751_v27 = vld [vmem:[#allocation5 + $0x19c] sm:$0xff]  ;;  %v7752_v15 = vld [vmem:[#allocation5 + $0x1a4] sm:$0xff] }
 0xa2d   : > { %7447 = vrot.lane.b32.xlu1 %v7361_v20, %s10137_s21  ;;  %7449 = vrot.lane.b32.xlu0 %v7362_v30, %s10137_s21  ;;  %v6982_v20 = vld [vmem:[#allocation5 + $0x1b8] sm:$0xff]  ;;  %v6983_v30 = vld [vmem:[#allocation5 + $0x1c8] sm:$0xff] }
 0xa2f   : > { %v7802_v21 = vpop.permute.xlu1 %7801  ;;  %v7804_v11 = vpop.permute.xlu0 %7803 }
 0xa30   : > { %7892 = vst.msk [vmem:[#allocation6 + $0x30] sm:$0xff] %vm7885_vm1, %v7802_v21  ;;  %7893 = vst.msk [vmem:[#allocation6 + $0x38] sm:$0xff] %vm7885_vm1, %v7804_v11 }
 0xa31   : > { %7636 = vrot.lane.b32.xlu1 %v7552_v49, %s10138_s16  ;;  %7638 = vrot.lane.b32.xlu0 %v7553_v33, %s10138_s16  ;;  %v6984_v49 = vld [vmem:[#allocation5 + $0x1d0] sm:$0xff] }
 0xa32   : > { %v7174_v33 = vld [vmem:[#allocation5 + $0x1b1] sm:$0xff] }
 0xa33   : > { %v7227_v45 = vpop.permute.xlu1 %7226  ;;  %v7229_v35 = vpop.permute.xlu0 %7228  ;;  %v7922_v2 = vld [vmem:[#allocation6 + $0x20] sm:$0xff]  ;;  %v7923_v5 = vld [vmem:[#allocation6 + $0x28] sm:$0xff] }
 0xa34   : > { %7315 = vst.msk [vmem:[#allocation6 + $0x40] sm:$0xff] %vm7306_vm13, %v7227_v45  ;;  %7316 = vst.msk [vmem:[#allocation6 + $0x48] sm:$0xff] %vm7306_vm13, %v7229_v35  ;;  %v7952_v62 = vpack.c.bf16 %v7923_v5, %v7922_v2  ;;  %v7175_v2 = vld [vmem:[#allocation5 + $0x1b9] sm:$0xff]  ;;  %v7176_v5 = vld [vmem:[#allocation5 + $0x1c9] sm:$0xff] }
 0xa35   : > { %7640 = vrot.lane.b32.xlu1 %v7554_v51, %s10138_s16  ;;  %7642 = vrot.lane.b32.xlu0 %v7555_v18, %s10138_s16 }
 0xa36   : > { %9874 = vmatprep.mubr.msk.bf16.mxu0 %vm8025_vm3, %v7952_v62  ;;  %v7177_v62 = vld [vmem:[#allocation5 + $0x1d1] sm:$0xff] }
 0xa37   : > { %v7231_v32 = vpop.permute.xlu1 %7230  ;;  %v7233_v53 = vpop.permute.xlu0 %7232  ;;  %v7924_v10 = vld [vmem:[#allocation6 + $0x30] sm:$0xff]  ;;  %v7925_v44 = vld [vmem:[#allocation6 + $0x38] sm:$0xff] }
 0xa38   : > { %7317 = vst.msk [vmem:[#allocation6 + $0x50] sm:$0xff] %vm7306_vm13, %v7231_v32  ;;  %7318 = vst.msk [vmem:[#allocation6 + $0x58] sm:$0xff] %vm7306_vm13, %v7233_v53  ;;  %v7953_v22 = vpack.c.bf16 %v7925_v44, %v7924_v10  ;;  %v7367_v32 = vld [vmem:[#allocation5 + $0x1b2] sm:$0xff]  ;;  %v7368_v44 = vld [vmem:[#allocation5 + $0x1ba] sm:$0xff] }
 0xa39   : > { %7829 = vrot.lane.b32.xlu1 %v7745_v39, %s10139_s14  ;;  %7831 = vrot.lane.b32.xlu0 %v7746_v43, %s10139_s14  ;;  %v7369_v39 = vld [vmem:[#allocation5 + $0x1ca] sm:$0xff] }
 0xa3a   : > { %9875 = vmatmul.mubr.msk.bf16.gmra.mxu0 %vm8025_vm3, %v7953_v22 }
 0xa3b   : > { %v7420_v9 = vpop.permute.xlu1 %7419  ;;  %v7422_v52 = vpop.permute.xlu0 %7421 }
 0xa3c   : > { %7508 = vst.msk [vmem:[#allocation6 + $0x40] sm:$0xff] %vm7499_vm14, %v7420_v9  ;;  %7509 = vst.msk [vmem:[#allocation6 + $0x48] sm:$0xff] %vm7499_vm14, %v7422_v52  ;;  %v7370_v9 = vld [vmem:[#allocation5 + $0x1d2] sm:$0xff] }
 0xa3d   : > { %7833 = vrot.lane.b32.xlu1 %v7747_v61, %s10139_s14  ;;  %7835 = vrot.lane.b32.xlu0 %v7748_v4, %s10139_s14  ;;  %v7560_v52 = vld [vmem:[#allocation5 + $0x1b3] sm:$0xff] }
 0xa3f   : > { %v7424_v58 = vpop.permute.xlu1 %7423  ;;  %v7426_v38 = vpop.permute.xlu0 %7425 }
 0xa40   : > { %7510 = vst.msk [vmem:[#allocation6 + $0x50] sm:$0xff] %vm7499_vm14, %v7424_v58  ;;  %7511 = vst.msk [vmem:[#allocation6 + $0x58] sm:$0xff] %vm7499_vm14, %v7426_v38 }
 0xa41   : > { %7258 = vrot.lane.b32.xlu1 %v7170_v56, %s10136_s26  ;;  %7260 = vrot.lane.b32.xlu0 %v7171_v1, %s10136_s26  ;;  %v7561_v1 = vld [vmem:[#allocation5 + $0x1bb] sm:$0xff] }
 0xa43   : > { %v7613_v29 = vpop.permute.xlu1 %7612  ;;  %v7615_v47 = vpop.permute.xlu0 %7614 }
 0xa44   : > { %7701 = vst.msk [vmem:[#allocation6 + $0x40] sm:$0xff] %vm7692_vm15, %v7613_v29  ;;  %7702 = vst.msk [vmem:[#allocation6 + $0x48] sm:$0xff] %vm7692_vm15, %v7615_v47  ;;  %v7562_v29 = vld [vmem:[#allocation5 + $0x1cb] sm:$0xff] }
 0xa45   : > { %7262 = vrot.lane.b32.xlu1 %v7172_v34, %s10136_s26  ;;  %7264 = vrot.lane.b32.xlu0 %v7173_v28, %s10136_s26 }
 0xa47   : > { %v7617_v16 = vpop.permute.xlu1 %7616  ;;  %v7619_v63 = vpop.permute.xlu0 %7618 }
 0xa48   : > { %7703 = vst.msk [vmem:[#allocation6 + $0x50] sm:$0xff] %vm7692_vm15, %v7617_v16  ;;  %7704 = vst.msk [vmem:[#allocation6 + $0x58] sm:$0xff] %vm7692_vm15, %v7619_v63 }
 0xa49   : > { %7451 = vrot.lane.b32.xlu1 %v7363_v54, %s10137_s21  ;;  %7453 = vrot.lane.b32.xlu0 %v7364_v19, %s10137_s21  ;;  %v7563_v54 = vld [vmem:[#allocation5 + $0x1d3] sm:$0xff] }
 0xa4a   : > { %v7753_v19 = vld [vmem:[#allocation5 + $0x1b4] sm:$0xff] }
 0xa4b   : > { %v7806_v46 = vpop.permute.xlu1 %7805  ;;  %v7808_v59 = vpop.permute.xlu0 %7807 }
 0xa4c   : > { %7894 = vst.msk [vmem:[#allocation6 + $0x40] sm:$0xff] %vm7885_vm1, %v7806_v46  ;;  %7895 = vst.msk [vmem:[#allocation6 + $0x48] sm:$0xff] %vm7885_vm1, %v7808_v59  ;;  %v7754_v46 = vld [vmem:[#allocation5 + $0x1bc] sm:$0xff]  ;;  %v7755_v59 = vld [vmem:[#allocation5 + $0x1cc] sm:$0xff] }
 0xa4d   : > { %7455 = vrot.lane.b32.xlu1 %v7365_v7, %s10137_s21  ;;  %7457 = vrot.lane.b32.xlu0 %v7366_v36, %s10137_s21 }
 0xa4f   : > { %v7810_v13 = vpop.permute.xlu1 %7809  ;;  %v7812_v60 = vpop.permute.xlu0 %7811 }
 0xa50   : > { %7896 = vst.msk [vmem:[#allocation6 + $0x50] sm:$0xff] %vm7885_vm1, %v7810_v13  ;;  %7897 = vst.msk [vmem:[#allocation6 + $0x58] sm:$0xff] %vm7885_vm1, %v7812_v60  ;;  %v7756_v13 = vld [vmem:[#allocation5 + $0x1d4] sm:$0xff] }
 0xa51   : > { %7644 = vrot.lane.b32.xlu1 %v7556_v3, %s10138_s16  ;;  %7646 = vrot.lane.b32.xlu0 %v7557_v23, %s10138_s16  ;;  %v8550_v23 = vld [vmem:[#allocation2 + $0x19] sm:$0xff] }
 0xa53   : > { %v7235_v25 = vpop.permute.xlu1 %7234  ;;  %v7237_v8 = vpop.permute.xlu0 %7236  ;;  %v7926_v50 = vld [vmem:[#allocation6 + $0x40] sm:$0xff]  ;;  %v7927_v42 = vld [vmem:[#allocation6 + $0x48] sm:$0xff] }
 0xa54   : > { %7319 = vst.msk [vmem:[#allocation6 + $0x60] sm:$0xff] %vm7306_vm13, %v7235_v25  ;;  %7320 = vst.msk [vmem:[#allocation6 + $0x68] sm:$0xff] %vm7306_vm13, %v7237_v8  ;;  %v7954_v48 = vpack.c.bf16 %v7927_v42, %v7926_v50  ;;  %v8551_v25 = vld [vmem:[#allocation2 + $0x21] sm:$0xff] }
 0xa55   : > { %7648 = vrot.lane.b32.xlu1 %v7558_v26, %s10138_s16  ;;  %7650 = vrot.lane.b32.xlu0 %v7559_v41, %s10138_s16  ;;  %v8582_v8 = vld [vmem:[#allocation2] sm:$0xff]  ;;  %v8583_v50 = vld [vmem:[#allocation2 + $0x8] sm:$0xff] }
 0xa56   : > { %9878 = vmatprep.mubr.msk.bf16.mxu0 %vm8025_vm3, %v7954_v48  ;;  %v8614_v42 = vmax.f32 %v8550_v23, %v8582_v8  ;;  %v8646_v26 = vld [vmem:[#allocation2 + $0x1] sm:$0xff]  ;;  %v8647_v41 = vld [vmem:[#allocation2 + $0x9] sm:$0xff]  ;;  %v8615_v48 = vmax.f32 %v8551_v25, %v8583_v50 }
 0xa57   : > { %v7239_v40 = vpop.permute.xlu1 %7238  ;;  %v7241_v31 = vpop.permute.xlu0 %7240  ;;  %v7928_v37 = vld [vmem:[#allocation6 + $0x50] sm:$0xff]  ;;  %v7929_v6 = vld [vmem:[#allocation6 + $0x58] sm:$0xff]  ;;  %v8908_v8 = vld [vmem:[#allocation2 + $0x68] sm:$0xff] }
 0xa58   : > { %7321 = vst.msk [vmem:[#allocation6 + $0x70] sm:$0xff] %vm7306_vm13, %v7239_v40  ;;  %7322 = vst.msk [vmem:[#allocation6 + $0x78] sm:$0xff] %vm7306_vm13, %v7241_v31  ;;  %v7955_v24 = vpack.c.bf16 %v7929_v6, %v7928_v37  ;;  %v8710_v40 = vld [vmem:[#allocation2 + $0x2] sm:$0xff]  ;;  %v8774_v31 = vld [vmem:[#allocation2 + $0x18] sm:$0xff]  ;;  %v8678_v37 = vmax.f32 %v8614_v42, %v8646_v26 }
 0xa59   : > { %7837 = vrot.lane.b32.xlu1 %v7749_v17, %s10139_s14  ;;  %7839 = vrot.lane.b32.xlu0 %v7750_v12, %s10139_s14  ;;  %v8711_v6 = vld [vmem:[#allocation2 + $0xa] sm:$0xff]  ;;  %v8775_v17 = vld [vmem:[#allocation2 + $0x20] sm:$0xff] }
 0xa5a   : > { %9879 = vmatmul.mubr.msk.bf16.gmra.mxu0 %vm8025_vm3, %v7955_v24 }
 0xa5b   : > { %v7428_v57 = vpop.permute.xlu1 %7427  ;;  %v7430_v0 = vpop.permute.xlu0 %7429 }
 0xa5c   : > { %7512 = vst.msk [vmem:[#allocation6 + $0x60] sm:$0xff] %vm7499_vm14, %v7428_v57  ;;  %7513 = vst.msk [vmem:[#allocation6 + $0x68] sm:$0xff] %vm7499_vm14, %v7430_v0  ;;  %v8679_v57 = vmax.f32 %v8615_v48, %v8647_v41  ;;  %v8903_v0 = vld [vmem:[#allocation2 + $0x30] sm:$0xff]  ;;  %v13753_v48 = vld [vmem:[#allocation2 + $0x62] sm:$0xff] }
 0xa5d   : > { %7841 = vrot.lane.b32.xlu1 %v7751_v27, %s10139_s14  ;;  %7843 = vrot.lane.b32.xlu0 %v7752_v15, %s10139_s14  ;;  %v13721_v27 = vld [vmem:[#allocation2 + $0x31] sm:$0xff]  ;;  %v8742_v15 = vmax.f32 %v8678_v37, %v8710_v40 }
 0xa5f   : > { %v7432_v21 = vpop.permute.xlu1 %7431  ;;  %v7434_v11 = vpop.permute.xlu0 %7433 }
 0xa60   : > { %7514 = vst.msk [vmem:[#allocation6 + $0x70] sm:$0xff] %vm7499_vm14, %v7432_v21  ;;  %7515 = vst.msk [vmem:[#allocation6 + $0x78] sm:$0xff] %vm7499_vm14, %v7434_v11  ;;  %v8616_v21 = vmax.f32 %v13721_v27, %v8774_v31  ;;  %v8743_v11 = vmax.f32 %v8679_v57, %v8711_v6 }
 0xa61   : > { %7075 = vrot.lane.b32.xlu1 %v6982_v20, %s10135_s17  ;;  %7077 = vrot.lane.b32.xlu0 %v6983_v30, %s10135_s17  ;;  %v8904_v20 = vld [vmem:[#allocation2 + $0x38] sm:$0xff] }
 0xa62   : > { %v13725_v30 = vld [vmem:[#allocation2 + $0x39] sm:$0xff] }
 0xa63   : > { %v7621_v45 = vpop.permute.xlu1 %7620  ;;  %v7623_v35 = vpop.permute.xlu0 %7622 }
 0xa64   : > { %7705 = vst.msk [vmem:[#allocation6 + $0x60] sm:$0xff] %vm7692_vm15, %v7621_v45  ;;  %7706 = vst.msk [vmem:[#allocation6 + $0x68] sm:$0xff] %vm7692_vm15, %v7623_v35  ;;  %v8905_v45 = vld [vmem:[#allocation2 + $0x48] sm:$0xff] }
 0xa65   : > { %7079 = vrot.lane.b32.xlu1 %v6984_v49, %s10135_s17  ;;  %7266 = vrot.lane.b32.xlu0 %v7174_v33, %s10136_s26  ;;  %v8838_v49 = vld [vmem:[#allocation2 + $0x1a] sm:$0xff]  ;;  %v8617_v33 = vmax.f32 %v13725_v30, %v8775_v17  ;;  %v13729_v35 = vld [vmem:[#allocation2 + $0x49] sm:$0xff] }
 0xa67   : > { %v7625_v51 = vpop.permute.xlu1 %7624  ;;  %v7627_v18 = vpop.permute.xlu0 %7626 }
 0xa68   : > { %7707 = vst.msk [vmem:[#allocation6 + $0x70] sm:$0xff] %vm7692_vm15, %v7625_v51  ;;  %7708 = vst.msk [vmem:[#allocation6 + $0x78] sm:$0xff] %vm7692_vm15, %v7627_v18  ;;  %v8680_v51 = vmax.f32 %v8616_v21, %v8550_v23  ;;  %v8906_v18 = vld [vmem:[#allocation2 + $0x50] sm:$0xff] }
 0xa69   : > { %7268 = vrot.lane.b32.xlu1 %v7175_v2, %s10136_s26  ;;  %7270 = vrot.lane.b32.xlu0 %v7176_v5, %s10136_s26  ;;  %v8806_v2 = vmax.f32 %v8742_v15, %v8774_v31  ;;  %v8839_v5 = vld [vmem:[#allocation2 + $0x22] sm:$0xff] }
 0xa6b   : > { %v7814_v53 = vpop.permute.xlu1 %7813  ;;  %v7816_v10 = vpop.permute.xlu0 %7815 }
 0xa6c   : > { %7898 = vst.msk [vmem:[#allocation6 + $0x60] sm:$0xff] %vm7885_vm1, %v7814_v53  ;;  %7899 = vst.msk [vmem:[#allocation6 + $0x68] sm:$0xff] %vm7885_vm1, %v7816_v10 }
 0xa6d   : > { %7272 = vrot.lane.b32.xlu1 %v7177_v62, %s10136_s26  ;;  %7459 = vrot.lane.b32.xlu0 %v7367_v32, %s10137_s21  ;;  %v13731_v62 = vld [vmem:[#allocation2 + $0x51] sm:$0xff]  ;;  %v8618_v32 = vmax.f32 %v13729_v35, %v8903_v0  ;;  %s10140_s26 = smov [#allocation7]  }
 0xa6f   : > { %v7818_v43 = vpop.permute.xlu1 %7817  ;;  %v7820_v22 = vpop.permute.xlu0 %7819 }
 0xa70   : > { %7900 = vst.msk [vmem:[#allocation6 + $0x70] sm:$0xff] %vm7885_vm1, %v7818_v43  ;;  %7901 = vst.msk [vmem:[#allocation6 + $0x78] sm:$0xff] %vm7885_vm1, %v7820_v22  ;;  %v8619_v43 = vmax.f32 %v13731_v62, %v8904_v20  ;;  %v13735_v22 = vld [vmem:[#allocation2 + $0x61] sm:$0xff] }
 0xa71   : > { %7461 = vrot.lane.b32.xlu1 %v7368_v44, %s10137_s21  ;;  %7463 = vrot.lane.b32.xlu0 %v7369_v39, %s10137_s21  ;;  %v8807_v44 = vmax.f32 %v8743_v11, %v8775_v17  ;;  %v8681_v39 = vmax.f32 %v8617_v33, %v8551_v25  ;;  %v13755_v17 = vld [vmem:[#allocation2 + $0x6a] sm:$0xff]  ;;  %v8973_v11 = vld [vmem:[#allocation2 + $0x79] sm:$0xff] }
 0xa73   : > { %v7243_v61 = vpop.permute.xlu1 %7242  ;;  %v7245_v4 = vpop.permute.xlu0 %7244  ;;  %v7930_v58 = vld [vmem:[#allocation6 + $0x60] sm:$0xff]  ;;  %v7931_v38 = vld [vmem:[#allocation6 + $0x68] sm:$0xff] }
 0xa74   : > { %7323 = vst.msk [vmem:[#allocation6 + $0x80] sm:$0xff] %vm7306_vm13, %v7243_v61  ;;  %7324 = vst.msk [vmem:[#allocation6 + $0x88] sm:$0xff] %vm7306_vm13, %v7245_v4  ;;  %v7956_v56 = vpack.c.bf16 %v7931_v38, %v7930_v58  ;;  %v8682_v61 = vmax.f32 %v8618_v32, %v13721_v27  ;;  %v13740_v4 = vld [vmem:[#allocation2 + $0x69] sm:$0xff]  ;;  %v8620_v58 = vmax.f32 %v13735_v22, %v8905_v45 }
 0xa75   : > { %7465 = vrot.lane.b32.xlu1 %v7370_v9, %s10137_s21  ;;  %7652 = vrot.lane.b32.xlu0 %v7560_v52, %s10138_s16  ;;  %v8870_v9 = vmax.f32 %v8806_v2, %v8838_v49  ;;  %v8744_v52 = vmax.f32 %v8680_v51, %v8838_v49  ;;  %v8871_v38 = vmax.f32 %v8807_v44, %v8839_v5  ;;  %s10054_s21 = sshll.u32 %s10140_s26, 4  ;;  %s10055_s21 = int_to_ptr.vmem [resolvable:$false] %s10054_s21 }
 0xa76   : > { %9882 = vmatprep.mubr.msk.bf16.mxu0 %vm8025_vm3, %v7956_v56  ;;  %v9031_v56 = vld [vmem:[#allocation2 + $0x32] sm:$0xff] }
 0xa77   : > { %v7247_v47 = vpop.permute.xlu1 %7246  ;;  %v7249_v34 = vpop.permute.xlu0 %7248  ;;  %v7932_v28 = vld [vmem:[#allocation6 + $0x70] sm:$0xff]  ;;  %v7933_v16 = vld [vmem:[#allocation6 + $0x78] sm:$0xff] }
 0xa78   : > { %7325 = vst.msk [vmem:[#allocation6 + $0x90] sm:$0xff] %vm7306_vm13, %v7247_v47  ;;  %7326 = vst.msk [vmem:[#allocation6 + $0x98] sm:$0xff] %vm7306_vm13, %v7249_v34  ;;  %v7957_v63 = vpack.c.bf16 %v7933_v16, %v7932_v28  ;;  %v8683_v47 = vmax.f32 %v8619_v43, %v13725_v30  ;;  %v8621_v34 = vmax.f32 %v13740_v4, %v8906_v18  ;;  %v9032_v16 = vld [vmem:[#allocation2 + $0x3a] sm:$0xff] }
 0xa79   : > { %7654 = vrot.lane.b32.xlu1 %v7561_v1, %s10138_s16  ;;  %7656 = vrot.lane.b32.xlu0 %v7562_v29, %s10138_s16  ;;  %v8745_v1 = vmax.f32 %v8681_v39, %v8839_v5  ;;  %v9033_v29 = vld [vmem:[#allocation2 + $0x4a] sm:$0xff]  ;;  %v8935_v28 = vmax.f32 %v8870_v9, %v8903_v0  ;;  %v8974_v5 = vld [vmem:[#allocation2 + $0x81] sm:$0xff] }
 0xa7a   : > { %9883 = vmatmul.mubr.msk.bf16.gmra.mxu0 %vm8025_vm3, %v7957_v63  ;;  %v8808_v63 = vmax.f32 %v8744_v52, %v8903_v0  ;;  %v8910_v43 = vld [vmem:[#allocation2 + $0x80] sm:$0xff]  ;;  %v13768_v52 = vld [vmem:[#allocation2 + $0x91] sm:$0xff] }
 0xa7b   : > { %v7436_v55 = vpop.permute.xlu1 %7435  ;;  %v7438_v14 = vpop.permute.xlu0 %7437 }
 0xa7c   : > { %7516 = vst.msk [vmem:[#allocation6 + $0x80] sm:$0xff] %vm7499_vm14, %v7436_v55  ;;  %7517 = vst.msk [vmem:[#allocation6 + $0x88] sm:$0xff] %vm7499_vm14, %v7438_v14  ;;  %v8684_v55 = vmax.f32 %v8620_v58, %v13729_v35  ;;  %v8872_v23 = vmax.f32 %v8808_v63, %v9031_v56 }
 0xa7d   : > { %7658 = vrot.lane.b32.xlu1 %v7563_v54, %s10138_s16  ;;  %7845 = vrot.lane.b32.xlu0 %v7753_v19, %s10139_s14  ;;  %v9034_v54 = vld [vmem:[#allocation2 + $0x52] sm:$0xff]  ;;  %v8746_v19 = vmax.f32 %v8682_v61, %v9031_v56  ;;  %s10056_s16 = scalar_lea.vmem %s10055_s21, 8192 }
 0xa7e   : > { %v8748_v50 = vmax.f32 %v8684_v55, %v9033_v29  ;;  %v8937_v37 = vmax.f32 %v8872_v23, %v8905_v45 }
 0xa7f   : > { %v7440_v7 = vpop.permute.xlu1 %7439  ;;  %v7442_v36 = vpop.permute.xlu0 %7441  ;;  %v8810_v25 = vmax.f32 %v8746_v19, %v8905_v45 }
 0xa80   : > { %7518 = vst.msk [vmem:[#allocation6 + $0x90] sm:$0xff] %vm7499_vm14, %v7440_v7  ;;  %7519 = vst.msk [vmem:[#allocation6 + $0x98] sm:$0xff] %vm7499_vm14, %v7442_v36  ;;  %v8809_v7 = vmax.f32 %v8745_v1, %v8904_v20  ;;  %v8747_v36 = vmax.f32 %v8683_v47, %v9032_v16  ;;  %v9001_v33 = vmax.f32 %v8937_v37, %v13729_v35  ;;  %v8913_v37 = vld [vmem:[#allocation2 + $0xa8] sm:$0xff] }
 0xa81   : > { %7847 = vrot.lane.b32.xlu1 %v7754_v46, %s10139_s14  ;;  %7849 = vrot.lane.b32.xlu0 %v7755_v59, %s10139_s14  ;;  %v8936_v59 = vmax.f32 %v8871_v38, %v8904_v20  ;;  %v8874_v6 = vmax.f32 %v8810_v25, %v9033_v29 }
 0xa82   : > { %v8873_v26 = vmax.f32 %v8809_v7, %v9032_v16  ;;  %v8811_v41 = vmax.f32 %v8747_v36, %v8906_v18  ;;  %v9065_v44 = vmax.f32 %v9001_v33, %v9033_v29  ;;  %v13772_v29 = vld [vmem:[#allocation2 + $0x99] sm:$0xff]  ;;  %v8911_v36 = vld [vmem:[#allocation2 + $0x90] sm:$0xff] }
 0xa83   : > { %v7629_v60 = vpop.permute.xlu1 %7628  ;;  %v7631_v3 = vpop.permute.xlu0 %7630  ;;  %v9000_v42 = vmax.f32 %v8936_v59, %v13725_v30  ;;  %v9038_v59 = vld [vmem:[#allocation2 + $0x82] sm:$0xff]  ;;  %v8625_v25 = vmax.f32 %v13772_v29, %v8910_v43  ;;  %v9039_v33 = vld [vmem:[#allocation2 + $0x92] sm:$0xff] }
 0xa84   : > { %7709 = vst.msk [vmem:[#allocation6 + $0x80] sm:$0xff] %vm7692_vm15, %v7629_v60  ;;  %7710 = vst.msk [vmem:[#allocation6 + $0x88] sm:$0xff] %vm7692_vm15, %v7631_v3  ;;  %v8685_v60 = vmax.f32 %v8621_v34, %v13731_v62  ;;  %v8999_v3 = vmax.f32 %v8935_v28, %v13721_v27  ;;  %v8938_v20 = vmax.f32 %v8873_v26, %v8906_v18 }
 0xa85   : > { %7851 = vrot.lane.b32.xlu1 %v7756_v13, %s10139_s14  ;;  %v13746_v13 = vld [vmem:[#allocation2 + $0x60] sm:$0xff]  ;;  %v9064_v15 = vmax.f32 %v9000_v42, %v9032_v16  ;;  %v8875_v21 = vmax.f32 %v8811_v41, %v9034_v54  ;;  %v8623_v34 = vmax.f32 %v8974_v5, %v8908_v8 }
 0xa86   : > { %v8749_v40 = vmax.f32 %v8685_v60, %v9034_v54  ;;  %v9063_v31 = vmax.f32 %v8999_v3, %v9031_v56  ;;  %v8939_v45 = vmax.f32 %v8874_v6, %v13746_v13  ;;  %v9002_v32 = vmax.f32 %v8938_v20, %v13731_v62  ;;  %v8912_v3 = vld [vmem:[#allocation2 + $0x98] sm:$0xff] }
 0xa87   : > { %v7633_v12 = vpop.permute.xlu1 %7632  ;;  %v7635_v24 = vpop.permute.xlu0 %7634  ;;  %v8622_v35 = vmax.f32 %v8973_v11, %v13746_v13  ;;  %v8687_v7 = vmax.f32 %v8623_v34, %v13740_v4 }
 0xa88   : > { %7711 = vst.msk [vmem:[#allocation6 + $0x90] sm:$0xff] %vm7692_vm15, %v7633_v12  ;;  %7712 = vst.msk [vmem:[#allocation6 + $0x98] sm:$0xff] %vm7692_vm15, %v7635_v24  ;;  %v8812_v12 = vmax.f32 %v8748_v50, %v13746_v13  ;;  %v8813_v30 = vmax.f32 %v8749_v40, %v8908_v8  ;;  %v9095_v51 = vpack.c.bf16 %v9064_v15, %v9063_v31 }
 0xa89   : > { %v9003_v39 = vmax.f32 %v8939_v45, %v13735_v22  ;;  %v9066_v62 = vmax.f32 %v9002_v32, %v9034_v54  ;;  %v8686_v19 = vmax.f32 %v8622_v35, %v13735_v22  ;;  %v13784_v22 = vld [vmem:[#allocation2 + $0xa9] sm:$0xff]  ;;  %v8751_v41 = vmax.f32 %v8687_v7, %v13755_v17  ;;  %v9040_v45 = vld [vmem:[#allocation2 + $0x9a] sm:$0xff] }
 0xa8a   : > { %v8876_v2 = vmax.f32 %v8812_v12, %v13753_v48  ;;  %v8877_v18 = vmax.f32 %v8813_v30, %v13755_v17  ;;  %9904 = vmatprep.mubr.msk.bf16.mxu1 %vm452_vm2, %v9095_v51  ;;  %v8689_v31 = vmax.f32 %v8625_v25, %v8974_v5  ;;  %v8914_v12 = vld [vmem:[#allocation2 + $0xb0] sm:$0xff] }
 0xa8b   : > { %v7822_v53 = vpop.permute.xlu1 %7821  ;;  %v7824_v10 = vpop.permute.xlu0 %7823  ;;  %v9067_v16 = vmax.f32 %v9003_v39, %v13753_v48  ;;  %v9096_v55 = vpack.c.bf16 %v9066_v62, %v9065_v44  ;;  %v8750_v60 = vmax.f32 %v8686_v19, %v13753_v48  ;;  %v8815_v6 = vmax.f32 %v8751_v41, %v8910_v43  ;;  %v8915_v62 = vld [vmem:[#allocation2 + $0xc0] sm:$0xff]  ;;  %v8916_v19 = vld [vmem:[#allocation2 + $0xc8] sm:$0xff] }
 0xa8c   : > { %7902 = vst.msk [vmem:[#allocation6 + $0x80] sm:$0xff] %vm7885_vm1, %v7822_v53  ;;  %7903 = vst.msk [vmem:[#allocation6 + $0x88] sm:$0xff] %vm7885_vm1, %v7824_v10  ;;  %v8940_v53 = vmax.f32 %v8875_v21, %v8908_v8  ;;  %v8909_v10 = vld [vmem:[#allocation2 + $0x78] sm:$0xff]  ;;  %v8942_v47 = vmax.f32 %v8877_v18, %v8910_v43  ;;  %v8753_v20 = vmax.f32 %v8689_v31, %v9038_v59  ;;  %v13797_v21 = vld [vmem:[#allocation2 + $0xc9] sm:$0xff] }
 0xa8d   : > { %v8941_v9 = vmax.f32 %v8876_v2, %v8909_v10  ;;  %v8624_v23 = vmax.f32 %v13768_v52, %v8909_v10  ;;  %v13786_v8 = vld [vmem:[#allocation2 + $0xb1] sm:$0xff]  ;;  %9905 = vmatmul.mubr.msk.bf16.vlgmr.msra.gmra.mxu1 %vm452_vm2, %v9096_v55  ;;  %v8814_v48 = vmax.f32 %v8750_v60, %v8909_v10  ;;  %v8629_v44 = vmax.f32 %v13797_v21, %v8914_v12 }
 0xa8e   : > { %v9004_v1 = vmax.f32 %v8940_v53, %v13740_v4  ;;  %v9006_v54 = vmax.f32 %v8942_v47, %v8974_v5  ;;  %v8817_v18 = vmax.f32 %v8753_v20, %v8912_v3  ;;  %v9041_v10 = vld [vmem:[#allocation2 + $0xaa] sm:$0xff]  ;;  %v9042_v43 = vld [vmem:[#allocation2 + $0xb2] sm:$0xff] }
 0xa8f   : > { %v7826_v14 = vpop.permute.xlu1 %7825  ;;  %v7828_v46 = vpop.permute.xlu0 %7827  ;;  %v9005_v63 = vmax.f32 %v8941_v9, %v8973_v11  ;;  %v8688_v40 = vmax.f32 %v8624_v23, %v8973_v11  ;;  %v8982_v23 = vld [vmem:[#allocation2 + $0xe1] sm:$0xff] }
 0xa90   : > { %7904 = vst.msk [vmem:[#allocation6 + $0x90] sm:$0xff] %vm7885_vm1, %v7826_v14  ;;  %7905 = vst.msk [vmem:[#allocation6 + $0x98] sm:$0xff] %vm7885_vm1, %v7828_v46  ;;  %v9068_v14 = vmax.f32 %v9004_v1, %v13755_v17  ;;  %v9037_v46 = vld [vmem:[#allocation2 + $0x7a] sm:$0xff]  ;;  %v9070_v26 = vmax.f32 %v9006_v54, %v9038_v59  ;;  %v8693_v1 = vmax.f32 %v8629_v44, %v13786_v8 }
 0xa91   : > { %v9069_v13 = vmax.f32 %v9005_v63, %v9037_v46  ;;  %v8878_v17 = vmax.f32 %v8814_v48, %v9037_v46  ;;  %v8752_v15 = vmax.f32 %v8688_v40, %v9037_v46 }
 0xa92   : > { %v9097_v4 = vpack.c.bf16 %v9068_v14, %v9067_v16  ;;  %v13810_v14 = vld [vmem:[#allocation2 + $0xd9] sm:$0xff]  ;;  %v8757_v7 = vmax.f32 %v8693_v1, %v9042_v43  ;;  %v9046_v1 = vld [vmem:[#allocation2 + $0xe2] sm:$0xff] }
 0xa93   : > { %v7251_v24 = vpop.permute.xlu1 %7250  ;;  %v7253_v57 = vpop.permute.xlu0 %7252  ;;  %v7934_v0 = vld [vmem:[#allocation6 + $0x80] sm:$0xff]  ;;  %v7935_v27 = vld [vmem:[#allocation6 + $0x88] sm:$0xff]  ;;  %v8943_v32 = vmax.f32 %v8878_v17, %v8911_v36  ;;  %v8816_v53 = vmax.f32 %v8752_v15, %v8911_v36 }
 0xa94   : > { %7327 = vst.msk [vmem:[#allocation6 + $0xa0] sm:$0xff] %vm7306_vm13, %v7251_v24  ;;  %7328 = vst.msk [vmem:[#allocation6 + $0xa8] sm:$0xff] %vm7306_vm13, %v7253_v57  ;;  %v7958_v49 = vpack.c.bf16 %v7935_v27, %v7934_v0  ;;  %9908 = vmatprep.mubr.msk.bf16.mxu1 %vm452_vm2, %v9097_v4  ;;  %v8626_v24 = vmax.f32 %v13784_v22, %v8911_v36  ;;  %v8627_v57 = vmax.f32 %v13786_v8, %v8912_v3  ;;  %v13795_v0 = vld [vmem:[#allocation2 + $0xc1] sm:$0xff] }
 0xa95   : > { %v9098_v27 = vpack.c.bf16 %v9070_v26, %v9069_v13  ;;  %v8628_v51 = vmax.f32 %v13795_v0, %v8913_v37  ;;  %v8630_v4 = vmax.f32 %v13810_v14, %v8915_v62  ;;  %v8918_v15 = vld [vmem:[#allocation2 + $0xe0] sm:$0xff] }
 0xa96   : > { %9886 = vmatprep.mubr.msk.bf16.mxu0 %vm8025_vm3, %v7958_v49  ;;  %v8879_v49 = vmax.f32 %v8815_v6, %v9038_v59  ;;  %v8690_v2 = vmax.f32 %v8626_v24, %v13768_v52  ;;  %v8691_v5 = vmax.f32 %v8627_v57, %v13772_v29  ;;  %v9043_v59 = vld [vmem:[#allocation2 + $0xc2] sm:$0xff]  ;;  %v8917_v6 = vld [vmem:[#allocation2 + $0xd8] sm:$0xff] }
 0xa97   : > { %v7255_v61 = vpop.permute.xlu1 %7254  ;;  %v7257_v58 = vpop.permute.xlu0 %7256  ;;  %v7936_v38 = vld [vmem:[#allocation6 + $0x90] sm:$0xff]  ;;  %v7937_v56 = vld [vmem:[#allocation6 + $0x98] sm:$0xff]  ;;  %9909 = vmatmul.mubr.msk.bf16.gmra.mxu1 %vm452_vm2, %v9098_v27 }
 0xa98   : > { %7329 = vst.msk [vmem:[#allocation6 + $0xb0] sm:$0xff] %vm7306_vm13, %v7255_v61  ;;  %7330 = vst.msk [vmem:[#allocation6 + $0xb8] sm:$0xff] %vm7306_vm13, %v7257_v58  ;;  %v7959_v28 = vpack.c.bf16 %v7937_v56, %v7936_v38  ;;  %v8944_v39 = vmax.f32 %v8879_v49, %v8912_v3  ;;  %v8754_v9 = vmax.f32 %v8690_v2, %v9039_v33  ;;  %v9044_v3 = vld [vmem:[#allocation2 + $0xca] sm:$0xff] }
 0xa99   : > { %v8755_v35 = vmax.f32 %v8691_v5, %v9040_v45  ;;  %v8692_v61 = vmax.f32 %v8628_v51, %v13784_v22  ;;  %v9007_v58 = vmax.f32 %v8943_v32, %v13768_v52  ;;  %v8880_v38 = vmax.f32 %v8816_v53, %v9039_v33  ;;  %v8919_v2 = vld [vmem:[#allocation2 + $0xf0] sm:$0xff] }
 0xa9a   : > { %9887 = vmatmul.mubr.msk.bf16.gmra.mxu0 %vm8025_vm3, %v7959_v28  ;;  %v8881_v56 = vmax.f32 %v8817_v18, %v9040_v45  ;;  %v9008_v28 = vmax.f32 %v8944_v39, %v13772_v29  ;;  %v8818_v16 = vmax.f32 %v8754_v9, %v8913_v37  ;;  %v13829_v51 = vld [vmem:[#allocation2 + $0x109] sm:$0xff]  ;;  %v9045_v39 = vld [vmem:[#allocation2 + $0xda] sm:$0xff] }
 0xa9b   : > { %v7444_v50 = vpop.permute.xlu1 %7443  ;;  %v7446_v42 = vpop.permute.xlu0 %7445  ;;  %v8819_v63 = vmax.f32 %v8755_v35, %v8914_v12  ;;  %v8756_v55 = vmax.f32 %v8692_v61, %v9041_v10  ;;  %v9071_v52 = vmax.f32 %v9007_v58, %v9039_v33  ;;  %v8945_v54 = vmax.f32 %v8880_v38, %v8913_v37  ;;  %v8921_v58 = vld [vmem:[#allocation2 + $0x108] sm:$0xff]  ;;  %v13837_v38 = vld [vmem:[#allocation2 + $0x111] sm:$0xff] }
 0xa9c   : > { %7520 = vst.msk [vmem:[#allocation6 + $0xa0] sm:$0xff] %vm7499_vm14, %v7444_v50  ;;  %7521 = vst.msk [vmem:[#allocation6 + $0xa8] sm:$0xff] %vm7499_vm14, %v7446_v42  ;;  %v8946_v46 = vmax.f32 %v8881_v56, %v8914_v12  ;;  %v9072_v36 = vmax.f32 %v9008_v28, %v9040_v45  ;;  %v8882_v13 = vmax.f32 %v8818_v16, %v9041_v10  ;;  %v13817_v12 = vld [vmem:[#allocation2 + $0xf1] sm:$0xff]  ;;  %v13839_v56 = vld [vmem:[#allocation2 + $0x121] sm:$0xff] }
 0xa9d   : > { %v8883_v60 = vmax.f32 %v8819_v63, %v9042_v43  ;;  %v8820_v29 = vmax.f32 %v8756_v55, %v8915_v62  ;;  %v9009_v25 = vmax.f32 %v8945_v54, %v13784_v22  ;;  %v8821_v42 = vmax.f32 %v8757_v7, %v8916_v19  ;;  %v13842_v54 = vld [vmem:[#allocation2 + $0x129] sm:$0xff]  ;;  %v9047_v7 = vld [vmem:[#allocation2 + $0xf2] sm:$0xff] }
 0xa9e   : > { %v9010_v50 = vmax.f32 %v8946_v46, %v13786_v8  ;;  %v9099_v48 = vpack.c.bf16 %v9072_v36, %v9071_v52  ;;  %v8947_v40 = vmax.f32 %v8882_v13, %v8915_v62  ;;  %v8631_v8 = vmax.f32 %v8982_v23, %v8916_v19  ;;  %v8922_v52 = vld [vmem:[#allocation2 + $0x110] sm:$0xff] }
 0xa9f   : > { %v7448_v30 = vpop.permute.xlu1 %7447  ;;  %v7450_v11 = vpop.permute.xlu0 %7449  ;;  %v8948_v31 = vmax.f32 %v8883_v60, %v8916_v19  ;;  %v8884_v37 = vmax.f32 %v8820_v29, %v9043_v59  ;;  %v9073_v24 = vmax.f32 %v9009_v25, %v9041_v10  ;;  %v8885_v57 = vmax.f32 %v8821_v42, %v9044_v3  ;;  %v9048_v42 = vld [vmem:[#allocation2 + $0xfa] sm:$0xff] }
 0xaa0   : > { %7522 = vst.msk [vmem:[#allocation6 + $0xb0] sm:$0xff] %vm7499_vm14, %v7448_v30  ;;  %7523 = vst.msk [vmem:[#allocation6 + $0xb8] sm:$0xff] %vm7499_vm14, %v7450_v11  ;;  %v9074_v22 = vmax.f32 %v9010_v50, %v9042_v43  ;;  %9912 = vmatprep.mubr.msk.bf16.mxu1 %vm452_vm2, %v9099_v48  ;;  %v9011_v27 = vmax.f32 %v8947_v40, %v13795_v0  ;;  %v8694_v30 = vmax.f32 %v8630_v4, %v13795_v0  ;;  %v13825_v11 = vld [vmem:[#allocation2 + $0xf9] sm:$0xff] }
 0xaa1   : > { %v9012_v17 = vmax.f32 %v8948_v31, %v13797_v21  ;;  %v8949_v20 = vmax.f32 %v8884_v37, %v8917_v6  ;;  %v8950_v33 = vmax.f32 %v8885_v57, %v8918_v15  ;;  %v8695_v45 = vmax.f32 %v8631_v8, %v13797_v21  ;;  %v8920_v0 = vld [vmem:[#allocation2 + $0xf8] sm:$0xff]  ;;  %v9049_v37 = vld [vmem:[#allocation2 + $0x10a] sm:$0xff] }
 0xaa2   : > { %v9100_v49 = vpack.c.bf16 %v9074_v22, %v9073_v24  ;;  %v8632_v5 = vmax.f32 %v13817_v12, %v8917_v6  ;;  %v9075_v18 = vmax.f32 %v9011_v27, %v9043_v59  ;;  %v8758_v43 = vmax.f32 %v8694_v30, %v9043_v59 }
 0xaa3   : > { %v7637_v47 = vpop.permute.xlu1 %7636  ;;  %v7639_v34 = vpop.permute.xlu0 %7638  ;;  %v9076_v10 = vmax.f32 %v9012_v17, %v9044_v3  ;;  %v9013_v44 = vmax.f32 %v8949_v20, %v13810_v14  ;;  %v9014_v21 = vmax.f32 %v8950_v33, %v8982_v23  ;;  %v8759_v9 = vmax.f32 %v8695_v45, %v9044_v3  ;;  %v9050_v17 = vld [vmem:[#allocation2 + $0x112] sm:$0xff] }
 0xaa4   : > { %7713 = vst.msk [vmem:[#allocation6 + $0xa0] sm:$0xff] %vm7692_vm15, %v7637_v47  ;;  %7714 = vst.msk [vmem:[#allocation6 + $0xa8] sm:$0xff] %vm7692_vm15, %v7639_v34  ;;  %9913 = vmatmul.mubr.msk.bf16.gmra.mxu1 %vm452_vm2, %v9100_v49  ;;  %v8633_v35 = vmax.f32 %v13825_v11, %v8918_v15  ;;  %v8696_v61 = vmax.f32 %v8632_v5, %v13810_v14  ;;  %v8822_v34 = vmax.f32 %v8758_v43, %v8917_v6  ;;  %v8923_v5 = vld [vmem:[#allocation2 + $0x120] sm:$0xff] }
 0xaa5   : > { %v9101_v62 = vpack.c.bf16 %v9076_v10, %v9075_v18  ;;  %v9077_v47 = vmax.f32 %v9013_v44, %v9045_v39  ;;  %v8634_v28 = vmax.f32 %v13829_v51, %v8919_v2  ;;  %v9078_v16 = vmax.f32 %v9014_v21, %v9046_v1  ;;  %v9051_v21 = vld [vmem:[#allocation2 + $0x122] sm:$0xff] }
 0xaa6   : > { %v8823_v63 = vmax.f32 %v8759_v9, %v8918_v15  ;;  %v8697_v19 = vmax.f32 %v8633_v35, %v8982_v23  ;;  %v8760_v55 = vmax.f32 %v8696_v61, %v9045_v39  ;;  %v8886_v59 = vmax.f32 %v8822_v34, %v9045_v39  ;;  %v13863_v34 = vld [vmem:[#allocation2 + $0x141] sm:$0xff] }
 0xaa7   : > { %v7641_v26 = vpop.permute.xlu1 %7640  ;;  %v7643_v41 = vpop.permute.xlu0 %7642  ;;  %9916 = vmatprep.mubr.msk.bf16.mxu1 %vm452_vm2, %v9101_v62  ;;  %v8635_v36 = vmax.f32 %v13837_v38, %v8920_v0  ;;  %v8698_v13 = vmax.f32 %v8634_v28, %v13817_v12  ;;  %v8636_v60 = vmax.f32 %v13839_v56, %v8921_v58  ;;  %v9102_v3 = vpack.c.bf16 %v9078_v16, %v9077_v47 }
 0xaa8   : > { %7715 = vst.msk [vmem:[#allocation6 + $0xb0] sm:$0xff] %vm7692_vm15, %v7641_v26  ;;  %7716 = vst.msk [vmem:[#allocation6 + $0xb8] sm:$0xff] %vm7692_vm15, %v7643_v41  ;;  %v8887_v29 = vmax.f32 %v8823_v63, %v9046_v1  ;;  %v8761_v23 = vmax.f32 %v8697_v19, %v9046_v1  ;;  %v8824_v25 = vmax.f32 %v8760_v55, %v8919_v2  ;;  %v9052_v55 = vld [vmem:[#allocation2 + $0x12a] sm:$0xff] }
 0xaa9   : > { %v8951_v50 = vmax.f32 %v8886_v59, %v8919_v2  ;;  %v8699_v4 = vmax.f32 %v8635_v36, %v13825_v11  ;;  %v8762_v26 = vmax.f32 %v8698_v13, %v9047_v7  ;;  %v8637_v41 = vmax.f32 %v13842_v54, %v8922_v52  ;;  %v13870_v36 = vld [vmem:[#allocation2 + $0x151] sm:$0xff] }
 0xaaa   : > { %v8952_v48 = vmax.f32 %v8887_v29, %v8920_v0  ;;  %v8825_v40 = vmax.f32 %v8761_v23, %v8920_v0  ;;  %v8888_v31 = vmax.f32 %v8824_v25, %v9047_v7  ;;  %v8700_v6 = vmax.f32 %v8636_v60, %v13829_v51  ;;  %v8924_v0 = vld [vmem:[#allocation2 + $0x128] sm:$0xff]  ;;  %v8926_v60 = vld [vmem:[#allocation2 + $0x140] sm:$0xff] }
 0xaab   : > { %v7830_v32 = vpop.permute.xlu1 %7829  ;;  %v7832_v53 = vpop.permute.xlu0 %7831  ;;  %v9015_v27 = vmax.f32 %v8951_v50, %v13817_v12  ;;  %v8763_v15 = vmax.f32 %v8699_v4, %v9048_v42  ;;  %v8826_v20 = vmax.f32 %v8762_v26, %v8921_v58  ;;  %v8701_v30 = vmax.f32 %v8637_v41, %v13837_v38  ;;  %v13876_v29 = vld [vmem:[#allocation2 + $0x159] sm:$0xff]  ;;  %v8927_v41 = vld [vmem:[#allocation2 + $0x150] sm:$0xff] }
 0xaac   : > { %7906 = vst.msk [vmem:[#allocation6 + $0xa0] sm:$0xff] %vm7885_vm1, %v7830_v32  ;;  %7907 = vst.msk [vmem:[#allocation6 + $0xa8] sm:$0xff] %vm7885_vm1, %v7832_v53  ;;  %9917 = vmatmul.mubr.msk.bf16.gmra.mxu1 %vm452_vm2, %v9102_v3  ;;  %v9016_v33 = vmax.f32 %v8952_v48, %v13825_v11  ;;  %v8889_v45 = vmax.f32 %v8825_v40, %v9048_v42  ;;  %v8953_v2 = vmax.f32 %v8888_v31, %v8921_v58  ;;  %v13859_v32 = vld [vmem:[#allocation2 + $0x139] sm:$0xff]  ;;  %v13879_v48 = vld [vmem:[#allocation2 + $0x169] sm:$0xff] }
 0xaad   : > { %v9079_v12 = vmax.f32 %v9015_v27, %v9047_v7  ;;  %v8827_v53 = vmax.f32 %v8763_v15, %v8922_v52  ;;  %v8890_v18 = vmax.f32 %v8826_v20, %v9049_v37  ;;  %v8764_v10 = vmax.f32 %v8700_v6, %v9049_v37  ;;  %v8925_v7 = vld [vmem:[#allocation2 + $0x138] sm:$0xff]  ;;  %v9054_v15 = vld [vmem:[#allocation2 + $0x142] sm:$0xff] }
 0xaae   : > { %v9080_v44 = vmax.f32 %v9016_v33, %v9048_v42  ;;  %v8954_v39 = vmax.f32 %v8889_v45, %v8922_v52  ;;  %v9017_v43 = vmax.f32 %v8953_v2, %v13829_v51  ;;  %v8765_v9 = vmax.f32 %v8701_v30, %v9050_v17  ;;  %v13892_v45 = vld [vmem:[#allocation2 + $0x181] sm:$0xff] }
 0xaaf   : > { %v7834_v46 = vpop.permute.xlu1 %7833  ;;  %v7836_v14 = vpop.permute.xlu0 %7835  ;;  %v8891_v62 = vmax.f32 %v8827_v53, %v9050_v17  ;;  %v8955_v1 = vmax.f32 %v8890_v18, %v8923_v5  ;;  %v8828_v47 = vmax.f32 %v8764_v10, %v8923_v5  ;;  %v8638_v28 = vmax.f32 %v13859_v32, %v8923_v5 }
 0xab0   : > { %7908 = vst.msk [vmem:[#allocation6 + $0xb0] sm:$0xff] %vm7885_vm1, %v7834_v46  ;;  %7909 = vst.msk [vmem:[#allocation6 + $0xb8] sm:$0xff] %vm7885_vm1, %v7836_v14  ;;  %v9103_v51 = vpack.c.bf16 %v9080_v44, %v9079_v12  ;;  %v9018_v63 = vmax.f32 %v8954_v39, %v13837_v38  ;;  %v9081_v19 = vmax.f32 %v9017_v43, %v9049_v37  ;;  %v8930_v43 = vld [vmem:[#allocation2 + $0x170] sm:$0xff] }
 0xab1   : > { %v8956_v52 = vmax.f32 %v8891_v62, %v8924_v0  ;;  %v9019_v46 = vmax.f32 %v8955_v1, %v13839_v56  ;;  %v8829_v14 = vmax.f32 %v8765_v9, %v8924_v0  ;;  %v8892_v59 = vmax.f32 %v8828_v47, %v9051_v21  ;;  %v9056_v47 = vld [vmem:[#allocation2 + $0x15a] sm:$0xff] }
 0xab2   : > { %9920 = vmatprep.mubr.msk.bf16.mxu1 %vm452_vm2, %v9103_v51  ;;  %v9082_v13 = vmax.f32 %v9018_v63, %v9050_v17  ;;  %v8639_v3 = vmax.f32 %v13863_v34, %v8924_v0  ;;  %v8702_v38 = vmax.f32 %v8638_v28, %v13839_v56  ;;  %v8640_v37 = vmax.f32 %v13870_v36, %v8925_v7  ;;  %v13887_v17 = vld [vmem:[#allocation2 + $0x171] sm:$0xff] }
 0xab3   : > { %v7259_v24 = vpop.permute.xlu1 %7258  ;;  %v7261_v22 = vpop.permute.xlu0 %7260  ;;  %v7938_v57 = vld [vmem:[#allocation6 + $0xa0] sm:$0xff]  ;;  %v7939_v8 = vld [vmem:[#allocation6 + $0xa8] sm:$0xff]  ;;  %v9020_v50 = vmax.f32 %v8956_v52, %v13842_v54  ;;  %v9083_v42 = vmax.f32 %v9019_v46, %v9051_v21  ;;  %v8893_v4 = vmax.f32 %v8829_v14, %v9052_v55  ;;  %v8957_v26 = vmax.f32 %v8892_v59, %v8925_v7 }
 0xab4   : > { %7331 = vst.msk [vmem:[#allocation6 + $0xc0] sm:$0xff] %vm7306_vm13, %v7259_v24  ;;  %7332 = vst.msk [vmem:[#allocation6 + $0xc8] sm:$0xff] %vm7306_vm13, %v7261_v22  ;;  %v7960_v49 = vpack.c.bf16 %v7939_v8, %v7938_v57  ;;  %v9104_v40 = vpack.c.bf16 %v9082_v13, %v9081_v19  ;;  %v8703_v31 = vmax.f32 %v8639_v3, %v13842_v54  ;;  %v9053_v57 = vld [vmem:[#allocation2 + $0x13a] sm:$0xff]  ;;  %v9058_v13 = vld [vmem:[#allocation2 + $0x172] sm:$0xff] }
 0xab5   : > { %v8766_v56 = vmax.f32 %v8702_v38, %v9051_v21  ;;  %v9084_v6 = vmax.f32 %v9020_v50, %v9052_v55  ;;  %v8958_v24 = vmax.f32 %v8893_v4, %v8926_v60  ;;  %v9021_v22 = vmax.f32 %v8957_v26, %v13859_v32  ;;  %v8928_v8 = vld [vmem:[#allocation2 + $0x158] sm:$0xff]  ;;  %v13899_v21 = vld [vmem:[#allocation2 + $0x189] sm:$0xff] }
 0xab6   : > { %9890 = vmatprep.mubr.msk.bf16.mxu0 %vm8025_vm3, %v7960_v49  ;;  %v8641_v27 = vmax.f32 %v13876_v29, %v8926_v60  ;;  %9921 = vmatmul.mubr.msk.bf16.gmra.mxu1 %vm452_vm2, %v9104_v40  ;;  %v8767_v20 = vmax.f32 %v8703_v31, %v9052_v55  ;;  %v8704_v54 = vmax.f32 %v8640_v37, %v13859_v32  ;;  %v8929_v49 = vld [vmem:[#allocation2 + $0x168] sm:$0xff] }
 0xab7   : > { %v7263_v35 = vpop.permute.xlu1 %7262  ;;  %v7265_v11 = vpop.permute.xlu0 %7264  ;;  %v7940_v61 = vld [vmem:[#allocation6 + $0xb0] sm:$0xff]  ;;  %v7941_v58 = vld [vmem:[#allocation6 + $0xb8] sm:$0xff]  ;;  %v8830_v30 = vmax.f32 %v8766_v56, %v8925_v7  ;;  %v8642_v33 = vmax.f32 %v13879_v48, %v8927_v41  ;;  %v9105_v12 = vpack.c.bf16 %v9084_v6, %v9083_v42  ;;  %v9022_v53 = vmax.f32 %v8958_v24, %v13863_v34  ;;  %v8932_v40 = vld [vmem:[#allocation2 + $0x188] sm:$0xff] }
 0xab8   : > { %7333 = vst.msk [vmem:[#allocation6 + $0xd0] sm:$0xff] %vm7306_vm13, %v7263_v35  ;;  %7334 = vst.msk [vmem:[#allocation6 + $0xd8] sm:$0xff] %vm7306_vm13, %v7265_v11  ;;  %v7961_v16 = vpack.c.bf16 %v7941_v58, %v7940_v61  ;;  %v9085_v18 = vmax.f32 %v9021_v22, %v9053_v57  ;;  %v8705_v10 = vmax.f32 %v8641_v27, %v13863_v34  ;;  %v9055_v35 = vld [vmem:[#allocation2 + $0x152] sm:$0xff]  ;;  %v9057_v7 = vld [vmem:[#allocation2 + $0x16a] sm:$0xff] }
 0xab9   : > { %v8831_v44 = vmax.f32 %v8767_v20, %v8926_v60  ;;  %v8894_v39 = vmax.f32 %v8830_v30, %v9053_v57  ;;  %v8768_v32 = vmax.f32 %v8704_v54, %v9053_v57  ;;  %v8643_v0 = vmax.f32 %v13887_v17, %v8928_v8  ;;  %9924 = vmatprep.mubr.msk.bf16.mxu1 %vm452_vm2, %v9105_v12  ;;  %v9060_v27 = vld [vmem:[#allocation2 + $0x18a] sm:$0xff]  ;;  %v8934_v12 = vld [vmem:[#allocation2 + $0x1a0] sm:$0xff] }
 0xaba   : > { %9891 = vmatmul.mubr.msk.bf16.gmra.mxu0 %vm8025_vm3, %v7961_v16  ;;  %v9086_v9 = vmax.f32 %v9022_v53, %v9054_v15  ;;  %v8769_v11 = vmax.f32 %v8705_v10, %v9054_v15  ;;  %v8706_v61 = vmax.f32 %v8642_v33, %v13870_v36  ;;  %v8644_v58 = vmax.f32 %v13892_v45, %v8929_v49 }
 0xabb   : > { %v7452_v23 = vpop.permute.xlu1 %7451  ;;  %v7454_v25 = vpop.permute.xlu0 %7453  ;;  %v8895_v62 = vmax.f32 %v8831_v44, %v9054_v15  ;;  %v8959_v1 = vmax.f32 %v8894_v39, %v8927_v41  ;;  %v8832_v34 = vmax.f32 %v8768_v32, %v8927_v41  ;;  %v8707_v28 = vmax.f32 %v8643_v0, %v13876_v29  ;;  %v8931_v41 = vld [vmem:[#allocation2 + $0x180] sm:$0xff] }
 0xabc   : > { %7524 = vst.msk [vmem:[#allocation6 + $0xc0] sm:$0xff] %vm7499_vm14, %v7452_v23  ;;  %7525 = vst.msk [vmem:[#allocation6 + $0xc8] sm:$0xff] %vm7499_vm14, %v7454_v25  ;;  %v9106_v63 = vpack.c.bf16 %v9086_v9, %v9085_v18  ;;  %v8833_v19 = vmax.f32 %v8769_v11, %v8928_v8  ;;  %v8770_v55 = vmax.f32 %v8706_v61, %v9055_v35  ;;  %v8997_v32 = vld [vmem:[#allocation2 + $0x199] sm:$0xff] }
 0xabd   : > { %v8645_v52 = vmax.f32 %v13899_v21, %v8930_v43  ;;  %v8960_v46 = vmax.f32 %v8895_v62, %v8928_v8  ;;  %v9023_v14 = vmax.f32 %v8959_v1, %v13870_v36  ;;  %v8896_v59 = vmax.f32 %v8832_v34, %v9055_v35  ;;  %v9062_v62 = vld [vmem:[#allocation2 + $0x1a2] sm:$0xff] }
 0xabe   : > { %v8771_v60 = vmax.f32 %v8707_v28, %v9056_v47  ;;  %v8897_v3 = vmax.f32 %v8833_v19, %v9056_v47  ;;  %v8834_v38 = vmax.f32 %v8770_v55, %v8929_v49  ;;  %v8708_v23 = vmax.f32 %v8644_v58, %v13879_v48  ;;  %9925 = vmatmul.mubr.msk.bf16.gmra.mxu1 %vm452_vm2, %v9106_v63  ;;  %v9061_v58 = vld [vmem:[#allocation2 + $0x19a] sm:$0xff] }
 0xabf   : > { %v7456_v2 = vpop.permute.xlu1 %7455  ;;  %v7458_v5 = vpop.permute.xlu0 %7457  ;;  %v8709_v25 = vmax.f32 %v8645_v52, %v13887_v17  ;;  %v9024_v50 = vmax.f32 %v8960_v46, %v13876_v29  ;;  %v9087_v42 = vmax.f32 %v9023_v14, %v9055_v35  ;;  %v8961_v4 = vmax.f32 %v8896_v59, %v8929_v49  ;;  %v9059_v29 = vld [vmem:[#allocation2 + $0x182] sm:$0xff] }
 0xac0   : > { %7526 = vst.msk [vmem:[#allocation6 + $0xd0] sm:$0xff] %vm7499_vm14, %v7456_v2  ;;  %7527 = vst.msk [vmem:[#allocation6 + $0xd8] sm:$0xff] %vm7499_vm14, %v7458_v5  ;;  %v8835_v26 = vmax.f32 %v8771_v60, %v8930_v43  ;;  %v8962_v56 = vmax.f32 %v8897_v3, %v8930_v43  ;;  %v8898_v37 = vmax.f32 %v8834_v38, %v9057_v7  ;;  %v8933_v5 = vld [vmem:[#allocation2 + $0x198] sm:$0xff]  ;;  %v8998_v43 = vld [vmem:[#allocation2 + $0x1a1] sm:$0xff] }
 0xac1   : > { %v8772_v6 = vmax.f32 %v8708_v23, %v9057_v7  ;;  %v8773_v24 = vmax.f32 %v8709_v25, %v9058_v13  ;;  %v9088_v22 = vmax.f32 %v9024_v50, %v9056_v47  ;;  %v9025_v57 = vmax.f32 %v8961_v4, %v13879_v48  ;;  %v13936_v25 = vld [vmem:[%s14324_s8] ss:$0 sm:$0xff] }
 0xac2   : > { %v8899_v8 = vmax.f32 %v8835_v26, %v9058_v13  ;;  %v9026_v15 = vmax.f32 %v8962_v56, %v13887_v17  ;;  %v8963_v20 = vmax.f32 %v8898_v37, %v8931_v41 }
 0xac3   : > { %v7645_v16 = vpop.permute.xlu1 %7644  ;;  %v7647_v51 = vpop.permute.xlu0 %7646  ;;  %v8836_v30 = vmax.f32 %v8772_v6, %v8931_v41  ;;  %v8837_v54 = vmax.f32 %v8773_v24, %v8932_v40  ;;  %v9107_v49 = vpack.c.bf16 %v9088_v22, %v9087_v42  ;;  %v9089_v33 = vmax.f32 %v9025_v57, %v9057_v7 }
 0xac4   : > { %7717 = vst.msk [vmem:[#allocation6 + $0xc0] sm:$0xff] %vm7692_vm15, %v7645_v16  ;;  %7718 = vst.msk [vmem:[#allocation6 + $0xc8] sm:$0xff] %vm7692_vm15, %v7647_v51  ;;  %v8964_v2 = vmax.f32 %v8899_v8, %v8932_v40  ;;  %v9090_v10 = vmax.f32 %v9026_v15, %v9058_v13  ;;  %v9027_v44 = vmax.f32 %v8963_v20, %v13892_v45 }
 0xac5   : > { %v8900_v39 = vmax.f32 %v8836_v30, %v9059_v29  ;;  %v8901_v48 = vmax.f32 %v8837_v54, %v9060_v27  ;;  %9928 = vmatprep.mubr.msk.bf16.mxu1 %vm452_vm2, %v9107_v49 }
 0xac6   : > { %v9028_v17 = vmax.f32 %v8964_v2, %v13899_v21  ;;  %v9108_v0 = vpack.c.bf16 %v9090_v10, %v9089_v33  ;;  %v9091_v9 = vmax.f32 %v9027_v44, %v9059_v29 }
 0xac7   : > { %v7649_v36 = vpop.permute.xlu1 %7648  ;;  %v7651_v31 = vpop.permute.xlu0 %7650  ;;  %v8965_v35 = vmax.f32 %v8900_v39, %v8933_v5  ;;  %v8966_v11 = vmax.f32 %v8901_v48, %v8934_v12 }
 0xac8   : > { %7719 = vst.msk [vmem:[#allocation6 + $0xd0] sm:$0xff] %vm7692_vm15, %v7649_v36  ;;  %7720 = vst.msk [vmem:[#allocation6 + $0xd8] sm:$0xff] %vm7692_vm15, %v7651_v31  ;;  %v9092_v61 = vmax.f32 %v9028_v17, %v9060_v27  ;;  %9929 = vmatmul.mubr.msk.bf16.gmra.mxu1 %vm452_vm2, %v9108_v0 }
 0xac9   : > { %v9029_v47 = vmax.f32 %v8965_v35, %v8997_v32  ;;  %v9030_v34 = vmax.f32 %v8966_v11, %v8998_v43 }
 0xaca   : > { %v9109_v21 = vpack.c.bf16 %v9092_v61, %v9091_v9 }
 0xacb   : > { %v7838_v53 = vpop.permute.xlu1 %7837  ;;  %v7840_v18 = vpop.permute.xlu0 %7839  ;;  %v9093_v28 = vmax.f32 %v9029_v47, %v9061_v58  ;;  %v9094_v16 = vmax.f32 %v9030_v34, %v9062_v62 }
 0xacc   : > { %7910 = vst.msk [vmem:[#allocation6 + $0xc0] sm:$0xff] %vm7885_vm1, %v7838_v53  ;;  %7911 = vst.msk [vmem:[#allocation6 + $0xc8] sm:$0xff] %vm7885_vm1, %v7840_v18  ;;  %9932 = vmatprep.mubr.msk.bf16.mxu1 %vm452_vm2, %v9109_v21 }
 0xacd   : > { %v9110_v52 = vpack.c.bf16 %v9094_v16, %v9093_v28 }
 0xacf   : > { %v7842_v45 = vpop.permute.xlu1 %7841  ;;  %v7844_v1 = vpop.permute.xlu0 %7843 }
 0xad0   : > { %7912 = vst.msk [vmem:[#allocation6 + $0xd0] sm:$0xff] %vm7885_vm1, %v7842_v45  ;;  %7913 = vst.msk [vmem:[#allocation6 + $0xd8] sm:$0xff] %vm7885_vm1, %v7844_v1  ;;  %9933 = vmatmul.mubr.msk.bf16.gmra.mxu1 %vm452_vm2, %v9110_v52  ;;  %vm9491_vm2 = vcmask 261312  }
 0xad3   : > { %v7076_v51 = vpop.permute.xlu1 %7075  ;;  %v7942_v63 = vld [vmem:[#allocation6 + $0xc0] sm:$0xff]  ;;  %v7943_v19 = vld [vmem:[#allocation6 + $0xc8] sm:$0xff]  ;;  %v7078_v55 = vpop.permute.xlu0 %7077 }
 0xad4   : > { %7143 = vst.msk [vmem:[#allocation6 + $0xe8] sm:$0xff] %vm7113_vm12, %v7076_v51  ;;  %v7962_v46 = vpack.c.bf16 %v7943_v19, %v7942_v63  ;;  %7144 = vst.msk [vmem:[#allocation6 + $0xf0] sm:$0xff] %vm7113_vm12, %v7078_v55 }
 0xad6   : > { %9894 = vmatprep.mubr.msk.bf16.mxu0 %vm8025_vm3, %v7962_v46 }
 0xad7   : > { %v7080_v14 = vpop.permute.xlu1 %7079  ;;  %v7944_v59 = vld [vmem:[#allocation6 + $0xd0] sm:$0xff]  ;;  %v7945_v7 = vld [vmem:[#allocation6 + $0xd8] sm:$0xff]  ;;  %v7267_v13 = vpop.permute.xlu0 %7266 }
 0xad8   : > { %7145 = vst.msk [vmem:[#allocation6 + $0xf8] sm:$0xff] %vm7113_vm12, %v7080_v14  ;;  %v7963_v60 = vpack.c.bf16 %v7945_v7, %v7944_v59 }
 0xad9   : > { %7335 = vst.msk [vmem:[#allocation6 + $0xe0] sm:$0xff] %vm7306_vm13, %v7267_v13 }
 0xada   : > { %v9872_v3 = vpop.f32.mrf.mxu0  ;;  %9895 = vmatmul.mubr.msk.bf16.gmra.mxu0 %vm8025_vm3, %v7963_v60 }
 0xadb   : > { %v7269_v38 = vpop.permute.xlu1 %7268  ;;  %v7271_v23 = vpop.permute.xlu0 %7270  ;;  %v8120_v26 = vadd.f32 %v9872_v3, %v13936_v25 }
 0xadc   : > { %7336 = vst.msk [vmem:[#allocation6 + $0xe8] sm:$0xff] %vm7306_vm13, %v7269_v38  ;;  %v8111_v50 = vpop.f32.mrf.mxu0  ;;  %7337 = vst.msk [vmem:[#allocation6 + $0xf0] sm:$0xff] %vm7306_vm13, %v7271_v23 }
 0xadd   : > { %v8112_v42 = vadd.f32 %v13936_v25, %v8111_v50  ;;  %v8240_v37 = vmax.f32 %v8120_v26, 0.0 }
 0xade   : > { %v9873_v4 = vpop.f32.mrf.mxu0 }
 0xadf   : > { %v8238_v41 = vmax.f32 %v8112_v42, 0.0  ;;  %v7273_v40 = vpop.permute.xlu1 %7272  ;;  %v7460_v36 = vpop.permute.xlu0 %7459  ;;  %v8123_v6 = vadd.f32 %v9873_v4, %v13936_v25 }
 0xae0   : > { %7338 = vst.msk [vmem:[#allocation6 + $0xf8] sm:$0xff] %vm7306_vm13, %v7273_v40  ;;  %v8114_v31 = vpop.f32.mrf.mxu0 }
 0xae1   : > { %7528 = vst.msk [vmem:[#allocation6 + $0xe0] sm:$0xff] %vm7499_vm14, %v7460_v36  ;;  %v8115_v56 = vadd.f32 %v13936_v25, %v8114_v31  ;;  %8302 = vrot.lane.b32.xlu0 %v8238_v41, %s10118_s25  ;;  %v8241_v8 = vmax.f32 %v8123_v6, 0.0 }
 0xae3   : > { %v8239_v24 = vmax.f32 %v8115_v56, 0.0  ;;  %v7462_v22 = vpop.permute.xlu1 %7461  ;;  %v7464_v57 = vpop.permute.xlu0 %7463 }
 0xae4   : > { %7529 = vst.msk [vmem:[#allocation6 + $0xe8] sm:$0xff] %vm7499_vm14, %v7462_v22  ;;  %7530 = vst.msk [vmem:[#allocation6 + $0xf0] sm:$0xff] %vm7499_vm14, %v7464_v57 }
 0xae5   : > { %8304 = vrot.lane.b32.xlu1 %v8239_v24, %s10118_s25  ;;  %8306 = vrot.lane.b32.xlu0 %v8240_v37, %s10118_s25 }
 0xae7   : > { %v7466_v29 = vpop.permute.xlu1 %7465  ;;  %v7653_v27 = vpop.permute.xlu0 %7652 }
 0xae8   : > { %7531 = vst.msk [vmem:[#allocation6 + $0xf8] sm:$0xff] %vm7499_vm14, %v7466_v29 }
 0xae9   : > { %7721 = vst.msk [vmem:[#allocation6 + $0xe0] sm:$0xff] %vm7692_vm15, %v7653_v27  ;;  %8308 = vrot.lane.b32.xlu1 %v8241_v8, %s10118_s25 }
 0xaeb   : > { %v7655_v15 = vpop.permute.xlu1 %7654  ;;  %v7657_v20 = vpop.permute.xlu0 %7656 }
 0xaec   : > { %7722 = vst.msk [vmem:[#allocation6 + $0xe8] sm:$0xff] %vm7692_vm15, %v7655_v15  ;;  %7723 = vst.msk [vmem:[#allocation6 + $0xf0] sm:$0xff] %vm7692_vm15, %v7657_v20 }
 0xaef   : > { %v7659_v30 = vpop.permute.xlu1 %7658  ;;  %v7846_v54 = vpop.permute.xlu0 %7845 }
 0xaf0   : > { %7724 = vst.msk [vmem:[#allocation6 + $0xf8] sm:$0xff] %vm7692_vm15, %v7659_v30 }
 0xaf1   : > { %7914 = vst.msk [vmem:[#allocation6 + $0xe0] sm:$0xff] %vm7885_vm1, %v7846_v54 }
 0xaf3   : > { %v7848_v49 = vpop.permute.xlu1 %7847  ;;  %v7850_v33 = vpop.permute.xlu0 %7849 }
 0xaf4   : > { %7915 = vst.msk [vmem:[#allocation6 + $0xe8] sm:$0xff] %vm7885_vm1, %v7848_v49  ;;  %7916 = vst.msk [vmem:[#allocation6 + $0xf0] sm:$0xff] %vm7885_vm1, %v7850_v33 }
 0xaf7   : > { %v7852_v2 = vpop.permute.xlu1 %7851 }
 0xaf8   : > { %7917 = vst.msk [vmem:[#allocation6 + $0xf8] sm:$0xff] %vm7885_vm1, %v7852_v2  ;;  %v7946_v5 = vld [vmem:[#allocation6 + $0xe0] sm:$0xff] }
 0xafa   : > { %v9876_v12 = vpop.f32.mrf.mxu0 }
 0xafb   : > { %v7947_v53 = vld [vmem:[#allocation6 + $0xe8] sm:$0xff]  ;;  %v7948_v39 = vld [vmem:[#allocation6 + $0xf0] sm:$0xff]  ;;  %v8136_v17 = vadd.f32 %v9876_v12, %v13936_v25 }
 0xafc   : > { %v8127_v18 = vpop.f32.mrf.mxu0  ;;  %v7964_v10 = vpack.c.bf16 %v7947_v53, %v7946_v5 }
 0xafd   : > { %v8128_v44 = vadd.f32 %v13936_v25, %v8127_v18  ;;  %v8244_v11 = vmax.f32 %v8136_v17, 0.0 }
 0xafe   : > { %v9877_v48 = vpop.f32.mrf.mxu0  ;;  %9898 = vmatprep.mubr.msk.bf16.mxu0 %vm8025_vm3, %v7964_v10 }
 0xaff   : > { %v8242_v32 = vmax.f32 %v8128_v44, 0.0  ;;  %v7949_v43 = vld [vmem:[#allocation6 + $0xf8] sm:$0xff]  ;;  %v8139_v61 = vadd.f32 %v9877_v48, %v13936_v25 }
 0xb00   : > { %v8130_v0 = vpop.f32.mrf.mxu0  ;;  %v7965_v9 = vpack.c.bf16 %v7949_v43, %v7948_v39 }
 0xb01   : > { %v8131_v35 = vadd.f32 %v13936_v25, %v8130_v0  ;;  %8310 = vrot.lane.b32.xlu0 %v8242_v32, %s10118_s25  ;;  %v8245_v62 = vmax.f32 %v8139_v61, 0.0 }
 0xb02   : > { %9899 = vmatmul.mubr.msk.bf16.gmra.mxu0 %vm8025_vm3, %v7965_v9 }
 0xb03   : > { %v8243_v58 = vmax.f32 %v8131_v35, 0.0 }
 0xb05   : > { %8312 = vrot.lane.b32.xlu1 %v8243_v58, %s10118_s25  ;;  %8314 = vrot.lane.b32.xlu0 %v8244_v11, %s10118_s25 }
 0xb09   : > { %8316 = vrot.lane.b32.xlu1 %v8245_v62, %s10118_s25 }
 0xb1a   : > { %v9880_v45 = vpop.f32.mrf.mxu0 }
 0xb1b   : > { %v8152_v21 = vadd.f32 %v9880_v45, %v13936_v25 }
 0xb1c   : > { %v8143_v1 = vpop.f32.mrf.mxu0 }
 0xb1d   : > { %v8144_v47 = vadd.f32 %v13936_v25, %v8143_v1  ;;  %v8248_v63 = vmax.f32 %v8152_v21, 0.0 }
 0xb1e   : > { %v9881_v34 = vpop.f32.mrf.mxu0 }
 0xb1f   : > { %v8246_v28 = vmax.f32 %v8144_v47, 0.0  ;;  %v8155_v19 = vadd.f32 %v9881_v34, %v13936_v25 }
 0xb20   : > { %v8146_v16 = vpop.f32.mrf.mxu0 }
 0xb21   : > { %v8147_v51 = vadd.f32 %v13936_v25, %v8146_v16  ;;  %8318 = vrot.lane.b32.xlu0 %v8246_v28, %s10118_s25  ;;  %v8249_v52 = vmax.f32 %v8155_v19, 0.0 }
 0xb23   : > { %v8247_v55 = vmax.f32 %v8147_v51, 0.0 }
 0xb25   : > { %8320 = vrot.lane.b32.xlu1 %v8247_v55, %s10118_s25  ;;  %8322 = vrot.lane.b32.xlu0 %v8248_v63, %s10118_s25 }
 0xb29   : > { %8324 = vrot.lane.b32.xlu1 %v8249_v52, %s10118_s25 }
 0xb3a   : > { %v9884_v46 = vpop.f32.mrf.mxu0 }
 0xb3b   : > { %v8168_v13 = vadd.f32 %v9884_v46, %v13936_v25 }
 0xb3c   : > { %v8159_v14 = vpop.f32.mrf.mxu0 }
 0xb3d   : > { %v8160_v59 = vadd.f32 %v13936_v25, %v8159_v14  ;;  %v8252_v23 = vmax.f32 %v8168_v13, 0.0 }
 0xb3e   : > { %v9885_v7 = vpop.f32.mrf.mxu0 }
 0xb3f   : > { %v8250_v60 = vmax.f32 %v8160_v59, 0.0  ;;  %v8171_v50 = vadd.f32 %v9885_v7, %v13936_v25 }
 0xb40   : > { %v8162_v3 = vpop.f32.mrf.mxu0 }
 0xb41   : > { %v8163_v38 = vadd.f32 %v13936_v25, %v8162_v3  ;;  %8326 = vrot.lane.b32.xlu0 %v8250_v60, %s10118_s25  ;;  %v8253_v4 = vmax.f32 %v8171_v50, 0.0 }
 0xb43   : > { %v8251_v42 = vmax.f32 %v8163_v38, 0.0 }
 0xb45   : > { %8328 = vrot.lane.b32.xlu1 %v8251_v42, %s10118_s25  ;;  %8330 = vrot.lane.b32.xlu0 %v8252_v23, %s10118_s25 }
 0xb49   : > { %8332 = vrot.lane.b32.xlu1 %v8253_v4, %s10118_s25 }
 0xb4d   : > { %v14018_v0 = vpop.f32.mrf.mxu1 }
 0xb4f   : > { %v9204_v9 = vpop.f32.mrf.mxu1 }
 0xb51   : > { %v14021_v35 = vpop.f32.mrf.mxu1 }
 0xb53   : > { %v8303_v26 = vpop.permute.xlu0 %8302  ;;  %v14025_v61 = vpop.f32.mrf.mxu1 }
 0xb54   : > { %8399 = vst.msk [vmem:[%s10613_s22] sm:$0xff] %vm8398_vm0, %v8303_v26 }
 0xb57   : > { %v8305_v41 = vpop.permute.xlu1 %8304  ;;  %v8307_v40 = vpop.permute.xlu0 %8306 }
 0xb58   : > { %8400 = vst.msk [vmem:[%s10613_s22 + $0x8] sm:$0xff] %vm8398_vm0, %v8305_v41  ;;  %8401 = vst.msk [vmem:[%s10613_s22 + $0x10] sm:$0xff] %vm8398_vm0, %v8307_v40  ;;  %v14031_v45 = vpop.f32.mrf.mxu1 }
 0xb5a   : > { %v9888_v36 = vpop.f32.mrf.mxu0  ;;  %v9220_v21 = vpop.f32.mrf.mxu1 }
 0xb5b   : > { %v8309_v31 = vpop.permute.xlu1 %8308  ;;  %v8184_v24 = vadd.f32 %v9888_v36, %v13936_v25 }
 0xb5c   : > { %8402 = vst.msk [vmem:[%s10613_s22 + $0x18] sm:$0xff] %vm8398_vm0, %v8309_v31  ;;  %v8175_v56 = vpop.f32.mrf.mxu0  ;;  %v14037_v55 = vpop.f32.mrf.mxu1 }
 0xb5d   : > { %v8176_v37 = vadd.f32 %v13936_v25, %v8175_v56  ;;  %v8256_v29 = vmax.f32 %v8184_v24, 0.0 }
 0xb5e   : > { %v9889_v6 = vpop.f32.mrf.mxu0  ;;  %v9223_v7 = vpop.f32.mrf.mxu1 }
 0xb5f   : > { %v8254_v22 = vmax.f32 %v8176_v37, 0.0  ;;  %v8187_v27 = vadd.f32 %v9889_v6, %v13936_v25 }
 0xb60   : > { %v8178_v57 = vpop.f32.mrf.mxu0 }
 0xb61   : > { %v8179_v8 = vadd.f32 %v13936_v25, %v8178_v57  ;;  %8334 = vrot.lane.b32.xlu0 %v8254_v22, %s10118_s25  ;;  %v8257_v20 = vmax.f32 %v8187_v27, 0.0 }
 0xb63   : > { %v8255_v15 = vmax.f32 %v8179_v8, 0.0  ;;  %v14074_v8 = vld [vmem:[%s14320_s4] ss:$0 sm:$0xff] }
 0xb64   : > { %v14044_v60 = vpop.f32.mrf.mxu1 }
 0xb65   : > { %8336 = vrot.lane.b32.xlu1 %v8255_v15, %s10118_s25  ;;  %8338 = vrot.lane.b32.xlu0 %v8256_v29, %s10118_s25 }
 0xb66   : > { %v14047_v3 = vpop.f32.mrf.mxu1 }
 0xb68   : > { %v14049_v38 = vpop.f32.mrf.mxu1 }
 0xb69   : > { %8340 = vrot.lane.b32.xlu1 %v8257_v20, %s10118_s25 }
 0xb6a   : > { %v14053_v50 = vpop.f32.mrf.mxu1 }
 0xb6c   : > { %v14059_v26 = vpop.f32.mrf.mxu1 }
 0xb6e   : > { %v14063_v40 = vpop.f32.mrf.mxu1 }
 0xb70   : > { %v14065_v36 = vpop.f32.mrf.mxu1 }
 0xb72   : > { %v14067_v37 = vpop.f32.mrf.mxu1 }
 0xb73   : > { %v8311_v30 = vpop.permute.xlu0 %8310 }
 0xb74   : > { %8403 = vst.msk [vmem:[%s10613_s22 + $0x20] sm:$0xff] %vm8398_vm0, %v8311_v30 }
 0xb76   : > { %v14076_v27 = vpop.f32.mrf.mxu1 }
 0xb77   : > { %v8313_v54 = vpop.permute.xlu1 %8312  ;;  %v8315_v49 = vpop.permute.xlu0 %8314 }
 0xb78   : > { %8404 = vst.msk [vmem:[%s10613_s22 + $0x28] sm:$0xff] %vm8398_vm0, %v8313_v54  ;;  %8405 = vst.msk [vmem:[%s10613_s22 + $0x30] sm:$0xff] %vm8398_vm0, %v8315_v49  ;;  %v9205_v54 = vadd.f32 %v14074_v8, %v9204_v9  ;;  %v9224_v9 = vadd.f32 %v14074_v8, %v9223_v7  ;;  %v9261_v7 = vadd.f32 %v14059_v26, %v14074_v8 }
 0xb7a   : > { %v9892_v33 = vpop.f32.mrf.mxu0 }
 0xb7b   : > { %v8317_v2 = vpop.permute.xlu1 %8316  ;;  %v8200_v18 = vadd.f32 %v9892_v33, %v13936_v25  ;;  %v14082_v33 = vpop.f32.mrf.mxu1 }
 0xb7c   : > { %8406 = vst.msk [vmem:[%s10613_s22 + $0x38] sm:$0xff] %vm8398_vm0, %v8317_v2  ;;  %v8191_v5 = vpop.f32.mrf.mxu0  ;;  %v9213_v2 = vadd.f32 %v14018_v0, %v14074_v8 }
 0xb7d   : > { %v8192_v12 = vadd.f32 %v13936_v25, %v8191_v5  ;;  %v8260_v48 = vmax.f32 %v8200_v18, 0.0  ;;  %v14090_v18 = vpop.f32.mrf.mxu1 }
 0xb7e   : > { %v9893_v53 = vpop.f32.mrf.mxu0 }
 0xb7f   : > { %v8258_v10 = vmax.f32 %v8192_v12, 0.0  ;;  %v8203_v17 = vadd.f32 %v9893_v53, %v13936_v25  ;;  %v9331_v12 = vmax.f32 %v9205_v54, 0.0  ;;  %v9208_v53 = vadd.f32 %v14074_v8, %v14025_v61 }
 0xb80   : > { %v8194_v44 = vpop.f32.mrf.mxu0 }
 0xb81   : > { %v8195_v39 = vadd.f32 %v13936_v25, %v8194_v44  ;;  %8342 = vrot.lane.b32.xlu0 %v8258_v10, %s10118_s25  ;;  %v8261_v43 = vmax.f32 %v8203_v17, 0.0  ;;  %v9216_v10 = vadd.f32 %v14021_v35, %v14074_v8  ;;  %v9332_v44 = vmax.f32 %v9208_v53, 0.0  ;;  %v9271_v17 = vpop.f32.mrf.mxu1 }
 0xb83   : > { %v8259_v32 = vmax.f32 %v8195_v39, 0.0  ;;  %v9221_v39 = vadd.f32 %v14074_v8, %v9220_v21  ;;  %v9926_v61 = vpop.f32.mrf.mxu1 }
 0xb85   : > { %8344 = vrot.lane.b32.xlu1 %v8259_v32, %s10118_s25  ;;  %8346 = vrot.lane.b32.xlu0 %v8260_v48, %s10118_s25  ;;  %v9334_v32 = vmax.f32 %v9216_v10, 0.0  ;;  %v9335_v0 = vmax.f32 %v9221_v39, 0.0 }
 0xb89   : > { %8348 = vrot.lane.b32.xlu1 %v8261_v43, %s10118_s25  ;;  %v9229_v43 = vadd.f32 %v14031_v45, %v14074_v8  ;;  %v9237_v45 = vadd.f32 %v14074_v8, %v14047_v3 }
 0xb93   : > { %v8319_v11 = vpop.permute.xlu0 %8318 }
 0xb94   : > { %8407 = vst.msk [vmem:[%s10613_s22 + $0x40] sm:$0xff] %vm8398_vm0, %v8319_v11 }
 0xb97   : > { %v8321_v58 = vpop.permute.xlu1 %8320  ;;  %v8323_v62 = vpop.permute.xlu0 %8322 }
 0xb98   : > { %8408 = vst.msk [vmem:[%s10613_s22 + $0x48] sm:$0xff] %vm8398_vm0, %v8321_v58  ;;  %8409 = vst.msk [vmem:[%s10613_s22 + $0x50] sm:$0xff] %vm8398_vm0, %v8323_v62  ;;  %v9337_v58 = vmax.f32 %v9229_v43, 0.0  ;;  %v9232_v62 = vadd.f32 %v14037_v55, %v14074_v8  ;;  %v9248_v55 = vadd.f32 %v14049_v38, %v14074_v8  ;;  %v9345_v38 = vmax.f32 %v9261_v7, 0.0 }
 0xb9a   : > { %v9896_v1 = vpop.f32.mrf.mxu0  ;;  %v9338_v21 = vmax.f32 %v9232_v62, 0.0 }
 0xb9b   : > { %v8325_v47 = vpop.permute.xlu1 %8324  ;;  %v8216_v51 = vadd.f32 %v9896_v1, %v13936_v25  ;;  %v9336_v1 = vmax.f32 %v9224_v9, 0.0 }
 0xb9c   : > { %8410 = vst.msk [vmem:[%s10613_s22 + $0x58] sm:$0xff] %vm8398_vm0, %v8325_v47  ;;  %v8207_v34 = vpop.f32.mrf.mxu0 }
 0xb9d   : > { %v8208_v28 = vadd.f32 %v13936_v25, %v8207_v34  ;;  %v8264_v46 = vmax.f32 %v8216_v51, 0.0  ;;  %v9284_v34 = vpop.f32.mrf.mxu1  ;;  %v9240_v51 = vadd.f32 %v14074_v8, %v14053_v50 }
 0xb9e   : > { %v9897_v16 = vpop.f32.mrf.mxu0 }
 0xb9f   : > { %v8262_v63 = vmax.f32 %v8208_v28, 0.0  ;;  %v8219_v14 = vadd.f32 %v9897_v16, %v13936_v25  ;;  %v9245_v28 = vadd.f32 %v14044_v60, %v14074_v8  ;;  %v9339_v16 = vmax.f32 %v9237_v45, 0.0 }
 0xba0   : > { %v8210_v19 = vpop.f32.mrf.mxu0  ;;  %v9256_v60 = vadd.f32 %v14074_v8, %v14067_v37  ;;  %v9280_v37 = vadd.f32 %v14090_v18, %v14074_v8 }
 0xba1   : > { %v8211_v52 = vadd.f32 %v13936_v25, %v8210_v19  ;;  %8350 = vrot.lane.b32.xlu0 %v8262_v63, %s10118_s25  ;;  %v8265_v13 = vmax.f32 %v8219_v14, 0.0  ;;  %v9927_v63 = vpop.f32.mrf.mxu1  ;;  %v9341_v19 = vmax.f32 %v9245_v28, 0.0 }
 0xba2   : > { %v9344_v50 = vmax.f32 %v9256_v60, 0.0 }
 0xba3   : > { %v8263_v59 = vmax.f32 %v8211_v52, 0.0  ;;  %v9340_v52 = vmax.f32 %v9240_v51, 0.0  ;;  %v9287_v14 = vpop.f32.mrf.mxu1 }
 0xba5   : > { %8352 = vrot.lane.b32.xlu1 %v8263_v59, %s10118_s25  ;;  %8354 = vrot.lane.b32.xlu0 %v8264_v46, %s10118_s25  ;;  %v9253_v46 = vadd.f32 %v14074_v8, %v14063_v40  ;;  %v9342_v59 = vmax.f32 %v9248_v55, 0.0  ;;  %v9930_v3 = vpop.f32.mrf.mxu1 }
 0xba6   : > { %v9309_v10 = vadd.f32 %v9930_v3, %v14074_v8 }
 0xba9   : > { %8356 = vrot.lane.b32.xlu1 %v8265_v13, %s10118_s25  ;;  %v9343_v13 = vmax.f32 %v9253_v46, 0.0 }
 0xbb3   : > { %v8327_v23 = vpop.permute.xlu0 %8326 }
 0xbb4   : > { %8411 = vst.msk [vmem:[%s10613_s22 + $0x60] sm:$0xff] %vm8398_vm0, %v8327_v23  ;;  %v9264_v23 = vadd.f32 %v14065_v36, %v14074_v8 }
 0xbb6   : > { %v9346_v26 = vmax.f32 %v9264_v23, 0.0 }
 0xbb7   : > { %v8329_v42 = vpop.permute.xlu1 %8328  ;;  %v8331_v4 = vpop.permute.xlu0 %8330 }
 0xbb8   : > { %8412 = vst.msk [vmem:[%s10613_s22 + $0x68] sm:$0xff] %vm8398_vm0, %v8329_v42  ;;  %8413 = vst.msk [vmem:[%s10613_s22 + $0x70] sm:$0xff] %vm8398_vm0, %v8331_v4  ;;  %v9269_v42 = vadd.f32 %v14074_v8, %v14082_v33  ;;  %v9300_v4 = vpop.f32.mrf.mxu1 }
 0xbba   : > { %v9347_v40 = vmax.f32 %v9269_v42, 0.0 }
 0xbbb   : > { %v8333_v41 = vpop.permute.xlu1 %8332 }
 0xbbc   : > { %8414 = vst.msk [vmem:[%s10613_s22 + $0x78] sm:$0xff] %vm8398_vm0, %v8333_v41  ;;  %v9277_v41 = vadd.f32 %v14076_v27, %v14074_v8  ;;  %v9293_v27 = vadd.f32 %v9926_v61, %v14074_v8 }
 0xbbe   : > { %v9349_v36 = vmax.f32 %v9277_v41, 0.0  ;;  %v9353_v33 = vmax.f32 %v9293_v27, 0.0 }
 0xbc2   : > { %v9900_v31 = vpop.f32.mrf.mxu0 }
 0xbc3   : > { %v8232_v22 = vadd.f32 %v9900_v31, %v13936_v25  ;;  %v9272_v31 = vadd.f32 %v14074_v8, %v9271_v17  ;;  %v9357_v17 = vmax.f32 %v9309_v10, 0.0 }
 0xbc4   : > { %v8223_v56 = vpop.f32.mrf.mxu0 }
 0xbc5   : > { %v8224_v6 = vadd.f32 %v13936_v25, %v8223_v56  ;;  %v8268_v20 = vmax.f32 %v8232_v22, 0.0  ;;  %v9931_v56 = vpop.f32.mrf.mxu1 }
 0xbc6   : > { %v9901_v24 = vpop.f32.mrf.mxu0 }
 0xbc7   : > { %v8266_v57 = vmax.f32 %v8224_v6, 0.0  ;;  %v8235_v30 = vadd.f32 %v9901_v24, %v13936_v25  ;;  %v9348_v6 = vmax.f32 %v9272_v31, 0.0  ;;  %v9285_v24 = vadd.f32 %v14074_v8, %v9284_v34 }
 0xbc8   : > { %v8226_v29 = vpop.f32.mrf.mxu0 }
 0xbc9   : > { %v8227_v15 = vadd.f32 %v13936_v25, %v8226_v29  ;;  %8358 = vrot.lane.b32.xlu0 %v8266_v57, %s10118_s25  ;;  %v8269_v5 = vmax.f32 %v8235_v30, 0.0  ;;  %v9333_v25 = vmax.f32 %v9213_v2, 0.0  ;;  %v9303_v57 = vpop.f32.mrf.mxu1  ;;  %v9350_v29 = vmax.f32 %v9280_v37, 0.0 }
 0xbca   : > { %v9296_v2 = vadd.f32 %v9927_v63, %v14074_v8  ;;  %v9304_v39 = vadd.f32 %v14074_v8, %v9303_v57 }
 0xbcb   : > { %v8267_v49 = vmax.f32 %v8227_v15, 0.0  ;;  %v9351_v15 = vmax.f32 %v9285_v24, 0.0 }
 0xbcc   : > { %v9356_v43 = vmax.f32 %v9304_v39, 0.0 }
 0xbcd   : > { %8360 = vrot.lane.b32.xlu1 %v8267_v49, %s10118_s25  ;;  %8362 = vrot.lane.b32.xlu0 %v8268_v20, %s10118_s25  ;;  %v9288_v20 = vadd.f32 %v14074_v8, %v9287_v14  ;;  %v9934_v49 = vpop.f32.mrf.mxu1 }
 0xbcf   : > { %v9316_v18 = vpop.f32.mrf.mxu1 }
 0xbd1   : > { %8364 = vrot.lane.b32.xlu1 %v8269_v5, %s10118_s25  ;;  %9395 = vrot.lane.b32.xlu0 %v9331_v12, %s14406_s28  ;;  %v9352_v5 = vmax.f32 %v9288_v20, 0.0  ;;  %v9301_v12 = vadd.f32 %v14074_v8, %v9300_v4  ;;  %s9707_s25 = sshll.u32 %s10213_s13, 12  ;;  %s14407_s13 = sand.u32 1, %s10102_s10  }
 0xbd2   : > { %s14267_s23 = scalar_lea.hbm %s14325_s9, %s9707_s25  ;;  %s14275_s24 = scalar_lea.sflag [#allocation8], %s14407_s13 }
 0xbd3   : > { %v8335_v48 = vpop.permute.xlu0 %8334 }
 0xbd4   : > { %8415 = vst.msk [vmem:[%s10613_s22 + $0x80] sm:$0xff] %vm8398_vm0, %v8335_v48  ;;  %v9935_v48 = vpop.f32.mrf.mxu1 }
 0xbd5   : > { %9397 = vrot.lane.b32.xlu1 %v9332_v44, %s14406_s28  ;;  %9399 = vrot.lane.b32.xlu0 %v9333_v25, %s14406_s28  ;;  %v9354_v25 = vmax.f32 %v9296_v2, 0.0  ;;  %v9355_v44 = vmax.f32 %v9301_v12, 0.0 }
 0xbd6   : > { %v9319_v9 = vpop.f32.mrf.mxu1 }
 0xbd7   : > { %v8337_v35 = vpop.permute.xlu1 %8336  ;;  %v8339_v11 = vpop.permute.xlu0 %8338 }
 0xbd8   : > { %8416 = vst.msk [vmem:[%s10613_s22 + $0x88] sm:$0xff] %vm8398_vm0, %v8337_v35  ;;  %8417 = vst.msk [vmem:[%s10613_s22 + $0x90] sm:$0xff] %vm8398_vm0, %v8339_v11  ;;  %v9325_v11 = vadd.f32 %v9934_v49, %v14074_v8 }
 0xbd9   : > { %9401 = vrot.lane.b32.xlu1 %v9334_v32, %s14406_s28  ;;  %9403 = vrot.lane.b32.xlu0 %v9335_v0, %s14406_s28  ;;  %v9312_v32 = vadd.f32 %v9931_v56, %v14074_v8  ;;  %v9317_v0 = vadd.f32 %v14074_v8, %v9316_v18 }
 0xbda   : > { %v9361_v62 = vmax.f32 %v9325_v11, 0.0 }
 0xbdb   : > { %v8341_v47 = vpop.permute.xlu1 %8340  ;;  %v9358_v35 = vmax.f32 %v9312_v32, 0.0  ;;  %v9359_v61 = vmax.f32 %v9317_v0, 0.0 }
 0xbdc   : > { %8418 = vst.msk [vmem:[%s10613_s22 + $0x98] sm:$0xff] %vm8398_vm0, %v8341_v47 }
 0xbdd   : > { %9405 = vrot.lane.b32.xlu1 %v9336_v1, %s14406_s28  ;;  %9407 = vrot.lane.b32.xlu0 %v9337_v58, %s14406_s28  ;;  %v9320_v58 = vadd.f32 %v14074_v8, %v9319_v9  ;;  %v9328_v1 = vadd.f32 %v9935_v48, %v14074_v8 }
 0xbdf   : > { %v9360_v45 = vmax.f32 %v9320_v58, 0.0  ;;  %v9362_v47 = vmax.f32 %v9328_v1, 0.0 }
 0xbe1   : > { %9409 = vrot.lane.b32.xlu1 %v9338_v21, %s14406_s28  ;;  %9411 = vrot.lane.b32.xlu0 %v9339_v16, %s14406_s28 }
 0xbe5   : > { %9413 = vrot.lane.b32.xlu1 %v9340_v52, %s14406_s28  ;;  %9415 = vrot.lane.b32.xlu0 %v9341_v19, %s14406_s28 }
 0xbe9   : > { %9417 = vrot.lane.b32.xlu1 %v9342_v59, %s14406_s28  ;;  %9419 = vrot.lane.b32.xlu0 %v9343_v13, %s14406_s28 }
 0xbed   : > { %9421 = vrot.lane.b32.xlu1 %v9344_v50, %s14406_s28  ;;  %9423 = vrot.lane.b32.xlu0 %v9345_v38, %s14406_s28 }
 0xbf1   : > { %9425 = vrot.lane.b32.xlu1 %v9346_v26, %s14406_s28  ;;  %9427 = vrot.lane.b32.xlu0 %v9347_v40, %s14406_s28 }
 0xbf3   : > { %v8343_v22 = vpop.permute.xlu0 %8342 }
 0xbf4   : > { %8419 = vst.msk [vmem:[%s10613_s22 + $0xa0] sm:$0xff] %vm8398_vm0, %v8343_v22 }
 0xbf5   : > { %9429 = vrot.lane.b32.xlu1 %v9348_v6, %s14406_s28  ;;  %9431 = vrot.lane.b32.xlu0 %v9349_v36, %s14406_s28 }
 0xbf7   : > { %v8345_v30 = vpop.permute.xlu1 %8344  ;;  %v8347_v54 = vpop.permute.xlu0 %8346 }
 0xbf8   : > { %8420 = vst.msk [vmem:[%s10613_s22 + $0xa8] sm:$0xff] %vm8398_vm0, %v8345_v30  ;;  %8421 = vst.msk [vmem:[%s10613_s22 + $0xb0] sm:$0xff] %vm8398_vm0, %v8347_v54 }
 0xbf9   : > { %9433 = vrot.lane.b32.xlu1 %v9350_v29, %s14406_s28  ;;  %9435 = vrot.lane.b32.xlu0 %v9351_v15, %s14406_s28 }
 0xbfb   : > { %v8349_v53 = vpop.permute.xlu1 %8348 }
 0xbfc   : > { %8422 = vst.msk [vmem:[%s10613_s22 + $0xb8] sm:$0xff] %vm8398_vm0, %v8349_v53 }
 0xbfd   : > { %9437 = vrot.lane.b32.xlu1 %v9352_v5, %s14406_s28  ;;  %9439 = vrot.lane.b32.xlu0 %v9353_v33, %s14406_s28 }
 0xc01   : > { %9441 = vrot.lane.b32.xlu1 %v9354_v25, %s14406_s28  ;;  %9443 = vrot.lane.b32.xlu0 %v9355_v44, %s14406_s28 }
 0xc05   : > { %9445 = vrot.lane.b32.xlu1 %v9356_v43, %s14406_s28  ;;  %9447 = vrot.lane.b32.xlu0 %v9357_v17, %s14406_s28 }
 0xc09   : > { %9449 = vrot.lane.b32.xlu1 %v9358_v35, %s14406_s28  ;;  %9451 = vrot.lane.b32.xlu0 %v9359_v61, %s14406_s28 }
 0xc0d   : > { %9453 = vrot.lane.b32.xlu1 %v9360_v45, %s14406_s28  ;;  %9455 = vrot.lane.b32.xlu0 %v9361_v62, %s14406_s28 }
 0xc11   : > { %9457 = vrot.lane.b32.xlu1 %v9362_v47, %s14406_s28  ;;  %s9538_s28 = sshll.u32 %s10613_s22, 4  ;;  %s14269_s28 = int_to_ptr.vmem [resolvable:$true] %s9538_s28 }
 0xc12   : > { %s10050_s17 = scalar_lea.vmem %s14269_s28, 4096  ;;  %p10057_p0 = scmp.lt.s32.totalorder %s14269_s28, %s10055_s21 }
 0xc13   : > { %v8351_v34 = vpop.permute.xlu0 %8350  ;;  %p10051_p11 = scmp.ne.s32.totalorder %s14269_s28, %s10050_s17  ;;  %p10058_p1 = scmp.lt.s32.totalorder %s10056_s16, %s10050_s17 }
 0xc14   : > { %8423 = vst.msk [vmem:[%s10613_s22 + $0xc0] sm:$0xff] %vm8398_vm0, %v8351_v34 }
 0xc15   : > { %p10052_p12 = pnand %p10051_p11, %p10230_p5  ;;  %p10059_p2 = por %p10058_p1, %p10057_p0 }
 0xc17   : > { %v8353_v21 = vpop.permute.xlu1 %8352  ;;  %v8355_v28 = vpop.permute.xlu0 %8354  ;;  %p10053_p13 = pneg %p10052_p12 }
 0xc18   : > { %8424 = vst.msk [vmem:[%s10613_s22 + $0xc8] sm:$0xff] %vm8398_vm0, %v8353_v21  ;;  %8425 = vst.msk [vmem:[%s10613_s22 + $0xd0] sm:$0xff] %vm8398_vm0, %v8355_v28 }
 0xc19   : > { %p10060_p3 = pnand %p10059_p2, %p10053_p13 }
 0xc1b   : > { %v8357_v8 = vpop.permute.xlu1 %8356 }
 0xc1c   : > { %8426 = vst.msk [vmem:[%s10613_s22 + $0xd8] sm:$0xff] %vm8398_vm0, %v8357_v8 }
 0xc3b   : > { %v8359_v16 = vpop.permute.xlu0 %8358 }
 0xc3c   : > { %8427 = vst.msk [vmem:[%s10613_s22 + $0xe0] sm:$0xff] %vm8398_vm0, %v8359_v16 }
 0xc3f   : > { %v8361_v51 = vpop.permute.xlu1 %8360  ;;  %v8363_v63 = vpop.permute.xlu0 %8362 }
 0xc40   : > { %8428 = vst.msk [vmem:[%s10613_s22 + $0xe8] sm:$0xff] %vm8398_vm0, %v8361_v51  ;;  %8429 = vst.msk [vmem:[%s10613_s22 + $0xf0] sm:$0xff] %vm8398_vm0, %v8363_v63 }
 0xc43   : > { %v8365_v19 = vpop.permute.xlu1 %8364  ;;  %v9396_v55 = vpop.permute.xlu0 %9395 }
 0xc44   : > { %8430 = vst.msk [vmem:[%s10613_s22 + $0xf8] sm:$0xff] %vm8398_vm0, %v8365_v19 }
 0xc45   : > { %9492 = vst.msk [vmem:[%s10613_s22] sm:$0xff] %vm9491_vm2, %v9396_v55 }
 0xc47   : > { %v9398_v52 = vpop.permute.xlu1 %9397  ;;  %v9400_v46 = vpop.permute.xlu0 %9399 }
 0xc48   : > { %9493 = vst.msk [vmem:[%s10613_s22 + $0x8] sm:$0xff] %vm9491_vm2, %v9398_v52  ;;  %9494 = vst.msk [vmem:[%s10613_s22 + $0x10] sm:$0xff] %vm9491_vm2, %v9400_v46 }
 0xc4b   : > { %v9402_v14 = vpop.permute.xlu1 %9401  ;;  %v9404_v59 = vpop.permute.xlu0 %9403 }
 0xc4c   : > { %9495 = vst.msk [vmem:[%s10613_s22 + $0x18] sm:$0xff] %vm9491_vm2, %v9402_v14  ;;  %9496 = vst.msk [vmem:[%s10613_s22 + $0x20] sm:$0xff] %vm9491_vm2, %v9404_v59 }
 0xc4f   : > { %v9406_v7 = vpop.permute.xlu1 %9405  ;;  %v9408_v13 = vpop.permute.xlu0 %9407 }
 0xc50   : > { %9497 = vst.msk [vmem:[%s10613_s22 + $0x28] sm:$0xff] %vm9491_vm2, %v9406_v7  ;;  %9498 = vst.msk [vmem:[%s10613_s22 + $0x30] sm:$0xff] %vm9491_vm2, %v9408_v13 }
 0xc53   : > { %v9410_v60 = vpop.permute.xlu1 %9409  ;;  %v9412_v3 = vpop.permute.xlu0 %9411 }
 0xc54   : > { %9499 = vst.msk [vmem:[%s10613_s22 + $0x38] sm:$0xff] %vm9491_vm2, %v9410_v60  ;;  %9500 = vst.msk [vmem:[%s10613_s22 + $0x40] sm:$0xff] %vm9491_vm2, %v9412_v3 }
 0xc57   : > { %v9414_v38 = vpop.permute.xlu1 %9413  ;;  %v9416_v23 = vpop.permute.xlu0 %9415 }
 0xc58   : > { %9501 = vst.msk [vmem:[%s10613_s22 + $0x48] sm:$0xff] %vm9491_vm2, %v9414_v38  ;;  %9502 = vst.msk [vmem:[%s10613_s22 + $0x50] sm:$0xff] %vm9491_vm2, %v9416_v23 }
 0xc5b   : > { %v9418_v50 = vpop.permute.xlu1 %9417  ;;  %v9420_v42 = vpop.permute.xlu0 %9419 }
 0xc5c   : > { %9503 = vst.msk [vmem:[%s10613_s22 + $0x58] sm:$0xff] %vm9491_vm2, %v9418_v50  ;;  %9504 = vst.msk [vmem:[%s10613_s22 + $0x60] sm:$0xff] %vm9491_vm2, %v9420_v42 }
 0xc5f   : > { %v9422_v4 = vpop.permute.xlu1 %9421  ;;  %v9424_v26 = vpop.permute.xlu0 %9423 }
 0xc60   : > { %9505 = vst.msk [vmem:[%s10613_s22 + $0x68] sm:$0xff] %vm9491_vm2, %v9422_v4  ;;  %9506 = vst.msk [vmem:[%s10613_s22 + $0x70] sm:$0xff] %vm9491_vm2, %v9424_v26 }
 0xc63   : > { %v9426_v41 = vpop.permute.xlu1 %9425  ;;  %v9428_v40 = vpop.permute.xlu0 %9427 }
 0xc64   : > { %9507 = vst.msk [vmem:[%s10613_s22 + $0x78] sm:$0xff] %vm9491_vm2, %v9426_v41  ;;  %9508 = vst.msk [vmem:[%s10613_s22 + $0x80] sm:$0xff] %vm9491_vm2, %v9428_v40 }
 0xc67   : > { %v9430_v31 = vpop.permute.xlu1 %9429  ;;  %v9432_v56 = vpop.permute.xlu0 %9431 }
 0xc68   : > { %9509 = vst.msk [vmem:[%s10613_s22 + $0x88] sm:$0xff] %vm9491_vm2, %v9430_v31  ;;  %9510 = vst.msk [vmem:[%s10613_s22 + $0x90] sm:$0xff] %vm9491_vm2, %v9432_v56 }
 0xc6b   : > { %v9434_v36 = vpop.permute.xlu1 %9433  ;;  %v9436_v37 = vpop.permute.xlu0 %9435 }
 0xc6c   : > { %9511 = vst.msk [vmem:[%s10613_s22 + $0x98] sm:$0xff] %vm9491_vm2, %v9434_v36  ;;  %9512 = vst.msk [vmem:[%s10613_s22 + $0xa0] sm:$0xff] %vm9491_vm2, %v9436_v37 }
 0xc6f   : > { %v9438_v6 = vpop.permute.xlu1 %9437  ;;  %v9440_v24 = vpop.permute.xlu0 %9439 }
 0xc70   : > { %9513 = vst.msk [vmem:[%s10613_s22 + $0xa8] sm:$0xff] %vm9491_vm2, %v9438_v6  ;;  %9514 = vst.msk [vmem:[%s10613_s22 + $0xb0] sm:$0xff] %vm9491_vm2, %v9440_v24 }
 0xc73   : > { %v9442_v22 = vpop.permute.xlu1 %9441  ;;  %v9444_v57 = vpop.permute.xlu0 %9443 }
 0xc74   : > { %9515 = vst.msk [vmem:[%s10613_s22 + $0xb8] sm:$0xff] %vm9491_vm2, %v9442_v22  ;;  %9516 = vst.msk [vmem:[%s10613_s22 + $0xc0] sm:$0xff] %vm9491_vm2, %v9444_v57 }
 0xc77   : > { %v9446_v29 = vpop.permute.xlu1 %9445  ;;  %v9448_v27 = vpop.permute.xlu0 %9447 }
 0xc78   : > { %9517 = vst.msk [vmem:[%s10613_s22 + $0xc8] sm:$0xff] %vm9491_vm2, %v9446_v29  ;;  %9518 = vst.msk [vmem:[%s10613_s22 + $0xd0] sm:$0xff] %vm9491_vm2, %v9448_v27 }
 0xc7b   : > { %v9450_v15 = vpop.permute.xlu1 %9449  ;;  %v9452_v20 = vpop.permute.xlu0 %9451 }
 0xc7c   : > { %9519 = vst.msk [vmem:[%s10613_s22 + $0xd8] sm:$0xff] %vm9491_vm2, %v9450_v15  ;;  %9520 = vst.msk [vmem:[%s10613_s22 + $0xe0] sm:$0xff] %vm9491_vm2, %v9452_v20 }
 0xc7f   : > { %v9454_v30 = vpop.permute.xlu1 %9453  ;;  %v9456_v54 = vpop.permute.xlu0 %9455 }
 0xc80   : > { %9521 = vst.msk [vmem:[%s10613_s22 + $0xe8] sm:$0xff] %vm9491_vm2, %v9454_v30  ;;  %9522 = vst.msk [vmem:[%s10613_s22 + $0xf0] sm:$0xff] %vm9491_vm2, %v9456_v54 }
 0xc83   : > { %v9458_v49 = vpop.permute.xlu1 %9457 }
 0xc84   : > { %9523 = vst.msk [vmem:[%s10613_s22 + $0xf8] sm:$0xff] %vm9491_vm2, %v9458_v49 }
 0xc85   : > { %10063 = shalt.err (!%p10060_p3)
}
 0xc86   : > { %s10064_s22 = scalar_lea.hbm %s14267_s23, 4096  ;;  %s10068_s14 = scalar_lea.hbm %s14325_s9, 8192 }
 0xc87   : > { %p10065_p4 = scmp.ne.s32.totalorder %s14267_s23, %s10064_s22  ;;  %p10069_p9 = scmp.lt.s32.totalorder %s14267_s23, %s14325_s9 }
 0xc88   : > { %p10070_p10 = scmp.lt.s32.totalorder %s10068_s14, %s10064_s22 }
 0xc89   : > { %p10066_p7 = pnand %p10065_p4, %p10230_p5 }
 0xc8a   : > { %p10071_p11 = por %p10070_p10, %p10069_p9 }
 0xc8b   : > { %p10067_p8 = pneg %p10066_p7 }
 0xc8d   : > { %p10072_p12 = pnand %p10071_p11, %p10067_p8 }
 0xc8f   : > { %10075 = shalt.err (!%p10072_p12)
}
 0xc90   : > { %s10141_s17 = smov 128  }
 0xc91   : > { %9940 = dma.vmem_to_hbm [thread:$0]  (%p10230_p5), %s14269_s28, 4096, %s14267_s23, %s14275_s24, %s10141_s17, %s10141_s17, %s10115_s29  }
 0xc92 PF: > { %p9946_p13 = scmp.ge.s32.totalorder %s10110_s12, 2  ;;  %s9553_s21 = sand.u32 1, %s10098_s30  }
 0xc93   : > { %s9554_s16 = scalar_lea.sflag [#allocation8], %s9553_s21 }
 0xc94   : > { %p9943_p0 = pnand %p9946_p13, %p10234_p6 }
 0xc96   : > { %p9944_p1 = pneg %p9943_p0 }
 0xc98   : > { %10093 = dma.done.wait (%p9944_p1), %s9554_s16, 4096  }
 0xc99   : > { %10095 = vsyncadd (%p9944_p1), %s9554_s16, 4294963200  ;;  %p19_p2 = scmp.ge.s32.totalorder %s10217_s15, 4   ;;  %s14408_s30 = smov %s10102_s10 }
 0xc9a   : > { %s14409_s10 = smov %s10106_s11  ;;  %s14410_s11 = smov %s10228_s18 }
 0xc9b   : > { %s14411_s12 = smov %s10217_s15  ;;  %21 = sbr.rel (!%p19_p2) target bundleno = 3 (0x3), region = 99 }
 0xca0   :  { %9559 = vsyncpa [#allocation8], 1 }
 0xca1   :  { %9561 = vsyncpa [#allocation8 + $0x1], 1 }

</bundles_post_ra>
